<compile_context>
chip_gen: v5e
topology: v5e:2x2
jax: 0.10.0
libtpu: 0.0.40
codegen_flags: <defaults>
</compile_context>

<pallas_src>
import functools
import math

import jax
import jax.numpy as jnp
from jax import lax
from jax.experimental import pallas as pl
from jax.experimental.pallas import tpu as pltpu

NEG_SLOPE = 0.15


# ---------------------------------------------------------------------------
# Pallas kernel: (TM, K) @ (K, Np) + bias, LeakyReLU fused in the epilogue
# ---------------------------------------------------------------------------
def _mm_bias_act_kernel(x_ref, w_ref, b_ref, o_ref, *, act):
    acc = jnp.dot(x_ref[...], w_ref[...], preferred_element_type=jnp.float32)
    y = acc + b_ref[...]
    if act == "leaky":
        y = jnp.where(y > 0, y, NEG_SLOPE * y)
    elif act == "relu":
        y = jnp.maximum(y, 0.0)
    o_ref[...] = y.astype(o_ref.dtype)


def _pick_tm(K, Np, budget_bytes=24 * 1024 * 1024):
    """Largest M tile whose double-buffered working set fits the VMEM budget."""
    for tm in (1024, 512, 256, 128, 64, 32, 16, 8):
        vmem = (2 * tm * K * 2          # double-buffered bf16 LHS tile
                + 2 * K * Np * 2        # double-buffered bf16 RHS (grid-invariant)
                + 2 * tm * Np * 4       # double-buffered f32 output tile
                + tm * Np * 4)          # headroom for f32 epilogue values
        if vmem <= budget_bytes:
            return tm
    return 8


def matmul_bias_act(lhs_bf16, rhs_bf16, bias_f32, act="leaky"):
    """lhs: (M, K) bf16, rhs: (K, Np) bf16, bias: (1, Np) f32 -> (M, Np) f32."""
    M, K = lhs_bf16.shape
    Np = rhs_bf16.shape[1]
    tm = _pick_tm(K, Np)
    Mp = pl.cdiv(M, tm) * tm
    if Mp != M:
        lhs_bf16 = jnp.pad(lhs_bf16, ((0, Mp - M), (0, 0)))

    out = pl.pallas_call(
        functools.partial(_mm_bias_act_kernel, act=act),
        out_shape=jax.ShapeDtypeStruct((Mp, Np), jnp.float32),
        grid=(Mp // tm,),
        in_specs=[
            pl.BlockSpec((tm, K), lambda m: (m, 0)),    # im2col LHS tile
            pl.BlockSpec((K, Np), lambda m: (0, 0)),    # full folded-K weights
            pl.BlockSpec((1, Np), lambda m: (0, 0)),    # bias row
        ],
        out_specs=pl.BlockSpec((tm, Np), lambda m: (m, 0)),
        compiler_params=pltpu.CompilerParams(
            dimension_semantics=("parallel",)),
    )(lhs_bf16, rhs_bf16, bias_f32)
    return out[:M] if Mp != M else out


# ---------------------------------------------------------------------------
# Conv3d(kernel=3, padding=1, stride=1) built on the Pallas matmul
# ---------------------------------------------------------------------------
def conv3d_k3p1(x, w, b, act="leaky"):
    """x: (N,D,H,W,Cin) f32; w: (3,3,3,Cin,Cout); b: (Cout,)."""
    N, D, H, W, Cin = x.shape
    Cout = w.shape[-1]
    K = 27 * Cin
    Np = pl.cdiv(Cout, 128) * 128               # lane-dense (unmasked) stores

    xp = jnp.pad(x.astype(jnp.bfloat16),
                 ((0, 0), (1, 1), (1, 1), (1, 1), (0, 0)))
    # im2col built once as a single (M, 27*Cin) bf16 matrix (taps folded into K,
    # ordering matches w.reshape(27*Cin, Cout)).
    slices = [xp[:, i:i + D, j:j + H, k:k + W, :]
              for i in range(3) for j in range(3) for k in range(3)]
    lhs = jnp.concatenate(slices, axis=-1).reshape(N * D * H * W, K)

    rhs = w.reshape(K, Cout).astype(jnp.bfloat16)
    if Np != Cout:
        rhs = jnp.pad(rhs, ((0, 0), (0, Np - Cout)))
    bias = jnp.pad(b.astype(jnp.float32), (0, Np - Cout)).reshape(1, Np)

    y = matmul_bias_act(lhs, rhs, bias, act=act)
    return y[:, :Cout].reshape(N, D, H, W, Cout)


# ---------------------------------------------------------------------------
# Trilinear upsample, align_corners=False (PyTorch semantics)
# ---------------------------------------------------------------------------
def _upsample2_axis(y, axis):
    """x2 resize along `axis` with fixed 0.75/0.25 weights (no gathers).

    out[2m]   = 0.75*x[m] + 0.25*x[max(m-1,0)]
    out[2m+1] = 0.75*x[m] + 0.25*x[min(m+1,n-1)]
    which is exactly PyTorch's (o+0.5)/2-0.5 source-coordinate rule with the
    negative-coordinate clamp.
    """
    n = y.shape[axis]

    def take(lo, hi):
        idx = [slice(None)] * y.ndim
        idx[axis] = slice(lo, hi)
        return y[tuple(idx)]

    prev = jnp.concatenate([take(0, 1), take(0, n - 1)], axis=axis)
    nxt = jnp.concatenate([take(1, n), take(n - 1, n)], axis=axis)
    even = 0.75 * y + 0.25 * prev
    odd = 0.75 * y + 0.25 * nxt
    out = jnp.stack([even, odd], axis=axis + 1)
    new_shape = list(y.shape)
    new_shape[axis] = 2 * n
    return out.reshape(new_shape)


def _resize_axis_noalign(y, axis, scale):
    """General linear resize along one axis, align_corners=False."""
    in_sz = y.shape[axis]
    out_sz = in_sz * scale
    src = (jnp.arange(out_sz, dtype=jnp.float32) + 0.5) / scale - 0.5
    src = jnp.maximum(src, 0.0)                 # PyTorch clamps negative coords
    i0 = jnp.clip(jnp.floor(src).astype(jnp.int32), 0, in_sz - 1)
    i1 = jnp.clip(i0 + 1, 0, in_sz - 1)
    f = src - i0.astype(jnp.float32)
    y0 = jnp.take(y, i0, axis=axis)
    y1 = jnp.take(y, i1, axis=axis)
    shp = [1] * y.ndim
    shp[axis] = out_sz
    f = f.reshape(shp).astype(y.dtype)
    return y0 * (1.0 - f) + y1 * f


def trilinear_upsample(x, scale=2):
    # TODO(synk): the separable trilinear resize stays as XLA glue (static
    # slices + lerp); the hot Conv3d path runs through the Pallas matmul.
    for axis in (1, 2, 3):
        if scale == 2:
            x = _upsample2_axis(x, axis)
        else:
            x = _resize_axis_noalign(x, axis, scale)
    return x


# ---------------------------------------------------------------------------
# Upsampling module forward (normalization='none', relu='LeakyReLU')
# ---------------------------------------------------------------------------
def upsampling_forward(params, x_ncdhw, *, stride=2):
    x = jnp.transpose(x_ncdhw, (0, 2, 3, 4, 1))           # NCDHW -> NDHWC
    x = trilinear_upsample(x, stride)                      # align_corners=False
    y = conv3d_k3p1(x, params["w"], params["b"], act="leaky")
    return jnp.transpose(y, (0, 4, 1, 2, 3))               # NDHWC -> NCDHW


# ---------------------------------------------------------------------------
# Main
# ---------------------------------------------------------------------------
if __name__ == "__main__":
    key = jax.random.PRNGKey(0)
    kx, kw, kb = jax.random.split(key, 3)

    # Upsampling(n_filters_in=32, n_filters_out=16, stride=2)
    N, Cin, D, H, W = 2, 32, 8, 8, 8
    Cout, stride = 16, 2

    x = jax.random.normal(kx, (N, Cin, D, H, W), jnp.float32)
    fan = 27 * Cin
    w = jax.random.normal(kw, (3, 3, 3, Cin, Cout), jnp.float32) / math.sqrt(fan)
    b = jax.random.normal(kb, (Cout,), jnp.float32) * 0.01
    params = {"w": w, "b": b}

    fwd = jax.jit(functools.partial(upsampling_forward, stride=stride))
    out = fwd(params, x)
    jax.block_until_ready(out)

    assert out.shape == (N, Cout, stride * D, stride * H, stride * W)
    assert bool(jnp.all(jnp.isfinite(out)))

    # Reference: same resize glue + XLA f32 conv + bias + LeakyReLU.
    x_up = trilinear_upsample(jnp.transpose(x, (0, 2, 3, 4, 1)), stride)
    ref = lax.conv_general_dilated(
        x_up, w, window_strides=(1, 1, 1), padding="SAME",
        dimension_numbers=("NDHWC", "DHWIO", "NDHWC"))
    ref = ref + b
    ref = jnp.where(ref > 0, ref, NEG_SLOPE * ref)
    ref = jnp.transpose(ref, (0, 4, 1, 2, 3))
    err = float(jnp.max(jnp.abs(out - ref)))
    assert err < 1e-1, f"max abs error {err}"   # bf16 operands, f32 accumulation

    print("KERNEL_OK")
</pallas_src>

<mosaic_0001>
module attributes {stable_mosaic.version = 11 : i64} {
  func.func @_mm_bias_act_kernel(%arg0: i32, %arg1: memref<1024x864xbf16, #tpu.memory_space<vmem>>, %arg2: memref<864x128xbf16, #tpu.memory_space<vmem>>, %arg3: memref<1x128xf32, #tpu.memory_space<vmem>>, %arg4: memref<1024x128xf32, #tpu.memory_space<vmem>>) attributes {dimension_semantics = [#tpu.dimension_semantics<parallel>], iteration_bounds = array<i64: 8>, scalar_prefetch = 0 : i64, scratch_operands = 0 : i64, tpu.core_type = #tpu.core_type<tc>, window_params = [{transform_indices = @transform_0, window_bounds = array<i64: 1024, 864>}, {pipeline_mode = #tpu.pipeline_mode<synchronous>, transform_indices = @transform_1, window_bounds = array<i64: 864, 128>}, {pipeline_mode = #tpu.pipeline_mode<synchronous>, transform_indices = @transform_2, window_bounds = array<i64: 1, 128>}, {transform_indices = @transform_3, window_bounds = array<i64: 1024, 128>}]} {
    %c0 = arith.constant 0 : index
    %c0_0 = arith.constant 0 : index
    %0 = vector.load %arg1[%c0, %c0_0] : memref<1024x864xbf16, #tpu.memory_space<vmem>>, vector<1024x864xbf16>
    %c0_1 = arith.constant 0 : index
    %c0_2 = arith.constant 0 : index
    %1 = vector.load %arg2[%c0_1, %c0_2] : memref<864x128xbf16, #tpu.memory_space<vmem>>, vector<864x128xbf16>
    %cst = arith.constant dense<0.000000e+00> : vector<1024x128xf32>
    %2 = tpu.matmul %0, %1, %cst {dimension_numbers = #tpu.dot_dimension_numbers<[1], [0], [0], [1], [0, 0, 1, 1], [], []>} : vector<1024x864xbf16>, vector<864x128xbf16>, vector<1024x128xf32> -> vector<1024x128xf32>
    %c0_3 = arith.constant 0 : index
    %c0_4 = arith.constant 0 : index
    %3 = vector.load %arg3[%c0_3, %c0_4] : memref<1x128xf32, #tpu.memory_space<vmem>>, vector<1x128xf32>
    %4 = vector.broadcast %3 : vector<1x128xf32> to vector<1024x128xf32>
    %5 = arith.addf %2, %4 : vector<1024x128xf32>
    %cst_5 = arith.constant 0.000000e+00 : f32
    %6 = vector.broadcast %cst_5 : f32 to vector<1024x128xf32>
    %7 = arith.cmpf ogt, %5, %6 : vector<1024x128xf32>
    %cst_6 = arith.constant 1.500000e-01 : f32
    %8 = vector.broadcast %cst_6 : f32 to vector<1024x128xf32>
    %9 = arith.mulf %8, %5 : vector<1024x128xf32>
    %10 = arith.select %7, %5, %9 : vector<1024x128xi1>, vector<1024x128xf32>
    %c0_7 = arith.constant 0 : index
    %c0_8 = arith.constant 0 : index
    %11 = vector.load %arg4[%c0_7, %c0_8] : memref<1024x128xf32, #tpu.memory_space<vmem>>, vector<1024x128xf32>
    tpu.vector_store %arg4[%c0_7, %c0_8], %10 {strides = array<i32>} : memref<1024x128xf32, #tpu.memory_space<vmem>>, vector<1024x128xf32>,
    return
  }
  func.func @transform_0(%arg0: i32) -> (i32, i32) {
    %c0_i32 = arith.constant 0 : i32
    %c0_i32_0 = arith.constant 0 : i32
    return %arg0, %c0_i32 : i32, i32
  }
  func.func @transform_1(%arg0: i32) -> (i32, i32) {
    %c0_i32 = arith.constant 0 : i32
    %c0_i32_0 = arith.constant 0 : i32
    %c0_i32_1 = arith.constant 0 : i32
    return %c0_i32, %c0_i32_0 : i32, i32
  }
  func.func @transform_2(%arg0: i32) -> (i32, i32) {
    %c0_i32 = arith.constant 0 : i32
    %c0_i32_0 = arith.constant 0 : i32
    %c0_i32_1 = arith.constant 0 : i32
    return %c0_i32, %c0_i32_0 : i32, i32
  }
  func.func @transform_3(%arg0: i32) -> (i32, i32) {
    %c0_i32 = arith.constant 0 : i32
    %c0_i32_0 = arith.constant 0 : i32
    return %arg0, %c0_i32 : i32, i32
  }
}

</mosaic_0001>

<bundles_post_ra>
// kernel: upsampling_forward.1
= control target key start
LH: loop header
LB: loop body
LE: loop exit
PB: predicated region body
PF: predicated region fallthrough
CT: control target
= control target key end

     0   :  { %s9080_s12 = smov 0   ;;  %s11127_s0 = inlined_call_operand.vmem [shape: bf16[8192,864], index: 0, kind: input, shape index: {}]   ;;  %s11128_s1 = inlined_call_operand.vmem [shape: bf16[864,128], index: 1, kind: input, shape index: {}]   ;;  %s11129_s2 = inlined_call_operand.vmem [shape: f32[1,128], index: 2, kind: input, shape index: {}]   ;;  %s11130_s3 = inlined_call_operand.vmem [shape: f32[8192,128], index: 3, kind: output, shape index: {}]  }
   0x1 LB: > { %s6430_s13 = sadd.s32 4294967295, %s9058_s12   ;;  %p6434_p0 = scmp.ge.s32.totalorder %s9058_s12, 1  ;;  %s9058_s12 = sphi %s9080_s12, %s13_s12  }
   0x2   : > { %p139_p1 = scmp.lt.s32.totalorder %s9058_s12, 9 }
   0x4   : > { %p140_p2 = pnand %p6434_p0, %p139_p1 }
   0x6   : > { %143 = sbr.rel (%p140_p2) target bundleno = 1971 (0x7b3), region = 32 }
   0xb   : > { %v8968_v0 = vld [vmem:[%s11128_s1 + $0x38] sm:$0xff]  ;;  %v8967_v3 = vld [vmem:[%s11128_s1 + $0x30] sm:$0xff]  ;;  %v8966_v6 = vld [vmem:[%s11128_s1 + $0x28] sm:$0xff]  ;;  %s6435_s5 = sshll.u32 %s6430_s13, 7  ;;  %vm3366_vm0 = vcmask 785408  }
   0xc   : > { %v9094_v1 = vld [vmem:[%s11128_s1 + $0xb8] sm:$0xff]  ;;  %3559 = vmatpush.bf16.msra.mxu0 %v8968_v0  ;;  %9015 = vmatpush.bf16.msra.mxu3 %v8968_v0  ;;  %v9109_v4 = vld [vmem:[%s11128_s1 + $0xb0] sm:$0xff]  ;;  %v9124_v7 = vld [vmem:[%s11128_s1 + $0xa8] sm:$0xff]  ;;  %p165_p3 = scmp.lt.s32.totalorder %s6435_s5, 1023 }
   0xd   : > { %v9099_v2 = vld [vmem:[%s11128_s1 + $0x78] sm:$0xff]  ;;  %4217 = vmatpush.bf16.msra.mxu2 %v9094_v1  ;;  %v9114_v5 = vld [vmem:[%s11128_s1 + $0x70] sm:$0xff]  ;;  %v9129_v8 = vld [vmem:[%s11128_s1 + $0x68] sm:$0xff] }
   0xe   : > { %3888 = vmatpush.bf16.msra.mxu1 %v9099_v2  ;;  %v8965_v9 = vld [vmem:[%s11128_s1 + $0x20] sm:$0xff]  ;;  %v8964_v12 = vld [vmem:[%s11128_s1 + $0x18] sm:$0xff]  ;;  %s11304_s5 = smov (!%p165_p3, %s6435_s5), 1023  ;;  %v8963_v15 = vld [vmem:[%s11128_s1 + $0x10] sm:$0xff] }
   0xf   : > { %v9139_v10 = vld [vmem:[%s11128_s1 + $0xa0] sm:$0xff]  ;;  %v9156_v13 = vld [vmem:[%s11128_s1 + $0x98] sm:$0xff]  ;;  %s9039_s21 = smul.u32 28, %s11304_s5  ;;  %v9172_v16 = vld [vmem:[%s11128_s1 + $0x90] sm:$0xff]  ;;  %s6438_s11 = sshll.u32 %s11304_s5, 3 }
  0x10   : > { %3560 = vmatpush.bf16.msra.mxu0 %v8967_v3  ;;  %9016 = vmatpush.bf16.msra.mxu3 %v8967_v3  ;;  %v9144_v11 = vld [vmem:[%s11128_s1 + $0x60] sm:$0xff]  ;;  %v9161_v14 = vld [vmem:[%s11128_s1 + $0x58] sm:$0xff]  ;;  %v8971_v17 = vld [vmem:[%s11128_s1 + $0x50] sm:$0xff]  ;;  %s10380_s15 = scalar_lea.vmem %s11130_s3, %s6438_s11 }
  0x11   : > { %4218 = vmatpush.bf16.msra.mxu2 %v9109_v4  ;;  %v8962_v18 = vld [vmem:[%s11128_s1 + $0x8] sm:$0xff]  ;;  %s9183_s30 = scalar_lea.vmem %s11127_s0, %s9039_s21  ;;  %v8961_v21 = vld [vmem:[%s11128_s1] sm:$0xff]  ;;  %v9000_v37 = vld [vmem:[%s11128_s1 + $0x138] sm:$0xff] }
  0x12   : > { %3889 = vmatpush.bf16.msra.mxu1 %v9114_v5  ;;  %v9189_v19 = vld [vmem:[%s11128_s1 + $0x88] sm:$0xff]  ;;  %v9200_v22 = vld [vmem:[%s11128_s1 + $0x80] sm:$0xff]  ;;  %v8516_v25 = vld [vmem:[%s9183_s30 + $0x18] sm:$0xf0] }
  0x13   : > { %v8970_v20 = vld [vmem:[%s11128_s1 + $0x48] sm:$0xff]  ;;  %v8969_v23 = vld [vmem:[%s11128_s1 + $0x40] sm:$0xff]  ;;  %v8852_v27 = vld [vmem:[%s9183_s30 + $0xa98] sm:$0xf0] }
  0x14   : > { %3561 = vmatpush.bf16.msra.mxu0 %v8966_v6  ;;  %9017 = vmatpush.bf16.msra.mxu3 %v8966_v6  ;;  %v6441_v24 = vld [vmem:[%s9183_s30] sm:$0xf]  ;;  %v6449_v28 = vld [vmem:[%s9183_s30 + $0x8] sm:$0xf]  ;;  %v8517_v29 = vld [vmem:[%s9183_s30 + $0x20] sm:$0xf0] }
  0x15   : > { %4219 = vmatpush.bf16.msra.mxu2 %v9124_v7  ;;  %v7785_v26 = vld [vmem:[%s9183_s30 + $0xa80] sm:$0xf]  ;;  %v8513_v30 = vld [vmem:[%s9183_s30 + $0x4] sm:$0xf]  ;;  %v9014_v32 = vld [vmem:[%s11128_s1 + $0x1a8] sm:$0xff]  ;;  %v6442_v33 = vor.u32 %v8516_v25, %v6441_v24  ;;  %v6450_v35 = vor.u32 %v8517_v29, %v6449_v28 }
  0x16   : > { %3890 = vmatpush.bf16.msra.mxu1 %v9129_v8  ;;  %v6443_v31 = vld [vmem:[%s9183_s30 + $0x1c] sm:$0xf0]  ;;  %v7786_v34 = vor.u32 %v8852_v27, %v7785_v26  ;;  %v9008_v38 = vld [vmem:[%s11128_s1 + $0x178] sm:$0xff]  ;;  %v8523_v40 = vld [vmem:[%s9183_s30 + $0x50] sm:$0xf0] }
  0x17   : > { %v6446_v36 = vor.u32 %v8513_v30, %v6443_v31  ;;  %v6469_v39 = vld [vmem:[%s9183_s30 + $0x38] sm:$0xf]  ;;  %v8859_v42 = vld [vmem:[%s9183_s30 + $0xad0] sm:$0xf0]  ;;  %v6477_v43 = vld [vmem:[%s9183_s30 + $0x40] sm:$0xf] }
  0x18   : > { %3562 = vmatpush.bf16.msra.mxu0 %v8965_v9  ;;  %9018 = vmatpush.bf16.msra.mxu3 %v8965_v9  ;;  %v7813_v41 = vld [vmem:[%s9183_s30 + $0xab8] sm:$0xf]  ;;  %v8524_v44 = vld [vmem:[%s9183_s30 + $0x58] sm:$0xf0]  ;;  %v6470_v47 = vor.u32 %v8523_v40, %v6469_v39  ;;  %v6497_v51 = vld [vmem:[%s9183_s30 + $0x70] sm:$0xf] }
  0x19   : > { %4220 = vmatpush.bf16.msra.mxu2 %v9139_v10  ;;  %v8520_v45 = vld [vmem:[%s9183_s30 + $0x3c] sm:$0xf]  ;;  %v6471_v46 = vld [vmem:[%s9183_s30 + $0x54] sm:$0xf0]  ;;  %v7814_v48 = vor.u32 %v8859_v42, %v7813_v41  ;;  %v6478_v49 = vor.u32 %v8524_v44, %v6477_v43  ;;  %v8530_v52 = vld [vmem:[%s9183_s30 + $0x88] sm:$0xf0] }
  0x1a   : > { %3891 = vmatpush.bf16.msra.mxu1 %v9144_v11  ;;  %v6474_v50 = vor.u32 %v8520_v45, %v6471_v46  ;;  %v7841_v53 = vld [vmem:[%s9183_s30 + $0xaf0] sm:$0xf]  ;;  %v8866_v54 = vld [vmem:[%s9183_s30 + $0xb08] sm:$0xf0]  ;;  %v6505_v55 = vld [vmem:[%s9183_s30 + $0x78] sm:$0xf]  ;;  %v6498_v59 = vor.u32 %v8530_v52, %v6497_v51 }
  0x1b   : > { %v8531_v56 = vld [vmem:[%s9183_s30 + $0x90] sm:$0xf0]  ;;  %v6499_v58 = vld [vmem:[%s9183_s30 + $0x8c] sm:$0xf0]  ;;  %v7842_v60 = vor.u32 %v8866_v54, %v7841_v53  ;;  %v6525_v63 = vld [vmem:[%s9183_s30 + $0xa8] sm:$0xf] }
  0x1c   : > { %3563 = vmatpush.bf16.msra.mxu0 %v8964_v12  ;;  %9019 = vmatpush.bf16.msra.mxu3 %v8964_v12  ;;  %v8527_v57 = vld [vmem:[%s9183_s30 + $0x74] sm:$0xf]  ;;  %v6506_v61 = vor.u32 %v8531_v56, %v6505_v55  ;;  %v8537_v0 = vld [vmem:[%s9183_s30 + $0xc0] sm:$0xf0]  ;;  %v8538_v6 = vld [vmem:[%s9183_s30 + $0xc8] sm:$0xf0] }
  0x1d   : > { %4221 = vmatpush.bf16.msra.mxu2 %v9156_v13  ;;  %v6502_v62 = vor.u32 %v8527_v57, %v6499_v58  ;;  %v8873_v3 = vld [vmem:[%s9183_s30 + $0xb40] sm:$0xf0]  ;;  %v6526_v9 = vor.u32 %v8537_v0, %v6525_v63  ;;  %v6553_v12 = vld [vmem:[%s9183_s30 + $0xe0] sm:$0xf]  ;;  %v8999_v24 = vld [vmem:[%s11128_s1 + $0x130] sm:$0xff] }
  0x1e   : > { %3892 = vmatpush.bf16.msra.mxu1 %v9161_v14  ;;  %v6581_v25 = vld [vmem:[%s9183_s30 + $0x118] sm:$0xf]  ;;  %v8551_v26 = vld [vmem:[%s9183_s30 + $0x130] sm:$0xf0]  ;;  %v6589_v29 = vld [vmem:[%s9183_s30 + $0x120] sm:$0xf] }
  0x1f   : > { %v7925_v27 = vld [vmem:[%s9183_s30 + $0xb98] sm:$0xf]  ;;  %v8887_v28 = vld [vmem:[%s9183_s30 + $0xbb0] sm:$0xf0]  ;;  %v8552_v30 = vld [vmem:[%s9183_s30 + $0x138] sm:$0xf0] }
  0x20   : > { %3564 = vmatpush.bf16.msra.mxu0 %v8963_v15  ;;  %9020 = vmatpush.bf16.msra.mxu3 %v8963_v15  ;;  %v8880_v15 = vld [vmem:[%s9183_s30 + $0xb78] sm:$0xf0]  ;;  %v7953_v39 = vld [vmem:[%s9183_s30 + $0xbd0] sm:$0xf]  ;;  %v8894_v40 = vld [vmem:[%s9183_s30 + $0xbe8] sm:$0xf0] }
  0x21   : > { %4222 = vmatpush.bf16.msra.mxu2 %v9172_v16  ;;  %v8548_v31 = vld [vmem:[%s9183_s30 + $0x11c] sm:$0xf]  ;;  %v6617_v41 = vld [vmem:[%s9183_s30 + $0x158] sm:$0xf]  ;;  %v8559_v42 = vld [vmem:[%s9183_s30 + $0x170] sm:$0xf0]  ;;  %v7954_v46 = vor.u32 %v8894_v40, %v7953_v39 }
  0x22   : > { %3893 = vmatpush.bf16.msra.mxu1 %v8971_v17  ;;  %v8555_v43 = vld [vmem:[%s9183_s30 + $0x154] sm:$0xf]  ;;  %v6611_v44 = vld [vmem:[%s9183_s30 + $0x16c] sm:$0xf0]  ;;  %v8565_v51 = vld [vmem:[%s9183_s30 + $0x1a0] sm:$0xf0] }
  0x23   : > { %v7981_v52 = vld [vmem:[%s9183_s30 + $0xc08] sm:$0xf]  ;;  %v8901_v53 = vld [vmem:[%s9183_s30 + $0xc20] sm:$0xf0]  ;;  %v6645_v54 = vld [vmem:[%s9183_s30 + $0x190] sm:$0xf] }
  0x24   : > { %3565 = vmatpush.bf16.msra.mxu0 %v8962_v18  ;;  %9021 = vmatpush.bf16.msra.mxu3 %v8962_v18  ;;  %v8545_v18 = vld [vmem:[%s9183_s30 + $0x100] sm:$0xf0]  ;;  %v8566_v55 = vld [vmem:[%s9183_s30 + $0x1a8] sm:$0xf0]  ;;  %v6639_v57 = vld [vmem:[%s9183_s30 + $0x1a4] sm:$0xf0] }
  0x25   : > { %4223 = vmatpush.bf16.msra.mxu2 %v9189_v19  ;;  %v8562_v56 = vld [vmem:[%s9183_s30 + $0x18c] sm:$0xf]  ;;  %v8572_v63 = vld [vmem:[%s9183_s30 + $0x1d8] sm:$0xf0]  ;;  %v8009_v0 = vld [vmem:[%s9183_s30 + $0xc40] sm:$0xf] }
  0x26   : > { %3894 = vmatpush.bf16.msra.mxu1 %v8970_v20 }
  0x28   : > { %3566 = vmatpush.bf16.msra.mxu0 %v8961_v21  ;;  %9022 = vmatpush.bf16.msra.mxu3 %v8961_v21  ;;  %v6555_v21 = vld [vmem:[%s9183_s30 + $0xfc] sm:$0xf0] }
  0x29   : > { %4224 = vmatpush.bf16.msra.mxu2 %v9200_v22 }
  0x2a   : > { %3895 = vmatpush.bf16.msra.mxu1 %v8969_v23 }
  0x2b   : > { %3567 = vmatmul.bf16.vlgmr.msra.gmra.mxu0 %v6442_v33  ;;  %3807 = vmatmul.bf16.vlgmr.msra.gmra.mxu3 %v7786_v34  ;;  %v6582_v33 = vor.u32 %v8551_v26, %v6581_v25  ;;  %v7926_v34 = vor.u32 %v8887_v28, %v7925_v27  ;;  %v8915_v25 = vld [vmem:[%s9183_s30 + $0xc90] sm:$0xf0]  ;;  %v6701_v26 = vld [vmem:[%s9183_s30 + $0x200] sm:$0xf]  ;;  %v8580_v27 = vld [vmem:[%s9183_s30 + $0x218] sm:$0xf0] }
  0x2c   : > { %9023 = vmatpush.bf16.msrb.mxu3 %v9099_v2  ;;  %4225 = vmatmul.bf16.vlgmr.msra.gmra.mxu2 %v6450_v35  ;;  %v7869_v2 = vld [vmem:[%s9183_s30 + $0xb28] sm:$0xf]  ;;  %v6590_v35 = vor.u32 %v8552_v30, %v6589_v29  ;;  %v8576_v28 = vld [vmem:[%s9183_s30 + $0x1fc] sm:$0xf]  ;;  %v6695_v29 = vld [vmem:[%s9183_s30 + $0x214] sm:$0xf0] }
  0x2d   : > { %5535 = vmatpush.bf16.msrb.mxu2 %v9014_v32  ;;  %3896 = vmatmul.bf16.vlgmr.msra.gmra.mxu1 %v6446_v36  ;;  %v6583_v32 = vld [vmem:[%s9183_s30 + $0x134] sm:$0xf0] }
  0x2e   : > { %4875 = vmatpush.bf16.msrb.mxu0 %v9000_v37  ;;  %5204 = vmatpush.bf16.msrb.mxu1 %v9008_v38  ;;  %v6586_v36 = vor.u32 %v8548_v31, %v6583_v32  ;;  %v6609_v37 = vld [vmem:[%s9183_s30 + $0x150] sm:$0xf]  ;;  %v8558_v38 = vld [vmem:[%s9183_s30 + $0x168] sm:$0xf0] }
  0x2f   : > { %v6610_v45 = vor.u32 %v8558_v38, %v6609_v37  ;;  %v6698_v37 = vor.u32 %v8576_v28, %v6695_v29 }
  0x30   : > { %9024 = vmatpush.bf16.msrb.mxu3 %v9114_v5  ;;  %v6533_v5 = vld [vmem:[%s9183_s30 + $0xb0] sm:$0xf] }
  0x32   : > { %4876 = vmatpush.bf16.msrb.mxu0 %v8999_v24  ;;  %v8579_v24 = vld [vmem:[%s9183_s30 + $0x210] sm:$0xf0] }
  0x34   : > { %9025 = vmatpush.bf16.msrb.mxu3 %v9129_v8  ;;  %v6527_v8 = vld [vmem:[%s9183_s30 + $0xc4] sm:$0xf0] }
  0x38   : > { %9026 = vmatpush.bf16.msrb.mxu3 %v9144_v11 }
  0x3b   : > { %3572 = vmatmul.bf16.gmra.mxu0 %v6470_v47  ;;  %3812 = vmatmul.bf16.gmra.mxu3 %v7814_v48  ;;  %v6618_v47 = vor.u32 %v8559_v42, %v6617_v41  ;;  %v6614_v48 = vor.u32 %v8555_v43, %v6611_v44 }
  0x3c   : > { %9027 = vmatpush.bf16.msrb.mxu3 %v9161_v14  ;;  %4230 = vmatmul.bf16.gmra.mxu2 %v6478_v49  ;;  %v7897_v14 = vld [vmem:[%s9183_s30 + $0xb60] sm:$0xf] }
  0x3d   : > { %3901 = vmatmul.bf16.gmra.mxu1 %v6474_v50  ;;  %v9013_v49 = vld [vmem:[%s11128_s1 + $0x1a0] sm:$0xff]  ;;  %v6637_v50 = vld [vmem:[%s9183_s30 + $0x188] sm:$0xf] }
  0x3e   : > { %5536 = vmatpush.bf16.msrb.mxu2 %v9013_v49  ;;  %v6638_v58 = vor.u32 %v8565_v51, %v6637_v50  ;;  %v8586_v49 = vld [vmem:[%s9183_s30 + $0x248] sm:$0xf0]  ;;  %v8065_v50 = vld [vmem:[%s9183_s30 + $0xcb0] sm:$0xf] }
  0x3f   : > { %v8922_v51 = vld [vmem:[%s9183_s30 + $0xcc8] sm:$0xf0] }
  0x40   : > { %9028 = vmatpush.bf16.msrb.mxu3 %v8971_v17  ;;  %v6561_v17 = vld [vmem:[%s9183_s30 + $0xe8] sm:$0xf] }
  0x44   : > { %9029 = vmatpush.bf16.msrb.mxu3 %v8970_v20  ;;  %v8541_v20 = vld [vmem:[%s9183_s30 + $0xe4] sm:$0xf] }
  0x48   : > { %9030 = vmatpush.bf16.msrb.mxu3 %v8969_v23  ;;  %v7898_v23 = vor.u32 %v8880_v15, %v7897_v14 }
  0x4b   : > { %3577 = vmatmul.bf16.gmra.mxu0 %v6498_v59  ;;  %3817 = vmatmul.bf16.gmra.mxu3 %v7842_v60  ;;  %v7982_v59 = vor.u32 %v8901_v53, %v7981_v52  ;;  %v6646_v60 = vor.u32 %v8566_v55, %v6645_v54  ;;  %v6729_v52 = vld [vmem:[%s9183_s30 + $0x238] sm:$0xf]  ;;  %v8587_v53 = vld [vmem:[%s9183_s30 + $0x250] sm:$0xf0]  ;;  %v6723_v55 = vld [vmem:[%s9183_s30 + $0x24c] sm:$0xf0] }
  0x4c   : > { %9031 = vmatpush.bf16.msra.mxu3 %v9094_v1  ;;  %4235 = vmatmul.bf16.gmra.mxu2 %v6506_v61  ;;  %v8534_v1 = vld [vmem:[%s9183_s30 + $0xac] sm:$0xf]  ;;  %v6642_v61 = vor.u32 %v8562_v56, %v6639_v57  ;;  %v8583_v54 = vld [vmem:[%s9183_s30 + $0x234] sm:$0xf] }
  0x4d   : > { %3906 = vmatmul.bf16.gmra.mxu1 %v6502_v62  ;;  %v6530_v11 = vor.u32 %v8534_v1, %v6527_v8  ;;  %v6665_v62 = vld [vmem:[%s9183_s30 + $0x1c0] sm:$0xf] }
  0x4e   : > { %v6667_v1 = vld [vmem:[%s9183_s30 + $0x1dc] sm:$0xf0] }
  0x4f   : > { %v9313_v8 = vld [vmem:[%s11129_s2] ss:$0 sm:$0xff] }
  0x50   : > { %9032 = vmatpush.bf16.msra.mxu3 %v9109_v4  ;;  %v7870_v4 = vor.u32 %v8873_v3, %v7869_v2  ;;  %v8908_v2 = vld [vmem:[%s9183_s30 + $0xc58] sm:$0xf0]  ;;  %v6673_v3 = vld [vmem:[%s9183_s30 + $0x1c8] sm:$0xf] }
  0x54   : > { %9033 = vmatpush.bf16.msra.mxu3 %v9124_v7  ;;  %v6534_v7 = vor.u32 %v8538_v6, %v6533_v5  ;;  %v8573_v5 = vld [vmem:[%s9183_s30 + $0x1e0] sm:$0xf0] }
  0x55   : > { %v8569_v6 = vld [vmem:[%s9183_s30 + $0x1c4] sm:$0xf] }
  0x58   : > { %9034 = vmatpush.bf16.msra.mxu3 %v9139_v10  ;;  %v8544_v10 = vld [vmem:[%s9183_s30 + $0xf8] sm:$0xf0] }
  0x5b   : > { %3582 = vmatmul.bf16.gmra.mxu0 %v6526_v9  ;;  %3822 = vmatmul.bf16.gmra.mxu3 %v7870_v4  ;;  %v6666_v9 = vor.u32 %v8572_v63, %v6665_v62  ;;  %v8010_v4 = vor.u32 %v8908_v2, %v8009_v0  ;;  %v6730_v62 = vor.u32 %v8587_v53, %v6729_v52  ;;  %v6779_v52 = vld [vmem:[%s9183_s30 + $0x2bc] sm:$0xf0] }
  0x5c   : > { %9035 = vmatpush.bf16.msra.mxu3 %v9156_v13  ;;  %4240 = vmatmul.bf16.gmra.mxu2 %v6534_v7  ;;  %v6554_v13 = vor.u32 %v8544_v10, %v6553_v12  ;;  %v6670_v12 = vor.u32 %v8569_v6, %v6667_v1  ;;  %v6726_v63 = vor.u32 %v8583_v54, %v6723_v55 }
  0x5d   : > { %3911 = vmatmul.bf16.gmra.mxu1 %v6530_v11  ;;  %v6674_v11 = vor.u32 %v8573_v5, %v6673_v3 }
  0x60   : > { %9036 = vmatpush.bf16.msra.mxu3 %v9172_v16  ;;  %v6562_v16 = vor.u32 %v8545_v18, %v6561_v17 }
  0x64   : > { %9037 = vmatpush.bf16.msra.mxu3 %v9189_v19  ;;  %v6558_v19 = vor.u32 %v8541_v20, %v6555_v21 }
  0x68   : > { %9038 = vmatpush.bf16.msra.mxu3 %v9200_v22  ;;  %v9007_v22 = vld [vmem:[%s11128_s1 + $0x170] sm:$0xff] }
  0x69   : > { %5205 = vmatpush.bf16.msrb.mxu1 %v9007_v22  ;;  %v8037_v22 = vld [vmem:[%s9183_s30 + $0xc78] sm:$0xf] }
  0x6b   : > { %3587 = vmatmul.bf16.gmra.mxu0 %v6554_v13  ;;  %3827 = vmatmul.bf16.gmra.mxu3 %v7898_v23 }
  0x6c   : > { %4245 = vmatmul.bf16.gmra.mxu2 %v6562_v16 }
  0x6d   : > { %3916 = vmatmul.bf16.gmra.mxu1 %v6558_v19  ;;  %v6693_v19 = vld [vmem:[%s9183_s30 + $0x1f8] sm:$0xf] }
  0x6e   : > { %v6694_v32 = vor.u32 %v8579_v24, %v6693_v19  ;;  %v6751_v19 = vld [vmem:[%s9183_s30 + $0x284] sm:$0xf0] }
  0x7b   : > { %3592 = vmatmul.bf16.gmra.mxu0 %v6582_v33  ;;  %3832 = vmatmul.bf16.gmra.mxu3 %v7926_v34  ;;  %v8038_v33 = vor.u32 %v8915_v25, %v8037_v22 }
  0x7c   : > { %4250 = vmatmul.bf16.gmra.mxu2 %v6590_v35 }
  0x7d   : > { %3921 = vmatmul.bf16.gmra.mxu1 %v6586_v36  ;;  %v6702_v36 = vor.u32 %v8580_v27, %v6701_v26 }
  0x8b   : > { %3597 = vmatmul.bf16.gmra.mxu0 %v6610_v45  ;;  %3837 = vmatmul.bf16.gmra.mxu3 %v7954_v46 }
  0x8c   : > { %4255 = vmatmul.bf16.gmra.mxu2 %v6618_v47 }
  0x8d   : > { %3926 = vmatmul.bf16.gmra.mxu1 %v6614_v48  ;;  %v6721_v48 = vld [vmem:[%s9183_s30 + $0x230] sm:$0xf] }
  0x9b   : > { %3602 = vmatmul.bf16.gmra.mxu0 %v6638_v58  ;;  %3842 = vmatmul.bf16.gmra.mxu3 %v7982_v59  ;;  %v6722_v58 = vor.u32 %v8586_v49, %v6721_v48  ;;  %v8066_v59 = vor.u32 %v8922_v51, %v8065_v50  ;;  %v8936_v48 = vld [vmem:[%s9183_s30 + $0xd38] sm:$0xf0]  ;;  %v6785_v49 = vld [vmem:[%s9183_s30 + $0x2a8] sm:$0xf]  ;;  %v8601_v50 = vld [vmem:[%s9183_s30 + $0x2c0] sm:$0xf0] }
  0x9c   : > { %4260 = vmatmul.bf16.gmra.mxu2 %v6646_v60  ;;  %v8597_v51 = vld [vmem:[%s9183_s30 + $0x2a4] sm:$0xf] }
  0x9d   : > { %3931 = vmatmul.bf16.gmra.mxu1 %v6642_v61 }
  0xa8   : > { %v3568_v7 = vpop.f32.mrf.mxu0 }
  0xa9   : > { %v3569_v10 = vadd.f32 %v9313_v8, %v3568_v7 }
  0xaa   : > { %v3897_v14 = vpop.f32.mrf.mxu1 }
  0xab   : > { %v3898_v15 = vadd.f32 %v3897_v14, %v3569_v10  ;;  %3607 = vmatmul.bf16.gmra.mxu0 %v6666_v9  ;;  %3847 = vmatmul.bf16.gmra.mxu3 %v8010_v4  ;;  %v8593_v10 = vld [vmem:[%s9183_s30 + $0x280] sm:$0xf0]  ;;  %v8998_v14 = vld [vmem:[%s11128_s1 + $0x128] sm:$0xff] }
  0xac   : > { %4265 = vmatmul.bf16.gmra.mxu2 %v6674_v11  ;;  %v6749_v11 = vld [vmem:[%s9183_s30 + $0x268] sm:$0xf]  ;;  %4877 = vmatpush.bf16.msrb.mxu0 %v8998_v14  ;;  %v8607_v14 = vld [vmem:[%s9183_s30 + $0x2f0] sm:$0xf0] }
  0xad   : > { %3936 = vmatmul.bf16.gmra.mxu1 %v6670_v12  ;;  %v6750_v25 = vor.u32 %v8593_v10, %v6749_v11  ;;  %v6805_v10 = vld [vmem:[%s9183_s30 + $0x2d8] sm:$0xf] }
  0xae   : > { %v9316_v17 = vpop.f32.mrf.mxu3 }
  0xaf   : > { %v4226_v18 = vpop.f32.mrf.mxu2 }
  0xb0   : > { %v9318_v20 = vadd.f32 %v4226_v18, %v3898_v15  ;;  %v3570_v21 = vpop.f32.mrf.mxu0  ;;  %v9006_v15 = vld [vmem:[%s11128_s1 + $0x168] sm:$0xff] }
  0xb1   : > { %v3571_v13 = vadd.f32 %v9313_v8, %v3570_v21  ;;  %v8093_v18 = vld [vmem:[%s9183_s30 + $0xce8] sm:$0xf]  ;;  %v8929_v21 = vld [vmem:[%s9183_s30 + $0xd00] sm:$0xf0]  ;;  %5206 = vmatpush.bf16.msrb.mxu1 %v9006_v15  ;;  %v8149_v15 = vld [vmem:[%s9183_s30 + $0xd58] sm:$0xf] }
  0xb2   : > { %v3899_v23 = vpop.f32.mrf.mxu1  ;;  %v8094_v26 = vor.u32 %v8929_v21, %v8093_v18  ;;  %v8943_v18 = vld [vmem:[%s9183_s30 + $0xd70] sm:$0xf0]  ;;  %v6813_v21 = vld [vmem:[%s9183_s30 + $0x2e0] sm:$0xf] }
  0xb3   : > { %v3900_v16 = vadd.f32 %v3899_v23, %v3571_v13  ;;  %v6757_v13 = vld [vmem:[%s9183_s30 + $0x270] sm:$0xf]  ;;  %v8594_v23 = vld [vmem:[%s9183_s30 + $0x288] sm:$0xf0] }
  0xb4   : > { %v6758_v29 = vor.u32 %v8594_v23, %v6757_v13  ;;  %v8608_v13 = vld [vmem:[%s9183_s30 + $0x2f8] sm:$0xf0] }
  0xb5   : > { %v8604_v23 = vld [vmem:[%s9183_s30 + $0x2dc] sm:$0xf] }
  0xb6   : > { %v9329_v30 = vpop.f32.mrf.mxu3 }
  0xb7   : > { %v4228_v31 = vpop.f32.mrf.mxu2 }
  0xb8   : > { %v9331_v34 = vadd.f32 %v4228_v31, %v3900_v16  ;;  %v3573_v35 = vpop.f32.mrf.mxu0  ;;  %v8590_v16 = vld [vmem:[%s9183_s30 + $0x26c] sm:$0xf] }
  0xb9   : > { %v3574_v38 = vadd.f32 %v9313_v8, %v3573_v35  ;;  %v6754_v31 = vor.u32 %v8590_v16, %v6751_v19  ;;  %v6807_v16 = vld [vmem:[%s9183_s30 + $0x2f4] sm:$0xf0] }
  0xba   : > { %v3902_v39 = vpop.f32.mrf.mxu1 }
  0xbb   : > { %v3903_v40 = vadd.f32 %v3902_v39, %v3574_v38  ;;  %3612 = vmatmul.bf16.gmra.mxu0 %v6694_v32  ;;  %3852 = vmatmul.bf16.gmra.mxu3 %v8038_v33 }
  0xbc   : > { %4270 = vmatmul.bf16.gmra.mxu2 %v6702_v36 }
  0xbd   : > { %3941 = vmatmul.bf16.gmra.mxu1 %v6698_v37 }
  0xbe   : > { %v9334_v41 = vpop.f32.mrf.mxu3 }
  0xbf   : > { %v4231_v42 = vpop.f32.mrf.mxu2 }
  0xc0   : > { %v9336_v43 = vadd.f32 %v4231_v42, %v3903_v40  ;;  %v3575_v44 = vpop.f32.mrf.mxu0 }
  0xc1   : > { %v3576_v45 = vadd.f32 %v9313_v8, %v3575_v44 }
  0xc2   : > { %v3904_v46 = vpop.f32.mrf.mxu1 }
  0xc3   : > { %v3905_v47 = vadd.f32 %v3904_v46, %v3576_v45  ;;  %v6777_v45 = vld [vmem:[%s9183_s30 + $0x2a0] sm:$0xf]  ;;  %v8600_v46 = vld [vmem:[%s9183_s30 + $0x2b8] sm:$0xf0] }
  0xc4   : > { %v6778_v55 = vor.u32 %v8600_v46, %v6777_v45 }
  0xc6   : > { %v9347_v56 = vpop.f32.mrf.mxu3 }
  0xc7   : > { %v4233_v57 = vpop.f32.mrf.mxu2 }
  0xc8   : > { %v9349_v60 = vadd.f32 %v4233_v57, %v3905_v47  ;;  %v3578_v61 = vpop.f32.mrf.mxu0  ;;  %v8121_v47 = vld [vmem:[%s9183_s30 + $0xd20] sm:$0xf] }
  0xc9   : > { %v3579_v0 = vadd.f32 %v9313_v8, %v3578_v61  ;;  %v8122_v57 = vor.u32 %v8936_v48, %v8121_v47  ;;  %v6786_v61 = vor.u32 %v8601_v50, %v6785_v49  ;;  %v6833_v48 = vld [vmem:[%s9183_s30 + $0x310] sm:$0xf]  ;;  %v8614_v49 = vld [vmem:[%s9183_s30 + $0x328] sm:$0xf0] }
  0xca   : > { %v3907_v2 = vpop.f32.mrf.mxu1  ;;  %v8177_v50 = vld [vmem:[%s9183_s30 + $0xd90] sm:$0xf] }
  0xcb   : > { %v3908_v3 = vadd.f32 %v3907_v2, %v3579_v0  ;;  %3617 = vmatmul.bf16.gmra.mxu0 %v6722_v58  ;;  %3857 = vmatmul.bf16.gmra.mxu3 %v8066_v59 }
  0xcc   : > { %4275 = vmatmul.bf16.gmra.mxu2 %v6730_v62  ;;  %v6782_v62 = vor.u32 %v8597_v51, %v6779_v52  ;;  %v8950_v51 = vld [vmem:[%s9183_s30 + $0xda8] sm:$0xf0]  ;;  %v6841_v52 = vld [vmem:[%s9183_s30 + $0x318] sm:$0xf] }
  0xcd   : > { %3946 = vmatmul.bf16.gmra.mxu1 %v6726_v63 }
  0xce   : > { %v9352_v5 = vpop.f32.mrf.mxu3 }
  0xcf   : > { %v4236_v6 = vpop.f32.mrf.mxu2 }
  0xd0   : > { %v9354_v1 = vadd.f32 %v4236_v6, %v3908_v3  ;;  %v3580_v9 = vpop.f32.mrf.mxu0 }
  0xd1   : > { %v3581_v4 = vadd.f32 %v9313_v8, %v3580_v9 }
  0xd2   : > { %v3909_v7 = vpop.f32.mrf.mxu1 }
  0xd3   : > { %v3910_v12 = vadd.f32 %v3909_v7, %v3581_v4 }
  0xd6   : > { %v9371_v24 = vpop.f32.mrf.mxu3 }
  0xd7   : > { %v4238_v22 = vpop.f32.mrf.mxu2 }
  0xd8   : > { %v9373_v27 = vadd.f32 %v4238_v22, %v3910_v12  ;;  %v3583_v28 = vpop.f32.mrf.mxu0 }
  0xd9   : > { %v3584_v32 = vadd.f32 %v9313_v8, %v3583_v28 }
  0xda   : > { %v3912_v33 = vpop.f32.mrf.mxu1 }
  0xdb   : > { %v3913_v35 = vadd.f32 %v3912_v33, %v3584_v32  ;;  %3622 = vmatmul.bf16.gmra.mxu0 %v6750_v25  ;;  %3862 = vmatmul.bf16.gmra.mxu3 %v8094_v26  ;;  %v6806_v25 = vor.u32 %v8607_v14, %v6805_v10  ;;  %v8150_v26 = vor.u32 %v8943_v18, %v8149_v15 }
  0xdc   : > { %4280 = vmatmul.bf16.gmra.mxu2 %v6758_v29  ;;  %v6810_v32 = vor.u32 %v8604_v23, %v6807_v16  ;;  %v9012_v23 = vld [vmem:[%s11128_s1 + $0x198] sm:$0xff] }
  0xdd   : > { %3951 = vmatmul.bf16.gmra.mxu1 %v6754_v31  ;;  %v6814_v31 = vor.u32 %v8608_v13, %v6813_v21  ;;  %5537 = vmatpush.bf16.msrb.mxu2 %v9012_v23 }
  0xde   : > { %v9376_v36 = vpop.f32.mrf.mxu3 }
  0xdf   : > { %v4241_v37 = vpop.f32.mrf.mxu2 }
  0xe0   : > { %v9378_v38 = vadd.f32 %v4241_v37, %v3913_v35  ;;  %v3585_v39 = vpop.f32.mrf.mxu0 }
  0xe1   : > { %v3586_v40 = vadd.f32 %v9313_v8, %v3585_v39 }
  0xe2   : > { %v3914_v42 = vpop.f32.mrf.mxu1 }
  0xe3   : > { %v3915_v44 = vadd.f32 %v3914_v42, %v3586_v40 }
  0xe6   : > { %v9389_v53 = vpop.f32.mrf.mxu3 }
  0xe7   : > { %v4243_v54 = vpop.f32.mrf.mxu2 }
  0xe8   : > { %v9391_v58 = vadd.f32 %v4243_v54, %v3915_v44  ;;  %v3588_v59 = vpop.f32.mrf.mxu0  ;;  %v8615_v54 = vld [vmem:[%s9183_s30 + $0x330] sm:$0xf0] }
  0xe9   : > { %v3589_v63 = vadd.f32 %v9313_v8, %v3588_v59 }
  0xea   : > { %v3917_v0 = vpop.f32.mrf.mxu1 }
  0xeb   : > { %v3918_v2 = vadd.f32 %v3917_v0, %v3589_v63  ;;  %3627 = vmatmul.bf16.gmra.mxu0 %v6778_v55  ;;  %3867 = vmatmul.bf16.gmra.mxu3 %v8122_v57  ;;  %v8611_v55 = vld [vmem:[%s9183_s30 + $0x314] sm:$0xf]  ;;  %v6835_v57 = vld [vmem:[%s9183_s30 + $0x32c] sm:$0xf0]  ;;  %v8178_v63 = vor.u32 %v8950_v51, %v8177_v50 }
  0xec   : > { %4285 = vmatmul.bf16.gmra.mxu2 %v6786_v61 }
  0xed   : > { %3956 = vmatmul.bf16.gmra.mxu1 %v6782_v62  ;;  %v6834_v62 = vor.u32 %v8614_v49, %v6833_v48 }
  0xee   : > { %v9394_v3 = vpop.f32.mrf.mxu3 }
  0xef   : > { %v4246_v6 = vpop.f32.mrf.mxu2 }
  0xf0   : > { %v9396_v9 = vadd.f32 %v4246_v6, %v3918_v2  ;;  %v3590_v4 = vpop.f32.mrf.mxu0  ;;  %v6842_v6 = vor.u32 %v8615_v54, %v6841_v52 }
  0xf1   : > { %v3591_v7 = vadd.f32 %v9313_v8, %v3590_v4  ;;  %v6838_v4 = vor.u32 %v8611_v55, %v6835_v57 }
  0xf2   : > { %11131 = vst [vmem:[#allocation2_spill] sm:$0xff] %v9396_v9  ;;  %v3919_v11 = vpop.f32.mrf.mxu1 }
  0xf3   : > { %v3920_v12 = vadd.f32 %v3919_v11, %v3591_v7 }
  0xf6   : > { %v9407_v19 = vpop.f32.mrf.mxu3 }
  0xf7   : > { %v4248_v22 = vpop.f32.mrf.mxu2 }
  0xf8   : > { %v9409_v28 = vadd.f32 %v4248_v22, %v3920_v12  ;;  %v3593_v29 = vpop.f32.mrf.mxu0  ;;  %v6861_v22 = vld [vmem:[%s9183_s30 + $0x348] sm:$0xf] }
  0xf9   : > { %v3594_v33 = vadd.f32 %v9313_v8, %v3593_v29  ;;  %v8957_v29 = vld [vmem:[%s9183_s30 + $0xde0] sm:$0xf0] }
  0xfa   : > { %11132 = vst [vmem:[#allocation3_spill] sm:$0xff] %v9409_v28  ;;  %v3922_v35 = vpop.f32.mrf.mxu1 }
  0xfb   : > { %v3923_v37 = vadd.f32 %v3922_v35, %v3594_v33  ;;  %3632 = vmatmul.bf16.gmra.mxu0 %v6806_v25  ;;  %3872 = vmatmul.bf16.gmra.mxu3 %v8150_v26  ;;  %v8621_v25 = vld [vmem:[%s9183_s30 + $0x360] sm:$0xf0]  ;;  %v8205_v26 = vld [vmem:[%s9183_s30 + $0xdc8] sm:$0xf]  ;;  %v8618_v33 = vld [vmem:[%s9183_s30 + $0x34c] sm:$0xf] }
  0xfc   : > { %4290 = vmatmul.bf16.gmra.mxu2 %v6814_v31  ;;  %v6869_v31 = vld [vmem:[%s9183_s30 + $0x350] sm:$0xf]  ;;  %v6863_v35 = vld [vmem:[%s9183_s30 + $0x364] sm:$0xf0] }
  0xfd   : > { %3961 = vmatmul.bf16.gmra.mxu1 %v6810_v32  ;;  %v8622_v32 = vld [vmem:[%s9183_s30 + $0x368] sm:$0xf0]  ;;  %v6866_v49 = vor.u32 %v8618_v33, %v6863_v35 }
  0xfe   : > { %v9412_v39 = vpop.f32.mrf.mxu3  ;;  %v6870_v48 = vor.u32 %v8622_v32, %v6869_v31 }
  0xff   : > { %v4251_v40 = vpop.f32.mrf.mxu2 }
 0x100   : > { %v9414_v42 = vadd.f32 %v4251_v40, %v3923_v37  ;;  %v3595_v44 = vpop.f32.mrf.mxu0 }
 0x101   : > { %v3596_v45 = vadd.f32 %v9313_v8, %v3595_v44  ;;  %v6862_v44 = vor.u32 %v8621_v25, %v6861_v22 }
 0x102   : > { %11133 = vst [vmem:[#allocation4_spill] sm:$0xff] %v9414_v42  ;;  %v3924_v46 = vpop.f32.mrf.mxu1 }
 0x103   : > { %v3925_v47 = vadd.f32 %v3924_v46, %v3596_v45  ;;  %v8206_v45 = vor.u32 %v8957_v29, %v8205_v26 }
 0x106   : > { %v9425_v59 = vpop.f32.mrf.mxu3 }
 0x107   : > { %v4253_v61 = vpop.f32.mrf.mxu2 }
 0x108   : > { %v9427_v0 = vadd.f32 %v4253_v61, %v3925_v47  ;;  %v3598_v2 = vpop.f32.mrf.mxu0 }
 0x109   : > { %v3599_v7 = vadd.f32 %v9313_v8, %v3598_v2 }
 0x10a   : > { %11134 = vst [vmem:[#allocation5_spill] sm:$0xff] %v9427_v0  ;;  %v3927_v11 = vpop.f32.mrf.mxu1 }
 0x10b   : > { %v3928_v12 = vadd.f32 %v3927_v11, %v3599_v7  ;;  %3637 = vmatmul.bf16.gmra.mxu0 %v6834_v62  ;;  %3877 = vmatmul.bf16.gmra.mxu3 %v8178_v63  ;;  %v8849_v7 = vld [vmem:[%s9183_s30 + $0xa84] sm:$0xf]  ;;  %v7787_v11 = vld [vmem:[%s9183_s30 + $0xa9c] sm:$0xf0] }
 0x10c   : > { %4295 = vmatmul.bf16.gmra.mxu2 %v6842_v6  ;;  %v6889_v6 = vld [vmem:[%s9183_s30 + $0x380] sm:$0xf]  ;;  %v7790_v22 = vor.u32 %v8849_v7, %v7787_v11  ;;  %v6919_v7 = vld [vmem:[%s9183_s30 + $0x3d4] sm:$0xf0] }
 0x10d   : > { %3966 = vmatmul.bf16.gmra.mxu1 %v6838_v4  ;;  %v8628_v4 = vld [vmem:[%s9183_s30 + $0x398] sm:$0xf0] }
 0x10e   : > { %v9430_v10 = vpop.f32.mrf.mxu3 }
 0x10f   : > { %v4256_v14 = vpop.f32.mrf.mxu2 }
 0x110   : > { %v9432_v15 = vadd.f32 %v4256_v14, %v3928_v12  ;;  %v3600_v18 = vpop.f32.mrf.mxu0  ;;  %v6897_v12 = vld [vmem:[%s9183_s30 + $0x388] sm:$0xf]  ;;  %v8629_v14 = vld [vmem:[%s9183_s30 + $0x3a0] sm:$0xf0] }
 0x111   : > { %v3601_v21 = vadd.f32 %v9313_v8, %v3600_v18  ;;  %v8625_v18 = vld [vmem:[%s9183_s30 + $0x384] sm:$0xf]  ;;  %v6898_v29 = vor.u32 %v8629_v14, %v6897_v12 }
 0x112   : > { %11135 = vst [vmem:[#allocation6_spill] sm:$0xff] %v9432_v15  ;;  %v3929_v13 = vpop.f32.mrf.mxu1 }
 0x113   : > { %v3930_v16 = vadd.f32 %v3929_v13, %v3601_v21  ;;  %v6891_v21 = vld [vmem:[%s9183_s30 + $0x39c] sm:$0xf0] }
 0x114   : > { %v6894_v31 = vor.u32 %v8625_v18, %v6891_v21 }
 0x116   : > { %v9446_v37 = vpop.f32.mrf.mxu3 }
 0x117   : > { %v4258_v40 = vpop.f32.mrf.mxu2 }
 0x118   : > { %v9448_v46 = vadd.f32 %v4258_v40, %v3930_v16  ;;  %v3603_v47 = vpop.f32.mrf.mxu0  ;;  %v6890_v16 = vor.u32 %v8628_v4, %v6889_v6  ;;  %v8636_v6 = vld [vmem:[%s9183_s30 + $0x3d8] sm:$0xf0] }
 0x119   : > { %v3604_v50 = vadd.f32 %v9313_v8, %v3603_v47  ;;  %v8632_v4 = vld [vmem:[%s9183_s30 + $0x3bc] sm:$0xf] }
 0x11a   : > { %11136 = vst [vmem:[#allocation7_spill] sm:$0xff] %v9448_v46  ;;  %v3932_v51 = vpop.f32.mrf.mxu1 }
 0x11b   : > { %v3933_v52 = vadd.f32 %v3932_v51, %v3604_v50  ;;  %3642 = vmatmul.bf16.gmra.mxu0 %v6862_v44  ;;  %3882 = vmatmul.bf16.gmra.mxu3 %v8206_v45  ;;  %v6917_v50 = vld [vmem:[%s9183_s30 + $0x3b8] sm:$0xf] }
 0x11c   : > { %4300 = vmatmul.bf16.gmra.mxu2 %v6870_v48 }
 0x11d   : > { %3971 = vmatmul.bf16.gmra.mxu1 %v6866_v49 }
 0x11e   : > { %v9451_v54 = vpop.f32.mrf.mxu3 }
 0x11f   : > { %v4261_v55 = vpop.f32.mrf.mxu2 }
 0x120   : > { %v9453_v57 = vadd.f32 %v4261_v55, %v3933_v52  ;;  %v3605_v61 = vpop.f32.mrf.mxu0  ;;  %v8635_v52 = vld [vmem:[%s9183_s30 + $0x3d0] sm:$0xf0]  ;;  %v8997_v55 = vld [vmem:[%s11128_s1 + $0x120] sm:$0xff] }
 0x121   : > { %v3606_v62 = vadd.f32 %v9313_v8, %v3605_v61  ;;  %v9005_v61 = vld [vmem:[%s11128_s1 + $0x160] sm:$0xff]  ;;  %4878 = vmatpush.bf16.msrb.mxu0 %v8997_v55  ;;  %v6918_v14 = vor.u32 %v8635_v52, %v6917_v50  ;;  %v6945_v50 = vld [vmem:[%s9183_s30 + $0x3f0] sm:$0xf]  ;;  %v8863_v52 = vld [vmem:[%s9183_s30 + $0xaf4] sm:$0xf] }
 0x122   : > { %11137 = vst [vmem:[#allocation8_spill] sm:$0xff] %v9453_v57  ;;  %v3934_v63 = vpop.f32.mrf.mxu1  ;;  %5207 = vmatpush.bf16.msrb.mxu1 %v9005_v61  ;;  %v7843_v55 = vld [vmem:[%s9183_s30 + $0xb0c] sm:$0xf0]  ;;  %v6953_v61 = vld [vmem:[%s9183_s30 + $0x3f8] sm:$0xf] }
 0x123   : > { %v3935_v2 = vadd.f32 %v3934_v63, %v3606_v62  ;;  %v8856_v62 = vld [vmem:[%s9183_s30 + $0xabc] sm:$0xf]  ;;  %v7815_v63 = vld [vmem:[%s9183_s30 + $0xad4] sm:$0xf0] }
 0x124   : > { %v7818_v18 = vor.u32 %v8856_v62, %v7815_v63  ;;  %v8643_v62 = vld [vmem:[%s9183_s30 + $0x410] sm:$0xf0] }
 0x125   : > { %v8639_v63 = vld [vmem:[%s9183_s30 + $0x3f4] sm:$0xf] }
 0x126   : > { %v9464_v13 = vpop.f32.mrf.mxu3 }
 0x127   : > { %v4263_v23 = vpop.f32.mrf.mxu2 }
 0x128   : > { %v9466_v25 = vadd.f32 %v4263_v23, %v3935_v2  ;;  %v3608_v26 = vpop.f32.mrf.mxu0  ;;  %v6925_v2 = vld [vmem:[%s9183_s30 + $0x3c0] sm:$0xf] }
 0x129   : > { %v3609_v32 = vadd.f32 %v9313_v8, %v3608_v26 }
 0x12a   : > { %11138 = vst [vmem:[#allocation9_spill] sm:$0xff] %v9466_v25  ;;  %v3937_v33 = vpop.f32.mrf.mxu1 }
 0x12b   : > { %v3938_v35 = vadd.f32 %v3937_v33, %v3609_v32  ;;  %3647 = vmatmul.bf16.gmra.mxu0 %v6890_v16  ;;  %4136 = vmatmul.bf16.vlgmr.msrb.gmra.mxu3 %v7790_v22  ;;  %v6926_v16 = vor.u32 %v8636_v6, %v6925_v2  ;;  %v6922_v22 = vor.u32 %v8632_v4, %v6919_v7  ;;  %v6947_v2 = vld [vmem:[%s9183_s30 + $0x40c] sm:$0xf0] }
 0x12c   : > { %4305 = vmatmul.bf16.gmra.mxu2 %v6898_v29 }
 0x12d   : > { %3976 = vmatmul.bf16.gmra.mxu1 %v6894_v31 }
 0x12e   : > { %v9469_v40 = vpop.f32.mrf.mxu3 }
 0x12f   : > { %v4266_v44 = vpop.f32.mrf.mxu2 }
 0x130   : > { %v9471_v45 = vadd.f32 %v4266_v44, %v3938_v35  ;;  %v3610_v47 = vpop.f32.mrf.mxu0 }
 0x131   : > { %v3611_v48 = vadd.f32 %v9313_v8, %v3610_v47 }
 0x132   : > { %11139 = vst [vmem:[#allocation10_spill] sm:$0xff] %v9471_v45  ;;  %v3939_v49 = vpop.f32.mrf.mxu1 }
 0x133   : > { %v3940_v51 = vadd.f32 %v3939_v49, %v3611_v48 }
 0x136   : > { %v9488_v11 = vpop.f32.mrf.mxu3 }
 0x137   : > { %v4268_v12 = vpop.f32.mrf.mxu2 }
 0x138   : > { %v9490_v21 = vadd.f32 %v4268_v12, %v3940_v51  ;;  %v3613_v23 = vpop.f32.mrf.mxu0  ;;  %v8642_v51 = vld [vmem:[%s9183_s30 + $0x408] sm:$0xf0]  ;;  %v7846_v12 = vor.u32 %v8863_v52, %v7843_v55  ;;  %v8649_v52 = vld [vmem:[%s9183_s30 + $0x440] sm:$0xf0] }
 0x139   : > { %v3614_v26 = vadd.f32 %v9313_v8, %v3613_v23  ;;  %v6946_v7 = vor.u32 %v8642_v51, %v6945_v50  ;;  %v6954_v23 = vor.u32 %v8643_v62, %v6953_v61  ;;  %v6973_v51 = vld [vmem:[%s9183_s30 + $0x428] sm:$0xf]  ;;  %v8870_v55 = vld [vmem:[%s9183_s30 + $0xb2c] sm:$0xf]  ;;  %v6981_v62 = vld [vmem:[%s9183_s30 + $0x430] sm:$0xf] }
 0x13a   : > { %11140 = vst [vmem:[#allocation11_spill] sm:$0xff] %v9490_v21  ;;  %v3942_v29 = vpop.f32.mrf.mxu1  ;;  %v7871_v61 = vld [vmem:[%s9183_s30 + $0xb44] sm:$0xf0] }
 0x13b   : > { %v3943_v31 = vadd.f32 %v3942_v29, %v3614_v26  ;;  %3652 = vmatmul.bf16.gmra.mxu0 %v6918_v14  ;;  %4141 = vmatmul.bf16.gmra.mxu3 %v7818_v18 }
 0x13c   : > { %4310 = vmatmul.bf16.gmra.mxu2 %v6926_v16  ;;  %v6950_v16 = vor.u32 %v8639_v63, %v6947_v2  ;;  %v8650_v63 = vld [vmem:[%s9183_s30 + $0x448] sm:$0xf0] }
 0x13d   : > { %3981 = vmatmul.bf16.gmra.mxu1 %v6922_v22  ;;  %v8646_v2 = vld [vmem:[%s9183_s30 + $0x42c] sm:$0xf] }
 0x13e   : > { %v9493_v32 = vpop.f32.mrf.mxu3 }
 0x13f   : > { %v4271_v33 = vpop.f32.mrf.mxu2 }
 0x140   : > { %v9495_v35 = vadd.f32 %v4271_v33, %v3943_v31  ;;  %v3615_v44 = vpop.f32.mrf.mxu0 }
 0x141   : > { %v3616_v47 = vadd.f32 %v9313_v8, %v3615_v44 }
 0x142   : > { %11141 = vst [vmem:[#allocation12_spill] sm:$0xff] %v9495_v35  ;;  %v3944_v48 = vpop.f32.mrf.mxu1 }
 0x143   : > { %v3945_v49 = vadd.f32 %v3944_v48, %v3616_v47 }
 0x146   : > { %v9506_v6 = vpop.f32.mrf.mxu3 }
 0x147   : > { %v4273_v4 = vpop.f32.mrf.mxu2 }
 0x148   : > { %v9508_v14 = vadd.f32 %v4273_v4, %v3945_v49  ;;  %v3618_v18 = vpop.f32.mrf.mxu0  ;;  %v6975_v4 = vld [vmem:[%s9183_s30 + $0x444] sm:$0xf0] }
 0x149   : > { %v3619_v22 = vadd.f32 %v9313_v8, %v3618_v18  ;;  %v6974_v18 = vor.u32 %v8649_v52, %v6973_v51 }
 0x14a   : > { %11142 = vst [vmem:[#allocation13_spill] sm:$0xff] %v9508_v14  ;;  %v3947_v26 = vpop.f32.mrf.mxu1 }
 0x14b   : > { %v3948_v29 = vadd.f32 %v3947_v26, %v3619_v22  ;;  %3657 = vmatmul.bf16.gmra.mxu0 %v6946_v7  ;;  %4146 = vmatmul.bf16.gmra.mxu3 %v7846_v12  ;;  %v6982_v26 = vor.u32 %v8650_v63, %v6981_v62  ;;  %v7001_v63 = vld [vmem:[%s9183_s30 + $0x460] sm:$0xf] }
 0x14c   : > { %4315 = vmatmul.bf16.gmra.mxu2 %v6954_v23  ;;  %v7874_v23 = vor.u32 %v8870_v55, %v7871_v61 }
 0x14d   : > { %3986 = vmatmul.bf16.gmra.mxu1 %v6950_v16 }
 0x14e   : > { %v9511_v31 = vpop.f32.mrf.mxu3 }
 0x14f   : > { %v4276_v33 = vpop.f32.mrf.mxu2 }
 0x150   : > { %v9513_v44 = vadd.f32 %v4276_v33, %v3948_v29  ;;  %v3620_v47 = vpop.f32.mrf.mxu0  ;;  %v6978_v29 = vor.u32 %v8646_v2, %v6975_v4  ;;  %v8656_v2 = vld [vmem:[%s9183_s30 + $0x478] sm:$0xf0]  ;;  %v8877_v4 = vld [vmem:[%s9183_s30 + $0xb64] sm:$0xf] }
 0x151   : > { %v3621_v48 = vadd.f32 %v9313_v8, %v3620_v47 }
 0x152   : > { %11143 = vst [vmem:[#allocation14_spill] sm:$0xff] %v9513_v44  ;;  %v3949_v49 = vpop.f32.mrf.mxu1 }
 0x153   : > { %v3950_v50 = vadd.f32 %v3949_v49, %v3621_v48 }
 0x156   : > { %v9524_v7 = vpop.f32.mrf.mxu3 }
 0x157   : > { %v4278_v12 = vpop.f32.mrf.mxu2 }
 0x158   : > { %v9526_v16 = vadd.f32 %v4278_v12, %v3950_v50  ;;  %v3623_v22 = vpop.f32.mrf.mxu0  ;;  %v7899_v12 = vld [vmem:[%s9183_s30 + $0xb7c] sm:$0xf0] }
 0x159   : > { %v3624_v33 = vadd.f32 %v9313_v8, %v3623_v22  ;;  %v8653_v22 = vld [vmem:[%s9183_s30 + $0x464] sm:$0xf] }
 0x15a   : > { %11144 = vst [vmem:[#allocation15_spill] sm:$0xff] %v9526_v16  ;;  %v3952_v47 = vpop.f32.mrf.mxu1  ;;  %v7902_v16 = vor.u32 %v8877_v4, %v7899_v12 }
 0x15b   : > { %v3953_v48 = vadd.f32 %v3952_v47, %v3624_v33  ;;  %3662 = vmatmul.bf16.gmra.mxu0 %v6974_v18  ;;  %4151 = vmatmul.bf16.gmra.mxu3 %v7874_v23  ;;  %v7009_v18 = vld [vmem:[%s9183_s30 + $0x468] sm:$0xf]  ;;  %v8657_v23 = vld [vmem:[%s9183_s30 + $0x480] sm:$0xf0]  ;;  %v7002_v47 = vor.u32 %v8656_v2, %v7001_v63 }
 0x15c   : > { %4320 = vmatmul.bf16.gmra.mxu2 %v6982_v26  ;;  %v7003_v26 = vld [vmem:[%s9183_s30 + $0x47c] sm:$0xf0] }
 0x15d   : > { %3991 = vmatmul.bf16.gmra.mxu1 %v6978_v29 }
 0x15e   : > { %v9529_v49 = vpop.f32.mrf.mxu3 }
 0x15f   : > { %v4281_v50 = vpop.f32.mrf.mxu2 }
 0x160   : > { %v9531_v51 = vadd.f32 %v4281_v50, %v3953_v48  ;;  %v3625_v52 = vpop.f32.mrf.mxu0 }
 0x161   : > { %v3626_v55 = vadd.f32 %v9313_v8, %v3625_v52  ;;  %v7006_v52 = vor.u32 %v8653_v22, %v7003_v26  ;;  %v7029_v22 = vld [vmem:[%s9183_s30 + $0x498] sm:$0xf]  ;;  %v8663_v26 = vld [vmem:[%s9183_s30 + $0x4b0] sm:$0xf0] }
 0x162   : > { %11145 = vst [vmem:[#allocation16_spill] sm:$0xff] %v9531_v51  ;;  %v3954_v61 = vpop.f32.mrf.mxu1  ;;  %v7010_v51 = vor.u32 %v8657_v23, %v7009_v18 }
 0x163   : > { %v3955_v62 = vadd.f32 %v3954_v61, %v3626_v55 }
 0x166   : > { %v9542_v33 = vpop.f32.mrf.mxu3 }
 0x167   : > { %v4283_v29 = vpop.f32.mrf.mxu2 }
 0x168   : > { %v9544_v48 = vadd.f32 %v4283_v29, %v3955_v62  ;;  %v3628_v50 = vpop.f32.mrf.mxu0  ;;  %v8884_v29 = vld [vmem:[%s9183_s30 + $0xb9c] sm:$0xf] }
 0x169   : > { %v3629_v55 = vadd.f32 %v9313_v8, %v3628_v50  ;;  %v7037_v50 = vld [vmem:[%s9183_s30 + $0x4a0] sm:$0xf] }
 0x16a   : > { %11146 = vst [vmem:[#allocation17_spill] sm:$0xff] %v9544_v48  ;;  %v3957_v61 = vpop.f32.mrf.mxu1  ;;  %v7030_v48 = vor.u32 %v8663_v26, %v7029_v22 }
 0x16b   : > { %v3958_v44 = vadd.f32 %v3957_v61, %v3629_v55  ;;  %3667 = vmatmul.bf16.gmra.mxu0 %v7002_v47  ;;  %4156 = vmatmul.bf16.gmra.mxu3 %v7902_v16  ;;  %v7927_v47 = vld [vmem:[%s9183_s30 + $0xbb4] sm:$0xf0]  ;;  %v8664_v16 = vld [vmem:[%s9183_s30 + $0x4b8] sm:$0xf0] }
 0x16c   : > { %4325 = vmatmul.bf16.gmra.mxu2 %v7010_v51  ;;  %v8660_v55 = vld [vmem:[%s9183_s30 + $0x49c] sm:$0xf]  ;;  %v7031_v51 = vld [vmem:[%s9183_s30 + $0x4b4] sm:$0xf0]  ;;  %v7930_v14 = vor.u32 %v8884_v29, %v7927_v47 }
 0x16d   : > { %3996 = vmatmul.bf16.gmra.mxu1 %v7006_v52 }
 0x16e   : > { %v9547_v62 = vpop.f32.mrf.mxu3 }
 0x16f   : > { %v4286_v63 = vpop.f32.mrf.mxu2 }
 0x170   : > { %v9549_v2 = vadd.f32 %v4286_v63, %v3958_v44  ;;  %v3630_v4 = vpop.f32.mrf.mxu0 }
 0x171   : > { %v3631_v12 = vadd.f32 %v9313_v8, %v3630_v4  ;;  %v7034_v4 = vor.u32 %v8660_v55, %v7031_v51  ;;  %v7057_v55 = vld [vmem:[%s9183_s30 + $0x4d0] sm:$0xf]  ;;  %v8670_v51 = vld [vmem:[%s9183_s30 + $0x4e8] sm:$0xf0] }
 0x172   : > { %11147 = vst [vmem:[#allocation18_spill] sm:$0xff] %v9549_v2  ;;  %v3959_v18 = vpop.f32.mrf.mxu1  ;;  %v7038_v2 = vor.u32 %v8664_v16, %v7037_v50 }
 0x173   : > { %v3960_v23 = vadd.f32 %v3959_v18, %v3631_v12 }
 0x176   : > { %v9560_v61 = vpop.f32.mrf.mxu3 }
 0x177   : > { %v4288_v52 = vpop.f32.mrf.mxu2 }
 0x178   : > { %v9562_v44 = vadd.f32 %v4288_v52, %v3960_v23  ;;  %v3633_v63 = vpop.f32.mrf.mxu0  ;;  %v8891_v52 = vld [vmem:[%s9183_s30 + $0xbd4] sm:$0xf] }
 0x179   : > { %v3634_v12 = vadd.f32 %v9313_v8, %v3633_v63  ;;  %v7065_v63 = vld [vmem:[%s9183_s30 + $0x4d8] sm:$0xf] }
 0x17a   : > { %11148 = vst [vmem:[#allocation19_spill] sm:$0xff] %v9562_v44  ;;  %v3962_v18 = vpop.f32.mrf.mxu1  ;;  %v7058_v44 = vor.u32 %v8670_v51, %v7057_v55 }
 0x17b   : > { %v3963_v35 = vadd.f32 %v3962_v18, %v3634_v12  ;;  %3672 = vmatmul.bf16.gmra.mxu0 %v7030_v48  ;;  %4161 = vmatmul.bf16.gmra.mxu3 %v7930_v14  ;;  %v7955_v48 = vld [vmem:[%s9183_s30 + $0xbec] sm:$0xf0]  ;;  %v8671_v14 = vld [vmem:[%s9183_s30 + $0x4f0] sm:$0xf0] }
 0x17c   : > { %4330 = vmatmul.bf16.gmra.mxu2 %v7038_v2  ;;  %v8667_v12 = vld [vmem:[%s9183_s30 + $0x4d4] sm:$0xf]  ;;  %v7059_v2 = vld [vmem:[%s9183_s30 + $0x4ec] sm:$0xf0]  ;;  %v7958_v21 = vor.u32 %v8891_v52, %v7955_v48 }
 0x17d   : > { %4001 = vmatmul.bf16.gmra.mxu1 %v7034_v4 }
 0x17e   : > { %v9565_v23 = vpop.f32.mrf.mxu3 }
 0x17f   : > { %v4291_v22 = vpop.f32.mrf.mxu2 }
 0x180   : > { %v9567_v26 = vadd.f32 %v4291_v22, %v3963_v35  ;;  %v3635_v29 = vpop.f32.mrf.mxu0 }
 0x181   : > { %v3636_v47 = vadd.f32 %v9313_v8, %v3635_v29  ;;  %v7062_v29 = vor.u32 %v8667_v12, %v7059_v2  ;;  %v8996_v12 = vld [vmem:[%s11128_s1 + $0x118] sm:$0xff]  ;;  %v8898_v2 = vld [vmem:[%s9183_s30 + $0xc0c] sm:$0xf] }
 0x182   : > { %11149 = vst [vmem:[#allocation20_spill] sm:$0xff] %v9567_v26  ;;  %v3964_v50 = vpop.f32.mrf.mxu1  ;;  %v7066_v26 = vor.u32 %v8671_v14, %v7065_v63  ;;  %v8677_v14 = vld [vmem:[%s9183_s30 + $0x520] sm:$0xf0]  ;;  %4879 = vmatpush.bf16.msrb.mxu0 %v8996_v12 }
 0x183   : > { %v3965_v16 = vadd.f32 %v3964_v50, %v3636_v47 }
 0x186   : > { %v9578_v18 = vpop.f32.mrf.mxu3 }
 0x187   : > { %v4293_v4 = vpop.f32.mrf.mxu2 }
 0x188   : > { %v9580_v35 = vadd.f32 %v4293_v4, %v3965_v16  ;;  %v3638_v22 = vpop.f32.mrf.mxu0  ;;  %v7983_v4 = vld [vmem:[%s9183_s30 + $0xc24] sm:$0xf0] }
 0x189   : > { %v3639_v47 = vadd.f32 %v9313_v8, %v3638_v22  ;;  %v7093_v22 = vld [vmem:[%s9183_s30 + $0x510] sm:$0xf] }
 0x18a   : > { %11150 = vst [vmem:[#allocation21_spill] sm:$0xff] %v9580_v35  ;;  %v3967_v50 = vpop.f32.mrf.mxu1 }
 0x18b   : > { %v3968_v45 = vadd.f32 %v3967_v50, %v3639_v47  ;;  %3677 = vmatmul.bf16.gmra.mxu0 %v7058_v44  ;;  %4166 = vmatmul.bf16.gmra.mxu3 %v7958_v21  ;;  %v9011_v21 = vld [vmem:[%s11128_s1 + $0x190] sm:$0xff]  ;;  %v7085_v44 = vld [vmem:[%s9183_s30 + $0x508] sm:$0xf]  ;;  %v8674_v47 = vld [vmem:[%s9183_s30 + $0x50c] sm:$0xf] }
 0x18c   : > { %4335 = vmatmul.bf16.gmra.mxu2 %v7066_v26  ;;  %v7087_v50 = vld [vmem:[%s9183_s30 + $0x524] sm:$0xf0] }
 0x18d   : > { %4006 = vmatmul.bf16.gmra.mxu1 %v7062_v29  ;;  %5538 = vmatpush.bf16.msrb.mxu2 %v9011_v21  ;;  %v8678_v29 = vld [vmem:[%s9183_s30 + $0x528] sm:$0xf0]  ;;  %v7090_v25 = vor.u32 %v8674_v47, %v7087_v50  ;;  %v8685_v47 = vld [vmem:[%s9183_s30 + $0x560] sm:$0xf0] }
 0x18e   : > { %v9583_v55 = vpop.f32.mrf.mxu3  ;;  %v7094_v35 = vor.u32 %v8678_v29, %v7093_v22  ;;  %v8011_v22 = vld [vmem:[%s9183_s30 + $0xc5c] sm:$0xf0]  ;;  %v7121_v29 = vld [vmem:[%s9183_s30 + $0x548] sm:$0xf]  ;;  %v8681_v50 = vld [vmem:[%s9183_s30 + $0x544] sm:$0xf] }
 0x18f   : > { %v4296_v16 = vpop.f32.mrf.mxu2 }
 0x190   : > { %v9585_v51 = vadd.f32 %v4296_v16, %v3968_v45  ;;  %v3640_v52 = vpop.f32.mrf.mxu0  ;;  %v9004_v45 = vld [vmem:[%s11128_s1 + $0x158] sm:$0xff] }
 0x191   : > { %v3641_v48 = vadd.f32 %v9313_v8, %v3640_v52  ;;  %5208 = vmatpush.bf16.msrb.mxu1 %v9004_v45 }
 0x192   : > { %11151 = vst [vmem:[#allocation22_spill] sm:$0xff] %v9585_v51  ;;  %v3969_v63 = vpop.f32.mrf.mxu1 }
 0x193   : > { %v3970_v26 = vadd.f32 %v3969_v63, %v3641_v48  ;;  %v7086_v48 = vor.u32 %v8677_v14, %v7085_v44  ;;  %v7986_v63 = vor.u32 %v8898_v2, %v7983_v4  ;;  %v7113_v4 = vld [vmem:[%s9183_s30 + $0x540] sm:$0xf] }
 0x196   : > { %v9605_v16 = vpop.f32.mrf.mxu3 }
 0x197   : > { %v4298_v52 = vpop.f32.mrf.mxu2 }
 0x198   : > { %v9607_v21 = vadd.f32 %v4298_v52, %v3970_v26  ;;  %v3643_v51 = vpop.f32.mrf.mxu0 }
 0x199   : > { %v3644_v57 = vadd.f32 %v9313_v8, %v3643_v51 }
 0x19a   : > { %11152 = vst [vmem:[#allocation23_spill] sm:$0xff] %v9607_v21  ;;  %v3972_v46 = vpop.f32.mrf.mxu1 }
 0x19b   : > { %v3973_v15 = vadd.f32 %v3972_v46, %v3644_v57  ;;  %3682 = vmatmul.bf16.gmra.mxu0 %v7086_v48  ;;  %4171 = vmatmul.bf16.gmra.mxu3 %v7986_v63  ;;  %v8684_v46 = vld [vmem:[%s9183_s30 + $0x558] sm:$0xf0]  ;;  %v8905_v57 = vld [vmem:[%s9183_s30 + $0xc44] sm:$0xf] }
 0x19c   : > { %4340 = vmatmul.bf16.gmra.mxu2 %v7094_v35  ;;  %v7115_v35 = vld [vmem:[%s9183_s30 + $0x55c] sm:$0xf0]  ;;  %v7114_v48 = vor.u32 %v8684_v46, %v7113_v4  ;;  %v8014_v63 = vor.u32 %v8905_v57, %v8011_v22 }
 0x19d   : > { %4011 = vmatmul.bf16.gmra.mxu1 %v7090_v25 }
 0x19e   : > { %v9610_v44 = vpop.f32.mrf.mxu3 }
 0x19f   : > { %v4301_v26 = vpop.f32.mrf.mxu2 }
 0x1a0   : > { %v9612_v14 = vadd.f32 %v4301_v26, %v3973_v15  ;;  %v3645_v12 = vpop.f32.mrf.mxu0 }
 0x1a1   : > { %v3646_v51 = vadd.f32 %v9313_v8, %v3645_v12  ;;  %v7118_v12 = vor.u32 %v8681_v50, %v7115_v35 }
 0x1a2   : > { %11153 = vst [vmem:[#allocation24_spill] sm:$0xff] %v9612_v14  ;;  %v3974_v45 = vpop.f32.mrf.mxu1  ;;  %v7122_v14 = vor.u32 %v8685_v47, %v7121_v29  ;;  %v9637_v47 = vld [vmem:[%s11129_s2] ss:$0 sm:$0xff] }
 0x1a3   : > { %v3975_v2 = vadd.f32 %v3974_v45, %v3646_v51 }
 0x1a6   : > { %v9623_v52 = vpop.f32.mrf.mxu3 }
 0x1a7   : > { %v4303_v25 = vpop.f32.mrf.mxu2 }
 0x1a8   : > { %v9625_v15 = vadd.f32 %v4303_v25, %v3975_v2  ;;  %v3648_v26 = vpop.f32.mrf.mxu0  ;;  %v3809_v2 = vadd.f32 %v9313_v8, %v9316_v17  ;;  %v8691_v17 = vld [vmem:[%s9183_s30 + $0x590] sm:$0xf0]  ;;  %v8912_v25 = vld [vmem:[%s9183_s30 + $0xc7c] sm:$0xf] }
 0x1a9   : > { %v3649_v51 = vadd.f32 %v9313_v8, %v3648_v26  ;;  %v7141_v8 = vld [vmem:[%s9183_s30 + $0x578] sm:$0xf]  ;;  %v3811_v26 = vadd.f32 %v9637_v47, %v9329_v30 }
 0x1aa   : > { %11154 = vst [vmem:[#allocation25_spill] sm:$0xff] %v9625_v15  ;;  %v3977_v45 = vpop.f32.mrf.mxu1 }
 0x1ab   : > { %v3978_v21 = vadd.f32 %v3977_v45, %v3649_v51  ;;  %3687 = vmatmul.bf16.gmra.mxu0 %v7114_v48  ;;  %4176 = vmatmul.bf16.gmra.mxu3 %v8014_v63  ;;  %v8039_v48 = vld [vmem:[%s9183_s30 + $0xc94] sm:$0xf0]  ;;  %v7149_v63 = vld [vmem:[%s9183_s30 + $0x580] sm:$0xf] }
 0x1ac   : > { %4345 = vmatmul.bf16.gmra.mxu2 %v7122_v14  ;;  %v7143_v51 = vld [vmem:[%s9183_s30 + $0x594] sm:$0xf0] }
 0x1ad   : > { %4016 = vmatmul.bf16.gmra.mxu1 %v7118_v12  ;;  %v8688_v12 = vld [vmem:[%s9183_s30 + $0x57c] sm:$0xf] }
 0x1ae   : > { %v4137_v4 = vpop.f32.mrf.mxu3  ;;  %v7146_v15 = vor.u32 %v8688_v12, %v7143_v51  ;;  %v8067_v12 = vld [vmem:[%s9183_s30 + $0xccc] sm:$0xf0]  ;;  %v7177_v51 = vld [vmem:[%s9183_s30 + $0x5b8] sm:$0xf] }
 0x1af   : > { %v9630_v46 = vadd.f32 %v4137_v4, %v3809_v2  ;;  %v4306_v57 = vpop.f32.mrf.mxu2 }
 0x1b0   : > { %v9632_v22 = vadd.f32 %v4306_v57, %v3978_v21  ;;  %v3650_v29 = vpop.f32.mrf.mxu0  ;;  %v8692_v21 = vld [vmem:[%s9183_s30 + $0x598] sm:$0xf0]  ;;  %v7142_v57 = vor.u32 %v8691_v17, %v7141_v8 }
 0x1b1   : > { %v3651_v14 = vadd.f32 %v9637_v47, %v3650_v29 }
 0x1b2   : > { %11155 = vst [vmem:[#allocation26_spill] sm:$0xff] %v9632_v22  ;;  %v3979_v50 = vpop.f32.mrf.mxu1  ;;  %v8042_v22 = vor.u32 %v8912_v25, %v8039_v48 }
 0x1b3   : > { %v3980_v35 = vadd.f32 %v3979_v50, %v3651_v14  ;;  %v7150_v50 = vor.u32 %v8692_v21, %v7149_v63  ;;  %v8698_v21 = vld [vmem:[%s9183_s30 + $0x5c8] sm:$0xf0] }
 0x1b6   : > { %v4139_v45 = vpop.f32.mrf.mxu3 }
 0x1b7   : > { %v9650_v2 = vadd.f32 %v4139_v45, %v3811_v26  ;;  %v4308_v4 = vpop.f32.mrf.mxu2  ;;  %v7169_v26 = vld [vmem:[%s9183_s30 + $0x5b0] sm:$0xf]  ;;  %v8699_v45 = vld [vmem:[%s9183_s30 + $0x5d0] sm:$0xf0] }
 0x1b8   : > { %v9652_v29 = vadd.f32 %v4308_v4, %v3980_v35  ;;  %v3653_v14 = vpop.f32.mrf.mxu0  ;;  %v3814_v35 = vadd.f32 %v9637_v47, %v9334_v41  ;;  %v3816_v41 = vadd.f32 %v9637_v47, %v9347_v56  ;;  %v8695_v4 = vld [vmem:[%s9183_s30 + $0x5b4] sm:$0xf] }
 0x1b9   : > { %v3654_v0 = vadd.f32 %v9637_v47, %v3653_v14 }
 0x1ba   : > { %11156 = vst [vmem:[#allocation27_spill] sm:$0xff] %v9652_v29  ;;  %v3982_v42 = vpop.f32.mrf.mxu1 }
 0x1bb   : > { %v3983_v30 = vadd.f32 %v3982_v42, %v3654_v0  ;;  %3692 = vmatmul.bf16.gmra.mxu0 %v7142_v57  ;;  %4181 = vmatmul.bf16.gmra.mxu3 %v8042_v22  ;;  %v7171_v57 = vld [vmem:[%s9183_s30 + $0x5cc] sm:$0xf0] }
 0x1bc   : > { %4350 = vmatmul.bf16.gmra.mxu2 %v7150_v50 }
 0x1bd   : > { %4021 = vmatmul.bf16.gmra.mxu1 %v7146_v15  ;;  %v8919_v15 = vld [vmem:[%s9183_s30 + $0xcb4] sm:$0xf] }
 0x1be   : > { %v4142_v8 = vpop.f32.mrf.mxu3 }
 0x1bf   : > { %v9657_v17 = vadd.f32 %v4142_v8, %v3814_v35  ;;  %v4311_v25 = vpop.f32.mrf.mxu2  ;;  %v7170_v35 = vor.u32 %v8698_v21, %v7169_v26  ;;  %v8070_v8 = vor.u32 %v8919_v15, %v8067_v12 }
 0x1c0   : > { %v9659_v48 = vadd.f32 %v4311_v25, %v3983_v30  ;;  %v3655_v42 = vpop.f32.mrf.mxu0 }
 0x1c1   : > { %v3656_v0 = vadd.f32 %v9637_v47, %v3655_v42 }
 0x1c2   : > { %11157 = vst [vmem:[#allocation28_spill] sm:$0xff] %v9659_v48  ;;  %v3984_v63 = vpop.f32.mrf.mxu1 }
 0x1c3   : > { %v3985_v22 = vadd.f32 %v3984_v63, %v3656_v0  ;;  %v7178_v0 = vor.u32 %v8699_v45, %v7177_v51  ;;  %v7174_v63 = vor.u32 %v8695_v4, %v7171_v57  ;;  %v7197_v45 = vld [vmem:[%s9183_s30 + $0x5e8] sm:$0xf]  ;;  %v8705_v4 = vld [vmem:[%s9183_s30 + $0x600] sm:$0xf0]  ;;  %v8926_v57 = vld [vmem:[%s9183_s30 + $0xcec] sm:$0xf] }
 0x1c6   : > { %v4144_v14 = vpop.f32.mrf.mxu3 }
 0x1c7   : > { %v9672_v50 = vadd.f32 %v4144_v14, %v3816_v41  ;;  %v4313_v30 = vpop.f32.mrf.mxu2  ;;  %v8095_v14 = vld [vmem:[%s9183_s30 + $0xd04] sm:$0xf0] }
 0x1c8   : > { %v9674_v25 = vadd.f32 %v4313_v30, %v3985_v22  ;;  %v3658_v42 = vpop.f32.mrf.mxu0  ;;  %v3819_v22 = vadd.f32 %v9637_v47, %v9352_v5  ;;  %v7205_v30 = vld [vmem:[%s9183_s30 + $0x5f0] sm:$0xf]  ;;  %v3821_v5 = vadd.f32 %v9637_v47, %v9371_v24 }
 0x1c9   : > { %v3659_v48 = vadd.f32 %v9637_v47, %v3658_v42  ;;  %v7199_v42 = vld [vmem:[%s9183_s30 + $0x604] sm:$0xf0] }
 0x1ca   : > { %11158 = vst [vmem:[#allocation29_spill] sm:$0xff] %v9674_v25  ;;  %v3987_v29 = vpop.f32.mrf.mxu1 }
 0x1cb   : > { %v3988_v56 = vadd.f32 %v3987_v29, %v3659_v48  ;;  %3697 = vmatmul.bf16.gmra.mxu0 %v7170_v35  ;;  %4186 = vmatmul.bf16.gmra.mxu3 %v8070_v8  ;;  %v8706_v35 = vld [vmem:[%s9183_s30 + $0x608] sm:$0xf0] }
 0x1cc   : > { %4355 = vmatmul.bf16.gmra.mxu2 %v7178_v0  ;;  %v8702_v8 = vld [vmem:[%s9183_s30 + $0x5ec] sm:$0xf] }
 0x1cd   : > { %4026 = vmatmul.bf16.gmra.mxu1 %v7174_v63 }
 0x1ce   : > { %v4147_v26 = vpop.f32.mrf.mxu3 }
 0x1cf   : > { %v9679_v21 = vadd.f32 %v4147_v26, %v3819_v22  ;;  %v4316_v15 = vpop.f32.mrf.mxu2  ;;  %v7198_v22 = vor.u32 %v8705_v4, %v7197_v45  ;;  %v8098_v26 = vor.u32 %v8926_v57, %v8095_v14 }
 0x1d0   : > { %v9681_v12 = vadd.f32 %v4316_v15, %v3988_v56  ;;  %v3660_v29 = vpop.f32.mrf.mxu0 }
 0x1d1   : > { %v3661_v48 = vadd.f32 %v9637_v47, %v3660_v29 }
 0x1d2   : > { %11159 = vst [vmem:[#allocation30_spill] sm:$0xff] %v9681_v12  ;;  %v3989_v51 = vpop.f32.mrf.mxu1 }
 0x1d3   : > { %v3990_v41 = vadd.f32 %v3989_v51, %v3661_v48  ;;  %v7206_v48 = vor.u32 %v8706_v35, %v7205_v30  ;;  %v7202_v51 = vor.u32 %v8702_v8, %v7199_v42  ;;  %v7225_v35 = vld [vmem:[%s9183_s30 + $0x620] sm:$0xf]  ;;  %v8712_v8 = vld [vmem:[%s9183_s30 + $0x638] sm:$0xf0]  ;;  %v8933_v42 = vld [vmem:[%s9183_s30 + $0xd24] sm:$0xf] }
 0x1d6   : > { %v4149_v0 = vpop.f32.mrf.mxu3 }
 0x1d7   : > { %v9694_v63 = vadd.f32 %v4149_v0, %v3821_v5  ;;  %v4318_v56 = vpop.f32.mrf.mxu2  ;;  %v8123_v0 = vld [vmem:[%s9183_s30 + $0xd3c] sm:$0xf0] }
 0x1d8   : > { %v9696_v15 = vadd.f32 %v4318_v56, %v3990_v41  ;;  %v3663_v29 = vpop.f32.mrf.mxu0  ;;  %v3824_v41 = vadd.f32 %v9637_v47, %v9376_v36  ;;  %v7233_v56 = vld [vmem:[%s9183_s30 + $0x628] sm:$0xf]  ;;  %v3826_v36 = vadd.f32 %v9637_v47, %v9389_v53 }
 0x1d9   : > { %v3664_v12 = vadd.f32 %v9637_v47, %v3663_v29  ;;  %v7227_v29 = vld [vmem:[%s9183_s30 + $0x63c] sm:$0xf0] }
 0x1da   : > { %11160 = vst [vmem:[#allocation31_spill] sm:$0xff] %v9696_v15  ;;  %v3992_v25 = vpop.f32.mrf.mxu1 }
 0x1db   : > { %v3993_v24 = vadd.f32 %v3992_v25, %v3664_v12  ;;  %3702 = vmatmul.bf16.gmra.mxu0 %v7198_v22  ;;  %4191 = vmatmul.bf16.gmra.mxu3 %v8098_v26  ;;  %v8713_v22 = vld [vmem:[%s9183_s30 + $0x640] sm:$0xf0] }
 0x1dc   : > { %4360 = vmatmul.bf16.gmra.mxu2 %v7206_v48  ;;  %v8709_v26 = vld [vmem:[%s9183_s30 + $0x624] sm:$0xf] }
 0x1dd   : > { %4031 = vmatmul.bf16.gmra.mxu1 %v7202_v51 }
 0x1de   : > { %v4152_v45 = vpop.f32.mrf.mxu3 }
 0x1df   : > { %v9701_v4 = vadd.f32 %v4152_v45, %v3824_v41  ;;  %v4321_v57 = vpop.f32.mrf.mxu2  ;;  %v7226_v41 = vor.u32 %v8712_v8, %v7225_v35  ;;  %v8126_v45 = vor.u32 %v8933_v42, %v8123_v0 }
 0x1e0   : > { %v9703_v14 = vadd.f32 %v4321_v57, %v3993_v24  ;;  %v3665_v25 = vpop.f32.mrf.mxu0 }
 0x1e1   : > { %v3666_v12 = vadd.f32 %v9637_v47, %v3665_v25 }
 0x1e2   : > { %11161 = vst [vmem:[#allocation32_spill] sm:$0xff] %v9703_v14  ;;  %v3994_v30 = vpop.f32.mrf.mxu1 }
 0x1e3   : > { %v3995_v5 = vadd.f32 %v3994_v30, %v3666_v12  ;;  %v7234_v12 = vor.u32 %v8713_v22, %v7233_v56  ;;  %v7230_v30 = vor.u32 %v8709_v26, %v7227_v29  ;;  %v8719_v26 = vld [vmem:[%s9183_s30 + $0x670] sm:$0xf0] }
 0x1e4   : > { %v9003_v29 = vld [vmem:[%s11128_s1 + $0x150] sm:$0xff] }
 0x1e5   : > { %5209 = vmatpush.bf16.msrb.mxu1 %v9003_v29 }
 0x1e6   : > { %v4154_v48 = vpop.f32.mrf.mxu3 }
 0x1e7   : > { %v9716_v51 = vadd.f32 %v4154_v48, %v3826_v36  ;;  %v4323_v24 = vpop.f32.mrf.mxu2  ;;  %v7253_v36 = vld [vmem:[%s9183_s30 + $0x658] sm:$0xf]  ;;  %v8940_v48 = vld [vmem:[%s9183_s30 + $0xd5c] sm:$0xf] }
 0x1e8   : > { %v9718_v57 = vadd.f32 %v4323_v24, %v3995_v5  ;;  %v3668_v25 = vpop.f32.mrf.mxu0  ;;  %v3829_v5 = vadd.f32 %v9637_v47, %v9394_v3  ;;  %v8995_v3 = vld [vmem:[%s11128_s1 + $0x110] sm:$0xff]  ;;  %v8151_v24 = vld [vmem:[%s9183_s30 + $0xd74] sm:$0xf0] }
 0x1e9   : > { %v3669_v14 = vadd.f32 %v9637_v47, %v3668_v25  ;;  %v8720_v25 = vld [vmem:[%s9183_s30 + $0x678] sm:$0xf0]  ;;  %4880 = vmatpush.bf16.msrb.mxu0 %v8995_v3 }
 0x1ea   : > { %11162 = vst [vmem:[#allocation33_spill] sm:$0xff] %v9718_v57  ;;  %v3997_v15 = vpop.f32.mrf.mxu1 }
 0x1eb   : > { %v3998_v53 = vadd.f32 %v3997_v15, %v3669_v14  ;;  %3707 = vmatmul.bf16.gmra.mxu0 %v7226_v41  ;;  %4196 = vmatmul.bf16.gmra.mxu3 %v8126_v45  ;;  %v7261_v41 = vld [vmem:[%s9183_s30 + $0x660] sm:$0xf]  ;;  %v3831_v45 = vadd.f32 %v9637_v47, %v9407_v19 }
 0x1ec   : > { %4365 = vmatmul.bf16.gmra.mxu2 %v7234_v12  ;;  %v8716_v12 = vld [vmem:[%s9183_s30 + $0x65c] sm:$0xf] }
 0x1ed   : > { %4036 = vmatmul.bf16.gmra.mxu1 %v7230_v30  ;;  %v7255_v30 = vld [vmem:[%s9183_s30 + $0x674] sm:$0xf0] }
 0x1ee   : > { %v4157_v35 = vpop.f32.mrf.mxu3  ;;  %v7258_v57 = vor.u32 %v8716_v12, %v7255_v30  ;;  %v7289_v12 = vld [vmem:[%s9183_s30 + $0x698] sm:$0xf]  ;;  %v8727_v30 = vld [vmem:[%s9183_s30 + $0x6b0] sm:$0xf0] }
 0x1ef   : > { %v9723_v8 = vadd.f32 %v4157_v35, %v3829_v5  ;;  %v4326_v42 = vpop.f32.mrf.mxu2 }
 0x1f0   : > { %v9725_v0 = vadd.f32 %v4326_v42, %v3998_v53  ;;  %v3670_v15 = vpop.f32.mrf.mxu0  ;;  %v7254_v42 = vor.u32 %v8719_v26, %v7253_v36  ;;  %v3834_v36 = vadd.f32 %v9637_v47, %v9412_v39  ;;  %v3836_v39 = vadd.f32 %v9637_v47, %v9425_v59  ;;  %v8992_v59 = vld [vmem:[%s11128_s1 + $0xf8] sm:$0xff] }
 0x1f1   : > { %v3671_v14 = vadd.f32 %v9637_v47, %v3670_v15  ;;  %v8154_v15 = vor.u32 %v8940_v48, %v8151_v24  ;;  %4546 = vmatpush.bf16.msrb.mxu3 %v8992_v59 }
 0x1f2   : > { %11163 = vst [vmem:[#allocation34_spill] sm:$0xff] %v9725_v0  ;;  %v3999_v56 = vpop.f32.mrf.mxu1  ;;  %v7262_v0 = vor.u32 %v8720_v25, %v7261_v41  ;;  %v8179_v25 = vld [vmem:[%s9183_s30 + $0xdac] sm:$0xf0] }
 0x1f3   : > { %v4000_v22 = vadd.f32 %v3999_v56, %v3671_v14 }
 0x1f6   : > { %v4159_v53 = vpop.f32.mrf.mxu3 }
 0x1f7   : > { %v9744_v5 = vadd.f32 %v4159_v53, %v3831_v45  ;;  %v4328_v35 = vpop.f32.mrf.mxu2  ;;  %v7281_v45 = vld [vmem:[%s9183_s30 + $0x690] sm:$0xf]  ;;  %v8723_v53 = vld [vmem:[%s9183_s30 + $0x694] sm:$0xf] }
 0x1f8   : > { %v9746_v14 = vadd.f32 %v4328_v35, %v4000_v22  ;;  %v3673_v56 = vpop.f32.mrf.mxu0  ;;  %v7283_v35 = vld [vmem:[%s9183_s30 + $0x6ac] sm:$0xf0] }
 0x1f9   : > { %v3674_v28 = vadd.f32 %v9637_v47, %v3673_v56 }
 0x1fa   : > { %11164 = vst [vmem:[#allocation35_spill] sm:$0xff] %v9746_v14  ;;  %v4002_v19 = vpop.f32.mrf.mxu1 }
 0x1fb   : > { %v4003_v9 = vadd.f32 %v4002_v19, %v3674_v28  ;;  %3712 = vmatmul.bf16.gmra.mxu0 %v7254_v42  ;;  %4201 = vmatmul.bf16.gmra.mxu3 %v8154_v15 }
 0x1fc   : > { %4370 = vmatmul.bf16.gmra.mxu2 %v7262_v0  ;;  %v8726_v0 = vld [vmem:[%s9183_s30 + $0x6a8] sm:$0xf0] }
 0x1fd   : > { %4041 = vmatmul.bf16.gmra.mxu1 %v7258_v57  ;;  %v8947_v57 = vld [vmem:[%s9183_s30 + $0xd94] sm:$0xf]  ;;  %v7282_v56 = vor.u32 %v8726_v0, %v7281_v45 }
 0x1fe   : > { %v4162_v22 = vpop.f32.mrf.mxu3  ;;  %v8182_v19 = vor.u32 %v8947_v57, %v8179_v25 }
 0x1ff   : > { %v9751_v26 = vadd.f32 %v4162_v22, %v3834_v36  ;;  %v4331_v3 = vpop.f32.mrf.mxu2 }
 0x200   : > { %v9753_v29 = vadd.f32 %v4331_v3, %v4003_v9  ;;  %v3675_v28 = vpop.f32.mrf.mxu0  ;;  %v7290_v3 = vor.u32 %v8727_v30, %v7289_v12 }
 0x201   : > { %v3676_v48 = vadd.f32 %v9637_v47, %v3675_v28  ;;  %v7286_v28 = vor.u32 %v8723_v53, %v7283_v35  ;;  %v9010_v53 = vld [vmem:[%s11128_s1 + $0x188] sm:$0xff] }
 0x202   : > { %11165 = vst [vmem:[#allocation36_spill] sm:$0xff] %v9753_v29  ;;  %v4004_v24 = vpop.f32.mrf.mxu1  ;;  %v7309_v35 = vld [vmem:[%s9183_s30 + $0x6c8] sm:$0xf]  ;;  %5539 = vmatpush.bf16.msrb.mxu2 %v9010_v53 }
 0x203   : > { %v4005_v41 = vadd.f32 %v4004_v24, %v3676_v48 }
 0x206   : > { %v4164_v42 = vpop.f32.mrf.mxu3 }
 0x207   : > { %v9766_v15 = vadd.f32 %v4164_v42, %v3836_v39  ;;  %v4333_v9 = vpop.f32.mrf.mxu2  ;;  %v8733_v42 = vld [vmem:[%s9183_s30 + $0x6e0] sm:$0xf0] }
 0x208   : > { %v9768_v36 = vadd.f32 %v4333_v9, %v4005_v41  ;;  %v3678_v22 = vpop.f32.mrf.mxu0  ;;  %v3839_v41 = vadd.f32 %v9637_v47, %v9430_v10  ;;  %v8954_v9 = vld [vmem:[%s9183_s30 + $0xdcc] sm:$0xf] }
 0x209   : > { %v3679_v48 = vadd.f32 %v9637_v47, %v3678_v22  ;;  %v3841_v22 = vadd.f32 %v9637_v47, %v9446_v37 }
 0x20a   : > { %11166 = vst [vmem:[#allocation37_spill] sm:$0xff] %v9768_v36  ;;  %v4007_v24 = vpop.f32.mrf.mxu1 }
 0x20b   : > { %v4008_v29 = vadd.f32 %v4007_v24, %v3679_v48  ;;  %3717 = vmatmul.bf16.gmra.mxu0 %v7282_v56  ;;  %4206 = vmatmul.bf16.gmra.mxu3 %v8182_v19  ;;  %v8207_v56 = vld [vmem:[%s9183_s30 + $0xde4] sm:$0xf0]  ;;  %v7317_v19 = vld [vmem:[%s9183_s30 + $0x6d0] sm:$0xf] }
 0x20c   : > { %4375 = vmatmul.bf16.gmra.mxu2 %v7290_v3  ;;  %v8730_v3 = vld [vmem:[%s9183_s30 + $0x6cc] sm:$0xf] }
 0x20d   : > { %4046 = vmatmul.bf16.gmra.mxu1 %v7286_v28  ;;  %v7311_v28 = vld [vmem:[%s9183_s30 + $0x6e4] sm:$0xf0] }
 0x20e   : > { %v4167_v45 = vpop.f32.mrf.mxu3 }
 0x20f   : > { %v9776_v0 = vadd.f32 %v4167_v45, %v3839_v41  ;;  %v4336_v57 = vpop.f32.mrf.mxu2  ;;  %v7310_v41 = vor.u32 %v8733_v42, %v7309_v35  ;;  %v8210_v45 = vor.u32 %v8954_v9, %v8207_v56 }
 0x210   : > { %v9778_v25 = vadd.f32 %v4336_v57, %v4008_v29  ;;  %v3680_v12 = vpop.f32.mrf.mxu0  ;;  %v8734_v29 = vld [vmem:[%s9183_s30 + $0x6e8] sm:$0xf0] }
 0x211   : > { %v3681_v39 = vadd.f32 %v9637_v47, %v3680_v12 }
 0x212   : > { %11167 = vst [vmem:[#allocation38_spill] sm:$0xff] %v9778_v25  ;;  %v4009_v30 = vpop.f32.mrf.mxu1 }
 0x213   : > { %v4010_v10 = vadd.f32 %v4009_v30, %v3681_v39  ;;  %v7318_v39 = vor.u32 %v8734_v29, %v7317_v19  ;;  %v7314_v30 = vor.u32 %v8730_v3, %v7311_v28  ;;  %v7337_v3 = vld [vmem:[%s9183_s30 + $0x700] sm:$0xf]  ;;  %v8740_v28 = vld [vmem:[%s9183_s30 + $0x718] sm:$0xf0] }
 0x216   : > { %v4169_v48 = vpop.f32.mrf.mxu3 }
 0x217   : > { %v9794_v24 = vadd.f32 %v4169_v48, %v3841_v22  ;;  %v4338_v59 = vpop.f32.mrf.mxu2  ;;  %v7345_v48 = vld [vmem:[%s9183_s30 + $0x708] sm:$0xf] }
 0x218   : > { %v9796_v57 = vadd.f32 %v4338_v59, %v4010_v10  ;;  %v3683_v12 = vpop.f32.mrf.mxu0  ;;  %v3844_v10 = vadd.f32 %v9637_v47, %v9451_v54  ;;  %v7793_v59 = vld [vmem:[%s9183_s30 + $0xa88] sm:$0xf]  ;;  %v3846_v54 = vadd.f32 %v9637_v47, %v9464_v13  ;;  %v8991_v13 = vld [vmem:[%s11128_s1 + $0xf0] sm:$0xff] }
 0x219   : > { %v3684_v53 = vadd.f32 %v9637_v47, %v3683_v12  ;;  %v8737_v12 = vld [vmem:[%s9183_s30 + $0x704] sm:$0xf]  ;;  %4547 = vmatpush.bf16.msrb.mxu3 %v8991_v13 }
 0x21a   : > { %11168 = vst [vmem:[#allocation39_spill] sm:$0xff] %v9796_v57  ;;  %v4012_v25 = vpop.f32.mrf.mxu1 }
 0x21b   : > { %v4013_v37 = vadd.f32 %v4012_v25, %v3684_v53  ;;  %3722 = vmatmul.bf16.gmra.mxu0 %v7310_v41  ;;  %4211 = vmatmul.bf16.gmra.mxu3 %v8210_v45  ;;  %v8853_v41 = vld [vmem:[%s9183_s30 + $0xaa0] sm:$0xf0] }
 0x21c   : > { %4380 = vmatmul.bf16.gmra.mxu2 %v7318_v39  ;;  %v8741_v45 = vld [vmem:[%s9183_s30 + $0x720] sm:$0xf0]  ;;  %v7339_v39 = vld [vmem:[%s9183_s30 + $0x71c] sm:$0xf0] }
 0x21d   : > { %4051 = vmatmul.bf16.gmra.mxu1 %v7314_v30 }
 0x21e   : > { %v4172_v35 = vpop.f32.mrf.mxu3 }
 0x21f   : > { %v9801_v42 = vadd.f32 %v4172_v35, %v3844_v10  ;;  %v4341_v9 = vpop.f32.mrf.mxu2  ;;  %v7338_v10 = vor.u32 %v8740_v28, %v7337_v3  ;;  %v7794_v35 = vor.u32 %v8853_v41, %v7793_v59 }
 0x220   : > { %v9803_v56 = vadd.f32 %v4341_v9, %v4013_v37  ;;  %v3685_v25 = vpop.f32.mrf.mxu0 }
 0x221   : > { %v3686_v19 = vadd.f32 %v9637_v47, %v3685_v25 }
 0x222   : > { %11169 = vst [vmem:[#allocation40_spill] sm:$0xff] %v9803_v56  ;;  %v4014_v22 = vpop.f32.mrf.mxu1 }
 0x223   : > { %v4015_v29 = vadd.f32 %v4014_v22, %v3686_v19  ;;  %v7346_v19 = vor.u32 %v8741_v45, %v7345_v48  ;;  %v7342_v22 = vor.u32 %v8737_v12, %v7339_v39  ;;  %v7365_v45 = vld [vmem:[%s9183_s30 + $0x738] sm:$0xf]  ;;  %v8747_v12 = vld [vmem:[%s9183_s30 + $0x750] sm:$0xf0]  ;;  %v7373_v39 = vld [vmem:[%s9183_s30 + $0x740] sm:$0xf] }
 0x224   : > { %v7366_v13 = vor.u32 %v8747_v12, %v7365_v45 }
 0x226   : > { %v4174_v30 = vpop.f32.mrf.mxu3 }
 0x227   : > { %v9816_v53 = vadd.f32 %v4174_v30, %v3846_v54  ;;  %v4343_v37 = vpop.f32.mrf.mxu2  ;;  %v7821_v30 = vld [vmem:[%s9183_s30 + $0xac0] sm:$0xf] }
 0x228   : > { %v9818_v9 = vadd.f32 %v4343_v37, %v4015_v29  ;;  %v3688_v25 = vpop.f32.mrf.mxu0  ;;  %v3849_v29 = vadd.f32 %v9637_v47, %v9469_v40  ;;  %v8860_v40 = vld [vmem:[%s9183_s30 + $0xad8] sm:$0xf0]  ;;  %v3851_v37 = vadd.f32 %v9637_v47, %v9488_v11 }
 0x229   : > { %v3689_v56 = vadd.f32 %v9637_v47, %v3688_v25  ;;  %v7367_v25 = vld [vmem:[%s9183_s30 + $0x754] sm:$0xf0] }
 0x22a   : > { %11170 = vst [vmem:[#allocation41_spill] sm:$0xff] %v9818_v9  ;;  %v4017_v57 = vpop.f32.mrf.mxu1 }
 0x22b   : > { %v4018_v36 = vadd.f32 %v4017_v57, %v3689_v56  ;;  %3727 = vmatmul.bf16.gmra.mxu0 %v7338_v10  ;;  %4465 = vmatmul.bf16.vlgmr.msra.gmra.mxu3 %v7794_v35  ;;  %v8748_v10 = vld [vmem:[%s9183_s30 + $0x758] sm:$0xf0] }
 0x22c   : > { %4385 = vmatmul.bf16.gmra.mxu2 %v7346_v19  ;;  %v8744_v35 = vld [vmem:[%s9183_s30 + $0x73c] sm:$0xf] }
 0x22d   : > { %4056 = vmatmul.bf16.gmra.mxu1 %v7342_v22 }
 0x22e   : > { %v4177_v3 = vpop.f32.mrf.mxu3 }
 0x22f   : > { %v9826_v57 = vadd.f32 %v4177_v3, %v3849_v29  ;;  %v4346_v56 = vpop.f32.mrf.mxu2  ;;  %v7822_v29 = vor.u32 %v8860_v40, %v7821_v30 }
 0x230   : > { %v9828_v28 = vadd.f32 %v4346_v56, %v4018_v36  ;;  %v3690_v48 = vpop.f32.mrf.mxu0 }
 0x231   : > { %v3691_v59 = vadd.f32 %v9637_v47, %v3690_v48  ;;  %v7374_v48 = vor.u32 %v8748_v10, %v7373_v39 }
 0x232   : > { %11171 = vst [vmem:[#allocation42_spill] sm:$0xff] %v9828_v28  ;;  %v4019_v41 = vpop.f32.mrf.mxu1 }
 0x233   : > { %v4020_v54 = vadd.f32 %v4019_v41, %v3691_v59  ;;  %v7370_v59 = vor.u32 %v8744_v35, %v7367_v25  ;;  %v7393_v35 = vld [vmem:[%s9183_s30 + $0x770] sm:$0xf]  ;;  %v8754_v25 = vld [vmem:[%s9183_s30 + $0x788] sm:$0xf0] }
 0x236   : > { %v4179_v19 = vpop.f32.mrf.mxu3 }
 0x237   : > { %v9841_v22 = vadd.f32 %v4179_v19, %v3851_v37  ;;  %v4348_v36 = vpop.f32.mrf.mxu2  ;;  %v7401_v19 = vld [vmem:[%s9183_s30 + $0x778] sm:$0xf] }
 0x238   : > { %v9843_v3 = vadd.f32 %v4348_v36, %v4020_v54  ;;  %v3693_v56 = vpop.f32.mrf.mxu0  ;;  %v3854_v54 = vadd.f32 %v9637_v47, %v9493_v32  ;;  %v7849_v36 = vld [vmem:[%s9183_s30 + $0xaf8] sm:$0xf]  ;;  %v3856_v32 = vadd.f32 %v9637_v47, %v9506_v6  ;;  %v8990_v6 = vld [vmem:[%s11128_s1 + $0xe8] sm:$0xff] }
 0x239   : > { %v3694_v41 = vadd.f32 %v9637_v47, %v3693_v56  ;;  %v8751_v56 = vld [vmem:[%s9183_s30 + $0x774] sm:$0xf]  ;;  %4548 = vmatpush.bf16.msrb.mxu3 %v8990_v6 }
 0x23a   : > { %11172 = vst [vmem:[#allocation43_spill] sm:$0xff] %v9843_v3  ;;  %v4022_v28 = vpop.f32.mrf.mxu1 }
 0x23b   : > { %v4023_v11 = vadd.f32 %v4022_v28, %v3694_v41  ;;  %3732 = vmatmul.bf16.gmra.mxu0 %v7366_v13  ;;  %4470 = vmatmul.bf16.gmra.mxu3 %v7822_v29  ;;  %v8867_v13 = vld [vmem:[%s9183_s30 + $0xb10] sm:$0xf0] }
 0x23c   : > { %4390 = vmatmul.bf16.gmra.mxu2 %v7374_v48  ;;  %v8755_v29 = vld [vmem:[%s9183_s30 + $0x790] sm:$0xf0]  ;;  %v7395_v48 = vld [vmem:[%s9183_s30 + $0x78c] sm:$0xf0] }
 0x23d   : > { %4061 = vmatmul.bf16.gmra.mxu1 %v7370_v59 }
 0x23e   : > { %v4182_v45 = vpop.f32.mrf.mxu3 }
 0x23f   : > { %v9848_v12 = vadd.f32 %v4182_v45, %v3854_v54  ;;  %v4351_v39 = vpop.f32.mrf.mxu2  ;;  %v7394_v54 = vor.u32 %v8754_v25, %v7393_v35  ;;  %v7850_v45 = vor.u32 %v8867_v13, %v7849_v36 }
 0x240   : > { %v9850_v30 = vadd.f32 %v4351_v39, %v4023_v11  ;;  %v3695_v28 = vpop.f32.mrf.mxu0 }
 0x241   : > { %v3696_v40 = vadd.f32 %v9637_v47, %v3695_v28 }
 0x242   : > { %11173 = vst [vmem:[#allocation44_spill] sm:$0xff] %v9850_v30  ;;  %v4024_v37 = vpop.f32.mrf.mxu1 }
 0x243   : > { %v4025_v10 = vadd.f32 %v4024_v37, %v3696_v40  ;;  %v7402_v40 = vor.u32 %v8755_v29, %v7401_v19  ;;  %v7398_v37 = vor.u32 %v8751_v56, %v7395_v48  ;;  %v8761_v56 = vld [vmem:[%s9183_s30 + $0x7c0] sm:$0xf0]  ;;  %v9002_v48 = vld [vmem:[%s11128_s1 + $0x148] sm:$0xff] }
 0x244   : > { %5210 = vmatpush.bf16.msrb.mxu1 %v9002_v48 }
 0x246   : > { %v4184_v59 = vpop.f32.mrf.mxu3 }
 0x247   : > { %v9863_v41 = vadd.f32 %v4184_v59, %v3856_v32  ;;  %v4353_v11 = vpop.f32.mrf.mxu2  ;;  %v7421_v32 = vld [vmem:[%s9183_s30 + $0x7a8] sm:$0xf]  ;;  %v7429_v59 = vld [vmem:[%s9183_s30 + $0x7b0] sm:$0xf] }
 0x248   : > { %v9865_v39 = vadd.f32 %v4353_v11, %v4025_v10  ;;  %v3698_v28 = vpop.f32.mrf.mxu0  ;;  %v3859_v10 = vadd.f32 %v9637_v47, %v9511_v31  ;;  %v8994_v31 = vld [vmem:[%s11128_s1 + $0x108] sm:$0xff]  ;;  %v7877_v11 = vld [vmem:[%s9183_s30 + $0xb30] sm:$0xf] }
 0x249   : > { %v3699_v30 = vadd.f32 %v9637_v47, %v3698_v28  ;;  %v8758_v28 = vld [vmem:[%s9183_s30 + $0x7ac] sm:$0xf]  ;;  %4881 = vmatpush.bf16.msrb.mxu0 %v8994_v31 }
 0x24a   : > { %11174 = vst [vmem:[#allocation45_spill] sm:$0xff] %v9865_v39  ;;  %v4027_v3 = vpop.f32.mrf.mxu1 }
 0x24b   : > { %v4028_v9 = vadd.f32 %v4027_v3, %v3699_v30  ;;  %3737 = vmatmul.bf16.gmra.mxu0 %v7394_v54  ;;  %4475 = vmatmul.bf16.gmra.mxu3 %v7850_v45  ;;  %v8874_v54 = vld [vmem:[%s9183_s30 + $0xb48] sm:$0xf0] }
 0x24c   : > { %4395 = vmatmul.bf16.gmra.mxu2 %v7402_v40  ;;  %v8762_v45 = vld [vmem:[%s9183_s30 + $0x7c8] sm:$0xf0]  ;;  %v7423_v40 = vld [vmem:[%s9183_s30 + $0x7c4] sm:$0xf0] }
 0x24d   : > { %4066 = vmatmul.bf16.gmra.mxu1 %v7398_v37 }
 0x24e   : > { %v4187_v35 = vpop.f32.mrf.mxu3 }
 0x24f   : > { %v9873_v25 = vadd.f32 %v4187_v35, %v3859_v10  ;;  %v4356_v3 = vpop.f32.mrf.mxu2  ;;  %v7422_v35 = vor.u32 %v8761_v56, %v7421_v32  ;;  %v3864_v32 = vadd.f32 %v9637_v47, %v9529_v49  ;;  %v3866_v49 = vadd.f32 %v9637_v47, %v9542_v33  ;;  %v8989_v33 = vld [vmem:[%s11128_s1 + $0xe0] sm:$0xff] }
 0x250   : > { %v9875_v30 = vadd.f32 %v4356_v3, %v4028_v9  ;;  %v3700_v19 = vpop.f32.mrf.mxu0  ;;  %v3861_v9 = vadd.f32 %v9637_v47, %v9524_v7  ;;  %v7878_v3 = vor.u32 %v8874_v54, %v7877_v11  ;;  %4549 = vmatpush.bf16.msrb.mxu3 %v8989_v33 }
 0x251   : > { %v3701_v36 = vadd.f32 %v9637_v47, %v3700_v19 }
 0x252   : > { %11175 = vst [vmem:[#allocation46_spill] sm:$0xff] %v9875_v30  ;;  %v4029_v13 = vpop.f32.mrf.mxu1  ;;  %v7426_v30 = vor.u32 %v8758_v28, %v7423_v40  ;;  %v7905_v28 = vld [vmem:[%s9183_s30 + $0xb68] sm:$0xf]  ;;  %v8881_v40 = vld [vmem:[%s9183_s30 + $0xb80] sm:$0xf0] }
 0x253   : > { %v4030_v29 = vadd.f32 %v4029_v13, %v3701_v36  ;;  %v7430_v13 = vor.u32 %v8762_v45, %v7429_v59  ;;  %v8768_v45 = vld [vmem:[%s9183_s30 + $0x7f8] sm:$0xf0] }
 0x256   : > { %v4189_v37 = vpop.f32.mrf.mxu3 }
 0x257   : > { %v9894_v6 = vadd.f32 %v4189_v37, %v3861_v9  ;;  %v4358_v10 = vpop.f32.mrf.mxu2  ;;  %v7449_v9 = vld [vmem:[%s9183_s30 + $0x7e0] sm:$0xf]  ;;  %v8769_v37 = vld [vmem:[%s9183_s30 + $0x800] sm:$0xf0] }
 0x258   : > { %v9896_v19 = vadd.f32 %v4358_v10, %v4030_v29  ;;  %v3703_v36 = vpop.f32.mrf.mxu0  ;;  %v8765_v10 = vld [vmem:[%s9183_s30 + $0x7e4] sm:$0xf] }
 0x259   : > { %v3704_v39 = vadd.f32 %v9637_v47, %v3703_v36 }
 0x25a   : > { %v4032_v7 = vpop.f32.mrf.mxu1 }
 0x25b   : > { %v4033_v14 = vadd.f32 %v4032_v7, %v3704_v39  ;;  %3742 = vmatmul.bf16.gmra.mxu0 %v7422_v35  ;;  %4480 = vmatmul.bf16.gmra.mxu3 %v7878_v3  ;;  %v7451_v35 = vld [vmem:[%s9183_s30 + $0x7fc] sm:$0xf0]  ;;  %v7906_v7 = vor.u32 %v8881_v40, %v7905_v28 }
 0x25c   : > { %4400 = vmatmul.bf16.gmra.mxu2 %v7430_v13  ;;  %v7450_v13 = vor.u32 %v8768_v45, %v7449_v9 }
 0x25d   : > { %4071 = vmatmul.bf16.gmra.mxu1 %v7426_v30  ;;  %v7457_v30 = vld [vmem:[%s9183_s30 + $0x7e8] sm:$0xf] }
 0x25e   : > { %v4192_v29 = vpop.f32.mrf.mxu3 }
 0x25f   : > { %v9901_v56 = vadd.f32 %v4192_v29, %v3864_v32  ;;  %v4361_v31 = vpop.f32.mrf.mxu2 }
 0x260   : > { %v9903_v48 = vadd.f32 %v4361_v31, %v4033_v14  ;;  %v3705_v39 = vpop.f32.mrf.mxu0  ;;  %v7458_v31 = vor.u32 %v8769_v37, %v7457_v30 }
 0x261   : > { %v3706_v59 = vadd.f32 %v9637_v47, %v3705_v39  ;;  %v7454_v39 = vor.u32 %v8765_v10, %v7451_v35  ;;  %v7477_v35 = vld [vmem:[%s9183_s30 + $0x818] sm:$0xf] }
 0x262   : > { %11176 = vst [vmem:[#allocation47_spill] sm:$0xff] %v9903_v48  ;;  %v4034_v11 = vpop.f32.mrf.mxu1 }
 0x263   : > { %v4035_v54 = vadd.f32 %v4034_v11, %v3706_v59 }
 0x266   : > { %v4194_v3 = vpop.f32.mrf.mxu3 }
 0x267   : > { %v9916_v36 = vadd.f32 %v4194_v3, %v3866_v49  ;;  %v4363_v14 = vpop.f32.mrf.mxu2  ;;  %v8775_v3 = vld [vmem:[%s9183_s30 + $0x830] sm:$0xf0] }
 0x268   : > { %v9918_v32 = vadd.f32 %v4363_v14, %v4035_v54  ;;  %v3708_v29 = vpop.f32.mrf.mxu0  ;;  %v3869_v54 = vadd.f32 %v9637_v47, %v9547_v62  ;;  %v7485_v14 = vld [vmem:[%s9183_s30 + $0x820] sm:$0xf]  ;;  %v8888_v62 = vld [vmem:[%s9183_s30 + $0xbb8] sm:$0xf0]  ;;  %v7478_v33 = vor.u32 %v8775_v3, %v7477_v35 }
 0x269   : > { %v3709_v59 = vadd.f32 %v9637_v47, %v3708_v29  ;;  %v8776_v29 = vld [vmem:[%s9183_s30 + $0x838] sm:$0xf0] }
 0x26a   : > { %11177 = vst [vmem:[#allocation48_spill] sm:$0xff] %v9918_v32  ;;  %v4037_v11 = vpop.f32.mrf.mxu1 }
 0x26b   : > { %v4038_v48 = vadd.f32 %v4037_v11, %v3709_v59  ;;  %3747 = vmatmul.bf16.gmra.mxu0 %v7450_v13  ;;  %4485 = vmatmul.bf16.gmra.mxu3 %v7906_v7  ;;  %v7933_v13 = vld [vmem:[%s9183_s30 + $0xba0] sm:$0xf]  ;;  %v3871_v7 = vadd.f32 %v9637_v47, %v9560_v61 }
 0x26c   : > { %4405 = vmatmul.bf16.gmra.mxu2 %v7458_v31  ;;  %v8772_v31 = vld [vmem:[%s9183_s30 + $0x81c] sm:$0xf] }
 0x26d   : > { %4076 = vmatmul.bf16.gmra.mxu1 %v7454_v39  ;;  %v7479_v39 = vld [vmem:[%s9183_s30 + $0x834] sm:$0xf0] }
 0x26e   : > { %v4197_v9 = vpop.f32.mrf.mxu3 }
 0x26f   : > { %v9926_v45 = vadd.f32 %v4197_v9, %v3869_v54  ;;  %v4366_v30 = vpop.f32.mrf.mxu2  ;;  %v7934_v54 = vor.u32 %v8888_v62, %v7933_v13 }
 0x270   : > { %v9928_v28 = vadd.f32 %v4366_v30, %v4038_v48  ;;  %v3710_v40 = vpop.f32.mrf.mxu0 }
 0x271   : > { %v3711_v49 = vadd.f32 %v9637_v47, %v3710_v40  ;;  %v7486_v40 = vor.u32 %v8776_v29, %v7485_v14 }
 0x272   : > { %11178 = vst [vmem:[#allocation49_spill] sm:$0xff] %v9928_v28  ;;  %v4039_v37 = vpop.f32.mrf.mxu1 }
 0x273   : > { %v4040_v10 = vadd.f32 %v4039_v37, %v3711_v49  ;;  %v7482_v49 = vor.u32 %v8772_v31, %v7479_v39  ;;  %v7505_v31 = vld [vmem:[%s9183_s30 + $0x850] sm:$0xf]  ;;  %v8782_v39 = vld [vmem:[%s9183_s30 + $0x868] sm:$0xf0] }
 0x276   : > { %v4199_v59 = vpop.f32.mrf.mxu3 }
 0x277   : > { %v9941_v11 = vadd.f32 %v4199_v59, %v3871_v7  ;;  %v4368_v48 = vpop.f32.mrf.mxu2  ;;  %v7513_v59 = vld [vmem:[%s9183_s30 + $0x858] sm:$0xf] }
 0x278   : > { %v9943_v9 = vadd.f32 %v4368_v48, %v4040_v10  ;;  %v3713_v30 = vpop.f32.mrf.mxu0  ;;  %v3874_v10 = vadd.f32 %v9637_v47, %v9565_v23  ;;  %v7961_v48 = vld [vmem:[%s9183_s30 + $0xbd8] sm:$0xf]  ;;  %v3876_v23 = vadd.f32 %v9637_v47, %v9578_v18 }
 0x279   : > { %v3714_v37 = vadd.f32 %v9637_v47, %v3713_v30  ;;  %v8779_v30 = vld [vmem:[%s9183_s30 + $0x854] sm:$0xf]  ;;  %v8988_v18 = vld [vmem:[%s11128_s1 + $0xd8] sm:$0xff] }
 0x27a   : > { %11179 = vst [vmem:[#allocation50_spill] sm:$0xff] %v9943_v9  ;;  %v4042_v28 = vpop.f32.mrf.mxu1  ;;  %4550 = vmatpush.bf16.msrb.mxu3 %v8988_v18 }
 0x27b   : > { %v4043_v61 = vadd.f32 %v4042_v28, %v3714_v37  ;;  %3752 = vmatmul.bf16.gmra.mxu0 %v7478_v33  ;;  %4490 = vmatmul.bf16.gmra.mxu3 %v7934_v54  ;;  %v8895_v33 = vld [vmem:[%s9183_s30 + $0xbf0] sm:$0xf0] }
 0x27c   : > { %4410 = vmatmul.bf16.gmra.mxu2 %v7486_v40  ;;  %v8783_v54 = vld [vmem:[%s9183_s30 + $0x870] sm:$0xf0]  ;;  %v7507_v40 = vld [vmem:[%s9183_s30 + $0x86c] sm:$0xf0] }
 0x27d   : > { %4081 = vmatmul.bf16.gmra.mxu1 %v7482_v49 }
 0x27e   : > { %v4202_v35 = vpop.f32.mrf.mxu3 }
 0x27f   : > { %v9948_v3 = vadd.f32 %v4202_v35, %v3874_v10  ;;  %v4371_v14 = vpop.f32.mrf.mxu2  ;;  %v7506_v10 = vor.u32 %v8782_v39, %v7505_v31  ;;  %v7962_v35 = vor.u32 %v8895_v33, %v7961_v48 }
 0x280   : > { %v9950_v13 = vadd.f32 %v4371_v14, %v4043_v61  ;;  %v3715_v28 = vpop.f32.mrf.mxu0 }
 0x281   : > { %v3716_v62 = vadd.f32 %v9637_v47, %v3715_v28 }
 0x282   : > { %11180 = vst [vmem:[#allocation51_spill] sm:$0xff] %v9950_v13  ;;  %v4044_v7 = vpop.f32.mrf.mxu1 }
 0x283   : > { %v4045_v29 = vadd.f32 %v4044_v7, %v3716_v62  ;;  %v7514_v62 = vor.u32 %v8783_v54, %v7513_v59  ;;  %v7510_v7 = vor.u32 %v8779_v30, %v7507_v40  ;;  %v7533_v54 = vld [vmem:[%s9183_s30 + $0x888] sm:$0xf]  ;;  %v8789_v30 = vld [vmem:[%s9183_s30 + $0x8a0] sm:$0xf0]  ;;  %v7541_v40 = vld [vmem:[%s9183_s30 + $0x890] sm:$0xf] }
 0x286   : > { %v4204_v49 = vpop.f32.mrf.mxu3 }
 0x287   : > { %v9963_v37 = vadd.f32 %v4204_v49, %v3876_v23  ;;  %v4373_v61 = vpop.f32.mrf.mxu2  ;;  %v9009_v23 = vld [vmem:[%s11128_s1 + $0x180] sm:$0xff]  ;;  %v7989_v49 = vld [vmem:[%s9183_s30 + $0xc10] sm:$0xf] }
 0x288   : > { %v9965_v14 = vadd.f32 %v4373_v61, %v4045_v29  ;;  %v3718_v28 = vpop.f32.mrf.mxu0  ;;  %v3879_v29 = vadd.f32 %v9637_v47, %v9583_v55  ;;  %5540 = vmatpush.bf16.msrb.mxu2 %v9009_v23  ;;  %v8902_v61 = vld [vmem:[%s9183_s30 + $0xc28] sm:$0xf0]  ;;  %v9998_v23 = vld [vmem:[%s11129_s2] ss:$0 sm:$0xff] }
 0x289   : > { %v3719_v13 = vadd.f32 %v9637_v47, %v3718_v28  ;;  %v7535_v28 = vld [vmem:[%s9183_s30 + $0x8a4] sm:$0xf0] }
 0x28a   : > { %11181 = vst [vmem:[#allocation52_spill] sm:$0xff] %v9965_v14  ;;  %v4047_v9 = vpop.f32.mrf.mxu1 }
 0x28b   : > { %v4048_v32 = vadd.f32 %v4047_v9, %v3719_v13  ;;  %3757 = vmatmul.bf16.gmra.mxu0 %v7506_v10  ;;  %4495 = vmatmul.bf16.gmra.mxu3 %v7962_v35  ;;  %v3881_v10 = vadd.f32 %v9637_v47, %v9605_v16  ;;  %v8786_v35 = vld [vmem:[%s9183_s30 + $0x88c] sm:$0xf] }
 0x28c   : > { %4415 = vmatmul.bf16.gmra.mxu2 %v7514_v62 }
 0x28d   : > { %4086 = vmatmul.bf16.gmra.mxu1 %v7510_v7 }
 0x28e   : > { %v4207_v31 = vpop.f32.mrf.mxu3 }
 0x28f   : > { %v9973_v9 = vadd.f32 %v4207_v31, %v3879_v29  ;;  %v4376_v13 = vpop.f32.mrf.mxu2  ;;  %v7534_v29 = vor.u32 %v8789_v30, %v7533_v54  ;;  %v7990_v31 = vor.u32 %v8902_v61, %v7989_v49 }
 0x290   : > { %v9975_v39 = vadd.f32 %v4376_v13, %v4048_v32  ;;  %v3720_v59 = vpop.f32.mrf.mxu0  ;;  %v8790_v32 = vld [vmem:[%s9183_s30 + $0x8a8] sm:$0xf0] }
 0x291   : > { %v3721_v48 = vadd.f32 %v9637_v47, %v3720_v59 }
 0x292   : > { %11182 = vst [vmem:[#allocation53_spill] sm:$0xff] %v9975_v39  ;;  %v4049_v33 = vpop.f32.mrf.mxu1 }
 0x293   : > { %v4050_v55 = vadd.f32 %v4049_v33, %v3721_v48  ;;  %v7542_v48 = vor.u32 %v8790_v32, %v7541_v40  ;;  %v7538_v33 = vor.u32 %v8786_v35, %v7535_v28 }
 0x296   : > { %v4209_v62 = vpop.f32.mrf.mxu3 }
 0x297   : > { %v9991_v7 = vadd.f32 %v4209_v62, %v3881_v10  ;;  %v4378_v18 = vpop.f32.mrf.mxu2  ;;  %v7561_v62 = vld [vmem:[%s9183_s30 + $0x8c0] sm:$0xf] }
 0x298   : > { %v9993_v13 = vadd.f32 %v4378_v18, %v4050_v55  ;;  %v3723_v59 = vpop.f32.mrf.mxu0  ;;  %v3884_v55 = vadd.f32 %v9998_v23, %v9610_v44  ;;  %v8796_v18 = vld [vmem:[%s9183_s30 + $0x8d8] sm:$0xf0]  ;;  %v3886_v44 = vadd.f32 %v9998_v23, %v9623_v52  ;;  %v8987_v52 = vld [vmem:[%s11128_s1 + $0xd0] sm:$0xff] }
 0x299   : > { %v3724_v16 = vadd.f32 %v9998_v23, %v3723_v59  ;;  %v8909_v59 = vld [vmem:[%s9183_s30 + $0xc60] sm:$0xf0]  ;;  %4551 = vmatpush.bf16.msrb.mxu3 %v8987_v52 }
 0x29a   : > { %11183 = vst [vmem:[#allocation54_spill] sm:$0xff] %v9993_v13  ;;  %v4052_v47 = vpop.f32.mrf.mxu1 }
 0x29b   : > { %v4053_v10 = vadd.f32 %v4052_v47, %v3724_v16  ;;  %3762 = vmatmul.bf16.gmra.mxu0 %v7534_v29  ;;  %4500 = vmatmul.bf16.gmra.mxu3 %v7990_v31  ;;  %v7569_v29 = vld [vmem:[%s9183_s30 + $0x8c8] sm:$0xf]  ;;  %v7563_v16 = vld [vmem:[%s9183_s30 + $0x8dc] sm:$0xf0] }
 0x29c   : > { %4420 = vmatmul.bf16.gmra.mxu2 %v7542_v48  ;;  %v8017_v31 = vld [vmem:[%s9183_s30 + $0xc48] sm:$0xf]  ;;  %v8797_v48 = vld [vmem:[%s9183_s30 + $0x8e0] sm:$0xf0] }
 0x29d   : > { %4091 = vmatmul.bf16.gmra.mxu1 %v7538_v33  ;;  %v8793_v33 = vld [vmem:[%s9183_s30 + $0x8c4] sm:$0xf] }
 0x29e   : > { %v4212_v54 = vpop.f32.mrf.mxu3 }
 0x29f   : > { %v10003_v30 = vadd.f32 %v4212_v54, %v3884_v55  ;;  %v4381_v40 = vpop.f32.mrf.mxu2  ;;  %v7562_v54 = vor.u32 %v8796_v18, %v7561_v62 }
 0x2a0   : > { %v10005_v49 = vadd.f32 %v4381_v40, %v4053_v10  ;;  %v3725_v61 = vpop.f32.mrf.mxu0  ;;  %v8018_v40 = vor.u32 %v8909_v59, %v8017_v31  ;;  %v7589_v31 = vld [vmem:[%s9183_s30 + $0x8f8] sm:$0xf] }
 0x2a1   : > { %v3726_v32 = vadd.f32 %v9998_v23, %v3725_v61 }
 0x2a2   : > { %11184 = vst [vmem:[#allocation55_spill] sm:$0xff] %v10005_v49  ;;  %v4054_v35 = vpop.f32.mrf.mxu1  ;;  %v7566_v49 = vor.u32 %v8793_v33, %v7563_v16  ;;  %v9001_v33 = vld [vmem:[%s11128_s1 + $0x140] sm:$0xff] }
 0x2a3   : > { %v4055_v28 = vadd.f32 %v4054_v35, %v3726_v32  ;;  %v7570_v35 = vor.u32 %v8797_v48, %v7569_v29  ;;  %v8993_v48 = vld [vmem:[%s11128_s1 + $0x100] sm:$0xff]  ;;  %5211 = vmatpush.bf16.msrb.mxu1 %v9001_v33 }
 0x2a4   : > { %v7597_v16 = vld [vmem:[%s9183_s30 + $0x900] sm:$0xf]  ;;  %4882 = vmatpush.bf16.msrb.mxu0 %v8993_v48 }
 0x2a6   : > { %v4214_v47 = vpop.f32.mrf.mxu3 }
 0x2a7   : > { %v10018_v55 = vadd.f32 %v4214_v47, %v3886_v44  ;;  %v4383_v10 = vpop.f32.mrf.mxu2  ;;  %v8803_v44 = vld [vmem:[%s9183_s30 + $0x910] sm:$0xf0]  ;;  %v8916_v47 = vld [vmem:[%s9183_s30 + $0xc98] sm:$0xf0] }
 0x2a8   : > { %v10020_v61 = vadd.f32 %v4383_v10, %v4055_v28  ;;  %v3728_v32 = vpop.f32.mrf.mxu0  ;;  %v8800_v10 = vld [vmem:[%s9183_s30 + $0x8fc] sm:$0xf]  ;;  %v7590_v52 = vor.u32 %v8803_v44, %v7589_v31 }
 0x2a9   : > { %v3729_v13 = vadd.f32 %v9998_v23, %v3728_v32 }
 0x2aa   : > { %v4057_v39 = vpop.f32.mrf.mxu1 }
 0x2ab   : > { %v4058_v14 = vadd.f32 %v4057_v39, %v3729_v13  ;;  %3767 = vmatmul.bf16.gmra.mxu0 %v7562_v54  ;;  %4505 = vmatmul.bf16.gmra.mxu3 %v8018_v40  ;;  %v7591_v54 = vld [vmem:[%s9183_s30 + $0x914] sm:$0xf0] }
 0x2ac   : > { %4425 = vmatmul.bf16.gmra.mxu2 %v7570_v35 }
 0x2ad   : > { %4096 = vmatmul.bf16.gmra.mxu1 %v7566_v49 }
 0x2ae   : > { %v4466_v28 = vpop.f32.mrf.mxu3 }
 0x2af   : > { %v4386_v62 = vpop.f32.mrf.mxu2  ;;  %v10027_v39 = vadd.f32 %v4466_v28, %v9630_v46  ;;  %v8045_v46 = vld [vmem:[%s9183_s30 + $0xc80] sm:$0xf] }
 0x2b0   : > { %v10029_v13 = vadd.f32 %v4386_v62, %v4058_v14  ;;  %v3730_v18 = vpop.f32.mrf.mxu0  ;;  %v8804_v14 = vld [vmem:[%s9183_s30 + $0x918] sm:$0xf0]  ;;  %v8046_v28 = vor.u32 %v8916_v47, %v8045_v46  ;;  %v7617_v46 = vld [vmem:[%s9183_s30 + $0x930] sm:$0xf]  ;;  %v8810_v47 = vld [vmem:[%s9183_s30 + $0x948] sm:$0xf0] }
 0x2b1   : > { %11185 = vst [vmem:[#allocation56_spill] sm:$0xff] %v10027_v39  ;;  %v3731_v49 = vadd.f32 %v9998_v23, %v3730_v18 }
 0x2b2   : > { %11186 = vst [vmem:[#allocation57_spill] sm:$0xff] %v10029_v13  ;;  %v4059_v29 = vpop.f32.mrf.mxu1 }
 0x2b3   : > { %v4060_v59 = vadd.f32 %v4059_v29, %v3731_v49  ;;  %v7598_v49 = vor.u32 %v8804_v14, %v7597_v16  ;;  %v7594_v29 = vor.u32 %v8800_v10, %v7591_v54  ;;  %v7625_v14 = vld [vmem:[%s9183_s30 + $0x938] sm:$0xf]  ;;  %v8923_v54 = vld [vmem:[%s9183_s30 + $0xcd0] sm:$0xf0] }
 0x2b4   : > { %v8073_v10 = vld [vmem:[%s9183_s30 + $0xcb8] sm:$0xf] }
 0x2b6   : > { %v4468_v40 = vpop.f32.mrf.mxu3 }
 0x2b7   : > { %v4388_v32 = vpop.f32.mrf.mxu2  ;;  %v10047_v35 = vadd.f32 %v4468_v40, %v9650_v2  ;;  %v8811_v40 = vld [vmem:[%s9183_s30 + $0x950] sm:$0xf0] }
 0x2b8   : > { %v10049_v62 = vadd.f32 %v4388_v32, %v4060_v59  ;;  %v3733_v18 = vpop.f32.mrf.mxu0  ;;  %v8807_v32 = vld [vmem:[%s9183_s30 + $0x934] sm:$0xf] }
 0x2b9   : > { %v3734_v39 = vadd.f32 %v9998_v23, %v3733_v18 }
 0x2ba   : > { %v4062_v13 = vpop.f32.mrf.mxu1 }
 0x2bb   : > { %v4063_v48 = vadd.f32 %v4062_v13, %v3734_v39  ;;  %3772 = vmatmul.bf16.gmra.mxu0 %v7590_v52  ;;  %4510 = vmatmul.bf16.gmra.mxu3 %v8046_v28  ;;  %v7619_v52 = vld [vmem:[%s9183_s30 + $0x94c] sm:$0xf0] }
 0x2bc   : > { %4430 = vmatmul.bf16.gmra.mxu2 %v7598_v49  ;;  %v7618_v49 = vor.u32 %v8810_v47, %v7617_v46 }
 0x2bd   : > { %4101 = vmatmul.bf16.gmra.mxu1 %v7594_v29  ;;  %v8074_v29 = vor.u32 %v8923_v54, %v8073_v10 }
 0x2be   : > { %v4471_v2 = vpop.f32.mrf.mxu3 }
 0x2bf   : > { %v4391_v31 = vpop.f32.mrf.mxu2  ;;  %v10053_v59 = vadd.f32 %v4471_v2, %v9657_v17 }
 0x2c0   : > { %v10055_v44 = vadd.f32 %v4391_v31, %v4063_v48  ;;  %v3735_v33 = vpop.f32.mrf.mxu0  ;;  %v7626_v31 = vor.u32 %v8811_v40, %v7625_v14 }
 0x2c1   : > { %11187 = vst [vmem:[#allocation58_spill] sm:$0xff] %v10053_v59  ;;  %v3736_v16 = vadd.f32 %v9998_v23, %v3735_v33  ;;  %v7622_v33 = vor.u32 %v8807_v32, %v7619_v52  ;;  %v7645_v52 = vld [vmem:[%s9183_s30 + $0x968] sm:$0xf] }
 0x2c2   : > { %v4064_v39 = vpop.f32.mrf.mxu1 }
 0x2c3   : > { %v4065_v13 = vadd.f32 %v4064_v39, %v3736_v16 }
 0x2c6   : > { %v4473_v28 = vpop.f32.mrf.mxu3 }
 0x2c7   : > { %v4393_v18 = vpop.f32.mrf.mxu2  ;;  %v10067_v17 = vadd.f32 %v4473_v28, %v9672_v50  ;;  %v8986_v50 = vld [vmem:[%s11128_s1 + $0xc8] sm:$0xff]  ;;  %v8817_v28 = vld [vmem:[%s9183_s30 + $0x980] sm:$0xf0] }
 0x2c8   : > { %v10069_v48 = vadd.f32 %v4393_v18, %v4065_v13  ;;  %v3738_v2 = vpop.f32.mrf.mxu0  ;;  %4552 = vmatpush.bf16.msrb.mxu3 %v8986_v50  ;;  %v7653_v18 = vld [vmem:[%s9183_s30 + $0x970] sm:$0xf] }
 0x2c9   : > { %11188 = vst [vmem:[#allocation59_spill] sm:$0xff] %v10067_v17  ;;  %v3739_v16 = vadd.f32 %v9998_v23, %v3738_v2  ;;  %v8818_v2 = vld [vmem:[%s9183_s30 + $0x988] sm:$0xf0] }
 0x2ca   : > { %v4067_v39 = vpop.f32.mrf.mxu1 }
 0x2cb   : > { %v4068_v59 = vadd.f32 %v4067_v39, %v3739_v16  ;;  %3777 = vmatmul.bf16.gmra.mxu0 %v7618_v49  ;;  %4515 = vmatmul.bf16.gmra.mxu3 %v8074_v29  ;;  %v8101_v49 = vld [vmem:[%s9183_s30 + $0xcf0] sm:$0xf]  ;;  %v8930_v29 = vld [vmem:[%s9183_s30 + $0xd08] sm:$0xf0] }
 0x2cc   : > { %4435 = vmatmul.bf16.gmra.mxu2 %v7626_v31  ;;  %v8814_v31 = vld [vmem:[%s9183_s30 + $0x96c] sm:$0xf]  ;;  %v8102_v50 = vor.u32 %v8930_v29, %v8101_v49 }
 0x2cd   : > { %4106 = vmatmul.bf16.gmra.mxu1 %v7622_v33  ;;  %v7647_v33 = vld [vmem:[%s9183_s30 + $0x984] sm:$0xf0] }
 0x2ce   : > { %v4476_v13 = vpop.f32.mrf.mxu3 }
 0x2cf   : > { %v4396_v46 = vpop.f32.mrf.mxu2  ;;  %v10076_v47 = vadd.f32 %v4476_v13, %v9679_v21 }
 0x2d0   : > { %v10078_v14 = vadd.f32 %v4396_v46, %v4068_v59  ;;  %v3740_v10 = vpop.f32.mrf.mxu0  ;;  %v7646_v59 = vor.u32 %v8817_v28, %v7645_v52 }
 0x2d1   : > { %11189 = vst [vmem:[#allocation60_spill] sm:$0xff] %v10076_v47  ;;  %v3741_v54 = vadd.f32 %v9998_v23, %v3740_v10  ;;  %v7654_v10 = vor.u32 %v8818_v2, %v7653_v18  ;;  %v7673_v2 = vld [vmem:[%s9183_s30 + $0x9a0] sm:$0xf] }
 0x2d2   : > { %v4069_v40 = vpop.f32.mrf.mxu1 }
 0x2d3   : > { %v4070_v32 = vadd.f32 %v4069_v40, %v3741_v54  ;;  %v7650_v54 = vor.u32 %v8814_v31, %v7647_v33  ;;  %v8824_v31 = vld [vmem:[%s9183_s30 + $0x9b8] sm:$0xf0]  ;;  %v7681_v33 = vld [vmem:[%s9183_s30 + $0x9a8] sm:$0xf] }
 0x2d6   : > { %v4478_v16 = vpop.f32.mrf.mxu3 }
 0x2d7   : > { %v4398_v39 = vpop.f32.mrf.mxu2  ;;  %v10090_v21 = vadd.f32 %v4478_v16, %v9694_v63  ;;  %v8129_v16 = vld [vmem:[%s9183_s30 + $0xd28] sm:$0xf] }
 0x2d8   : > { %v10092_v13 = vadd.f32 %v4398_v39, %v4070_v32  ;;  %v3743_v46 = vpop.f32.mrf.mxu0  ;;  %v8937_v39 = vld [vmem:[%s9183_s30 + $0xd40] sm:$0xf0] }
 0x2d9   : > { %11190 = vst [vmem:[#allocation61_spill] sm:$0xff] %v10090_v21  ;;  %v3744_v40 = vadd.f32 %v9998_v23, %v3743_v46  ;;  %v7675_v46 = vld [vmem:[%s9183_s30 + $0x9bc] sm:$0xf0] }
 0x2da   : > { %v4072_v47 = vpop.f32.mrf.mxu1 }
 0x2db   : > { %v4073_v17 = vadd.f32 %v4072_v47, %v3744_v40  ;;  %3782 = vmatmul.bf16.gmra.mxu0 %v7646_v59  ;;  %4520 = vmatmul.bf16.gmra.mxu3 %v8102_v50  ;;  %v8825_v59 = vld [vmem:[%s9183_s30 + $0x9c0] sm:$0xf0]  ;;  %v8130_v40 = vor.u32 %v8937_v39, %v8129_v16 }
 0x2dc   : > { %4440 = vmatmul.bf16.gmra.mxu2 %v7654_v10  ;;  %v8821_v50 = vld [vmem:[%s9183_s30 + $0x9a4] sm:$0xf] }
 0x2dd   : > { %4111 = vmatmul.bf16.gmra.mxu1 %v7650_v54 }
 0x2de   : > { %v4481_v63 = vpop.f32.mrf.mxu3 }
 0x2df   : > { %v4401_v32 = vpop.f32.mrf.mxu2  ;;  %v10096_v52 = vadd.f32 %v4481_v63, %v9701_v4 }
 0x2e0   : > { %v10098_v28 = vadd.f32 %v4401_v32, %v4073_v17  ;;  %v3745_v18 = vpop.f32.mrf.mxu0  ;;  %v7674_v17 = vor.u32 %v8824_v31, %v7673_v2 }
 0x2e1   : > { %11191 = vst [vmem:[#allocation62_spill] sm:$0xff] %v10096_v52  ;;  %v3746_v49 = vadd.f32 %v9998_v23, %v3745_v18  ;;  %v7682_v18 = vor.u32 %v8825_v59, %v7681_v33 }
 0x2e2   : > { %v4074_v47 = vpop.f32.mrf.mxu1 }
 0x2e3   : > { %v4075_v29 = vadd.f32 %v4074_v47, %v3746_v49  ;;  %v7678_v49 = vor.u32 %v8821_v50, %v7675_v46  ;;  %v7701_v50 = vld [vmem:[%s9183_s30 + $0x9d8] sm:$0xf]  ;;  %v8831_v46 = vld [vmem:[%s9183_s30 + $0x9f0] sm:$0xf0] }
 0x2e6   : > { %v4483_v10 = vpop.f32.mrf.mxu3 }
 0x2e7   : > { %v4403_v54 = vpop.f32.mrf.mxu2  ;;  %v10110_v4 = vadd.f32 %v4483_v10, %v9716_v51  ;;  %v8985_v51 = vld [vmem:[%s11128_s1 + $0xc0] sm:$0xff] }
 0x2e8   : > { %v10112_v63 = vadd.f32 %v4403_v54, %v4075_v29  ;;  %v3748_v32 = vpop.f32.mrf.mxu0  ;;  %4553 = vmatpush.bf16.msrb.mxu3 %v8985_v51  ;;  %v7709_v10 = vld [vmem:[%s9183_s30 + $0x9e0] sm:$0xf] }
 0x2e9   : > { %11192 = vst [vmem:[#allocation63_spill] sm:$0xff] %v10110_v4  ;;  %v3749_v47 = vadd.f32 %v9998_v23, %v3748_v32  ;;  %v8157_v54 = vld [vmem:[%s9183_s30 + $0xd60] sm:$0xf]  ;;  %v8828_v32 = vld [vmem:[%s9183_s30 + $0x9dc] sm:$0xf] }
 0x2ea   : > { %v4077_v52 = vpop.f32.mrf.mxu1 }
 0x2eb   : > { %v4078_v21 = vadd.f32 %v4077_v52, %v3749_v47  ;;  %3787 = vmatmul.bf16.gmra.mxu0 %v7674_v17  ;;  %4525 = vmatmul.bf16.gmra.mxu3 %v8130_v40  ;;  %v8944_v17 = vld [vmem:[%s9183_s30 + $0xd78] sm:$0xf0] }
 0x2ec   : > { %4445 = vmatmul.bf16.gmra.mxu2 %v7682_v18  ;;  %v8832_v40 = vld [vmem:[%s9183_s30 + $0x9f8] sm:$0xf0]  ;;  %v7703_v18 = vld [vmem:[%s9183_s30 + $0x9f4] sm:$0xf0]  ;;  %v8158_v51 = vor.u32 %v8944_v17, %v8157_v54 }
 0x2ed   : > { %4116 = vmatmul.bf16.gmra.mxu1 %v7678_v49 }
 0x2ee   : > { %v4486_v29 = vpop.f32.mrf.mxu3 }
 0x2ef   : > { %v4406_v2 = vpop.f32.mrf.mxu2  ;;  %v10119_v52 = vadd.f32 %v4486_v29, %v9723_v8 }
 0x2f0   : > { %v10121_v31 = vadd.f32 %v4406_v2, %v4078_v21  ;;  %v3750_v33 = vpop.f32.mrf.mxu0  ;;  %v7702_v21 = vor.u32 %v8831_v46, %v7701_v50 }
 0x2f1   : > { %11193 = vst [vmem:[#allocation64_spill] sm:$0xff] %v10119_v52  ;;  %v3751_v16 = vadd.f32 %v9998_v23, %v3750_v33  ;;  %v7710_v33 = vor.u32 %v8832_v40, %v7709_v10  ;;  %v7729_v40 = vld [vmem:[%s9183_s30 + $0xa10] sm:$0xf] }
 0x2f2   : > { %v4079_v39 = vpop.f32.mrf.mxu1 }
 0x2f3   : > { %v4080_v59 = vadd.f32 %v4079_v39, %v3751_v16  ;;  %v7706_v16 = vor.u32 %v8828_v32, %v7703_v18  ;;  %v8838_v32 = vld [vmem:[%s9183_s30 + $0xa28] sm:$0xf0]  ;;  %v7737_v18 = vld [vmem:[%s9183_s30 + $0xa18] sm:$0xf] }
 0x2f6   : > { %v4488_v49 = vpop.f32.mrf.mxu3 }
 0x2f7   : > { %v4408_v47 = vpop.f32.mrf.mxu2  ;;  %v10133_v8 = vadd.f32 %v4488_v49, %v9744_v5  ;;  %v8185_v49 = vld [vmem:[%s9183_s30 + $0xd98] sm:$0xf] }
 0x2f8   : > { %v10135_v29 = vadd.f32 %v4408_v47, %v4080_v59  ;;  %v3753_v2 = vpop.f32.mrf.mxu0  ;;  %v8951_v47 = vld [vmem:[%s9183_s30 + $0xdb0] sm:$0xf0] }
 0x2f9   : > { %11194 = vst [vmem:[#allocation65_spill] sm:$0xff] %v10133_v8  ;;  %v3754_v39 = vadd.f32 %v9998_v23, %v3753_v2  ;;  %v7731_v2 = vld [vmem:[%s9183_s30 + $0xa2c] sm:$0xf0] }
 0x2fa   : > { %v4082_v52 = vpop.f32.mrf.mxu1 }
 0x2fb   : > { %v4083_v4 = vadd.f32 %v4082_v52, %v3754_v39  ;;  %3792 = vmatmul.bf16.gmra.mxu0 %v7702_v21  ;;  %4530 = vmatmul.bf16.gmra.mxu3 %v8158_v51  ;;  %v8839_v21 = vld [vmem:[%s9183_s30 + $0xa30] sm:$0xf0]  ;;  %v8186_v39 = vor.u32 %v8951_v47, %v8185_v49 }
 0x2fc   : > { %4450 = vmatmul.bf16.gmra.mxu2 %v7710_v33  ;;  %v8835_v51 = vld [vmem:[%s9183_s30 + $0xa14] sm:$0xf] }
 0x2fd   : > { %4121 = vmatmul.bf16.gmra.mxu1 %v7706_v16 }
 0x2fe   : > { %v4491_v5 = vpop.f32.mrf.mxu3 }
 0x2ff   : > { %v4411_v59 = vpop.f32.mrf.mxu2  ;;  %v10139_v50 = vadd.f32 %v4491_v5, %v9751_v26 }
 0x300   : > { %v10141_v46 = vadd.f32 %v4411_v59, %v4083_v4  ;;  %v3755_v10 = vpop.f32.mrf.mxu0  ;;  %v7730_v4 = vor.u32 %v8838_v32, %v7729_v40 }
 0x301   : > { %11195 = vst [vmem:[#allocation66_spill] sm:$0xff] %v10139_v50  ;;  %v3756_v54 = vadd.f32 %v9998_v23, %v3755_v10  ;;  %v7738_v10 = vor.u32 %v8839_v21, %v7737_v18  ;;  %v7757_v21 = vld [vmem:[%s9183_s30 + $0xa48] sm:$0xf] }
 0x302   : > { %v4084_v52 = vpop.f32.mrf.mxu1 }
 0x303   : > { %v4085_v17 = vadd.f32 %v4084_v52, %v3756_v54  ;;  %v7734_v54 = vor.u32 %v8835_v51, %v7731_v2  ;;  %v8845_v51 = vld [vmem:[%s9183_s30 + $0xa60] sm:$0xf0]  ;;  %v7765_v2 = vld [vmem:[%s9183_s30 + $0xa50] sm:$0xf] }
 0x306   : > { %v4493_v33 = vpop.f32.mrf.mxu3 }
 0x307   : > { %v4413_v16 = vpop.f32.mrf.mxu2  ;;  %v10153_v26 = vadd.f32 %v4493_v33, %v9766_v15  ;;  %v8213_v33 = vld [vmem:[%s9183_s30 + $0xdd0] sm:$0xf] }
 0x308   : > { %v10155_v5 = vadd.f32 %v4413_v16, %v4085_v17  ;;  %v3758_v59 = vpop.f32.mrf.mxu0  ;;  %v8958_v16 = vld [vmem:[%s9183_s30 + $0xde8] sm:$0xf0] }
 0x309   : > { %11196 = vst [vmem:[#allocation67_spill] sm:$0xff] %v10153_v26  ;;  %v3759_v52 = vadd.f32 %v9998_v23, %v3758_v59  ;;  %v7759_v59 = vld [vmem:[%s9183_s30 + $0xa64] sm:$0xf0] }
 0x30a   : > { %v4087_v50 = vpop.f32.mrf.mxu1 }
 0x30b   : > { %v4088_v8 = vadd.f32 %v4087_v50, %v3759_v52  ;;  %3797 = vmatmul.bf16.gmra.mxu0 %v7730_v4  ;;  %4535 = vmatmul.bf16.gmra.mxu3 %v8186_v39  ;;  %v8846_v4 = vld [vmem:[%s9183_s30 + $0xa68] sm:$0xf0]  ;;  %v8214_v52 = vor.u32 %v8958_v16, %v8213_v33 }
 0x30c   : > { %4455 = vmatmul.bf16.gmra.mxu2 %v7738_v10  ;;  %v8842_v39 = vld [vmem:[%s9183_s30 + $0xa4c] sm:$0xf] }
 0x30d   : > { %4126 = vmatmul.bf16.gmra.mxu1 %v7734_v54 }
 0x30e   : > { %v4496_v15 = vpop.f32.mrf.mxu3 }
 0x30f   : > { %v4416_v17 = vpop.f32.mrf.mxu2  ;;  %v10159_v40 = vadd.f32 %v4496_v15, %v9776_v0 }
 0x310   : > { %v10161_v32 = vadd.f32 %v4416_v17, %v4088_v8  ;;  %v3760_v18 = vpop.f32.mrf.mxu0  ;;  %v7758_v8 = vor.u32 %v8845_v51, %v7757_v21 }
 0x311   : > { %11197 = vst [vmem:[#allocation68_spill] sm:$0xff] %v10159_v40  ;;  %v3761_v49 = vadd.f32 %v9998_v23, %v3760_v18  ;;  %v7766_v18 = vor.u32 %v8846_v4, %v7765_v2  ;;  %v8514_v4 = vld [vmem:[%s9183_s30 + $0xc] sm:$0xf] }
 0x312   : > { %v4089_v50 = vpop.f32.mrf.mxu1 }
 0x313   : > { %v4090_v47 = vadd.f32 %v4089_v50, %v3761_v49  ;;  %v7762_v49 = vor.u32 %v8842_v39, %v7759_v59  ;;  %v6451_v39 = vld [vmem:[%s9183_s30 + $0x24] sm:$0xf0]  ;;  %v6457_v59 = vld [vmem:[%s9183_s30 + $0x10] sm:$0xf] }
 0x316   : > { %v4498_v10 = vpop.f32.mrf.mxu3 }
 0x317   : > { %v4418_v54 = vpop.f32.mrf.mxu2  ;;  %v10173_v0 = vadd.f32 %v4498_v10, %v9794_v24  ;;  %v8518_v10 = vld [vmem:[%s9183_s30 + $0x28] sm:$0xf0] }
 0x318   : > { %v10175_v15 = vadd.f32 %v4418_v54, %v4090_v47  ;;  %v3763_v17 = vpop.f32.mrf.mxu0  ;;  %v6465_v54 = vld [vmem:[%s9183_s30 + $0x18] sm:$0xf] }
 0x319   : > { %11198 = vst [vmem:[#allocation69_spill] sm:$0xff] %v10173_v0  ;;  %v3764_v50 = vadd.f32 %v9998_v23, %v3763_v17  ;;  %v6459_v17 = vld [vmem:[%s9183_s30 + $0x2c] sm:$0xf0] }
 0x31a   : > { %v4092_v40 = vpop.f32.mrf.mxu1 }
 0x31b   : > { %v4093_v26 = vadd.f32 %v4092_v40, %v3764_v50  ;;  %3802 = vmatmul.bf16.gmra.mxu0 %v7758_v8  ;;  %4540 = vmatmul.bf16.gmra.mxu3 %v8214_v52  ;;  %v8519_v8 = vld [vmem:[%s9183_s30 + $0x30] sm:$0xf0]  ;;  %v6458_v50 = vor.u32 %v8518_v10, %v6457_v59 }
 0x31c   : > { %4460 = vmatmul.bf16.gmra.mxu2 %v7766_v18  ;;  %v8515_v52 = vld [vmem:[%s9183_s30 + $0x14] sm:$0xf] }
 0x31d   : > { %4131 = vmatmul.bf16.gmra.mxu1 %v7762_v49 }
 0x31e   : > { %v4501_v24 = vpop.f32.mrf.mxu3 }
 0x31f   : > { %v4421_v47 = vpop.f32.mrf.mxu2  ;;  %v10179_v21 = vadd.f32 %v4501_v24, %v9801_v42 }
 0x320   : > { %v10181_v51 = vadd.f32 %v4421_v47, %v4093_v26  ;;  %v3765_v2 = vpop.f32.mrf.mxu0  ;;  %v6454_v26 = vor.u32 %v8514_v4, %v6451_v39 }
 0x321   : > { %11199 = vst [vmem:[#allocation70_spill] sm:$0xff] %v10179_v21  ;;  %v3766_v33 = vadd.f32 %v9998_v23, %v3765_v2  ;;  %v6466_v2 = vor.u32 %v8519_v8, %v6465_v54  ;;  %v8521_v8 = vld [vmem:[%s9183_s30 + $0x44] sm:$0xf] }
 0x322   : > { %v4094_v40 = vpop.f32.mrf.mxu1 }
 0x323   : > { %v4095_v16 = vadd.f32 %v4094_v40, %v3766_v33  ;;  %v6462_v33 = vor.u32 %v8515_v52, %v6459_v17  ;;  %v6479_v52 = vld [vmem:[%s9183_s30 + $0x5c] sm:$0xf0]  ;;  %v6485_v17 = vld [vmem:[%s9183_s30 + $0x48] sm:$0xf] }
 0x326   : > { %v4503_v18 = vpop.f32.mrf.mxu3 }
 0x327   : > { %v4423_v49 = vpop.f32.mrf.mxu2  ;;  %v10193_v42 = vadd.f32 %v4503_v18, %v9816_v53  ;;  %v8525_v18 = vld [vmem:[%s9183_s30 + $0x60] sm:$0xf0] }
 0x328   : > { %v10195_v24 = vadd.f32 %v4423_v49, %v4095_v16  ;;  %v3768_v47 = vpop.f32.mrf.mxu0  ;;  %v6493_v49 = vld [vmem:[%s9183_s30 + $0x50] sm:$0xf] }
 0x329   : > { %11200 = vst [vmem:[#allocation71_spill] sm:$0xff] %v10193_v42  ;;  %v3769_v40 = vadd.f32 %v9998_v23, %v3768_v47  ;;  %v6487_v47 = vld [vmem:[%s9183_s30 + $0x64] sm:$0xf0] }
 0x32a   : > { %v4097_v21 = vpop.f32.mrf.mxu1 }
 0x32b   : > { %v4098_v0 = vadd.f32 %v4097_v21, %v3769_v40  ;;  %4554 = vmatmul.bf16.vlgmr.msrb.gmra.mxu3 %v6454_v26  ;;  %4883 = vmatmul.bf16.vlgmr.msrb.gmra.mxu0 %v6458_v50  ;;  %v8526_v26 = vld [vmem:[%s9183_s30 + $0x68] sm:$0xf0]  ;;  %v6486_v40 = vor.u32 %v8525_v18, %v6485_v17 }
 0x32c   : > { %8447 = vmatmul.msk.bf16.vlgmr.msrb.gmra.mxu2 %vm3366_vm0, %v6466_v2  ;;  %v8522_v50 = vld [vmem:[%s9183_s30 + $0x4c] sm:$0xf] }
 0x32d   : > { %5212 = vmatmul.bf16.vlgmr.msrb.gmra.mxu1 %v6462_v33 }
 0x32e   : > { %v4506_v53 = vpop.f32.mrf.mxu3 }
 0x32f   : > { %v4426_v16 = vpop.f32.mrf.mxu2  ;;  %v10200_v4 = vadd.f32 %v4506_v53, %v9826_v57 }
 0x330   : > { %v10202_v39 = vadd.f32 %v4426_v16, %v4098_v0  ;;  %v3770_v59 = vpop.f32.mrf.mxu0  ;;  %v6482_v0 = vor.u32 %v8521_v8, %v6479_v52 }
 0x331   : > { %11201 = vst [vmem:[#allocation72_spill] sm:$0xff] %v10200_v4  ;;  %v3771_v21 = vadd.f32 %v9998_v23, %v3770_v59  ;;  %v6494_v59 = vor.u32 %v8526_v26, %v6493_v49  ;;  %v8528_v26 = vld [vmem:[%s9183_s30 + $0x7c] sm:$0xf] }
 0x332   : > { %v4099_v10 = vpop.f32.mrf.mxu1 }
 0x333   : > { %v4100_v54 = vadd.f32 %v4099_v10, %v3771_v21  ;;  %v6490_v21 = vor.u32 %v8522_v50, %v6487_v47  ;;  %v6507_v50 = vld [vmem:[%s9183_s30 + $0x94] sm:$0xf0]  ;;  %v6513_v47 = vld [vmem:[%s9183_s30 + $0x80] sm:$0xf] }
 0x336   : > { %v4508_v2 = vpop.f32.mrf.mxu3 }
 0x337   : > { %v4428_v33 = vpop.f32.mrf.mxu2  ;;  %v10214_v57 = vadd.f32 %v4508_v2, %v9841_v22  ;;  %v8532_v2 = vld [vmem:[%s9183_s30 + $0x98] sm:$0xf0] }
 0x338   : > { %v10216_v53 = vadd.f32 %v4428_v33, %v4100_v54  ;;  %v3773_v16 = vpop.f32.mrf.mxu0  ;;  %v6521_v33 = vld [vmem:[%s9183_s30 + $0x88] sm:$0xf] }
 0x339   : > { %11202 = vst [vmem:[#allocation73_spill] sm:$0xff] %v10214_v57  ;;  %v3774_v10 = vadd.f32 %v9998_v23, %v3773_v16  ;;  %v6515_v16 = vld [vmem:[%s9183_s30 + $0x9c] sm:$0xf0] }
 0x33a   : > { %v4102_v4 = vpop.f32.mrf.mxu1 }
 0x33b   : > { %v4103_v42 = vadd.f32 %v4102_v4, %v3774_v10  ;;  %4559 = vmatmul.bf16.gmra.mxu3 %v6482_v0  ;;  %4888 = vmatmul.bf16.gmra.mxu0 %v6486_v40  ;;  %v8533_v0 = vld [vmem:[%s9183_s30 + $0xa0] sm:$0xf0]  ;;  %v6514_v10 = vor.u32 %v8532_v2, %v6513_v47 }
 0x33c   : > { %8448 = vmatmul.msk.bf16.gmra.mxu2 %vm3366_vm0, %v6494_v59  ;;  %v8529_v40 = vld [vmem:[%s9183_s30 + $0x84] sm:$0xf] }
 0x33d   : > { %5217 = vmatmul.bf16.gmra.mxu1 %v6490_v21 }
 0x33e   : > { %v4511_v22 = vpop.f32.mrf.mxu3 }
 0x33f   : > { %v4431_v54 = vpop.f32.mrf.mxu2  ;;  %v10221_v8 = vadd.f32 %v4511_v22, %v9848_v12 }
 0x340   : > { %v10223_v52 = vadd.f32 %v4431_v54, %v4103_v42  ;;  %v3775_v17 = vpop.f32.mrf.mxu0  ;;  %v6510_v42 = vor.u32 %v8528_v26, %v6507_v50 }
 0x341   : > { %11203 = vst [vmem:[#allocation74_spill] sm:$0xff] %v10221_v8  ;;  %v3776_v4 = vadd.f32 %v9998_v23, %v3775_v17  ;;  %v6522_v17 = vor.u32 %v8533_v0, %v6521_v33  ;;  %v8535_v0 = vld [vmem:[%s9183_s30 + $0xb4] sm:$0xf] }
 0x342   : > { %v4104_v18 = vpop.f32.mrf.mxu1 }
 0x343   : > { %v4105_v49 = vadd.f32 %v4104_v18, %v3776_v4  ;;  %v6518_v4 = vor.u32 %v8529_v40, %v6515_v16  ;;  %v6535_v40 = vld [vmem:[%s9183_s30 + $0xcc] sm:$0xf0]  ;;  %v6541_v16 = vld [vmem:[%s9183_s30 + $0xb8] sm:$0xf] }
 0x346   : > { %v4513_v59 = vpop.f32.mrf.mxu3 }
 0x347   : > { %v4433_v21 = vpop.f32.mrf.mxu2  ;;  %v10235_v12 = vadd.f32 %v4513_v59, %v9863_v41  ;;  %v8539_v59 = vld [vmem:[%s9183_s30 + $0xd0] sm:$0xf0] }
 0x348   : > { %v10237_v22 = vadd.f32 %v4433_v21, %v4105_v49  ;;  %v3778_v54 = vpop.f32.mrf.mxu0  ;;  %v6549_v21 = vld [vmem:[%s9183_s30 + $0xc0] sm:$0xf] }
 0x349   : > { %11204 = vst [vmem:[#allocation75_spill] sm:$0xff] %v10235_v12  ;;  %v3779_v18 = vadd.f32 %v9998_v23, %v3778_v54  ;;  %v6543_v54 = vld [vmem:[%s9183_s30 + $0xd4] sm:$0xf0] }
 0x34a   : > { %v4107_v8 = vpop.f32.mrf.mxu1 }
 0x34b   : > { %v4108_v57 = vadd.f32 %v4107_v8, %v3779_v18  ;;  %4564 = vmatmul.bf16.gmra.mxu3 %v6510_v42  ;;  %4893 = vmatmul.bf16.gmra.mxu0 %v6514_v10  ;;  %v8540_v42 = vld [vmem:[%s9183_s30 + $0xd8] sm:$0xf0]  ;;  %v6542_v18 = vor.u32 %v8539_v59, %v6541_v16 }
 0x34c   : > { %8449 = vmatmul.msk.bf16.gmra.mxu2 %vm3366_vm0, %v6522_v17  ;;  %v8536_v10 = vld [vmem:[%s9183_s30 + $0xbc] sm:$0xf] }
 0x34d   : > { %5222 = vmatmul.bf16.gmra.mxu1 %v6518_v4 }
 0x34e   : > { %v4516_v41 = vpop.f32.mrf.mxu3 }
 0x34f   : > { %v4436_v49 = vpop.f32.mrf.mxu2  ;;  %v10242_v26 = vadd.f32 %v4516_v41, %v9873_v25 }
 0x350   : > { %v10244_v50 = vadd.f32 %v4436_v49, %v4108_v57  ;;  %v3780_v47 = vpop.f32.mrf.mxu0  ;;  %v6538_v57 = vor.u32 %v8535_v0, %v6535_v40 }
 0x351   : > { %11205 = vst [vmem:[#allocation76_spill] sm:$0xff] %v10242_v26  ;;  %v3781_v8 = vadd.f32 %v9998_v23, %v3780_v47  ;;  %v6550_v47 = vor.u32 %v8540_v42, %v6549_v21  ;;  %v8542_v42 = vld [vmem:[%s9183_s30 + $0xec] sm:$0xf] }
 0x352   : > { %v4109_v2 = vpop.f32.mrf.mxu1 }
 0x353   : > { %v4110_v33 = vadd.f32 %v4109_v2, %v3781_v8  ;;  %v6546_v8 = vor.u32 %v8536_v10, %v6543_v54  ;;  %v6563_v10 = vld [vmem:[%s9183_s30 + $0x104] sm:$0xf0]  ;;  %v6569_v54 = vld [vmem:[%s9183_s30 + $0xf0] sm:$0xf] }
 0x356   : > { %v4518_v17 = vpop.f32.mrf.mxu3 }
 0x357   : > { %v4438_v4 = vpop.f32.mrf.mxu2  ;;  %v10256_v25 = vadd.f32 %v4518_v17, %v9894_v6  ;;  %v8546_v17 = vld [vmem:[%s9183_s30 + $0x108] sm:$0xf0] }
 0x358   : > { %v10258_v41 = vadd.f32 %v4438_v4, %v4110_v33  ;;  %v3783_v49 = vpop.f32.mrf.mxu0  ;;  %v6577_v4 = vld [vmem:[%s9183_s30 + $0xf8] sm:$0xf] }
 0x359   : > { %11206 = vst [vmem:[#allocation77_spill] sm:$0xff] %v10256_v25  ;;  %v3784_v2 = vadd.f32 %v9998_v23, %v3783_v49  ;;  %v6571_v49 = vld [vmem:[%s9183_s30 + $0x10c] sm:$0xf0] }
 0x35a   : > { %v4112_v26 = vpop.f32.mrf.mxu1 }
 0x35b   : > { %v4113_v12 = vadd.f32 %v4112_v26, %v3784_v2  ;;  %4569 = vmatmul.bf16.gmra.mxu3 %v6538_v57  ;;  %4898 = vmatmul.bf16.gmra.mxu0 %v6542_v18  ;;  %v8547_v57 = vld [vmem:[%s9183_s30 + $0x110] sm:$0xf0]  ;;  %v6570_v2 = vor.u32 %v8546_v17, %v6569_v54 }
 0x35c   : > { %8450 = vmatmul.msk.bf16.gmra.mxu2 %vm3366_vm0, %v6550_v47  ;;  %v8543_v18 = vld [vmem:[%s9183_s30 + $0xf4] sm:$0xf] }
 0x35d   : > { %5227 = vmatmul.bf16.gmra.mxu1 %v6546_v8 }
 0x35e   : > { %v4521_v6 = vpop.f32.mrf.mxu3 }
 0x35f   : > { %v4441_v33 = vpop.f32.mrf.mxu2  ;;  %v10263_v0 = vadd.f32 %v4521_v6, %v9901_v56 }
 0x360   : > { %v10265_v40 = vadd.f32 %v4441_v33, %v4113_v12  ;;  %v3785_v16 = vpop.f32.mrf.mxu0  ;;  %v6566_v12 = vor.u32 %v8542_v42, %v6563_v10 }
 0x361   : > { %11207 = vst [vmem:[#allocation78_spill] sm:$0xff] %v10263_v0  ;;  %v3786_v26 = vadd.f32 %v9998_v23, %v3785_v16  ;;  %v6578_v16 = vor.u32 %v8547_v57, %v6577_v4  ;;  %v8549_v57 = vld [vmem:[%s9183_s30 + $0x124] sm:$0xf] }
 0x362   : > { %v4114_v59 = vpop.f32.mrf.mxu1 }
 0x363   : > { %v4115_v21 = vadd.f32 %v4114_v59, %v3786_v26  ;;  %v6574_v26 = vor.u32 %v8543_v18, %v6571_v49  ;;  %v6591_v18 = vld [vmem:[%s9183_s30 + $0x13c] sm:$0xf0]  ;;  %v6597_v49 = vld [vmem:[%s9183_s30 + $0x128] sm:$0xf] }
 0x366   : > { %v4523_v47 = vpop.f32.mrf.mxu3 }
 0x367   : > { %v4443_v8 = vpop.f32.mrf.mxu2  ;;  %v10277_v56 = vadd.f32 %v4523_v47, %v9916_v36  ;;  %v8553_v47 = vld [vmem:[%s9183_s30 + $0x140] sm:$0xf0] }
 0x368   : > { %v10279_v6 = vadd.f32 %v4443_v8, %v4115_v21  ;;  %v3788_v33 = vpop.f32.mrf.mxu0  ;;  %v6605_v8 = vld [vmem:[%s9183_s30 + $0x130] sm:$0xf] }
 0x369   : > { %11208 = vst [vmem:[#allocation79_spill] sm:$0xff] %v10277_v56  ;;  %v3789_v59 = vadd.f32 %v9998_v23, %v3788_v33  ;;  %v6599_v33 = vld [vmem:[%s9183_s30 + $0x144] sm:$0xf0] }
 0x36a   : > { %v4117_v0 = vpop.f32.mrf.mxu1 }
 0x36b   : > { %v4118_v25 = vadd.f32 %v4117_v0, %v3789_v59  ;;  %4574 = vmatmul.bf16.gmra.mxu3 %v6566_v12  ;;  %4903 = vmatmul.bf16.gmra.mxu0 %v6570_v2  ;;  %v8554_v12 = vld [vmem:[%s9183_s30 + $0x148] sm:$0xf0]  ;;  %v6598_v59 = vor.u32 %v8553_v47, %v6597_v49 }
 0x36c   : > { %8451 = vmatmul.msk.bf16.gmra.mxu2 %vm3366_vm0, %v6578_v16  ;;  %v8550_v2 = vld [vmem:[%s9183_s30 + $0x12c] sm:$0xf] }
 0x36d   : > { %5232 = vmatmul.bf16.gmra.mxu1 %v6574_v26 }
 0x36e   : > { %v4526_v36 = vpop.f32.mrf.mxu3 }
 0x36f   : > { %v4446_v21 = vpop.f32.mrf.mxu2  ;;  %v10284_v42 = vadd.f32 %v4526_v36, %v9926_v45 }
 0x370   : > { %v10286_v10 = vadd.f32 %v4446_v21, %v4118_v25  ;;  %v3790_v54 = vpop.f32.mrf.mxu0  ;;  %v6594_v25 = vor.u32 %v8549_v57, %v6591_v18 }
 0x371   : > { %11209 = vst [vmem:[#allocation80_spill] sm:$0xff] %v10284_v42  ;;  %v3791_v0 = vadd.f32 %v9998_v23, %v3790_v54  ;;  %v6606_v54 = vor.u32 %v8554_v12, %v6605_v8  ;;  %v8556_v12 = vld [vmem:[%s9183_s30 + $0x15c] sm:$0xf] }
 0x372   : > { %v4119_v17 = vpop.f32.mrf.mxu1 }
 0x373   : > { %v4120_v4 = vadd.f32 %v4119_v17, %v3791_v0  ;;  %v6602_v0 = vor.u32 %v8550_v2, %v6599_v33  ;;  %v6619_v2 = vld [vmem:[%s9183_s30 + $0x174] sm:$0xf0]  ;;  %v6625_v33 = vld [vmem:[%s9183_s30 + $0x160] sm:$0xf] }
 0x376   : > { %v4528_v16 = vpop.f32.mrf.mxu3 }
 0x377   : > { %v4448_v26 = vpop.f32.mrf.mxu2  ;;  %v10298_v45 = vadd.f32 %v4528_v16, %v9941_v11  ;;  %v8560_v16 = vld [vmem:[%s9183_s30 + $0x178] sm:$0xf0] }
 0x378   : > { %v10300_v36 = vadd.f32 %v4448_v26, %v4120_v4  ;;  %v3793_v21 = vpop.f32.mrf.mxu0  ;;  %v6633_v26 = vld [vmem:[%s9183_s30 + $0x168] sm:$0xf] }
 0x379   : > { %11210 = vst [vmem:[#allocation81_spill] sm:$0xff] %v10298_v45  ;;  %v3794_v17 = vadd.f32 %v9998_v23, %v3793_v21  ;;  %v6627_v21 = vld [vmem:[%s9183_s30 + $0x17c] sm:$0xf0] }
 0x37a   : > { %v4122_v42 = vpop.f32.mrf.mxu1 }
 0x37b   : > { %v4123_v56 = vadd.f32 %v4122_v42, %v3794_v17  ;;  %4579 = vmatmul.bf16.gmra.mxu3 %v6594_v25  ;;  %4908 = vmatmul.bf16.gmra.mxu0 %v6598_v59  ;;  %v8561_v25 = vld [vmem:[%s9183_s30 + $0x180] sm:$0xf0]  ;;  %v6626_v17 = vor.u32 %v8560_v16, %v6625_v33 }
 0x37c   : > { %8452 = vmatmul.msk.bf16.gmra.mxu2 %vm3366_vm0, %v6606_v54  ;;  %v8557_v59 = vld [vmem:[%s9183_s30 + $0x164] sm:$0xf] }
 0x37d   : > { %5237 = vmatmul.bf16.gmra.mxu1 %v6602_v0 }
 0x37e   : > { %v4531_v11 = vpop.f32.mrf.mxu3 }
 0x37f   : > { %v4451_v4 = vpop.f32.mrf.mxu2  ;;  %v10305_v57 = vadd.f32 %v4531_v11, %v9948_v3 }
 0x380   : > { %v10307_v18 = vadd.f32 %v4451_v4, %v4123_v56  ;;  %v3795_v49 = vpop.f32.mrf.mxu0  ;;  %v6622_v56 = vor.u32 %v8556_v12, %v6619_v2 }
 0x381   : > { %11211 = vst [vmem:[#allocation82_spill] sm:$0xff] %v10305_v57  ;;  %v3796_v42 = vadd.f32 %v9998_v23, %v3795_v49  ;;  %v6634_v49 = vor.u32 %v8561_v25, %v6633_v26  ;;  %v8563_v25 = vld [vmem:[%s9183_s30 + $0x194] sm:$0xf] }
 0x382   : > { %v4124_v47 = vpop.f32.mrf.mxu1 }
 0x383   : > { %v4125_v8 = vadd.f32 %v4124_v47, %v3796_v42  ;;  %v6630_v42 = vor.u32 %v8557_v59, %v6627_v21  ;;  %v6647_v59 = vld [vmem:[%s9183_s30 + $0x1ac] sm:$0xf0]  ;;  %v6653_v21 = vld [vmem:[%s9183_s30 + $0x198] sm:$0xf] }
 0x386   : > { %v4533_v54 = vpop.f32.mrf.mxu3 }
 0x387   : > { %v4453_v0 = vpop.f32.mrf.mxu2  ;;  %v10319_v3 = vadd.f32 %v4533_v54, %v9963_v37  ;;  %v8567_v54 = vld [vmem:[%s9183_s30 + $0x1b0] sm:$0xf0] }
 0x388   : > { %v10321_v11 = vadd.f32 %v4453_v0, %v4125_v8  ;;  %v3798_v4 = vpop.f32.mrf.mxu0  ;;  %v6661_v0 = vld [vmem:[%s9183_s30 + $0x1a0] sm:$0xf] }
 0x389   : > { %11212 = vst [vmem:[#allocation83_spill] sm:$0xff] %v10319_v3  ;;  %v3799_v47 = vadd.f32 %v9998_v23, %v3798_v4  ;;  %v6655_v4 = vld [vmem:[%s9183_s30 + $0x1b4] sm:$0xf0] }
 0x38a   : > { %v4127_v57 = vpop.f32.mrf.mxu1 }
 0x38b   : > { %v4128_v45 = vadd.f32 %v4127_v57, %v3799_v47  ;;  %4584 = vmatmul.bf16.gmra.mxu3 %v6622_v56  ;;  %4913 = vmatmul.bf16.gmra.mxu0 %v6626_v17  ;;  %v8568_v56 = vld [vmem:[%s9183_s30 + $0x1b8] sm:$0xf0]  ;;  %v6654_v47 = vor.u32 %v8567_v54, %v6653_v21 }
 0x38c   : > { %8453 = vmatmul.msk.bf16.gmra.mxu2 %vm3366_vm0, %v6634_v49  ;;  %v8564_v17 = vld [vmem:[%s9183_s30 + $0x19c] sm:$0xf] }
 0x38d   : > { %5242 = vmatmul.bf16.gmra.mxu1 %v6630_v42 }
 0x38e   : > { %v4536_v37 = vpop.f32.mrf.mxu3 }
 0x38f   : > { %v4456_v8 = vpop.f32.mrf.mxu2  ;;  %v10326_v12 = vadd.f32 %v4536_v37, %v9973_v9 }
 0x390   : > { %v10328_v2 = vadd.f32 %v4456_v8, %v4128_v45  ;;  %v3800_v33 = vpop.f32.mrf.mxu0  ;;  %v6650_v45 = vor.u32 %v8563_v25, %v6647_v59  ;;  %v6662_v8 = vor.u32 %v8568_v56, %v6661_v0  ;;  %v8570_v56 = vld [vmem:[%s9183_s30 + $0x1cc] sm:$0xf] }
 0x391   : > { %11213 = vst [vmem:[#allocation84_spill] sm:$0xff] %v10326_v12  ;;  %v3801_v57 = vadd.f32 %v9998_v23, %v3800_v33  ;;  %v6658_v33 = vor.u32 %v8564_v17, %v6655_v4  ;;  %v6675_v17 = vld [vmem:[%s9183_s30 + $0x1e4] sm:$0xf0]  ;;  %v6681_v4 = vld [vmem:[%s9183_s30 + $0x1d0] sm:$0xf] }
 0x392   : > { %v4129_v16 = vpop.f32.mrf.mxu1 }
 0x393   : > { %v4130_v26 = vadd.f32 %v4129_v16, %v3801_v57  ;;  %v9051_v57 = vld [vmem:[%s11129_s2] ss:$0 sm:$0xff] }
 0x396   : > { %v4538_v49 = vpop.f32.mrf.mxu3 }
 0x397   : > { %v4458_v42 = vpop.f32.mrf.mxu2  ;;  %v10340_v9 = vadd.f32 %v4538_v49, %v9991_v7  ;;  %v8574_v49 = vld [vmem:[%s9183_s30 + $0x1e8] sm:$0xf0] }
 0x398   : > { %v10342_v37 = vadd.f32 %v4458_v42, %v4130_v26  ;;  %v3803_v23 = vpop.f32.mrf.mxu0  ;;  %v6689_v42 = vld [vmem:[%s9183_s30 + $0x1d8] sm:$0xf] }
 0x399   : > { %11214 = vst [vmem:[#allocation85_spill] sm:$0xff] %v10340_v9  ;;  %v3804_v16 = vadd.f32 %v9051_v57, %v3803_v23  ;;  %v6683_v23 = vld [vmem:[%s9183_s30 + $0x1ec] sm:$0xf0] }
 0x39a   : > { %v4132_v12 = vpop.f32.mrf.mxu1 }
 0x39b   : > { %v4133_v3 = vadd.f32 %v4132_v12, %v3804_v16  ;;  %4589 = vmatmul.bf16.gmra.mxu3 %v6650_v45  ;;  %4918 = vmatmul.bf16.gmra.mxu0 %v6654_v47  ;;  %v8575_v45 = vld [vmem:[%s9183_s30 + $0x1f0] sm:$0xf0] }
 0x39c   : > { %8454 = vmatmul.msk.bf16.gmra.mxu2 %vm3366_vm0, %v6662_v8  ;;  %v8571_v47 = vld [vmem:[%s9183_s30 + $0x1d4] sm:$0xf] }
 0x39d   : > { %5247 = vmatmul.bf16.gmra.mxu1 %v6658_v33 }
 0x39e   : > { %v4541_v7 = vpop.f32.mrf.mxu3 }
 0x39f   : > { %v4461_v26 = vpop.f32.mrf.mxu2  ;;  %v10349_v25 = vadd.f32 %v4541_v7, %v10003_v30  ;;  %v6678_v30 = vor.u32 %v8570_v56, %v6675_v17 }
 0x3a0   : > { %v10351_v59 = vadd.f32 %v4461_v26, %v4133_v3  ;;  %v3805_v21 = vpop.f32.mrf.mxu0  ;;  %v6682_v3 = vor.u32 %v8574_v49, %v6681_v4  ;;  %v6690_v26 = vor.u32 %v8575_v45, %v6689_v42  ;;  %v8577_v42 = vld [vmem:[%s9183_s30 + $0x204] sm:$0xf]  ;;  %v6703_v45 = vld [vmem:[%s9183_s30 + $0x21c] sm:$0xf0] }
 0x3a1   : > { %11215 = vst [vmem:[#allocation86_spill] sm:$0xff] %v10349_v25  ;;  %v3806_v54 = vadd.f32 %v9051_v57, %v3805_v21  ;;  %v6686_v21 = vor.u32 %v8571_v47, %v6683_v23  ;;  %v6709_v47 = vld [vmem:[%s9183_s30 + $0x208] sm:$0xf]  ;;  %v8581_v23 = vld [vmem:[%s9183_s30 + $0x220] sm:$0xf0] }
 0x3a2   : > { %v4134_v12 = vpop.f32.mrf.mxu1 }
 0x3a3   : > { %v4135_v0 = vadd.f32 %v4134_v12, %v3806_v54 }
 0x3a6   : > { %v4543_v8 = vpop.f32.mrf.mxu3 }
 0x3a7   : > { %v4463_v33 = vpop.f32.mrf.mxu2  ;;  %v10362_v16 = vadd.f32 %v4543_v8, %v10018_v55  ;;  %v6717_v8 = vld [vmem:[%s9183_s30 + $0x210] sm:$0xf] }
 0x3a8   : > { %v10364_v7 = vadd.f32 %v4463_v33, %v4135_v0  ;;  %v4884_v57 = vpop.f32.mrf.mxu0 }
 0x3a9   : > { %11216 = vst [vmem:[#allocation87_spill] sm:$0xff] %v10362_v16  ;;  %v6706_v16 = vor.u32 %v8577_v42, %v6703_v45 }
 0x3aa   : > { %v5213_v54 = vpop.f32.mrf.mxu1 }
 0x3ab   : > { %4594 = vmatmul.bf16.gmra.mxu3 %v6678_v30  ;;  %4923 = vmatmul.bf16.gmra.mxu0 %v6682_v3  ;;  %v8582_v30 = vld [vmem:[%s9183_s30 + $0x228] sm:$0xf0] }
 0x3ac   : > { %8455 = vmatmul.msk.bf16.gmra.mxu2 %vm3366_vm0, %v6690_v26  ;;  %v8578_v3 = vld [vmem:[%s9183_s30 + $0x20c] sm:$0xf]  ;;  %v6711_v26 = vld [vmem:[%s9183_s30 + $0x224] sm:$0xf0] }
 0x3ad   : > { %5252 = vmatmul.bf16.gmra.mxu1 %v6686_v21 }
 0x3ae   : > { %v4555_v55 = vpop.f32.mrf.mxu3 }
 0x3af   : > { %v4556_v12 = vadd.f32 %v4555_v55, %v9318_v20  ;;  %v5542_v0 = vpop.f32.mrf.mxu2  ;;  %v6710_v55 = vor.u32 %v8581_v23, %v6709_v47 }
 0x3b0   : > { %v4886_v56 = vpop.f32.mrf.mxu0 }
 0x3b1   : > { %v4885_v17 = vadd.f32 %v4884_v57, %v4556_v12 }
 0x3b2   : > { %v5215_v4 = vpop.f32.mrf.mxu1 }
 0x3b3   : > { %v5214_v49 = vadd.f32 %v5213_v54, %v4885_v17  ;;  %v6718_v17 = vor.u32 %v8582_v30, %v6717_v8  ;;  %v8584_v30 = vld [vmem:[%s9183_s30 + $0x23c] sm:$0xf] }
 0x3b5   : > { %v5543_v33 = vadd.f32 %v5542_v0, %v5214_v49  ;;  %v6714_v0 = vor.u32 %v8578_v3, %v6711_v26  ;;  %v6731_v3 = vld [vmem:[%s9183_s30 + $0x254] sm:$0xf0]  ;;  %v6737_v26 = vld [vmem:[%s9183_s30 + $0x240] sm:$0xf] }
 0x3b6   : > { %v4557_v21 = vpop.f32.mrf.mxu3 }
 0x3b7   : > { %vm5862_vm1 = vcmp.gt.f32.partialorder %v5543_v33, 0.0  ;;  %v5990_v20 = vmul.f32 0.15, %v5543_v33  ;;  %v4558_v57 = vadd.f32 %v4557_v21, %v9331_v34  ;;  %v5544_v54 = vpop.f32.mrf.mxu2  ;;  %v8588_v21 = vld [vmem:[%s9183_s30 + $0x258] sm:$0xf0] }
 0x3b8   : > { %v4889_v12 = vpop.f32.mrf.mxu0 }
 0x3b9   : > { %v6118_v49 = vsel %vm5862_vm1, %v5543_v33, %v5990_v20  ;;  %v4887_v25 = vadd.f32 %v4886_v56, %v4558_v57  ;;  %v6745_v20 = vld [vmem:[%s9183_s30 + $0x248] sm:$0xf] }
 0x3ba   : > { %v5218_v9 = vpop.f32.mrf.mxu1  ;;  %6246 = vst [vmem:[%s10380_s15] sm:$0xff] %v6118_v49 }
 0x3bb   : > { %v5216_v42 = vadd.f32 %v5215_v4, %v4887_v25  ;;  %4599 = vmatmul.bf16.gmra.mxu3 %v6706_v16  ;;  %4928 = vmatmul.bf16.gmra.mxu0 %v6710_v55  ;;  %v8585_v55 = vld [vmem:[%s9183_s30 + $0x244] sm:$0xf] }
 0x3bc   : > { %8456 = vmatmul.msk.bf16.gmra.mxu2 %vm3366_vm0, %v6718_v17  ;;  %v6739_v17 = vld [vmem:[%s9183_s30 + $0x25c] sm:$0xf0] }
 0x3bd   : > { %5257 = vmatmul.bf16.gmra.mxu1 %v6714_v0  ;;  %v5545_v34 = vadd.f32 %v5544_v54, %v5216_v42  ;;  %v8589_v54 = vld [vmem:[%s9183_s30 + $0x260] sm:$0xf0] }
 0x3be   : > { %v4560_v45 = vpop.f32.mrf.mxu3 }
 0x3bf   : > { %vm5863_vm2 = vcmp.gt.f32.partialorder %v5545_v34, 0.0  ;;  %v5991_v47 = vmul.f32 0.15, %v5545_v34  ;;  %v4561_v56 = vadd.f32 %v4560_v45, %v9336_v43  ;;  %v5547_v25 = vpop.f32.mrf.mxu2  ;;  %v6734_v43 = vor.u32 %v8584_v30, %v6731_v3 }
 0x3c0   : > { %v4891_v16 = vpop.f32.mrf.mxu0 }
 0x3c1   : > { %v6119_v4 = vsel %vm5863_vm2, %v5545_v34, %v5991_v47  ;;  %v4890_v23 = vadd.f32 %v4889_v12, %v4561_v56  ;;  %v6738_v34 = vor.u32 %v8588_v21, %v6737_v26  ;;  %v6742_v47 = vor.u32 %v8585_v55, %v6739_v17  ;;  %v6759_v55 = vld [vmem:[%s9183_s30 + $0x28c] sm:$0xf0]  ;;  %v6765_v17 = vld [vmem:[%s9183_s30 + $0x278] sm:$0xf] }
 0x3c2   : > { %v5220_v8 = vpop.f32.mrf.mxu1  ;;  %6247 = vst [vmem:[%s10380_s15 + $0x8] sm:$0xff] %v6119_v4 }
 0x3c3   : > { %v5219_v33 = vadd.f32 %v5218_v9, %v4890_v23  ;;  %v6746_v9 = vor.u32 %v8589_v54, %v6745_v20  ;;  %v8591_v54 = vld [vmem:[%s9183_s30 + $0x274] sm:$0xf] }
 0x3c5   : > { %v5548_v57 = vadd.f32 %v5547_v25, %v5219_v33 }
 0x3c6   : > { %v4562_v0 = vpop.f32.mrf.mxu3 }
 0x3c7   : > { %vm5864_vm3 = vcmp.gt.f32.partialorder %v5548_v57, 0.0  ;;  %v5992_v49 = vmul.f32 0.15, %v5548_v57  ;;  %v4563_v42 = vadd.f32 %v4562_v0, %v9349_v60  ;;  %v5549_v12 = vpop.f32.mrf.mxu2  ;;  %v8595_v0 = vld [vmem:[%s9183_s30 + $0x290] sm:$0xf0] }
 0x3c8   : > { %v4894_v45 = vpop.f32.mrf.mxu0 }
 0x3c9   : > { %v6120_v56 = vsel %vm5864_vm3, %v5548_v57, %v5992_v49  ;;  %v4892_v4 = vadd.f32 %v4891_v16, %v4563_v42  ;;  %v8596_v42 = vld [vmem:[%s9183_s30 + $0x298] sm:$0xf0] }
 0x3ca   : > { %v5223_v23 = vpop.f32.mrf.mxu1  ;;  %6248 = vst [vmem:[%s10380_s15 + $0x10] sm:$0xff] %v6120_v56 }
 0x3cb   : > { %v5221_v25 = vadd.f32 %v5220_v8, %v4892_v4  ;;  %4604 = vmatmul.bf16.gmra.mxu3 %v6734_v43  ;;  %4933 = vmatmul.bf16.gmra.mxu0 %v6738_v34  ;;  %v6773_v43 = vld [vmem:[%s9183_s30 + $0x280] sm:$0xf]  ;;  %v6767_v34 = vld [vmem:[%s9183_s30 + $0x294] sm:$0xf0]  ;;  %v6766_v4 = vor.u32 %v8595_v0, %v6765_v17 }
 0x3cc   : > { %8457 = vmatmul.msk.bf16.gmra.mxu2 %vm3366_vm0, %v6746_v9 }
 0x3cd   : > { %5262 = vmatmul.bf16.gmra.mxu1 %v6742_v47  ;;  %v5550_v60 = vadd.f32 %v5549_v12, %v5221_v25  ;;  %v8592_v12 = vld [vmem:[%s9183_s30 + $0x27c] sm:$0xf] }
 0x3ce   : > { %v4565_v33 = vpop.f32.mrf.mxu3 }
 0x3cf   : > { %vm5865_vm4 = vcmp.gt.f32.partialorder %v5550_v60, 0.0  ;;  %v5993_v30 = vmul.f32 0.15, %v5550_v60  ;;  %v4566_v16 = vadd.f32 %v4565_v33, %v9354_v1  ;;  %v5552_v8 = vpop.f32.mrf.mxu2  ;;  %v6762_v1 = vor.u32 %v8591_v54, %v6759_v55 }
 0x3d0   : > { %v4896_v3 = vpop.f32.mrf.mxu0 }
 0x3d1   : > { %v6121_v26 = vsel %vm5865_vm4, %v5550_v60, %v5993_v30  ;;  %v4895_v21 = vadd.f32 %v4894_v45, %v4566_v16  ;;  %v6770_v60 = vor.u32 %v8592_v12, %v6767_v34  ;;  %v8602_v12 = vld [vmem:[%s9183_s30 + $0x2c8] sm:$0xf0]  ;;  %v6801_v34 = vld [vmem:[%s9183_s30 + $0x2b8] sm:$0xf] }
 0x3d2   : > { %v5225_v20 = vpop.f32.mrf.mxu1  ;;  %6249 = vst [vmem:[%s10380_s15 + $0x18] sm:$0xff] %v6121_v26 }
 0x3d3   : > { %v5224_v57 = vadd.f32 %v5223_v23, %v4895_v21  ;;  %v6774_v23 = vor.u32 %v8596_v42, %v6773_v43  ;;  %v8598_v43 = vld [vmem:[%s9183_s30 + $0x2ac] sm:$0xf]  ;;  %v6793_v42 = vld [vmem:[%s9183_s30 + $0x2b0] sm:$0xf] }
 0x3d5   : > { %v5553_v49 = vadd.f32 %v5552_v8, %v5224_v57 }
 0x3d6   : > { %v4567_v9 = vpop.f32.mrf.mxu3 }
 0x3d7   : > { %vm5866_vm5 = vcmp.gt.f32.partialorder %v5553_v49, 0.0  ;;  %v5994_v47 = vmul.f32 0.15, %v5553_v49  ;;  %v4568_v56 = vadd.f32 %v4567_v9, %v9373_v27  ;;  %v5554_v45 = vpop.f32.mrf.mxu2 }
 0x3d8   : > { %v4899_v25 = vpop.f32.mrf.mxu0 }
 0x3d9   : > { %v6122_v33 = vsel %vm5866_vm5, %v5553_v49, %v5994_v47  ;;  %v4897_v30 = vadd.f32 %v4896_v3, %v4568_v56  ;;  %v6787_v49 = vld [vmem:[%s9183_s30 + $0x2c4] sm:$0xf0]  ;;  %v8599_v47 = vld [vmem:[%s9183_s30 + $0x2b4] sm:$0xf]  ;;  %v6795_v56 = vld [vmem:[%s9183_s30 + $0x2cc] sm:$0xf0] }
 0x3da   : > { %v5228_v16 = vpop.f32.mrf.mxu1  ;;  %6250 = vst [vmem:[%s10380_s15 + $0x20] sm:$0xff] %v6122_v33 }
 0x3db   : > { %v5226_v8 = vadd.f32 %v5225_v20, %v4897_v30  ;;  %4609 = vmatmul.bf16.gmra.mxu3 %v6762_v1  ;;  %4938 = vmatmul.bf16.gmra.mxu0 %v6766_v4  ;;  %v8603_v1 = vld [vmem:[%s9183_s30 + $0x2d0] sm:$0xf0] }
 0x3dc   : > { %8458 = vmatmul.msk.bf16.gmra.mxu2 %vm3366_vm0, %v6774_v23  ;;  %v6802_v30 = vor.u32 %v8603_v1, %v6801_v34  ;;  %v6815_v34 = vld [vmem:[%s9183_s30 + $0x2fc] sm:$0xf0]  ;;  %v8609_v1 = vld [vmem:[%s9183_s30 + $0x300] sm:$0xf0] }
 0x3dd   : > { %5267 = vmatmul.bf16.gmra.mxu1 %v6770_v60  ;;  %v5555_v27 = vadd.f32 %v5554_v45, %v5226_v8  ;;  %v6794_v60 = vor.u32 %v8602_v12, %v6793_v42  ;;  %v8605_v12 = vld [vmem:[%s9183_s30 + $0x2e4] sm:$0xf] }
 0x3de   : > { %v4570_v26 = vpop.f32.mrf.mxu3 }
 0x3df   : > { %vm5867_vm6 = vcmp.gt.f32.partialorder %v5555_v27, 0.0  ;;  %v5995_v21 = vmul.f32 0.15, %v5555_v27  ;;  %v4571_v3 = vadd.f32 %v4570_v26, %v9378_v38  ;;  %v5557_v20 = vpop.f32.mrf.mxu2  ;;  %v6790_v38 = vor.u32 %v8598_v43, %v6787_v49 }
 0x3e0   : > { %v4901_v57 = vpop.f32.mrf.mxu0 }
 0x3e1   : > { %v6123_v54 = vsel %vm5867_vm6, %v5555_v27, %v5995_v21  ;;  %v4900_v55 = vadd.f32 %v4899_v25, %v4571_v3 }
 0x3e2   : > { %v5230_v17 = vpop.f32.mrf.mxu1  ;;  %6251 = vst [vmem:[%s10380_s15 + $0x28] sm:$0xff] %v6123_v54 }
 0x3e3   : > { %v5229_v0 = vadd.f32 %v5228_v16, %v4900_v55  ;;  %v6798_v16 = vor.u32 %v8599_v47, %v6795_v56  ;;  %v6829_v47 = vld [vmem:[%s9183_s30 + $0x2f0] sm:$0xf] }
 0x3e5   : > { %v5558_v9 = vadd.f32 %v5557_v20, %v5229_v0 }
 0x3e6   : > { %v4572_v45 = vpop.f32.mrf.mxu3 }
 0x3e7   : > { %vm5868_vm7 = vcmp.gt.f32.partialorder %v5558_v9, 0.0  ;;  %v5996_v4 = vmul.f32 0.15, %v5558_v9  ;;  %v4573_v23 = vadd.f32 %v4572_v45, %v9391_v58  ;;  %v5559_v25 = vpop.f32.mrf.mxu2  ;;  %v8610_v45 = vld [vmem:[%s9183_s30 + $0x308] sm:$0xf0] }
 0x3e8   : > { %v4904_v33 = vpop.f32.mrf.mxu0 }
 0x3e9   : > { %v6124_v8 = vsel %vm5868_vm7, %v5558_v9, %v5996_v4  ;;  %v4902_v27 = vadd.f32 %v4901_v57, %v4573_v23  ;;  %v11217_v57 = vld [vmem:[#allocation2_spill] sm:$0xff]  ;;  %v6821_v9 = vld [vmem:[%s9183_s30 + $0x2e8] sm:$0xf] }
 0x3ea   : > { %v5233_v26 = vpop.f32.mrf.mxu1  ;;  %6252 = vst [vmem:[%s10380_s15 + $0x30] sm:$0xff] %v6124_v8  ;;  %v6823_v4 = vld [vmem:[%s9183_s30 + $0x304] sm:$0xf0]  ;;  %v6822_v8 = vor.u32 %v8609_v1, %v6821_v9 }
 0x3eb   : > { %v5231_v21 = vadd.f32 %v5230_v17, %v4902_v27  ;;  %4614 = vmatmul.bf16.gmra.mxu3 %v6790_v38  ;;  %4943 = vmatmul.bf16.gmra.mxu0 %v6794_v60  ;;  %v8606_v38 = vld [vmem:[%s9183_s30 + $0x2ec] sm:$0xf] }
 0x3ec   : > { %8459 = vmatmul.msk.bf16.gmra.mxu2 %vm3366_vm0, %v6802_v30  ;;  %v11218_v30 = vld [vmem:[#allocation3_spill] sm:$0xff] }
 0x3ed   : > { %5272 = vmatmul.bf16.gmra.mxu1 %v6798_v16  ;;  %v5560_v58 = vadd.f32 %v5559_v25, %v5231_v21  ;;  %v6818_v25 = vor.u32 %v8605_v12, %v6815_v34  ;;  %v6826_v21 = vor.u32 %v8606_v38, %v6823_v4  ;;  %v8616_v38 = vld [vmem:[%s9183_s30 + $0x338] sm:$0xf0]  ;;  %v6857_v4 = vld [vmem:[%s9183_s30 + $0x328] sm:$0xf] }
 0x3ee   : > { %v4575_v3 = vpop.f32.mrf.mxu3 }
 0x3ef   : > { %vm5869_vm8 = vcmp.gt.f32.partialorder %v5560_v58, 0.0  ;;  %v5997_v20 = vmul.f32 0.15, %v5560_v58  ;;  %v4576_v54 = vadd.f32 %v4575_v3, %v11217_v57  ;;  %v5562_v55 = vpop.f32.mrf.mxu2 }
 0x3f0   : > { %v4906_v17 = vpop.f32.mrf.mxu0 }
 0x3f1   : > { %v6125_v0 = vsel %vm5869_vm8, %v5560_v58, %v5997_v20  ;;  %v4905_v43 = vadd.f32 %v4904_v33, %v4576_v54 }
 0x3f2   : > { %v5235_v49 = vpop.f32.mrf.mxu1  ;;  %6253 = vst [vmem:[%s10380_s15 + $0x38] sm:$0xff] %v6125_v0 }
 0x3f3   : > { %v5234_v42 = vadd.f32 %v5233_v26, %v4905_v43  ;;  %v6830_v26 = vor.u32 %v8610_v45, %v6829_v47  ;;  %v8612_v47 = vld [vmem:[%s9183_s30 + $0x31c] sm:$0xf]  ;;  %v6849_v45 = vld [vmem:[%s9183_s30 + $0x320] sm:$0xf] }
 0x3f5   : > { %v5563_v56 = vadd.f32 %v5562_v55, %v5234_v42 }
 0x3f6   : > { %v4577_v23 = vpop.f32.mrf.mxu3 }
 0x3f7   : > { %vm5870_vm9 = vcmp.gt.f32.partialorder %v5563_v56, 0.0  ;;  %v5998_v60 = vmul.f32 0.15, %v5563_v56  ;;  %v4578_v16 = vadd.f32 %v4577_v23, %v11218_v30  ;;  %v5564_v33 = vpop.f32.mrf.mxu2  ;;  %v6851_v30 = vld [vmem:[%s9183_s30 + $0x33c] sm:$0xf0] }
 0x3f8   : > { %v4909_v27 = vpop.f32.mrf.mxu0 }
 0x3f9   : > { %v6126_v58 = vsel %vm5870_vm9, %v5563_v56, %v5998_v60  ;;  %v4907_v3 = vadd.f32 %v4906_v17, %v4578_v16  ;;  %v11219_v17 = vld [vmem:[#allocation4_spill] sm:$0xff]  ;;  %v6843_v56 = vld [vmem:[%s9183_s30 + $0x334] sm:$0xf0]  ;;  %v8613_v60 = vld [vmem:[%s9183_s30 + $0x324] sm:$0xf] }
 0x3fa   : > { %v5238_v20 = vpop.f32.mrf.mxu1  ;;  %6254 = vst [vmem:[%s10380_s15 + $0x40] sm:$0xff] %v6126_v58  ;;  %v6850_v58 = vor.u32 %v8616_v38, %v6849_v45 }
 0x3fb   : > { %v5236_v57 = vadd.f32 %v5235_v49, %v4907_v3  ;;  %4619 = vmatmul.bf16.gmra.mxu3 %v6818_v25  ;;  %4948 = vmatmul.bf16.gmra.mxu0 %v6822_v8  ;;  %v8617_v25 = vld [vmem:[%s9183_s30 + $0x340] sm:$0xf0] }
 0x3fc   : > { %8460 = vmatmul.msk.bf16.gmra.mxu2 %vm3366_vm0, %v6830_v26  ;;  %v11220_v26 = vld [vmem:[#allocation5_spill] sm:$0xff] }
 0x3fd   : > { %5277 = vmatmul.bf16.gmra.mxu1 %v6826_v21  ;;  %v5565_v54 = vadd.f32 %v5564_v33, %v5236_v57  ;;  %v6846_v33 = vor.u32 %v8612_v47, %v6843_v56  ;;  %v6854_v57 = vor.u32 %v8613_v60, %v6851_v30  ;;  %v8623_v60 = vld [vmem:[%s9183_s30 + $0x370] sm:$0xf0]  ;;  %v6885_v30 = vld [vmem:[%s9183_s30 + $0x360] sm:$0xf] }
 0x3fe   : > { %v4580_v55 = vpop.f32.mrf.mxu3 }
 0x3ff   : > { %vm5871_vm10 = vcmp.gt.f32.partialorder %v5565_v54, 0.0  ;;  %v5999_v0 = vmul.f32 0.15, %v5565_v54  ;;  %v4581_v43 = vadd.f32 %v4580_v55, %v11219_v17  ;;  %v5567_v49 = vpop.f32.mrf.mxu2 }
 0x400   : > { %v4911_v42 = vpop.f32.mrf.mxu0 }
 0x401   : > { %v6127_v12 = vsel %vm5871_vm10, %v5565_v54, %v5999_v0  ;;  %v4910_v34 = vadd.f32 %v4909_v27, %v4581_v43 }
 0x402   : > { %v5240_v9 = vpop.f32.mrf.mxu1  ;;  %6255 = vst [vmem:[%s10380_s15 + $0x48] sm:$0xff] %v6127_v12 }
 0x403   : > { %v5239_v1 = vadd.f32 %v5238_v20, %v4910_v34  ;;  %v6858_v20 = vor.u32 %v8617_v25, %v6857_v4  ;;  %v8619_v4 = vld [vmem:[%s9183_s30 + $0x354] sm:$0xf]  ;;  %v6877_v25 = vld [vmem:[%s9183_s30 + $0x358] sm:$0xf] }
 0x405   : > { %v5568_v23 = vadd.f32 %v5567_v49, %v5239_v1 }
 0x406   : > { %v4582_v16 = vpop.f32.mrf.mxu3 }
 0x407   : > { %vm5872_vm11 = vcmp.gt.f32.partialorder %v5568_v23, 0.0  ;;  %v6000_v8 = vmul.f32 0.15, %v5568_v23  ;;  %v4583_v21 = vadd.f32 %v4582_v16, %v11220_v26  ;;  %v5569_v27 = vpop.f32.mrf.mxu2  ;;  %v6879_v26 = vld [vmem:[%s9183_s30 + $0x374] sm:$0xf0] }
 0x408   : > { %v4914_v3 = vpop.f32.mrf.mxu0 }
 0x409   : > { %v6128_v54 = vsel %vm5872_vm11, %v5568_v23, %v6000_v8  ;;  %v4912_v55 = vadd.f32 %v4911_v42, %v4583_v21  ;;  %v11221_v42 = vld [vmem:[#allocation6_spill] sm:$0xff]  ;;  %v6871_v23 = vld [vmem:[%s9183_s30 + $0x36c] sm:$0xf0]  ;;  %v8620_v8 = vld [vmem:[%s9183_s30 + $0x35c] sm:$0xf] }
 0x40a   : > { %v5243_v0 = vpop.f32.mrf.mxu1  ;;  %6256 = vst [vmem:[%s10380_s15 + $0x50] sm:$0xff] %v6128_v54  ;;  %v6878_v54 = vor.u32 %v8623_v60, %v6877_v25 }
 0x40b   : > { %v5241_v17 = vadd.f32 %v5240_v9, %v4912_v55  ;;  %4624 = vmatmul.bf16.gmra.mxu3 %v6846_v33  ;;  %4953 = vmatmul.bf16.gmra.mxu0 %v6850_v58  ;;  %v8624_v33 = vld [vmem:[%s9183_s30 + $0x378] sm:$0xf0] }
 0x40c   : > { %8461 = vmatmul.msk.bf16.gmra.mxu2 %vm3366_vm0, %v6858_v20  ;;  %v11222_v20 = vld [vmem:[#allocation7_spill] sm:$0xff] }
 0x40d   : > { %5282 = vmatmul.bf16.gmra.mxu1 %v6854_v57  ;;  %v5570_v43 = vadd.f32 %v5569_v27, %v5241_v17  ;;  %v6874_v27 = vor.u32 %v8619_v4, %v6871_v23  ;;  %v6882_v17 = vor.u32 %v8620_v8, %v6879_v26  ;;  %v8630_v8 = vld [vmem:[%s9183_s30 + $0x3a8] sm:$0xf0]  ;;  %v6913_v26 = vld [vmem:[%s9183_s30 + $0x398] sm:$0xf] }
 0x40e   : > { %v4585_v49 = vpop.f32.mrf.mxu3 }
 0x40f   : > { %vm5873_vm12 = vcmp.gt.f32.partialorder %v5570_v43, 0.0  ;;  %v6001_v12 = vmul.f32 0.15, %v5570_v43  ;;  %v4586_v34 = vadd.f32 %v4585_v49, %v11221_v42  ;;  %v5572_v9 = vpop.f32.mrf.mxu2 }
 0x410   : > { %v4916_v1 = vpop.f32.mrf.mxu0 }
 0x411   : > { %v6129_v47 = vsel %vm5873_vm12, %v5570_v43, %v6001_v12  ;;  %v4915_v56 = vadd.f32 %v4914_v3, %v4586_v34 }
 0x412   : > { %v5245_v45 = vpop.f32.mrf.mxu1  ;;  %6257 = vst [vmem:[%s10380_s15 + $0x58] sm:$0xff] %v6129_v47 }
 0x413   : > { %v5244_v38 = vadd.f32 %v5243_v0, %v4915_v56  ;;  %v6886_v0 = vor.u32 %v8624_v33, %v6885_v30  ;;  %v8626_v30 = vld [vmem:[%s9183_s30 + $0x38c] sm:$0xf]  ;;  %v6905_v33 = vld [vmem:[%s9183_s30 + $0x390] sm:$0xf] }
 0x415   : > { %v5573_v16 = vadd.f32 %v5572_v9, %v5244_v38 }
 0x416   : > { %v4587_v21 = vpop.f32.mrf.mxu3 }
 0x417   : > { %vm5874_vm13 = vcmp.gt.f32.partialorder %v5573_v16, 0.0  ;;  %v6002_v58 = vmul.f32 0.15, %v5573_v16  ;;  %v4588_v57 = vadd.f32 %v4587_v21, %v11222_v20  ;;  %v5574_v3 = vpop.f32.mrf.mxu2  ;;  %v6907_v20 = vld [vmem:[%s9183_s30 + $0x3ac] sm:$0xf0] }
 0x418   : > { %v4919_v55 = vpop.f32.mrf.mxu0 }
 0x419   : > { %v6130_v43 = vsel %vm5874_vm13, %v5573_v16, %v6002_v58  ;;  %v4917_v49 = vadd.f32 %v4916_v1, %v4588_v57  ;;  %v11223_v1 = vld [vmem:[#allocation8_spill] sm:$0xff]  ;;  %v6899_v16 = vld [vmem:[%s9183_s30 + $0x3a4] sm:$0xf0] }
 0x41a   : > { %v5248_v12 = vpop.f32.mrf.mxu1  ;;  %6258 = vst [vmem:[%s10380_s15 + $0x60] sm:$0xff] %v6130_v43  ;;  %v8627_v58 = vld [vmem:[%s9183_s30 + $0x394] sm:$0xf]  ;;  %v6906_v43 = vor.u32 %v8630_v8, %v6905_v33 }
 0x41b   : > { %v5246_v42 = vadd.f32 %v5245_v45, %v4917_v49  ;;  %4629 = vmatmul.bf16.gmra.mxu3 %v6874_v27  ;;  %4958 = vmatmul.bf16.gmra.mxu0 %v6878_v54  ;;  %v8631_v27 = vld [vmem:[%s9183_s30 + $0x3b0] sm:$0xf0] }
 0x41c   : > { %8462 = vmatmul.msk.bf16.gmra.mxu2 %vm3366_vm0, %v6886_v0  ;;  %v11224_v0 = vld [vmem:[#allocation9_spill] sm:$0xff] }
 0x41d   : > { %5287 = vmatmul.bf16.gmra.mxu1 %v6882_v17  ;;  %v5575_v34 = vadd.f32 %v5574_v3, %v5246_v42  ;;  %v6902_v3 = vor.u32 %v8626_v30, %v6899_v16  ;;  %v6910_v42 = vor.u32 %v8627_v58, %v6907_v20  ;;  %v8637_v58 = vld [vmem:[%s9183_s30 + $0x3e0] sm:$0xf0]  ;;  %v6941_v20 = vld [vmem:[%s9183_s30 + $0x3d0] sm:$0xf] }
 0x41e   : > { %v4590_v9 = vpop.f32.mrf.mxu3 }
 0x41f   : > { %vm5875_vm14 = vcmp.gt.f32.partialorder %v5575_v34, 0.0  ;;  %v6003_v47 = vmul.f32 0.15, %v5575_v34  ;;  %v4591_v56 = vadd.f32 %v4590_v9, %v11223_v1  ;;  %v5577_v45 = vpop.f32.mrf.mxu2 }
 0x420   : > { %v4921_v38 = vpop.f32.mrf.mxu0 }
 0x421   : > { %v6131_v4 = vsel %vm5875_vm14, %v5575_v34, %v6003_v47  ;;  %v4920_v23 = vadd.f32 %v4919_v55, %v4591_v56 }
 0x422   : > { %v5250_v25 = vpop.f32.mrf.mxu1  ;;  %6259 = vst [vmem:[%s10380_s15 + $0x68] sm:$0xff] %v6131_v4 }
 0x423   : > { %v5249_v60 = vadd.f32 %v5248_v12, %v4920_v23  ;;  %v6914_v12 = vor.u32 %v8631_v27, %v6913_v26  ;;  %v8633_v26 = vld [vmem:[%s9183_s30 + $0x3c4] sm:$0xf]  ;;  %v6933_v27 = vld [vmem:[%s9183_s30 + $0x3c8] sm:$0xf] }
 0x425   : > { %v5578_v21 = vadd.f32 %v5577_v45, %v5249_v60 }
 0x426   : > { %v4592_v57 = vpop.f32.mrf.mxu3 }
 0x427   : > { %vm5876_vm15 = vcmp.gt.f32.partialorder %v5578_v21, 0.0  ;;  %v6004_v54 = vmul.f32 0.15, %v5578_v21  ;;  %v4593_v17 = vadd.f32 %v4592_v57, %v11224_v0  ;;  %v5579_v55 = vpop.f32.mrf.mxu2  ;;  %v6935_v0 = vld [vmem:[%s9183_s30 + $0x3e4] sm:$0xf0] }
 0x428   : > { %v4924_v49 = vpop.f32.mrf.mxu0 }
 0x429   : > { %v6132_v34 = vsel %vm5876_vm15, %v5578_v21, %v6004_v54  ;;  %v4922_v9 = vadd.f32 %v4921_v38, %v4593_v17  ;;  %v11225_v38 = vld [vmem:[#allocation10_spill] sm:$0xff]  ;;  %v8634_v54 = vld [vmem:[%s9183_s30 + $0x3cc] sm:$0xf] }
 0x42a   : > { %v5253_v47 = vpop.f32.mrf.mxu1  ;;  %6260 = vst [vmem:[%s10380_s15 + $0x70] sm:$0xff] %v6132_v34  ;;  %v6927_v21 = vld [vmem:[%s9183_s30 + $0x3dc] sm:$0xf0]  ;;  %v6934_v34 = vor.u32 %v8637_v58, %v6933_v27 }
 0x42b   : > { %v5251_v1 = vadd.f32 %v5250_v25, %v4922_v9  ;;  %4634 = vmatmul.bf16.gmra.mxu3 %v6902_v3  ;;  %4963 = vmatmul.bf16.gmra.mxu0 %v6906_v43  ;;  %v8638_v3 = vld [vmem:[%s9183_s30 + $0x3e8] sm:$0xf0] }
 0x42c   : > { %8463 = vmatmul.msk.bf16.gmra.mxu2 %vm3366_vm0, %v6914_v12  ;;  %v11226_v12 = vld [vmem:[#allocation11_spill] sm:$0xff] }
 0x42d   : > { %5292 = vmatmul.bf16.gmra.mxu1 %v6910_v42  ;;  %v5580_v56 = vadd.f32 %v5579_v55, %v5251_v1  ;;  %v6930_v55 = vor.u32 %v8633_v26, %v6927_v21  ;;  %v6938_v1 = vor.u32 %v8634_v54, %v6935_v0  ;;  %v8644_v54 = vld [vmem:[%s9183_s30 + $0x418] sm:$0xf0]  ;;  %v6969_v0 = vld [vmem:[%s9183_s30 + $0x408] sm:$0xf] }
 0x42e   : > { %v4595_v45 = vpop.f32.mrf.mxu3 }
 0x42f   : > { %vm5877_vm1 = vcmp.gt.f32.partialorder %v5580_v56, 0.0  ;;  %v6005_v4 = vmul.f32 0.15, %v5580_v56  ;;  %v4596_v23 = vadd.f32 %v4595_v45, %v11225_v38  ;;  %v5582_v25 = vpop.f32.mrf.mxu2 }
 0x430   : > { %v4926_v60 = vpop.f32.mrf.mxu0 }
 0x431   : > { %v6133_v30 = vsel %vm5877_vm1, %v5580_v56, %v6005_v4  ;;  %v4925_v16 = vadd.f32 %v4924_v49, %v4596_v23 }
 0x432   : > { %v5255_v33 = vpop.f32.mrf.mxu1  ;;  %6261 = vst [vmem:[%s10380_s15 + $0x78] sm:$0xff] %v6133_v30 }
 0x433   : > { %v5254_v8 = vadd.f32 %v5253_v47, %v4925_v16  ;;  %v6942_v47 = vor.u32 %v8638_v3, %v6941_v20  ;;  %v8640_v20 = vld [vmem:[%s9183_s30 + $0x3fc] sm:$0xf]  ;;  %v6961_v3 = vld [vmem:[%s9183_s30 + $0x400] sm:$0xf] }
 0x435   : > { %v5583_v57 = vadd.f32 %v5582_v25, %v5254_v8 }
 0x436   : > { %v4597_v17 = vpop.f32.mrf.mxu3 }
 0x437   : > { %vm5878_vm2 = vcmp.gt.f32.partialorder %v5583_v57, 0.0  ;;  %v6006_v43 = vmul.f32 0.15, %v5583_v57  ;;  %v4598_v42 = vadd.f32 %v4597_v17, %v11226_v12  ;;  %v5584_v49 = vpop.f32.mrf.mxu2  ;;  %v6963_v12 = vld [vmem:[%s9183_s30 + $0x41c] sm:$0xf0] }
 0x438   : > { %v4929_v9 = vpop.f32.mrf.mxu0 }
 0x439   : > { %v6134_v56 = vsel %vm5878_vm2, %v5583_v57, %v6006_v43  ;;  %v4927_v45 = vadd.f32 %v4926_v60, %v4598_v42  ;;  %v11227_v60 = vld [vmem:[#allocation12_spill] sm:$0xff]  ;;  %v6955_v57 = vld [vmem:[%s9183_s30 + $0x414] sm:$0xf0]  ;;  %v8641_v43 = vld [vmem:[%s9183_s30 + $0x404] sm:$0xf] }
 0x43a   : > { %v5258_v4 = vpop.f32.mrf.mxu1  ;;  %6262 = vst [vmem:[%s10380_s15 + $0x80] sm:$0xff] %v6134_v56  ;;  %v6962_v56 = vor.u32 %v8644_v54, %v6961_v3 }
 0x43b   : > { %v5256_v38 = vadd.f32 %v5255_v33, %v4927_v45  ;;  %4639 = vmatmul.bf16.gmra.mxu3 %v6930_v55  ;;  %4968 = vmatmul.bf16.gmra.mxu0 %v6934_v34  ;;  %v8645_v55 = vld [vmem:[%s9183_s30 + $0x420] sm:$0xf0] }
 0x43c   : > { %8464 = vmatmul.msk.bf16.gmra.mxu2 %vm3366_vm0, %v6942_v47  ;;  %v11228_v47 = vld [vmem:[#allocation13_spill] sm:$0xff] }
 0x43d   : > { %5297 = vmatmul.bf16.gmra.mxu1 %v6938_v1  ;;  %v5585_v23 = vadd.f32 %v5584_v49, %v5256_v38  ;;  %v6958_v49 = vor.u32 %v8640_v20, %v6955_v57  ;;  %v6966_v38 = vor.u32 %v8641_v43, %v6963_v12  ;;  %v8651_v43 = vld [vmem:[%s9183_s30 + $0x450] sm:$0xf0]  ;;  %v6997_v12 = vld [vmem:[%s9183_s30 + $0x440] sm:$0xf] }
 0x43e   : > { %v4600_v25 = vpop.f32.mrf.mxu3 }
 0x43f   : > { %vm5879_vm3 = vcmp.gt.f32.partialorder %v5585_v23, 0.0  ;;  %v6007_v30 = vmul.f32 0.15, %v5585_v23  ;;  %v4601_v16 = vadd.f32 %v4600_v25, %v11227_v60  ;;  %v5587_v33 = vpop.f32.mrf.mxu2 }
 0x440   : > { %v4931_v8 = vpop.f32.mrf.mxu0 }
 0x441   : > { %v6135_v26 = vsel %vm5879_vm3, %v5585_v23, %v6007_v30  ;;  %v4930_v21 = vadd.f32 %v4929_v9, %v4601_v16 }
 0x442   : > { %v5260_v27 = vpop.f32.mrf.mxu1  ;;  %6263 = vst [vmem:[%s10380_s15 + $0x88] sm:$0xff] %v6135_v26 }
 0x443   : > { %v5259_v58 = vadd.f32 %v5258_v4, %v4930_v21  ;;  %v6970_v4 = vor.u32 %v8645_v55, %v6969_v0  ;;  %v8647_v0 = vld [vmem:[%s9183_s30 + $0x434] sm:$0xf]  ;;  %v6989_v55 = vld [vmem:[%s9183_s30 + $0x438] sm:$0xf] }
 0x445   : > { %v5588_v17 = vadd.f32 %v5587_v33, %v5259_v58 }
 0x446   : > { %v4602_v42 = vpop.f32.mrf.mxu3 }
 0x447   : > { %vm5880_vm4 = vcmp.gt.f32.partialorder %v5588_v17, 0.0  ;;  %v6008_v34 = vmul.f32 0.15, %v5588_v17  ;;  %v4603_v1 = vadd.f32 %v4602_v42, %v11228_v47  ;;  %v5589_v9 = vpop.f32.mrf.mxu2  ;;  %v6991_v47 = vld [vmem:[%s9183_s30 + $0x454] sm:$0xf0] }
 0x448   : > { %v4934_v45 = vpop.f32.mrf.mxu0 }
 0x449   : > { %v6136_v23 = vsel %vm5880_vm4, %v5588_v17, %v6008_v34  ;;  %v4932_v25 = vadd.f32 %v4931_v8, %v4603_v1  ;;  %v11229_v8 = vld [vmem:[#allocation14_spill] sm:$0xff]  ;;  %v6983_v17 = vld [vmem:[%s9183_s30 + $0x44c] sm:$0xf0]  ;;  %v8648_v34 = vld [vmem:[%s9183_s30 + $0x43c] sm:$0xf] }
 0x44a   : > { %v5263_v30 = vpop.f32.mrf.mxu1  ;;  %6264 = vst [vmem:[%s10380_s15 + $0x90] sm:$0xff] %v6136_v23  ;;  %v6990_v23 = vor.u32 %v8651_v43, %v6989_v55 }
 0x44b   : > { %v5261_v60 = vadd.f32 %v5260_v27, %v4932_v25  ;;  %4644 = vmatmul.bf16.gmra.mxu3 %v6958_v49  ;;  %4973 = vmatmul.bf16.gmra.mxu0 %v6962_v56  ;;  %v8652_v49 = vld [vmem:[%s9183_s30 + $0x458] sm:$0xf0] }
 0x44c   : > { %8465 = vmatmul.msk.bf16.gmra.mxu2 %vm3366_vm0, %v6970_v4  ;;  %v11230_v4 = vld [vmem:[#allocation15_spill] sm:$0xff] }
 0x44d   : > { %5302 = vmatmul.bf16.gmra.mxu1 %v6966_v38  ;;  %v5590_v16 = vadd.f32 %v5589_v9, %v5261_v60  ;;  %v6986_v9 = vor.u32 %v8647_v0, %v6983_v17  ;;  %v6994_v60 = vor.u32 %v8648_v34, %v6991_v47  ;;  %v8658_v34 = vld [vmem:[%s9183_s30 + $0x488] sm:$0xf0]  ;;  %v7025_v47 = vld [vmem:[%s9183_s30 + $0x478] sm:$0xf] }
 0x44e   : > { %v4605_v33 = vpop.f32.mrf.mxu3 }
 0x44f   : > { %vm5881_vm5 = vcmp.gt.f32.partialorder %v5590_v16, 0.0  ;;  %v6009_v26 = vmul.f32 0.15, %v5590_v16  ;;  %v4606_v21 = vadd.f32 %v4605_v33, %v11229_v8  ;;  %v5592_v27 = vpop.f32.mrf.mxu2 }
 0x450   : > { %v4936_v58 = vpop.f32.mrf.mxu0 }
 0x451   : > { %v6137_v20 = vsel %vm5881_vm5, %v5590_v16, %v6009_v26  ;;  %v4935_v57 = vadd.f32 %v4934_v45, %v4606_v21 }
 0x452   : > { %v5265_v3 = vpop.f32.mrf.mxu1  ;;  %6265 = vst [vmem:[%s10380_s15 + $0x98] sm:$0xff] %v6137_v20 }
 0x453   : > { %v5264_v54 = vadd.f32 %v5263_v30, %v4935_v57  ;;  %v6998_v30 = vor.u32 %v8652_v49, %v6997_v12  ;;  %v8654_v12 = vld [vmem:[%s9183_s30 + $0x46c] sm:$0xf]  ;;  %v7017_v49 = vld [vmem:[%s9183_s30 + $0x470] sm:$0xf] }
 0x455   : > { %v5593_v42 = vadd.f32 %v5592_v27, %v5264_v54 }
 0x456   : > { %v4607_v1 = vpop.f32.mrf.mxu3 }
 0x457   : > { %vm5882_vm6 = vcmp.gt.f32.partialorder %v5593_v42, 0.0  ;;  %v6010_v56 = vmul.f32 0.15, %v5593_v42  ;;  %v4608_v38 = vadd.f32 %v4607_v1, %v11230_v4  ;;  %v5594_v45 = vpop.f32.mrf.mxu2  ;;  %v7019_v4 = vld [vmem:[%s9183_s30 + $0x48c] sm:$0xf0] }
 0x458   : > { %v4939_v25 = vpop.f32.mrf.mxu0 }
 0x459   : > { %v6138_v16 = vsel %vm5882_vm6, %v5593_v42, %v6010_v56  ;;  %v4937_v33 = vadd.f32 %v4936_v58, %v4608_v38  ;;  %v11231_v58 = vld [vmem:[#allocation16_spill] sm:$0xff]  ;;  %v7011_v42 = vld [vmem:[%s9183_s30 + $0x484] sm:$0xf0] }
 0x45a   : > { %v5268_v26 = vpop.f32.mrf.mxu1  ;;  %6266 = vst [vmem:[%s10380_s15 + $0xa0] sm:$0xff] %v6138_v16  ;;  %v8655_v56 = vld [vmem:[%s9183_s30 + $0x474] sm:$0xf]  ;;  %v7018_v16 = vor.u32 %v8658_v34, %v7017_v49 }
 0x45b   : > { %v5266_v8 = vadd.f32 %v5265_v3, %v4937_v33  ;;  %4649 = vmatmul.bf16.gmra.mxu3 %v6986_v9  ;;  %4978 = vmatmul.bf16.gmra.mxu0 %v6990_v23  ;;  %v8659_v9 = vld [vmem:[%s9183_s30 + $0x490] sm:$0xf0] }
 0x45c   : > { %8466 = vmatmul.msk.bf16.gmra.mxu2 %vm3366_vm0, %v6998_v30  ;;  %v11232_v30 = vld [vmem:[#allocation17_spill] sm:$0xff] }
 0x45d   : > { %5307 = vmatmul.bf16.gmra.mxu1 %v6994_v60  ;;  %v5595_v21 = vadd.f32 %v5594_v45, %v5266_v8  ;;  %v7014_v45 = vor.u32 %v8654_v12, %v7011_v42  ;;  %v7022_v8 = vor.u32 %v8655_v56, %v7019_v4  ;;  %v8665_v56 = vld [vmem:[%s9183_s30 + $0x4c0] sm:$0xf0]  ;;  %v7053_v4 = vld [vmem:[%s9183_s30 + $0x4b0] sm:$0xf] }
 0x45e   : > { %v4610_v27 = vpop.f32.mrf.mxu3 }
 0x45f   : > { %vm5883_vm7 = vcmp.gt.f32.partialorder %v5595_v21, 0.0  ;;  %v6011_v20 = vmul.f32 0.15, %v5595_v21  ;;  %v4611_v57 = vadd.f32 %v4610_v27, %v11231_v58  ;;  %v5597_v3 = vpop.f32.mrf.mxu2 }
 0x460   : > { %v4941_v54 = vpop.f32.mrf.mxu0 }
 0x461   : > { %v6139_v0 = vsel %vm5883_vm7, %v5595_v21, %v6011_v20  ;;  %v4940_v17 = vadd.f32 %v4939_v25, %v4611_v57 }
 0x462   : > { %v5270_v55 = vpop.f32.mrf.mxu1  ;;  %6267 = vst [vmem:[%s10380_s15 + $0xa8] sm:$0xff] %v6139_v0 }
 0x463   : > { %v5269_v43 = vadd.f32 %v5268_v26, %v4940_v17  ;;  %v7026_v26 = vor.u32 %v8659_v9, %v7025_v47  ;;  %v8661_v47 = vld [vmem:[%s9183_s30 + $0x4a4] sm:$0xf]  ;;  %v7045_v9 = vld [vmem:[%s9183_s30 + $0x4a8] sm:$0xf] }
 0x465   : > { %v5598_v1 = vadd.f32 %v5597_v3, %v5269_v43 }
 0x466   : > { %v4612_v38 = vpop.f32.mrf.mxu3 }
 0x467   : > { %vm5884_vm8 = vcmp.gt.f32.partialorder %v5598_v1, 0.0  ;;  %v6012_v23 = vmul.f32 0.15, %v5598_v1  ;;  %v4613_v60 = vadd.f32 %v4612_v38, %v11232_v30  ;;  %v5599_v25 = vpop.f32.mrf.mxu2  ;;  %v7047_v30 = vld [vmem:[%s9183_s30 + $0x4c4] sm:$0xf0] }
 0x468   : > { %v4944_v33 = vpop.f32.mrf.mxu0 }
 0x469   : > { %v6140_v21 = vsel %vm5884_vm8, %v5598_v1, %v6012_v23  ;;  %v4942_v27 = vadd.f32 %v4941_v54, %v4613_v60  ;;  %v11233_v54 = vld [vmem:[#allocation18_spill] sm:$0xff]  ;;  %v8662_v23 = vld [vmem:[%s9183_s30 + $0x4ac] sm:$0xf] }
 0x46a   : > { %v5273_v20 = vpop.f32.mrf.mxu1  ;;  %6268 = vst [vmem:[%s10380_s15 + $0xb0] sm:$0xff] %v6140_v21  ;;  %v7039_v1 = vld [vmem:[%s9183_s30 + $0x4bc] sm:$0xf0]  ;;  %v7046_v21 = vor.u32 %v8665_v56, %v7045_v9 }
 0x46b   : > { %v5271_v58 = vadd.f32 %v5270_v55, %v4942_v27  ;;  %4654 = vmatmul.bf16.gmra.mxu3 %v7014_v45  ;;  %4983 = vmatmul.bf16.gmra.mxu0 %v7018_v16  ;;  %v8666_v45 = vld [vmem:[%s9183_s30 + $0x4c8] sm:$0xf0] }
 0x46c   : > { %8467 = vmatmul.msk.bf16.gmra.mxu2 %vm3366_vm0, %v7026_v26  ;;  %v11234_v26 = vld [vmem:[#allocation19_spill] sm:$0xff] }
 0x46d   : > { %5312 = vmatmul.bf16.gmra.mxu1 %v7022_v8  ;;  %v5600_v57 = vadd.f32 %v5599_v25, %v5271_v58  ;;  %v7042_v25 = vor.u32 %v8661_v47, %v7039_v1  ;;  %v7050_v58 = vor.u32 %v8662_v23, %v7047_v30  ;;  %v8672_v23 = vld [vmem:[%s9183_s30 + $0x4f8] sm:$0xf0]  ;;  %v7081_v30 = vld [vmem:[%s9183_s30 + $0x4e8] sm:$0xf] }
 0x46e   : > { %v4615_v3 = vpop.f32.mrf.mxu3 }
 0x46f   : > { %vm5885_vm9 = vcmp.gt.f32.partialorder %v5600_v57, 0.0  ;;  %v6013_v0 = vmul.f32 0.15, %v5600_v57  ;;  %v4616_v17 = vadd.f32 %v4615_v3, %v11233_v54  ;;  %v5602_v55 = vpop.f32.mrf.mxu2 }
 0x470   : > { %v4946_v43 = vpop.f32.mrf.mxu0 }
 0x471   : > { %v6141_v12 = vsel %vm5885_vm9, %v5600_v57, %v6013_v0  ;;  %v4945_v42 = vadd.f32 %v4944_v33, %v4616_v17 }
 0x472   : > { %v5275_v49 = vpop.f32.mrf.mxu1  ;;  %6269 = vst [vmem:[%s10380_s15 + $0xb8] sm:$0xff] %v6141_v12 }
 0x473   : > { %v5274_v34 = vadd.f32 %v5273_v20, %v4945_v42  ;;  %v7054_v20 = vor.u32 %v8666_v45, %v7053_v4  ;;  %v8668_v4 = vld [vmem:[%s9183_s30 + $0x4dc] sm:$0xf]  ;;  %v7073_v45 = vld [vmem:[%s9183_s30 + $0x4e0] sm:$0xf] }
 0x475   : > { %v5603_v38 = vadd.f32 %v5602_v55, %v5274_v34 }
 0x476   : > { %v4617_v60 = vpop.f32.mrf.mxu3 }
 0x477   : > { %vm5886_vm10 = vcmp.gt.f32.partialorder %v5603_v38, 0.0  ;;  %v6014_v16 = vmul.f32 0.15, %v5603_v38  ;;  %v4618_v8 = vadd.f32 %v4617_v60, %v11234_v26  ;;  %v5604_v33 = vpop.f32.mrf.mxu2  ;;  %v7075_v26 = vld [vmem:[%s9183_s30 + $0x4fc] sm:$0xf0] }
 0x478   : > { %v4949_v27 = vpop.f32.mrf.mxu0 }
 0x479   : > { %v6142_v57 = vsel %vm5886_vm10, %v5603_v38, %v6014_v16  ;;  %v4947_v3 = vadd.f32 %v4946_v43, %v4618_v8  ;;  %v11235_v43 = vld [vmem:[#allocation20_spill] sm:$0xff]  ;;  %v7067_v38 = vld [vmem:[%s9183_s30 + $0x4f4] sm:$0xf0]  ;;  %v8669_v16 = vld [vmem:[%s9183_s30 + $0x4e4] sm:$0xf] }
 0x47a   : > { %v5278_v0 = vpop.f32.mrf.mxu1  ;;  %6270 = vst [vmem:[%s10380_s15 + $0xc0] sm:$0xff] %v6142_v57  ;;  %v7074_v57 = vor.u32 %v8672_v23, %v7073_v45 }
 0x47b   : > { %v5276_v54 = vadd.f32 %v5275_v49, %v4947_v3  ;;  %4659 = vmatmul.bf16.gmra.mxu3 %v7042_v25  ;;  %4988 = vmatmul.bf16.gmra.mxu0 %v7046_v21  ;;  %v8673_v25 = vld [vmem:[%s9183_s30 + $0x500] sm:$0xf0] }
 0x47c   : > { %8468 = vmatmul.msk.bf16.gmra.mxu2 %vm3366_vm0, %v7054_v20  ;;  %v11236_v20 = vld [vmem:[#allocation21_spill] sm:$0xff] }
 0x47d   : > { %5317 = vmatmul.bf16.gmra.mxu1 %v7050_v58  ;;  %v5605_v17 = vadd.f32 %v5604_v33, %v5276_v54  ;;  %v7070_v33 = vor.u32 %v8668_v4, %v7067_v38  ;;  %v7078_v54 = vor.u32 %v8669_v16, %v7075_v26  ;;  %v8679_v16 = vld [vmem:[%s9183_s30 + $0x530] sm:$0xf0]  ;;  %v7109_v26 = vld [vmem:[%s9183_s30 + $0x520] sm:$0xf] }
 0x47e   : > { %v4620_v55 = vpop.f32.mrf.mxu3 }
 0x47f   : > { %vm5887_vm11 = vcmp.gt.f32.partialorder %v5605_v17, 0.0  ;;  %v6015_v12 = vmul.f32 0.15, %v5605_v17  ;;  %v4621_v42 = vadd.f32 %v4620_v55, %v11235_v43  ;;  %v5607_v49 = vpop.f32.mrf.mxu2 }
 0x480   : > { %v4951_v34 = vpop.f32.mrf.mxu0 }
 0x481   : > { %v6143_v47 = vsel %vm5887_vm11, %v5605_v17, %v6015_v12  ;;  %v4950_v1 = vadd.f32 %v4949_v27, %v4621_v42 }
 0x482   : > { %v5280_v9 = vpop.f32.mrf.mxu1  ;;  %6271 = vst [vmem:[%s10380_s15 + $0xc8] sm:$0xff] %v6143_v47 }
 0x483   : > { %v5279_v56 = vadd.f32 %v5278_v0, %v4950_v1  ;;  %v7082_v0 = vor.u32 %v8673_v25, %v7081_v30  ;;  %v8675_v30 = vld [vmem:[%s9183_s30 + $0x514] sm:$0xf]  ;;  %v7101_v25 = vld [vmem:[%s9183_s30 + $0x518] sm:$0xf] }
 0x485   : > { %v5608_v60 = vadd.f32 %v5607_v49, %v5279_v56 }
 0x486   : > { %v4622_v8 = vpop.f32.mrf.mxu3 }
 0x487   : > { %vm5888_vm12 = vcmp.gt.f32.partialorder %v5608_v60, 0.0  ;;  %v6016_v21 = vmul.f32 0.15, %v5608_v60  ;;  %v4623_v58 = vadd.f32 %v4622_v8, %v11236_v20  ;;  %v5609_v27 = vpop.f32.mrf.mxu2  ;;  %v7103_v20 = vld [vmem:[%s9183_s30 + $0x534] sm:$0xf0] }
 0x488   : > { %v4954_v3 = vpop.f32.mrf.mxu0 }
 0x489   : > { %v6144_v17 = vsel %vm5888_vm12, %v5608_v60, %v6016_v21  ;;  %v4952_v55 = vadd.f32 %v4951_v34, %v4623_v58  ;;  %v11237_v34 = vld [vmem:[#allocation22_spill] sm:$0xff]  ;;  %v7095_v60 = vld [vmem:[%s9183_s30 + $0x52c] sm:$0xf0]  ;;  %v8676_v21 = vld [vmem:[%s9183_s30 + $0x51c] sm:$0xf] }
 0x48a   : > { %v5283_v12 = vpop.f32.mrf.mxu1  ;;  %6272 = vst [vmem:[%s10380_s15 + $0xd0] sm:$0xff] %v6144_v17  ;;  %v7102_v17 = vor.u32 %v8679_v16, %v7101_v25 }
 0x48b   : > { %v5281_v43 = vadd.f32 %v5280_v9, %v4952_v55  ;;  %4664 = vmatmul.bf16.gmra.mxu3 %v7070_v33  ;;  %4993 = vmatmul.bf16.gmra.mxu0 %v7074_v57  ;;  %v8680_v33 = vld [vmem:[%s9183_s30 + $0x538] sm:$0xf0] }
 0x48c   : > { %8469 = vmatmul.msk.bf16.gmra.mxu2 %vm3366_vm0, %v7082_v0  ;;  %v11238_v0 = vld [vmem:[#allocation23_spill] sm:$0xff] }
 0x48d   : > { %5322 = vmatmul.bf16.gmra.mxu1 %v7078_v54  ;;  %v5610_v42 = vadd.f32 %v5609_v27, %v5281_v43  ;;  %v7098_v27 = vor.u32 %v8675_v30, %v7095_v60  ;;  %v7106_v43 = vor.u32 %v8676_v21, %v7103_v20  ;;  %v8686_v21 = vld [vmem:[%s9183_s30 + $0x568] sm:$0xf0]  ;;  %v7137_v20 = vld [vmem:[%s9183_s30 + $0x558] sm:$0xf] }
 0x48e   : > { %v4625_v49 = vpop.f32.mrf.mxu3 }
 0x48f   : > { %vm5889_vm13 = vcmp.gt.f32.partialorder %v5610_v42, 0.0  ;;  %v6017_v47 = vmul.f32 0.15, %v5610_v42  ;;  %v4626_v1 = vadd.f32 %v4625_v49, %v11237_v34  ;;  %v5612_v9 = vpop.f32.mrf.mxu2 }
 0x490   : > { %v4956_v56 = vpop.f32.mrf.mxu0 }
 0x491   : > { %v6145_v4 = vsel %vm5889_vm13, %v5610_v42, %v6017_v47  ;;  %v4955_v38 = vadd.f32 %v4954_v3, %v4626_v1 }
 0x492   : > { %v5285_v45 = vpop.f32.mrf.mxu1  ;;  %6273 = vst [vmem:[%s10380_s15 + $0xd8] sm:$0xff] %v6145_v4 }
 0x493   : > { %v5284_v23 = vadd.f32 %v5283_v12, %v4955_v38  ;;  %v7110_v12 = vor.u32 %v8680_v33, %v7109_v26  ;;  %v8682_v26 = vld [vmem:[%s9183_s30 + $0x54c] sm:$0xf]  ;;  %v7129_v33 = vld [vmem:[%s9183_s30 + $0x550] sm:$0xf] }
 0x495   : > { %v5613_v8 = vadd.f32 %v5612_v9, %v5284_v23 }
 0x496   : > { %v4627_v58 = vpop.f32.mrf.mxu3 }
 0x497   : > { %vm5890_vm14 = vcmp.gt.f32.partialorder %v5613_v8, 0.0  ;;  %v6018_v57 = vmul.f32 0.15, %v5613_v8  ;;  %v4628_v54 = vadd.f32 %v4627_v58, %v11238_v0  ;;  %v5614_v3 = vpop.f32.mrf.mxu2  ;;  %v7131_v0 = vld [vmem:[%s9183_s30 + $0x56c] sm:$0xf0] }
 0x498   : > { %v4959_v55 = vpop.f32.mrf.mxu0 }
 0x499   : > { %v6146_v42 = vsel %vm5890_vm14, %v5613_v8, %v6018_v57  ;;  %v4957_v49 = vadd.f32 %v4956_v56, %v4628_v54  ;;  %v11239_v56 = vld [vmem:[#allocation24_spill] sm:$0xff]  ;;  %v7123_v8 = vld [vmem:[%s9183_s30 + $0x564] sm:$0xf0] }
 0x49a   : > { %v5288_v47 = vpop.f32.mrf.mxu1  ;;  %6274 = vst [vmem:[%s10380_s15 + $0xe0] sm:$0xff] %v6146_v42  ;;  %v8683_v57 = vld [vmem:[%s9183_s30 + $0x554] sm:$0xf]  ;;  %v7130_v42 = vor.u32 %v8686_v21, %v7129_v33 }
 0x49b   : > { %v5286_v34 = vadd.f32 %v5285_v45, %v4957_v49  ;;  %4669 = vmatmul.bf16.gmra.mxu3 %v7098_v27  ;;  %4998 = vmatmul.bf16.gmra.mxu0 %v7102_v17  ;;  %v8687_v27 = vld [vmem:[%s9183_s30 + $0x570] sm:$0xf0] }
 0x49c   : > { %8470 = vmatmul.msk.bf16.gmra.mxu2 %vm3366_vm0, %v7110_v12  ;;  %v11240_v12 = vld [vmem:[#allocation25_spill] sm:$0xff] }
 0x49d   : > { %5327 = vmatmul.bf16.gmra.mxu1 %v7106_v43  ;;  %v5615_v1 = vadd.f32 %v5614_v3, %v5286_v34  ;;  %v7126_v3 = vor.u32 %v8682_v26, %v7123_v8  ;;  %v7134_v34 = vor.u32 %v8683_v57, %v7131_v0  ;;  %v8693_v57 = vld [vmem:[%s9183_s30 + $0x5a0] sm:$0xf0]  ;;  %v7165_v0 = vld [vmem:[%s9183_s30 + $0x590] sm:$0xf] }
 0x49e   : > { %v4630_v9 = vpop.f32.mrf.mxu3 }
 0x49f   : > { %vm5891_vm15 = vcmp.gt.f32.partialorder %v5615_v1, 0.0  ;;  %v6019_v4 = vmul.f32 0.15, %v5615_v1  ;;  %v4631_v38 = vadd.f32 %v4630_v9, %v11239_v56  ;;  %v5617_v45 = vpop.f32.mrf.mxu2 }
 0x4a0   : > { %v4961_v23 = vpop.f32.mrf.mxu0 }
 0x4a1   : > { %v6147_v30 = vsel %vm5891_vm15, %v5615_v1, %v6019_v4  ;;  %v4960_v60 = vadd.f32 %v4959_v55, %v4631_v38 }
 0x4a2   : > { %v5290_v25 = vpop.f32.mrf.mxu1  ;;  %6275 = vst [vmem:[%s10380_s15 + $0xe8] sm:$0xff] %v6147_v30 }
 0x4a3   : > { %v5289_v16 = vadd.f32 %v5288_v47, %v4960_v60  ;;  %v7138_v47 = vor.u32 %v8687_v27, %v7137_v20  ;;  %v8689_v20 = vld [vmem:[%s9183_s30 + $0x584] sm:$0xf]  ;;  %v7157_v27 = vld [vmem:[%s9183_s30 + $0x588] sm:$0xf] }
 0x4a5   : > { %v5618_v58 = vadd.f32 %v5617_v45, %v5289_v16 }
 0x4a6   : > { %v4632_v54 = vpop.f32.mrf.mxu3 }
 0x4a7   : > { %vm5892_vm1 = vcmp.gt.f32.partialorder %v5618_v58, 0.0  ;;  %v6020_v17 = vmul.f32 0.15, %v5618_v58  ;;  %v4633_v43 = vadd.f32 %v4632_v54, %v11240_v12  ;;  %v5619_v55 = vpop.f32.mrf.mxu2  ;;  %v7159_v12 = vld [vmem:[%s9183_s30 + $0x5a4] sm:$0xf0] }
 0x4a8   : > { %v4964_v49 = vpop.f32.mrf.mxu0 }
 0x4a9   : > { %v6148_v1 = vsel %vm5892_vm1, %v5618_v58, %v6020_v17  ;;  %v4962_v9 = vadd.f32 %v4961_v23, %v4633_v43  ;;  %v11241_v23 = vld [vmem:[#allocation26_spill] sm:$0xff]  ;;  %v8690_v17 = vld [vmem:[%s9183_s30 + $0x58c] sm:$0xf] }
 0x4aa   : > { %v5293_v4 = vpop.f32.mrf.mxu1  ;;  %6276 = vst [vmem:[%s10380_s15 + $0xf0] sm:$0xff] %v6148_v1  ;;  %v7151_v58 = vld [vmem:[%s9183_s30 + $0x59c] sm:$0xf0]  ;;  %v7158_v1 = vor.u32 %v8693_v57, %v7157_v27 }
 0x4ab   : > { %v5291_v56 = vadd.f32 %v5290_v25, %v4962_v9  ;;  %4674 = vmatmul.bf16.gmra.mxu3 %v7126_v3  ;;  %5003 = vmatmul.bf16.gmra.mxu0 %v7130_v42  ;;  %v8694_v3 = vld [vmem:[%s9183_s30 + $0x5a8] sm:$0xf0] }
 0x4ac   : > { %8471 = vmatmul.msk.bf16.gmra.mxu2 %vm3366_vm0, %v7138_v47  ;;  %v11242_v47 = vld [vmem:[#allocation27_spill] sm:$0xff] }
 0x4ad   : > { %5332 = vmatmul.bf16.gmra.mxu1 %v7134_v34  ;;  %v5620_v38 = vadd.f32 %v5619_v55, %v5291_v56  ;;  %v7154_v55 = vor.u32 %v8689_v20, %v7151_v58  ;;  %v7162_v56 = vor.u32 %v8690_v17, %v7159_v12  ;;  %v8700_v17 = vld [vmem:[%s9183_s30 + $0x5d8] sm:$0xf0]  ;;  %v7193_v12 = vld [vmem:[%s9183_s30 + $0x5c8] sm:$0xf] }
 0x4ae   : > { %v4635_v45 = vpop.f32.mrf.mxu3 }
 0x4af   : > { %vm5893_vm2 = vcmp.gt.f32.partialorder %v5620_v38, 0.0  ;;  %v6021_v30 = vmul.f32 0.15, %v5620_v38  ;;  %v4636_v60 = vadd.f32 %v4635_v45, %v11241_v23  ;;  %v5622_v25 = vpop.f32.mrf.mxu2 }
 0x4b0   : > { %v4966_v16 = vpop.f32.mrf.mxu0 }
 0x4b1   : > { %v6149_v26 = vsel %vm5893_vm2, %v5620_v38, %v6021_v30  ;;  %v4965_v8 = vadd.f32 %v4964_v49, %v4636_v60 }
 0x4b2   : > { %v5295_v33 = vpop.f32.mrf.mxu1  ;;  %6277 = vst [vmem:[%s10380_s15 + $0xf8] sm:$0xff] %v6149_v26 }
 0x4b3   : > { %v5294_v21 = vadd.f32 %v5293_v4, %v4965_v8  ;;  %v7166_v4 = vor.u32 %v8694_v3, %v7165_v0  ;;  %v8696_v0 = vld [vmem:[%s9183_s30 + $0x5bc] sm:$0xf]  ;;  %v7185_v3 = vld [vmem:[%s9183_s30 + $0x5c0] sm:$0xf] }
 0x4b5   : > { %v5623_v54 = vadd.f32 %v5622_v25, %v5294_v21 }
 0x4b6   : > { %v4637_v43 = vpop.f32.mrf.mxu3 }
 0x4b7   : > { %vm5894_vm3 = vcmp.gt.f32.partialorder %v5623_v54, 0.0  ;;  %v6022_v42 = vmul.f32 0.15, %v5623_v54  ;;  %v4638_v34 = vadd.f32 %v4637_v43, %v11242_v47  ;;  %v5624_v49 = vpop.f32.mrf.mxu2  ;;  %v7187_v47 = vld [vmem:[%s9183_s30 + $0x5dc] sm:$0xf0] }
 0x4b8   : > { %v4969_v9 = vpop.f32.mrf.mxu0 }
 0x4b9   : > { %v6150_v38 = vsel %vm5894_vm3, %v5623_v54, %v6022_v42  ;;  %v4967_v45 = vadd.f32 %v4966_v16, %v4638_v34  ;;  %v11243_v16 = vld [vmem:[#allocation28_spill] sm:$0xff]  ;;  %v7179_v54 = vld [vmem:[%s9183_s30 + $0x5d4] sm:$0xf0]  ;;  %v8697_v42 = vld [vmem:[%s9183_s30 + $0x5c4] sm:$0xf] }
 0x4ba   : > { %v5298_v30 = vpop.f32.mrf.mxu1  ;;  %6278 = vst [vmem:[%s10380_s15 + $0x100] sm:$0xff] %v6150_v38  ;;  %v7186_v38 = vor.u32 %v8700_v17, %v7185_v3 }
 0x4bb   : > { %v5296_v23 = vadd.f32 %v5295_v33, %v4967_v45  ;;  %4679 = vmatmul.bf16.gmra.mxu3 %v7154_v55  ;;  %5008 = vmatmul.bf16.gmra.mxu0 %v7158_v1  ;;  %v8701_v55 = vld [vmem:[%s9183_s30 + $0x5e0] sm:$0xf0] }
 0x4bc   : > { %8472 = vmatmul.msk.bf16.gmra.mxu2 %vm3366_vm0, %v7166_v4  ;;  %v11244_v4 = vld [vmem:[#allocation29_spill] sm:$0xff] }
 0x4bd   : > { %5337 = vmatmul.bf16.gmra.mxu1 %v7162_v56  ;;  %v5625_v60 = vadd.f32 %v5624_v49, %v5296_v23  ;;  %v7182_v49 = vor.u32 %v8696_v0, %v7179_v54  ;;  %v7190_v23 = vor.u32 %v8697_v42, %v7187_v47  ;;  %v8707_v42 = vld [vmem:[%s9183_s30 + $0x610] sm:$0xf0]  ;;  %v7221_v47 = vld [vmem:[%s9183_s30 + $0x600] sm:$0xf] }
 0x4be   : > { %v4640_v25 = vpop.f32.mrf.mxu3 }
 0x4bf   : > { %vm5895_vm4 = vcmp.gt.f32.partialorder %v5625_v60, 0.0  ;;  %v6023_v26 = vmul.f32 0.15, %v5625_v60  ;;  %v4641_v8 = vadd.f32 %v4640_v25, %v11243_v16  ;;  %v5627_v33 = vpop.f32.mrf.mxu2 }
 0x4c0   : > { %v4971_v21 = vpop.f32.mrf.mxu0 }
 0x4c1   : > { %v6151_v20 = vsel %vm5895_vm4, %v5625_v60, %v6023_v26  ;;  %v4970_v58 = vadd.f32 %v4969_v9, %v4641_v8 }
 0x4c2   : > { %v5300_v27 = vpop.f32.mrf.mxu1  ;;  %6279 = vst [vmem:[%s10380_s15 + $0x108] sm:$0xff] %v6151_v20 }
 0x4c3   : > { %v5299_v57 = vadd.f32 %v5298_v30, %v4970_v58  ;;  %v7194_v30 = vor.u32 %v8701_v55, %v7193_v12  ;;  %v8703_v12 = vld [vmem:[%s9183_s30 + $0x5f4] sm:$0xf]  ;;  %v7213_v55 = vld [vmem:[%s9183_s30 + $0x5f8] sm:$0xf] }
 0x4c5   : > { %v5628_v43 = vadd.f32 %v5627_v33, %v5299_v57 }
 0x4c6   : > { %v4642_v34 = vpop.f32.mrf.mxu3 }
 0x4c7   : > { %vm5896_vm5 = vcmp.gt.f32.partialorder %v5628_v43, 0.0  ;;  %v6024_v1 = vmul.f32 0.15, %v5628_v43  ;;  %v4643_v56 = vadd.f32 %v4642_v34, %v11244_v4  ;;  %v5629_v9 = vpop.f32.mrf.mxu2  ;;  %v7215_v4 = vld [vmem:[%s9183_s30 + $0x614] sm:$0xf0] }
 0x4c8   : > { %v4974_v45 = vpop.f32.mrf.mxu0 }
 0x4c9   : > { %v6152_v60 = vsel %vm5896_vm5, %v5628_v43, %v6024_v1  ;;  %v4972_v25 = vadd.f32 %v4971_v21, %v4643_v56  ;;  %v11245_v21 = vld [vmem:[#allocation30_spill] sm:$0xff]  ;;  %v7207_v43 = vld [vmem:[%s9183_s30 + $0x60c] sm:$0xf0]  ;;  %v8704_v1 = vld [vmem:[%s9183_s30 + $0x5fc] sm:$0xf] }
 0x4ca   : > { %v5303_v26 = vpop.f32.mrf.mxu1  ;;  %6280 = vst [vmem:[%s10380_s15 + $0x110] sm:$0xff] %v6152_v60  ;;  %v7214_v60 = vor.u32 %v8707_v42, %v7213_v55 }
 0x4cb   : > { %v5301_v16 = vadd.f32 %v5300_v27, %v4972_v25  ;;  %4684 = vmatmul.bf16.gmra.mxu3 %v7182_v49  ;;  %5013 = vmatmul.bf16.gmra.mxu0 %v7186_v38  ;;  %v8708_v49 = vld [vmem:[%s9183_s30 + $0x618] sm:$0xf0] }
 0x4cc   : > { %8473 = vmatmul.msk.bf16.gmra.mxu2 %vm3366_vm0, %v7194_v30  ;;  %v11246_v30 = vld [vmem:[#allocation31_spill] sm:$0xff] }
 0x4cd   : > { %5342 = vmatmul.bf16.gmra.mxu1 %v7190_v23  ;;  %v5630_v8 = vadd.f32 %v5629_v9, %v5301_v16  ;;  %v7210_v9 = vor.u32 %v8703_v12, %v7207_v43  ;;  %v7218_v16 = vor.u32 %v8704_v1, %v7215_v4  ;;  %v8714_v1 = vld [vmem:[%s9183_s30 + $0x648] sm:$0xf0]  ;;  %v7249_v4 = vld [vmem:[%s9183_s30 + $0x638] sm:$0xf] }
 0x4ce   : > { %v4645_v33 = vpop.f32.mrf.mxu3 }
 0x4cf   : > { %vm5897_vm6 = vcmp.gt.f32.partialorder %v5630_v8, 0.0  ;;  %v6025_v20 = vmul.f32 0.15, %v5630_v8  ;;  %v4646_v58 = vadd.f32 %v4645_v33, %v11245_v21  ;;  %v5632_v27 = vpop.f32.mrf.mxu2 }
 0x4d0   : > { %v4976_v57 = vpop.f32.mrf.mxu0 }
 0x4d1   : > { %v6153_v0 = vsel %vm5897_vm6, %v5630_v8, %v6025_v20  ;;  %v4975_v54 = vadd.f32 %v4974_v45, %v4646_v58 }
 0x4d2   : > { %v5305_v3 = vpop.f32.mrf.mxu1  ;;  %6281 = vst [vmem:[%s10380_s15 + $0x118] sm:$0xff] %v6153_v0 }
 0x4d3   : > { %v5304_v17 = vadd.f32 %v5303_v26, %v4975_v54  ;;  %v7222_v26 = vor.u32 %v8708_v49, %v7221_v47  ;;  %v8710_v47 = vld [vmem:[%s9183_s30 + $0x62c] sm:$0xf]  ;;  %v7241_v49 = vld [vmem:[%s9183_s30 + $0x630] sm:$0xf] }
 0x4d5   : > { %v5633_v34 = vadd.f32 %v5632_v27, %v5304_v17 }
 0x4d6   : > { %v4647_v56 = vpop.f32.mrf.mxu3 }
 0x4d7   : > { %vm5898_vm7 = vcmp.gt.f32.partialorder %v5633_v34, 0.0  ;;  %v6026_v38 = vmul.f32 0.15, %v5633_v34  ;;  %v4648_v23 = vadd.f32 %v4647_v56, %v11246_v30  ;;  %v5634_v45 = vpop.f32.mrf.mxu2  ;;  %v7243_v30 = vld [vmem:[%s9183_s30 + $0x64c] sm:$0xf0] }
 0x4d8   : > { %v4979_v25 = vpop.f32.mrf.mxu0 }
 0x4d9   : > { %v6154_v8 = vsel %vm5898_vm7, %v5633_v34, %v6026_v38  ;;  %v4977_v33 = vadd.f32 %v4976_v57, %v4648_v23  ;;  %v11247_v57 = vld [vmem:[#allocation32_spill] sm:$0xff]  ;;  %v7235_v34 = vld [vmem:[%s9183_s30 + $0x644] sm:$0xf0] }
 0x4da   : > { %v5308_v20 = vpop.f32.mrf.mxu1  ;;  %6282 = vst [vmem:[%s10380_s15 + $0x120] sm:$0xff] %v6154_v8  ;;  %v8711_v38 = vld [vmem:[%s9183_s30 + $0x634] sm:$0xf]  ;;  %v7242_v8 = vor.u32 %v8714_v1, %v7241_v49 }
 0x4db   : > { %v5306_v21 = vadd.f32 %v5305_v3, %v4977_v33  ;;  %4689 = vmatmul.bf16.gmra.mxu3 %v7210_v9  ;;  %5018 = vmatmul.bf16.gmra.mxu0 %v7214_v60  ;;  %v8715_v9 = vld [vmem:[%s9183_s30 + $0x650] sm:$0xf0] }
 0x4dc   : > { %8474 = vmatmul.msk.bf16.gmra.mxu2 %vm3366_vm0, %v7222_v26  ;;  %v11248_v26 = vld [vmem:[#allocation33_spill] sm:$0xff] }
 0x4dd   : > { %5347 = vmatmul.bf16.gmra.mxu1 %v7218_v16  ;;  %v5635_v58 = vadd.f32 %v5634_v45, %v5306_v21  ;;  %v7238_v45 = vor.u32 %v8710_v47, %v7235_v34  ;;  %v7246_v21 = vor.u32 %v8711_v38, %v7243_v30  ;;  %v8721_v38 = vld [vmem:[%s9183_s30 + $0x680] sm:$0xf0]  ;;  %v7277_v30 = vld [vmem:[%s9183_s30 + $0x670] sm:$0xf] }
 0x4de   : > { %v4650_v27 = vpop.f32.mrf.mxu3 }
 0x4df   : > { %vm5899_vm8 = vcmp.gt.f32.partialorder %v5635_v58, 0.0  ;;  %v6027_v0 = vmul.f32 0.15, %v5635_v58  ;;  %v4651_v54 = vadd.f32 %v4650_v27, %v11247_v57  ;;  %v5637_v3 = vpop.f32.mrf.mxu2 }
 0x4e0   : > { %v4981_v17 = vpop.f32.mrf.mxu0 }
 0x4e1   : > { %v6155_v12 = vsel %vm5899_vm8, %v5635_v58, %v6027_v0  ;;  %v4980_v43 = vadd.f32 %v4979_v25, %v4651_v54 }
 0x4e2   : > { %v5310_v55 = vpop.f32.mrf.mxu1  ;;  %6283 = vst [vmem:[%s10380_s15 + $0x128] sm:$0xff] %v6155_v12 }
 0x4e3   : > { %v5309_v42 = vadd.f32 %v5308_v20, %v4980_v43  ;;  %v7250_v20 = vor.u32 %v8715_v9, %v7249_v4  ;;  %v8717_v4 = vld [vmem:[%s9183_s30 + $0x664] sm:$0xf]  ;;  %v7269_v9 = vld [vmem:[%s9183_s30 + $0x668] sm:$0xf] }
 0x4e5   : > { %v5638_v56 = vadd.f32 %v5637_v3, %v5309_v42 }
 0x4e6   : > { %v4652_v23 = vpop.f32.mrf.mxu3 }
 0x4e7   : > { %vm5900_vm9 = vcmp.gt.f32.partialorder %v5638_v56, 0.0  ;;  %v6028_v60 = vmul.f32 0.15, %v5638_v56  ;;  %v4653_v16 = vadd.f32 %v4652_v23, %v11248_v26  ;;  %v5639_v25 = vpop.f32.mrf.mxu2  ;;  %v7271_v26 = vld [vmem:[%s9183_s30 + $0x684] sm:$0xf0] }
 0x4e8   : > { %v4984_v33 = vpop.f32.mrf.mxu0 }
 0x4e9   : > { %v6156_v58 = vsel %vm5900_vm9, %v5638_v56, %v6028_v60  ;;  %v4982_v27 = vadd.f32 %v4981_v17, %v4653_v16  ;;  %v11249_v17 = vld [vmem:[#allocation34_spill] sm:$0xff]  ;;  %v8718_v60 = vld [vmem:[%s9183_s30 + $0x66c] sm:$0xf] }
 0x4ea   : > { %v5313_v0 = vpop.f32.mrf.mxu1  ;;  %6284 = vst [vmem:[%s10380_s15 + $0x130] sm:$0xff] %v6156_v58  ;;  %v7263_v56 = vld [vmem:[%s9183_s30 + $0x67c] sm:$0xf0]  ;;  %v7270_v58 = vor.u32 %v8721_v38, %v7269_v9 }
 0x4eb   : > { %v5311_v57 = vadd.f32 %v5310_v55, %v4982_v27  ;;  %4694 = vmatmul.bf16.gmra.mxu3 %v7238_v45  ;;  %5023 = vmatmul.bf16.gmra.mxu0 %v7242_v8  ;;  %v8722_v45 = vld [vmem:[%s9183_s30 + $0x688] sm:$0xf0] }
 0x4ec   : > { %8475 = vmatmul.msk.bf16.gmra.mxu2 %vm3366_vm0, %v7250_v20  ;;  %v11250_v20 = vld [vmem:[#allocation35_spill] sm:$0xff] }
 0x4ed   : > { %5352 = vmatmul.bf16.gmra.mxu1 %v7246_v21  ;;  %v5640_v54 = vadd.f32 %v5639_v25, %v5311_v57  ;;  %v7266_v25 = vor.u32 %v8717_v4, %v7263_v56  ;;  %v7274_v57 = vor.u32 %v8718_v60, %v7271_v26  ;;  %v8728_v60 = vld [vmem:[%s9183_s30 + $0x6b8] sm:$0xf0]  ;;  %v7305_v26 = vld [vmem:[%s9183_s30 + $0x6a8] sm:$0xf] }
 0x4ee   : > { %v4655_v3 = vpop.f32.mrf.mxu3 }
 0x4ef   : > { %vm5901_vm10 = vcmp.gt.f32.partialorder %v5640_v54, 0.0  ;;  %v6029_v12 = vmul.f32 0.15, %v5640_v54  ;;  %v4656_v43 = vadd.f32 %v4655_v3, %v11249_v17  ;;  %v5642_v55 = vpop.f32.mrf.mxu2 }
 0x4f0   : > { %v4986_v42 = vpop.f32.mrf.mxu0 }
 0x4f1   : > { %v6157_v47 = vsel %vm5901_vm10, %v5640_v54, %v6029_v12  ;;  %v4985_v34 = vadd.f32 %v4984_v33, %v4656_v43 }
 0x4f2   : > { %v5315_v49 = vpop.f32.mrf.mxu1  ;;  %6285 = vst [vmem:[%s10380_s15 + $0x138] sm:$0xff] %v6157_v47 }
 0x4f3   : > { %v5314_v1 = vadd.f32 %v5313_v0, %v4985_v34  ;;  %v7278_v0 = vor.u32 %v8722_v45, %v7277_v30  ;;  %v8724_v30 = vld [vmem:[%s9183_s30 + $0x69c] sm:$0xf]  ;;  %v7297_v45 = vld [vmem:[%s9183_s30 + $0x6a0] sm:$0xf] }
 0x4f5   : > { %v5643_v23 = vadd.f32 %v5642_v55, %v5314_v1 }
 0x4f6   : > { %v4657_v16 = vpop.f32.mrf.mxu3 }
 0x4f7   : > { %vm5902_vm11 = vcmp.gt.f32.partialorder %v5643_v23, 0.0  ;;  %v6030_v8 = vmul.f32 0.15, %v5643_v23  ;;  %v4658_v21 = vadd.f32 %v4657_v16, %v11250_v20  ;;  %v5644_v33 = vpop.f32.mrf.mxu2  ;;  %v7299_v20 = vld [vmem:[%s9183_s30 + $0x6bc] sm:$0xf0] }
 0x4f8   : > { %v4989_v27 = vpop.f32.mrf.mxu0 }
 0x4f9   : > { %v6158_v54 = vsel %vm5902_vm11, %v5643_v23, %v6030_v8  ;;  %v4987_v3 = vadd.f32 %v4986_v42, %v4658_v21  ;;  %v11251_v42 = vld [vmem:[#allocation36_spill] sm:$0xff]  ;;  %v7291_v23 = vld [vmem:[%s9183_s30 + $0x6b4] sm:$0xf0]  ;;  %v8725_v8 = vld [vmem:[%s9183_s30 + $0x6a4] sm:$0xf] }
 0x4fa   : > { %v5318_v12 = vpop.f32.mrf.mxu1  ;;  %6286 = vst [vmem:[%s10380_s15 + $0x140] sm:$0xff] %v6158_v54  ;;  %v7298_v54 = vor.u32 %v8728_v60, %v7297_v45 }
 0x4fb   : > { %v5316_v17 = vadd.f32 %v5315_v49, %v4987_v3  ;;  %4699 = vmatmul.bf16.gmra.mxu3 %v7266_v25  ;;  %5028 = vmatmul.bf16.gmra.mxu0 %v7270_v58  ;;  %v8729_v25 = vld [vmem:[%s9183_s30 + $0x6c0] sm:$0xf0] }
 0x4fc   : > { %8476 = vmatmul.msk.bf16.gmra.mxu2 %vm3366_vm0, %v7278_v0  ;;  %v11252_v0 = vld [vmem:[#allocation37_spill] sm:$0xff] }
 0x4fd   : > { %5357 = vmatmul.bf16.gmra.mxu1 %v7274_v57  ;;  %v5645_v43 = vadd.f32 %v5644_v33, %v5316_v17  ;;  %v7294_v33 = vor.u32 %v8724_v30, %v7291_v23  ;;  %v7302_v17 = vor.u32 %v8725_v8, %v7299_v20  ;;  %v8735_v8 = vld [vmem:[%s9183_s30 + $0x6f0] sm:$0xf0]  ;;  %v7333_v20 = vld [vmem:[%s9183_s30 + $0x6e0] sm:$0xf] }
 0x4fe   : > { %v4660_v55 = vpop.f32.mrf.mxu3 }
 0x4ff   : > { %vm5903_vm12 = vcmp.gt.f32.partialorder %v5645_v43, 0.0  ;;  %v6031_v47 = vmul.f32 0.15, %v5645_v43  ;;  %v4661_v34 = vadd.f32 %v4660_v55, %v11251_v42  ;;  %v5647_v49 = vpop.f32.mrf.mxu2 }
 0x500   : > { %v4991_v1 = vpop.f32.mrf.mxu0 }
 0x501   : > { %v6159_v4 = vsel %vm5903_vm12, %v5645_v43, %v6031_v47  ;;  %v4990_v56 = vadd.f32 %v4989_v27, %v4661_v34 }
 0x502   : > { %v5320_v9 = vpop.f32.mrf.mxu1  ;;  %6287 = vst [vmem:[%s10380_s15 + $0x148] sm:$0xff] %v6159_v4 }
 0x503   : > { %v5319_v38 = vadd.f32 %v5318_v12, %v4990_v56  ;;  %v7306_v12 = vor.u32 %v8729_v25, %v7305_v26  ;;  %v8731_v26 = vld [vmem:[%s9183_s30 + $0x6d4] sm:$0xf]  ;;  %v7325_v25 = vld [vmem:[%s9183_s30 + $0x6d8] sm:$0xf] }
 0x505   : > { %v5648_v16 = vadd.f32 %v5647_v49, %v5319_v38 }
 0x506   : > { %v4662_v21 = vpop.f32.mrf.mxu3 }
 0x507   : > { %vm5904_vm13 = vcmp.gt.f32.partialorder %v5648_v16, 0.0  ;;  %v6032_v58 = vmul.f32 0.15, %v5648_v16  ;;  %v4663_v57 = vadd.f32 %v4662_v21, %v11252_v0  ;;  %v5649_v27 = vpop.f32.mrf.mxu2  ;;  %v7327_v0 = vld [vmem:[%s9183_s30 + $0x6f4] sm:$0xf0] }
 0x508   : > { %v4994_v3 = vpop.f32.mrf.mxu0 }
 0x509   : > { %v6160_v43 = vsel %vm5904_vm13, %v5648_v16, %v6032_v58  ;;  %v4992_v55 = vadd.f32 %v4991_v1, %v4663_v57  ;;  %v11253_v1 = vld [vmem:[#allocation38_spill] sm:$0xff]  ;;  %v7319_v16 = vld [vmem:[%s9183_s30 + $0x6ec] sm:$0xf0]  ;;  %v8732_v58 = vld [vmem:[%s9183_s30 + $0x6dc] sm:$0xf] }
 0x50a   : > { %v5323_v47 = vpop.f32.mrf.mxu1  ;;  %6288 = vst [vmem:[%s10380_s15 + $0x150] sm:$0xff] %v6160_v43  ;;  %v7326_v43 = vor.u32 %v8735_v8, %v7325_v25 }
 0x50b   : > { %v5321_v42 = vadd.f32 %v5320_v9, %v4992_v55  ;;  %4704 = vmatmul.bf16.gmra.mxu3 %v7294_v33  ;;  %5033 = vmatmul.bf16.gmra.mxu0 %v7298_v54  ;;  %v8736_v33 = vld [vmem:[%s9183_s30 + $0x6f8] sm:$0xf0] }
 0x50c   : > { %8477 = vmatmul.msk.bf16.gmra.mxu2 %vm3366_vm0, %v7306_v12  ;;  %v11254_v12 = vld [vmem:[#allocation39_spill] sm:$0xff] }
 0x50d   : > { %5362 = vmatmul.bf16.gmra.mxu1 %v7302_v17  ;;  %v5650_v34 = vadd.f32 %v5649_v27, %v5321_v42  ;;  %v7322_v27 = vor.u32 %v8731_v26, %v7319_v16  ;;  %v7330_v42 = vor.u32 %v8732_v58, %v7327_v0  ;;  %v8742_v58 = vld [vmem:[%s9183_s30 + $0x728] sm:$0xf0]  ;;  %v7361_v0 = vld [vmem:[%s9183_s30 + $0x718] sm:$0xf] }
 0x50e   : > { %v4665_v49 = vpop.f32.mrf.mxu3 }
 0x50f   : > { %vm5905_vm14 = vcmp.gt.f32.partialorder %v5650_v34, 0.0  ;;  %v6033_v4 = vmul.f32 0.15, %v5650_v34  ;;  %v4666_v56 = vadd.f32 %v4665_v49, %v11253_v1  ;;  %v5652_v9 = vpop.f32.mrf.mxu2 }
 0x510   : > { %v4996_v38 = vpop.f32.mrf.mxu0 }
 0x511   : > { %v6161_v30 = vsel %vm5905_vm14, %v5650_v34, %v6033_v4  ;;  %v4995_v23 = vadd.f32 %v4994_v3, %v4666_v56 }
 0x512   : > { %v5325_v45 = vpop.f32.mrf.mxu1  ;;  %6289 = vst [vmem:[%s10380_s15 + $0x158] sm:$0xff] %v6161_v30 }
 0x513   : > { %v5324_v60 = vadd.f32 %v5323_v47, %v4995_v23  ;;  %v7334_v47 = vor.u32 %v8736_v33, %v7333_v20  ;;  %v8738_v20 = vld [vmem:[%s9183_s30 + $0x70c] sm:$0xf]  ;;  %v7353_v33 = vld [vmem:[%s9183_s30 + $0x710] sm:$0xf] }
 0x515   : > { %v5653_v21 = vadd.f32 %v5652_v9, %v5324_v60 }
 0x516   : > { %v4667_v57 = vpop.f32.mrf.mxu3 }
 0x517   : > { %vm5906_vm15 = vcmp.gt.f32.partialorder %v5653_v21, 0.0  ;;  %v6034_v54 = vmul.f32 0.15, %v5653_v21  ;;  %v4668_v17 = vadd.f32 %v4667_v57, %v11254_v12  ;;  %v5654_v3 = vpop.f32.mrf.mxu2  ;;  %v7355_v12 = vld [vmem:[%s9183_s30 + $0x72c] sm:$0xf0] }
 0x518   : > { %v4999_v55 = vpop.f32.mrf.mxu0 }
 0x519   : > { %v6162_v34 = vsel %vm5906_vm15, %v5653_v21, %v6034_v54  ;;  %v4997_v49 = vadd.f32 %v4996_v38, %v4668_v17  ;;  %v11255_v38 = vld [vmem:[#allocation40_spill] sm:$0xff]  ;;  %v7347_v21 = vld [vmem:[%s9183_s30 + $0x724] sm:$0xf0] }
 0x51a   : > { %v5328_v4 = vpop.f32.mrf.mxu1  ;;  %6290 = vst [vmem:[%s10380_s15 + $0x160] sm:$0xff] %v6162_v34  ;;  %v8739_v54 = vld [vmem:[%s9183_s30 + $0x714] sm:$0xf]  ;;  %v7354_v34 = vor.u32 %v8742_v58, %v7353_v33 }
 0x51b   : > { %v5326_v1 = vadd.f32 %v5325_v45, %v4997_v49  ;;  %4709 = vmatmul.bf16.gmra.mxu3 %v7322_v27  ;;  %5038 = vmatmul.bf16.gmra.mxu0 %v7326_v43  ;;  %v8743_v27 = vld [vmem:[%s9183_s30 + $0x730] sm:$0xf0] }
 0x51c   : > { %8478 = vmatmul.msk.bf16.gmra.mxu2 %vm3366_vm0, %v7334_v47  ;;  %v11256_v47 = vld [vmem:[#allocation41_spill] sm:$0xff] }
 0x51d   : > { %5367 = vmatmul.bf16.gmra.mxu1 %v7330_v42  ;;  %v5655_v56 = vadd.f32 %v5654_v3, %v5326_v1  ;;  %v7350_v3 = vor.u32 %v8738_v20, %v7347_v21  ;;  %v7358_v1 = vor.u32 %v8739_v54, %v7355_v12  ;;  %v8749_v54 = vld [vmem:[%s9183_s30 + $0x760] sm:$0xf0]  ;;  %v7389_v12 = vld [vmem:[%s9183_s30 + $0x750] sm:$0xf] }
 0x51e   : > { %v4670_v9 = vpop.f32.mrf.mxu3 }
 0x51f   : > { %vm5907_vm1 = vcmp.gt.f32.partialorder %v5655_v56, 0.0  ;;  %v6035_v30 = vmul.f32 0.15, %v5655_v56  ;;  %v4671_v23 = vadd.f32 %v4670_v9, %v11255_v38  ;;  %v5657_v45 = vpop.f32.mrf.mxu2 }
 0x520   : > { %v5001_v60 = vpop.f32.mrf.mxu0 }
 0x521   : > { %v6163_v26 = vsel %vm5907_vm1, %v5655_v56, %v6035_v30  ;;  %v5000_v16 = vadd.f32 %v4999_v55, %v4671_v23 }
 0x522   : > { %v5330_v25 = vpop.f32.mrf.mxu1  ;;  %6291 = vst [vmem:[%s10380_s15 + $0x168] sm:$0xff] %v6163_v26 }
 0x523   : > { %v5329_v8 = vadd.f32 %v5328_v4, %v5000_v16  ;;  %v7362_v4 = vor.u32 %v8743_v27, %v7361_v0  ;;  %v8745_v0 = vld [vmem:[%s9183_s30 + $0x744] sm:$0xf]  ;;  %v7381_v27 = vld [vmem:[%s9183_s30 + $0x748] sm:$0xf] }
 0x525   : > { %v5658_v57 = vadd.f32 %v5657_v45, %v5329_v8 }
 0x526   : > { %v4672_v17 = vpop.f32.mrf.mxu3 }
 0x527   : > { %vm5908_vm2 = vcmp.gt.f32.partialorder %v5658_v57, 0.0  ;;  %v6036_v43 = vmul.f32 0.15, %v5658_v57  ;;  %v4673_v42 = vadd.f32 %v4672_v17, %v11256_v47  ;;  %v5659_v55 = vpop.f32.mrf.mxu2  ;;  %v7383_v47 = vld [vmem:[%s9183_s30 + $0x764] sm:$0xf0] }
 0x528   : > { %v5004_v49 = vpop.f32.mrf.mxu0 }
 0x529   : > { %v6164_v56 = vsel %vm5908_vm2, %v5658_v57, %v6036_v43  ;;  %v5002_v9 = vadd.f32 %v5001_v60, %v4673_v42  ;;  %v11257_v60 = vld [vmem:[#allocation42_spill] sm:$0xff]  ;;  %v8746_v43 = vld [vmem:[%s9183_s30 + $0x74c] sm:$0xf] }
 0x52a   : > { %v5333_v30 = vpop.f32.mrf.mxu1  ;;  %6292 = vst [vmem:[%s10380_s15 + $0x170] sm:$0xff] %v6164_v56  ;;  %v7375_v57 = vld [vmem:[%s9183_s30 + $0x75c] sm:$0xf0]  ;;  %v7382_v56 = vor.u32 %v8749_v54, %v7381_v27 }
 0x52b   : > { %v5331_v38 = vadd.f32 %v5330_v25, %v5002_v9  ;;  %4714 = vmatmul.bf16.gmra.mxu3 %v7350_v3  ;;  %5043 = vmatmul.bf16.gmra.mxu0 %v7354_v34  ;;  %v8750_v3 = vld [vmem:[%s9183_s30 + $0x768] sm:$0xf0] }
 0x52c   : > { %8479 = vmatmul.msk.bf16.gmra.mxu2 %vm3366_vm0, %v7362_v4  ;;  %v11258_v4 = vld [vmem:[#allocation43_spill] sm:$0xff] }
 0x52d   : > { %5372 = vmatmul.bf16.gmra.mxu1 %v7358_v1  ;;  %v5660_v23 = vadd.f32 %v5659_v55, %v5331_v38  ;;  %v7378_v55 = vor.u32 %v8745_v0, %v7375_v57  ;;  %v7386_v38 = vor.u32 %v8746_v43, %v7383_v47  ;;  %v8756_v43 = vld [vmem:[%s9183_s30 + $0x798] sm:$0xf0]  ;;  %v7417_v47 = vld [vmem:[%s9183_s30 + $0x788] sm:$0xf] }
 0x52e   : > { %v4675_v45 = vpop.f32.mrf.mxu3 }
 0x52f   : > { %vm5909_vm3 = vcmp.gt.f32.partialorder %v5660_v23, 0.0  ;;  %v6037_v26 = vmul.f32 0.15, %v5660_v23  ;;  %v4676_v16 = vadd.f32 %v4675_v45, %v11257_v60  ;;  %v5662_v25 = vpop.f32.mrf.mxu2 }
 0x530   : > { %v5006_v8 = vpop.f32.mrf.mxu0 }
 0x531   : > { %v6165_v20 = vsel %vm5909_vm3, %v5660_v23, %v6037_v26  ;;  %v5005_v21 = vadd.f32 %v5004_v49, %v4676_v16 }
 0x532   : > { %v5335_v33 = vpop.f32.mrf.mxu1  ;;  %6293 = vst [vmem:[%s10380_s15 + $0x178] sm:$0xff] %v6165_v20 }
 0x533   : > { %v5334_v58 = vadd.f32 %v5333_v30, %v5005_v21  ;;  %v7390_v30 = vor.u32 %v8750_v3, %v7389_v12  ;;  %v8752_v12 = vld [vmem:[%s9183_s30 + $0x77c] sm:$0xf]  ;;  %v7409_v3 = vld [vmem:[%s9183_s30 + $0x780] sm:$0xf] }
 0x535   : > { %v5663_v17 = vadd.f32 %v5662_v25, %v5334_v58 }
 0x536   : > { %v4677_v42 = vpop.f32.mrf.mxu3 }
 0x537   : > { %vm5910_vm4 = vcmp.gt.f32.partialorder %v5663_v17, 0.0  ;;  %v6038_v34 = vmul.f32 0.15, %v5663_v17  ;;  %v4678_v1 = vadd.f32 %v4677_v42, %v11258_v4  ;;  %v5664_v49 = vpop.f32.mrf.mxu2  ;;  %v7411_v4 = vld [vmem:[%s9183_s30 + $0x79c] sm:$0xf0] }
 0x538   : > { %v5009_v9 = vpop.f32.mrf.mxu0 }
 0x539   : > { %v6166_v23 = vsel %vm5910_vm4, %v5663_v17, %v6038_v34  ;;  %v5007_v45 = vadd.f32 %v5006_v8, %v4678_v1  ;;  %v11259_v8 = vld [vmem:[#allocation44_spill] sm:$0xff]  ;;  %v7403_v17 = vld [vmem:[%s9183_s30 + $0x794] sm:$0xf0]  ;;  %v8753_v34 = vld [vmem:[%s9183_s30 + $0x784] sm:$0xf] }
 0x53a   : > { %v5338_v26 = vpop.f32.mrf.mxu1  ;;  %6294 = vst [vmem:[%s10380_s15 + $0x180] sm:$0xff] %v6166_v23  ;;  %v7410_v23 = vor.u32 %v8756_v43, %v7409_v3 }
 0x53b   : > { %v5336_v60 = vadd.f32 %v5335_v33, %v5007_v45  ;;  %4719 = vmatmul.bf16.gmra.mxu3 %v7378_v55  ;;  %5048 = vmatmul.bf16.gmra.mxu0 %v7382_v56  ;;  %v8757_v55 = vld [vmem:[%s9183_s30 + $0x7a0] sm:$0xf0] }
 0x53c   : > { %8480 = vmatmul.msk.bf16.gmra.mxu2 %vm3366_vm0, %v7390_v30  ;;  %v11260_v30 = vld [vmem:[#allocation45_spill] sm:$0xff] }
 0x53d   : > { %5377 = vmatmul.bf16.gmra.mxu1 %v7386_v38  ;;  %v5665_v16 = vadd.f32 %v5664_v49, %v5336_v60  ;;  %v7406_v49 = vor.u32 %v8752_v12, %v7403_v17  ;;  %v7414_v60 = vor.u32 %v8753_v34, %v7411_v4  ;;  %v8763_v34 = vld [vmem:[%s9183_s30 + $0x7d0] sm:$0xf0]  ;;  %v7445_v4 = vld [vmem:[%s9183_s30 + $0x7c0] sm:$0xf] }
 0x53e   : > { %v4680_v25 = vpop.f32.mrf.mxu3 }
 0x53f   : > { %vm5911_vm5 = vcmp.gt.f32.partialorder %v5665_v16, 0.0  ;;  %v6039_v20 = vmul.f32 0.15, %v5665_v16  ;;  %v4681_v21 = vadd.f32 %v4680_v25, %v11259_v8  ;;  %v5667_v33 = vpop.f32.mrf.mxu2 }
 0x540   : > { %v5011_v58 = vpop.f32.mrf.mxu0 }
 0x541   : > { %v6167_v0 = vsel %vm5911_vm5, %v5665_v16, %v6039_v20  ;;  %v5010_v57 = vadd.f32 %v5009_v9, %v4681_v21 }
 0x542   : > { %v5340_v27 = vpop.f32.mrf.mxu1  ;;  %6295 = vst [vmem:[%s10380_s15 + $0x188] sm:$0xff] %v6167_v0 }
 0x543   : > { %v5339_v54 = vadd.f32 %v5338_v26, %v5010_v57  ;;  %v7418_v26 = vor.u32 %v8757_v55, %v7417_v47  ;;  %v8759_v47 = vld [vmem:[%s9183_s30 + $0x7b4] sm:$0xf]  ;;  %v7437_v55 = vld [vmem:[%s9183_s30 + $0x7b8] sm:$0xf] }
 0x545   : > { %v5668_v42 = vadd.f32 %v5667_v33, %v5339_v54 }
 0x546   : > { %v4682_v1 = vpop.f32.mrf.mxu3 }
 0x547   : > { %vm5912_vm6 = vcmp.gt.f32.partialorder %v5668_v42, 0.0  ;;  %v6040_v56 = vmul.f32 0.15, %v5668_v42  ;;  %v4683_v38 = vadd.f32 %v4682_v1, %v11260_v30  ;;  %v5669_v9 = vpop.f32.mrf.mxu2  ;;  %v7439_v30 = vld [vmem:[%s9183_s30 + $0x7d4] sm:$0xf0] }
 0x548   : > { %v5014_v45 = vpop.f32.mrf.mxu0 }
 0x549   : > { %v6168_v16 = vsel %vm5912_vm6, %v5668_v42, %v6040_v56  ;;  %v5012_v25 = vadd.f32 %v5011_v58, %v4683_v38  ;;  %v11261_v58 = vld [vmem:[#allocation46_spill] sm:$0xff]  ;;  %v7431_v42 = vld [vmem:[%s9183_s30 + $0x7cc] sm:$0xf0]  ;;  %v8760_v56 = vld [vmem:[%s9183_s30 + $0x7bc] sm:$0xf] }
 0x54a   : > { %v5343_v20 = vpop.f32.mrf.mxu1  ;;  %6296 = vst [vmem:[%s10380_s15 + $0x190] sm:$0xff] %v6168_v16 }
 0x54b   : > { %v5341_v8 = vadd.f32 %v5340_v27, %v5012_v25  ;;  %4724 = vmatmul.bf16.gmra.mxu3 %v7406_v49  ;;  %5053 = vmatmul.bf16.gmra.mxu0 %v7410_v23  ;;  %v8764_v49 = vld [vmem:[%s9183_s30 + $0x7d8] sm:$0xf0] }
 0x54c   : > { %8481 = vmatmul.msk.bf16.gmra.mxu2 %vm3366_vm0, %v7418_v26  ;;  %v7446_v25 = vor.u32 %v8764_v49, %v7445_v4  ;;  %v7465_v4 = vld [vmem:[%s9183_s30 + $0x7f0] sm:$0xf]  ;;  %v7473_v49 = vld [vmem:[%s9183_s30 + $0x7f8] sm:$0xf] }
 0x54d   : > { %5382 = vmatmul.bf16.gmra.mxu1 %v7414_v60  ;;  %v5670_v21 = vadd.f32 %v5669_v9, %v5341_v8  ;;  %v7434_v9 = vor.u32 %v8759_v47, %v7431_v42  ;;  %v7438_v60 = vor.u32 %v8763_v34, %v7437_v55  ;;  %v8766_v55 = vld [vmem:[%s9183_s30 + $0x7ec] sm:$0xf]  ;;  %v7459_v34 = vld [vmem:[%s9183_s30 + $0x804] sm:$0xf0] }
 0x54e   : > { %v4685_v33 = vpop.f32.mrf.mxu3 }
 0x54f   : > { %vm5913_vm7 = vcmp.gt.f32.partialorder %v5670_v21, 0.0  ;;  %v6041_v0 = vmul.f32 0.15, %v5670_v21  ;;  %v4686_v57 = vadd.f32 %v4685_v33, %v11261_v58  ;;  %v5672_v27 = vpop.f32.mrf.mxu2 }
 0x550   : > { %v5016_v54 = vpop.f32.mrf.mxu0 }
 0x551   : > { %v6169_v12 = vsel %vm5913_vm7, %v5670_v21, %v6041_v0  ;;  %v5015_v17 = vadd.f32 %v5014_v45, %v4686_v57 }
 0x552   : > { %v5345_v3 = vpop.f32.mrf.mxu1  ;;  %6297 = vst [vmem:[%s10380_s15 + $0x198] sm:$0xff] %v6169_v12 }
 0x553   : > { %v5344_v43 = vadd.f32 %v5343_v20, %v5015_v17  ;;  %v7442_v20 = vor.u32 %v8760_v56, %v7439_v30  ;;  %v8771_v30 = vld [vmem:[%s9183_s30 + $0x810] sm:$0xf0] }
 0x555   : > { %v5673_v1 = vadd.f32 %v5672_v27, %v5344_v43  ;;  %v11262_v27 = vld [vmem:[#allocation47_spill] sm:$0xff] }
 0x556   : > { %v4687_v38 = vpop.f32.mrf.mxu3 }
 0x557   : > { %vm5914_vm8 = vcmp.gt.f32.partialorder %v5673_v1, 0.0  ;;  %v6042_v23 = vmul.f32 0.15, %v5673_v1  ;;  %v4688_v26 = vadd.f32 %v4687_v38, %v9896_v19  ;;  %v5674_v45 = vpop.f32.mrf.mxu2  ;;  %v8767_v38 = vld [vmem:[%s9183_s30 + $0x7f4] sm:$0xf] }
 0x558   : > { %v5019_v16 = vpop.f32.mrf.mxu0 }
 0x559   : > { %v6170_v8 = vsel %vm5914_vm8, %v5673_v1, %v6042_v23  ;;  %v5017_v21 = vadd.f32 %v5016_v54, %v4688_v26  ;;  %v8770_v1 = vld [vmem:[%s9183_s30 + $0x808] sm:$0xf0]  ;;  %v7462_v26 = vor.u32 %v8766_v55, %v7459_v34 }
 0x55a   : > { %v5348_v33 = vpop.f32.mrf.mxu1  ;;  %6298 = vst [vmem:[%s10380_s15 + $0x1a0] sm:$0xff] %v6170_v8 }
 0x55b   : > { %v5346_v0 = vadd.f32 %v5345_v3, %v5017_v21  ;;  %4729 = vmatmul.bf16.gmra.mxu3 %v7434_v9  ;;  %5058 = vmatmul.bf16.gmra.mxu0 %v7438_v60  ;;  %v7467_v9 = vld [vmem:[%s9183_s30 + $0x80c] sm:$0xf0]  ;;  %v7474_v21 = vor.u32 %v8771_v30, %v7473_v49  ;;  %v7487_v49 = vld [vmem:[%s9183_s30 + $0x83c] sm:$0xf0]  ;;  %v8777_v30 = vld [vmem:[%s9183_s30 + $0x840] sm:$0xf0] }
 0x55c   : > { %8482 = vmatmul.msk.bf16.gmra.mxu2 %vm3366_vm0, %v7446_v25  ;;  %v11263_v60 = vld [vmem:[#allocation48_spill] sm:$0xff] }
 0x55d   : > { %5387 = vmatmul.bf16.gmra.mxu1 %v7442_v20  ;;  %v5675_v19 = vadd.f32 %v5674_v45, %v5346_v0  ;;  %v7466_v20 = vor.u32 %v8770_v1, %v7465_v4  ;;  %v8773_v1 = vld [vmem:[%s9183_s30 + $0x824] sm:$0xf] }
 0x55e   : > { %v4690_v58 = vpop.f32.mrf.mxu3 }
 0x55f   : > { %vm5915_vm9 = vcmp.gt.f32.partialorder %v5675_v19, 0.0  ;;  %v6043_v57 = vmul.f32 0.15, %v5675_v19  ;;  %v4691_v54 = vadd.f32 %v4690_v58, %v11262_v27  ;;  %v5677_v12 = vpop.f32.mrf.mxu2 }
 0x560   : > { %v5021_v17 = vpop.f32.mrf.mxu0 }
 0x561   : > { %v6171_v3 = vsel %vm5915_vm9, %v5675_v19, %v6043_v57  ;;  %v5020_v43 = vadd.f32 %v5019_v16, %v4691_v54 }
 0x562   : > { %v5350_v47 = vpop.f32.mrf.mxu1  ;;  %6299 = vst [vmem:[%s10380_s15 + $0x1a8] sm:$0xff] %v6171_v3 }
 0x563   : > { %v5349_v42 = vadd.f32 %v5348_v33, %v5020_v43  ;;  %v7470_v33 = vor.u32 %v8767_v38, %v7467_v9  ;;  %v7501_v38 = vld [vmem:[%s9183_s30 + $0x830] sm:$0xf] }
 0x565   : > { %v5678_v56 = vadd.f32 %v5677_v12, %v5349_v42 }
 0x566   : > { %v4692_v23 = vpop.f32.mrf.mxu3 }
 0x567   : > { %vm5916_vm10 = vcmp.gt.f32.partialorder %v5678_v56, 0.0  ;;  %v6044_v45 = vmul.f32 0.15, %v5678_v56  ;;  %v4693_v25 = vadd.f32 %v4692_v23, %v11263_v60  ;;  %v5679_v16 = vpop.f32.mrf.mxu2  ;;  %v8778_v23 = vld [vmem:[%s9183_s30 + $0x848] sm:$0xf0] }
 0x568   : > { %v5024_v8 = vpop.f32.mrf.mxu0 }
 0x569   : > { %v6172_v0 = vsel %vm5916_vm10, %v5678_v56, %v6044_v45  ;;  %v5022_v19 = vadd.f32 %v5021_v17, %v4693_v25  ;;  %v11264_v17 = vld [vmem:[#allocation49_spill] sm:$0xff]  ;;  %v7493_v56 = vld [vmem:[%s9183_s30 + $0x828] sm:$0xf]  ;;  %v7490_v25 = vor.u32 %v8773_v1, %v7487_v49 }
 0x56a   : > { %v5353_v58 = vpop.f32.mrf.mxu1  ;;  %6300 = vst [vmem:[%s10380_s15 + $0x1b0] sm:$0xff] %v6172_v0  ;;  %v7495_v45 = vld [vmem:[%s9183_s30 + $0x844] sm:$0xf0] }
 0x56b   : > { %v5351_v57 = vadd.f32 %v5350_v47, %v5022_v19  ;;  %4734 = vmatmul.bf16.gmra.mxu3 %v7462_v26  ;;  %5063 = vmatmul.bf16.gmra.mxu0 %v7466_v20  ;;  %v8774_v26 = vld [vmem:[%s9183_s30 + $0x82c] sm:$0xf]  ;;  %v11265_v20 = vld [vmem:[#allocation50_spill] sm:$0xff]  ;;  %v7502_v19 = vor.u32 %v8778_v23, %v7501_v38  ;;  %v7515_v38 = vld [vmem:[%s9183_s30 + $0x874] sm:$0xf0] }
 0x56c   : > { %8483 = vmatmul.msk.bf16.gmra.mxu2 %vm3366_vm0, %v7474_v21  ;;  %v8784_v23 = vld [vmem:[%s9183_s30 + $0x878] sm:$0xf0] }
 0x56d   : > { %5392 = vmatmul.bf16.gmra.mxu1 %v7470_v33  ;;  %v5680_v27 = vadd.f32 %v5679_v16, %v5351_v57  ;;  %v7494_v33 = vor.u32 %v8777_v30, %v7493_v56  ;;  %v8780_v30 = vld [vmem:[%s9183_s30 + $0x85c] sm:$0xf] }
 0x56e   : > { %v4695_v54 = vpop.f32.mrf.mxu3 }
 0x56f   : > { %vm5917_vm11 = vcmp.gt.f32.partialorder %v5680_v27, 0.0  ;;  %v6045_v12 = vmul.f32 0.15, %v5680_v27  ;;  %v4696_v3 = vadd.f32 %v4695_v54, %v11264_v17  ;;  %v5682_v43 = vpop.f32.mrf.mxu2 }
 0x570   : > { %v5026_v47 = vpop.f32.mrf.mxu0 }
 0x571   : > { %v6173_v42 = vsel %vm5917_vm11, %v5680_v27, %v6045_v12  ;;  %v5025_v55 = vadd.f32 %v5024_v8, %v4696_v3 }
 0x572   : > { %v5355_v34 = vpop.f32.mrf.mxu1  ;;  %6301 = vst [vmem:[%s10380_s15 + $0x1b8] sm:$0xff] %v6173_v42 }
 0x573   : > { %v5354_v4 = vadd.f32 %v5353_v58, %v5025_v55  ;;  %v7498_v58 = vor.u32 %v8774_v26, %v7495_v45  ;;  %v7529_v26 = vld [vmem:[%s9183_s30 + $0x868] sm:$0xf] }
 0x575   : > { %v5683_v9 = vadd.f32 %v5682_v43, %v5354_v4 }
 0x576   : > { %v4697_v60 = vpop.f32.mrf.mxu3 }
 0x577   : > { %vm5918_vm12 = vcmp.gt.f32.partialorder %v5683_v9, 0.0  ;;  %v6046_v16 = vmul.f32 0.15, %v5683_v9  ;;  %v4698_v21 = vadd.f32 %v4697_v60, %v11265_v20  ;;  %v5684_v8 = vpop.f32.mrf.mxu2  ;;  %v8785_v60 = vld [vmem:[%s9183_s30 + $0x880] sm:$0xf0] }
 0x578   : > { %v5029_v0 = vpop.f32.mrf.mxu0 }
 0x579   : > { %v6174_v57 = vsel %vm5918_vm12, %v5683_v9, %v6046_v16  ;;  %v5027_v27 = vadd.f32 %v5026_v47, %v4698_v21  ;;  %v11266_v47 = vld [vmem:[#allocation51_spill] sm:$0xff]  ;;  %v7521_v9 = vld [vmem:[%s9183_s30 + $0x860] sm:$0xf]  ;;  %v7518_v21 = vor.u32 %v8780_v30, %v7515_v38 }
 0x57a   : > { %v5358_v54 = vpop.f32.mrf.mxu1  ;;  %6302 = vst [vmem:[%s10380_s15 + $0x1c0] sm:$0xff] %v6174_v57  ;;  %v7523_v16 = vld [vmem:[%s9183_s30 + $0x87c] sm:$0xf0] }
 0x57b   : > { %v5356_v12 = vadd.f32 %v5355_v34, %v5027_v27  ;;  %4739 = vmatmul.bf16.gmra.mxu3 %v7490_v25  ;;  %5068 = vmatmul.bf16.gmra.mxu0 %v7494_v33  ;;  %v8781_v25 = vld [vmem:[%s9183_s30 + $0x864] sm:$0xf]  ;;  %v11267_v33 = vld [vmem:[#allocation52_spill] sm:$0xff]  ;;  %v7530_v27 = vor.u32 %v8785_v60, %v7529_v26 }
 0x57c   : > { %8484 = vmatmul.msk.bf16.gmra.mxu2 %vm3366_vm0, %v7502_v19  ;;  %v7543_v26 = vld [vmem:[%s9183_s30 + $0x8ac] sm:$0xf0]  ;;  %v8791_v60 = vld [vmem:[%s9183_s30 + $0x8b0] sm:$0xf0] }
 0x57d   : > { %5397 = vmatmul.bf16.gmra.mxu1 %v7498_v58  ;;  %v5685_v17 = vadd.f32 %v5684_v8, %v5356_v12  ;;  %v7522_v58 = vor.u32 %v8784_v23, %v7521_v9  ;;  %v8787_v23 = vld [vmem:[%s9183_s30 + $0x894] sm:$0xf] }
 0x57e   : > { %v4700_v3 = vpop.f32.mrf.mxu3 }
 0x57f   : > { %vm5919_vm13 = vcmp.gt.f32.partialorder %v5685_v17, 0.0  ;;  %v6047_v43 = vmul.f32 0.15, %v5685_v17  ;;  %v4701_v42 = vadd.f32 %v4700_v3, %v11266_v47  ;;  %v5687_v55 = vpop.f32.mrf.mxu2 }
 0x580   : > { %v5031_v34 = vpop.f32.mrf.mxu0 }
 0x581   : > { %v6175_v4 = vsel %vm5919_vm13, %v5685_v17, %v6047_v43  ;;  %v5030_v1 = vadd.f32 %v5029_v0, %v4701_v42 }
 0x582   : > { %v5360_v49 = vpop.f32.mrf.mxu1  ;;  %6303 = vst [vmem:[%s10380_s15 + $0x1c8] sm:$0xff] %v6175_v4 }
 0x583   : > { %v5359_v56 = vadd.f32 %v5358_v54, %v5030_v1  ;;  %v7526_v54 = vor.u32 %v8781_v25, %v7523_v16  ;;  %v7557_v25 = vld [vmem:[%s9183_s30 + $0x8a0] sm:$0xf] }
 0x585   : > { %v5688_v45 = vadd.f32 %v5687_v55, %v5359_v56 }
 0x586   : > { %v4702_v20 = vpop.f32.mrf.mxu3 }
 0x587   : > { %vm5920_vm14 = vcmp.gt.f32.partialorder %v5688_v45, 0.0  ;;  %v6048_v8 = vmul.f32 0.15, %v5688_v45  ;;  %v4703_v19 = vadd.f32 %v4702_v20, %v11267_v33  ;;  %v5689_v0 = vpop.f32.mrf.mxu2  ;;  %v8792_v20 = vld [vmem:[%s9183_s30 + $0x8b8] sm:$0xf0] }
 0x588   : > { %v5034_v57 = vpop.f32.mrf.mxu0 }
 0x589   : > { %v6176_v12 = vsel %vm5920_vm14, %v5688_v45, %v6048_v8  ;;  %v5032_v17 = vadd.f32 %v5031_v34, %v4703_v19  ;;  %v11268_v34 = vld [vmem:[#allocation53_spill] sm:$0xff]  ;;  %v7546_v19 = vor.u32 %v8787_v23, %v7543_v26 }
 0x58a   : > { %v5363_v3 = vpop.f32.mrf.mxu1  ;;  %6304 = vst [vmem:[%s10380_s15 + $0x1d0] sm:$0xff] %v6176_v12  ;;  %v7549_v45 = vld [vmem:[%s9183_s30 + $0x898] sm:$0xf] }
 0x58b   : > { %v5361_v43 = vadd.f32 %v5360_v49, %v5032_v17  ;;  %4744 = vmatmul.bf16.gmra.mxu3 %v7518_v21  ;;  %5073 = vmatmul.bf16.gmra.mxu0 %v7522_v58  ;;  %v8788_v21 = vld [vmem:[%s9183_s30 + $0x89c] sm:$0xf]  ;;  %v7551_v8 = vld [vmem:[%s9183_s30 + $0x8b4] sm:$0xf0]  ;;  %v11269_v58 = vld [vmem:[#allocation54_spill] sm:$0xff]  ;;  %v7558_v17 = vor.u32 %v8792_v20, %v7557_v25 }
 0x58c   : > { %8485 = vmatmul.msk.bf16.gmra.mxu2 %vm3366_vm0, %v7530_v27  ;;  %v7571_v25 = vld [vmem:[%s9183_s30 + $0x8e4] sm:$0xf0]  ;;  %v8798_v20 = vld [vmem:[%s9183_s30 + $0x8e8] sm:$0xf0] }
 0x58d   : > { %5402 = vmatmul.bf16.gmra.mxu1 %v7526_v54  ;;  %v5690_v47 = vadd.f32 %v5689_v0, %v5361_v43  ;;  %v7550_v54 = vor.u32 %v8791_v60, %v7549_v45  ;;  %v8794_v60 = vld [vmem:[%s9183_s30 + $0x8cc] sm:$0xf] }
 0x58e   : > { %v4705_v42 = vpop.f32.mrf.mxu3 }
 0x58f   : > { %vm5921_vm15 = vcmp.gt.f32.partialorder %v5690_v47, 0.0  ;;  %v6049_v55 = vmul.f32 0.15, %v5690_v47  ;;  %v4706_v4 = vadd.f32 %v4705_v42, %v11268_v34  ;;  %v5692_v1 = vpop.f32.mrf.mxu2 }
 0x590   : > { %v5036_v49 = vpop.f32.mrf.mxu0 }
 0x591   : > { %v6177_v56 = vsel %vm5921_vm15, %v5690_v47, %v6049_v55  ;;  %v5035_v30 = vadd.f32 %v5034_v57, %v4706_v4 }
 0x592   : > { %v5365_v38 = vpop.f32.mrf.mxu1  ;;  %6305 = vst [vmem:[%s10380_s15 + $0x1d8] sm:$0xff] %v6177_v56 }
 0x593   : > { %v5364_v9 = vadd.f32 %v5363_v3, %v5035_v30  ;;  %v7554_v3 = vor.u32 %v8788_v21, %v7551_v8  ;;  %v7585_v21 = vld [vmem:[%s9183_s30 + $0x8d8] sm:$0xf] }
 0x595   : > { %v5693_v16 = vadd.f32 %v5692_v1, %v5364_v9 }
 0x596   : > { %v4707_v33 = vpop.f32.mrf.mxu3 }
 0x597   : > { %vm5922_vm1 = vcmp.gt.f32.partialorder %v5693_v16, 0.0  ;;  %v6050_v0 = vmul.f32 0.15, %v5693_v16  ;;  %v4708_v27 = vadd.f32 %v4707_v33, %v11269_v58  ;;  %v5694_v57 = vpop.f32.mrf.mxu2  ;;  %v8799_v33 = vld [vmem:[%s9183_s30 + $0x8f0] sm:$0xf0] }
 0x598   : > { %v5039_v12 = vpop.f32.mrf.mxu0 }
 0x599   : > { %v6178_v43 = vsel %vm5922_vm1, %v5693_v16, %v6050_v0  ;;  %v5037_v47 = vadd.f32 %v5036_v49, %v4708_v27  ;;  %v11270_v49 = vld [vmem:[#allocation55_spill] sm:$0xff]  ;;  %v7577_v16 = vld [vmem:[%s9183_s30 + $0x8d0] sm:$0xf]  ;;  %v7574_v27 = vor.u32 %v8794_v60, %v7571_v25  ;;  %v8801_v25 = vld [vmem:[%s9183_s30 + $0x904] sm:$0xf] }
 0x59a   : > { %v5368_v42 = vpop.f32.mrf.mxu1  ;;  %6306 = vst [vmem:[%s10380_s15 + $0x1e0] sm:$0xff] %v6178_v43  ;;  %v7579_v0 = vld [vmem:[%s9183_s30 + $0x8ec] sm:$0xf0]  ;;  %v7586_v43 = vor.u32 %v8799_v33, %v7585_v21  ;;  %v8805_v21 = vld [vmem:[%s9183_s30 + $0x920] sm:$0xf0] }
 0x59b   : > { %v5366_v55 = vadd.f32 %v5365_v38, %v5037_v47  ;;  %4749 = vmatmul.bf16.gmra.mxu3 %v7546_v19  ;;  %5078 = vmatmul.bf16.gmra.mxu0 %v7550_v54  ;;  %v8795_v19 = vld [vmem:[%s9183_s30 + $0x8d4] sm:$0xf] }
 0x59c   : > { %8486 = vmatmul.msk.bf16.gmra.mxu2 %vm3366_vm0, %v7558_v17  ;;  %v7578_v17 = vor.u32 %v8798_v20, %v7577_v16  ;;  %v7582_v47 = vor.u32 %v8795_v19, %v7579_v0  ;;  %v7599_v16 = vld [vmem:[%s9183_s30 + $0x91c] sm:$0xf0]  ;;  %v7605_v20 = vld [vmem:[%s9183_s30 + $0x908] sm:$0xf]  ;;  %v8806_v19 = vld [vmem:[%s9183_s30 + $0x928] sm:$0xf0] }
 0x59d   : > { %5407 = vmatmul.bf16.gmra.mxu1 %v7554_v3  ;;  %v5695_v34 = vadd.f32 %v5694_v57, %v5366_v55  ;;  %v8802_v0 = vld [vmem:[%s9183_s30 + $0x90c] sm:$0xf] }
 0x59e   : > { %v4710_v4 = vpop.f32.mrf.mxu3 }
 0x59f   : > { %vm5923_vm2 = vcmp.gt.f32.partialorder %v5695_v34, 0.0  ;;  %v6051_v1 = vmul.f32 0.15, %v5695_v34  ;;  %v4711_v56 = vadd.f32 %v4710_v4, %v11270_v49  ;;  %v5697_v30 = vpop.f32.mrf.mxu2 }
 0x5a0   : > { %v5041_v38 = vpop.f32.mrf.mxu0 }
 0x5a1   : > { %v6179_v9 = vsel %vm5923_vm2, %v5695_v34, %v6051_v1  ;;  %v5040_v23 = vadd.f32 %v5039_v12, %v4711_v56  ;;  %v11271_v56 = vld [vmem:[#allocation57_spill] sm:$0xff] }
 0x5a2   : > { %v5370_v26 = vpop.f32.mrf.mxu1  ;;  %6307 = vst [vmem:[%s10380_s15 + $0x1e8] sm:$0xff] %v6179_v9 }
 0x5a3   : > { %v5369_v45 = vadd.f32 %v5368_v42, %v5040_v23 }
 0x5a5   : > { %v5698_v8 = vadd.f32 %v5697_v30, %v5369_v45 }
 0x5a6   : > { %v4712_v58 = vpop.f32.mrf.mxu3 }
 0x5a7   : > { %vm5924_vm3 = vcmp.gt.f32.partialorder %v5698_v8, 0.0  ;;  %v6052_v57 = vmul.f32 0.15, %v5698_v8  ;;  %v4713_v54 = vadd.f32 %v4712_v58, %v10020_v61  ;;  %v5699_v12 = vpop.f32.mrf.mxu2  ;;  %v7607_v58 = vld [vmem:[%s9183_s30 + $0x924] sm:$0xf0] }
 0x5a8   : > { %v5044_v3 = vpop.f32.mrf.mxu0 }
 0x5a9   : > { %v6180_v42 = vsel %vm5924_vm3, %v5698_v8, %v6052_v57  ;;  %v5042_v55 = vadd.f32 %v5041_v38, %v4713_v54  ;;  %v7613_v8 = vld [vmem:[%s9183_s30 + $0x910] sm:$0xf]  ;;  %v7602_v57 = vor.u32 %v8801_v25, %v7599_v16  ;;  %v7627_v25 = vld [vmem:[%s9183_s30 + $0x954] sm:$0xf0]  ;;  %v7633_v16 = vld [vmem:[%s9183_s30 + $0x940] sm:$0xf] }
 0x5aa   : > { %v5373_v34 = vpop.f32.mrf.mxu1  ;;  %6308 = vst [vmem:[%s10380_s15 + $0x1f0] sm:$0xff] %v6180_v42  ;;  %v7610_v42 = vor.u32 %v8802_v0, %v7607_v58  ;;  %v7635_v0 = vld [vmem:[%s9183_s30 + $0x95c] sm:$0xf0] }
 0x5ab   : > { %v5371_v4 = vadd.f32 %v5370_v26, %v5042_v55  ;;  %4754 = vmatmul.bf16.gmra.mxu3 %v7574_v27  ;;  %5083 = vmatmul.bf16.gmra.mxu0 %v7578_v17 }
 0x5ac   : > { %8487 = vmatmul.msk.bf16.gmra.mxu2 %vm3366_vm0, %v7586_v43 }
 0x5ad   : > { %5412 = vmatmul.bf16.gmra.mxu1 %v7582_v47  ;;  %v5700_v61 = vadd.f32 %v5699_v12, %v5371_v4  ;;  %v7614_v47 = vor.u32 %v8806_v19, %v7613_v8  ;;  %v8809_v19 = vld [vmem:[%s9183_s30 + $0x944] sm:$0xf] }
 0x5ae   : > { %v4715_v1 = vpop.f32.mrf.mxu3 }
 0x5af   : > { %vm5925_vm4 = vcmp.gt.f32.partialorder %v5700_v61, 0.0  ;;  %v6053_v49 = vmul.f32 0.15, %v5700_v61  ;;  %v4716_v30 = vadd.f32 %v4715_v1, %v11271_v56  ;;  %v5702_v38 = vpop.f32.mrf.mxu2 }
 0x5b0   : > { %v5046_v9 = vpop.f32.mrf.mxu0 }
 0x5b1   : > { %v6181_v23 = vsel %vm5925_vm4, %v5700_v61, %v6053_v49  ;;  %v5045_v26 = vadd.f32 %v5044_v3, %v4716_v30  ;;  %v7606_v3 = vor.u32 %v8805_v21, %v7605_v20  ;;  %v8812_v20 = vld [vmem:[%s9183_s30 + $0x958] sm:$0xf0]  ;;  %v7641_v21 = vld [vmem:[%s9183_s30 + $0x948] sm:$0xf] }
 0x5b2   : > { %v5375_v45 = vpop.f32.mrf.mxu1  ;;  %6309 = vst [vmem:[%s10380_s15 + $0x1f8] sm:$0xff] %v6181_v23 }
 0x5b3   : > { %v5374_v60 = vadd.f32 %v5373_v34, %v5045_v26 }
 0x5b5   : > { %v5703_v33 = vadd.f32 %v5702_v38, %v5374_v60  ;;  %v8808_v60 = vld [vmem:[%s9183_s30 + $0x93c] sm:$0xf] }
 0x5b6   : > { %v4717_v27 = vpop.f32.mrf.mxu3 }
 0x5b7   : > { %vm5926_vm5 = vcmp.gt.f32.partialorder %v5703_v33, 0.0  ;;  %v6054_v54 = vmul.f32 0.15, %v5703_v33  ;;  %v4718_v12 = vadd.f32 %v4717_v27, %v10049_v62  ;;  %v5704_v17 = vpop.f32.mrf.mxu2 }
 0x5b8   : > { %v5049_v43 = vpop.f32.mrf.mxu0 }
 0x5b9   : > { %v6182_v55 = vsel %vm5926_vm5, %v5703_v33, %v6054_v54  ;;  %v5047_v34 = vadd.f32 %v5046_v9, %v4718_v12  ;;  %v8813_v33 = vld [vmem:[%s9183_s30 + $0x960] sm:$0xf0]  ;;  %v7634_v12 = vor.u32 %v8812_v20, %v7633_v16  ;;  %v8820_v20 = vld [vmem:[%s9183_s30 + $0x998] sm:$0xf0] }
 0x5ba   : > { %v5378_v4 = vpop.f32.mrf.mxu1  ;;  %6310 = vst [vmem:[%s10380_s15 + $0x200] sm:$0xff] %v6182_v55 }
 0x5bb   : > { %v5376_v61 = vadd.f32 %v5375_v45, %v5047_v34  ;;  %4759 = vmatmul.bf16.gmra.mxu3 %v7602_v57  ;;  %5088 = vmatmul.bf16.gmra.mxu0 %v7606_v3  ;;  %v7642_v3 = vor.u32 %v8813_v33, %v7641_v21  ;;  %v8816_v21 = vld [vmem:[%s9183_s30 + $0x97c] sm:$0xf] }
 0x5bc   : > { %8488 = vmatmul.msk.bf16.gmra.mxu2 %vm3366_vm0, %v7614_v47 }
 0x5bd   : > { %5417 = vmatmul.bf16.gmra.mxu1 %v7610_v42  ;;  %v5705_v62 = vadd.f32 %v5704_v17, %v5376_v61 }
 0x5be   : > { %v4720_v1 = vpop.f32.mrf.mxu3 }
 0x5bf   : > { %vm5927_vm6 = vcmp.gt.f32.partialorder %v5705_v62, 0.0  ;;  %v6055_v49 = vmul.f32 0.15, %v5705_v62  ;;  %v4721_v56 = vadd.f32 %v4720_v1, %v10055_v44  ;;  %v5707_v30 = vpop.f32.mrf.mxu2  ;;  %v7630_v44 = vor.u32 %v8808_v60, %v7627_v25  ;;  %v8819_v60 = vld [vmem:[%s9183_s30 + $0x990] sm:$0xf0] }
 0x5c0   : > { %v5051_v38 = vpop.f32.mrf.mxu0  ;;  %v7669_v25 = vld [vmem:[%s9183_s30 + $0x980] sm:$0xf] }
 0x5c1   : > { %v6183_v9 = vsel %vm5927_vm6, %v5705_v62, %v6055_v49  ;;  %v5050_v23 = vadd.f32 %v5049_v43, %v4721_v56  ;;  %v7638_v43 = vor.u32 %v8809_v19, %v7635_v0 }
 0x5c2   : > { %v5380_v26 = vpop.f32.mrf.mxu1  ;;  %6311 = vst [vmem:[%s10380_s15 + $0x208] sm:$0xff] %v6183_v9 }
 0x5c3   : > { %v5379_v45 = vadd.f32 %v5378_v4, %v5050_v23  ;;  %v8815_v23 = vld [vmem:[%s9183_s30 + $0x974] sm:$0xf] }
 0x5c5   : > { %v5708_v8 = vadd.f32 %v5707_v30, %v5379_v45  ;;  %v7661_v45 = vld [vmem:[%s9183_s30 + $0x978] sm:$0xf] }
 0x5c6   : > { %v4722_v58 = vpop.f32.mrf.mxu3 }
 0x5c7   : > { %vm5928_vm7 = vcmp.gt.f32.partialorder %v5708_v8, 0.0  ;;  %v6056_v27 = vmul.f32 0.15, %v5708_v8  ;;  %v4723_v57 = vadd.f32 %v4722_v58, %v10069_v48  ;;  %v5709_v54 = vpop.f32.mrf.mxu2 }
 0x5c8   : > { %v5054_v17 = vpop.f32.mrf.mxu0 }
 0x5c9   : > { %v6184_v47 = vsel %vm5928_vm7, %v5708_v8, %v6056_v27  ;;  %v5052_v42 = vadd.f32 %v5051_v38, %v4723_v57  ;;  %v7663_v8 = vld [vmem:[%s9183_s30 + $0x994] sm:$0xf0]  ;;  %v7670_v57 = vor.u32 %v8820_v20, %v7669_v25 }
 0x5ca   : > { %v5383_v55 = vpop.f32.mrf.mxu1  ;;  %6312 = vst [vmem:[%s10380_s15 + $0x210] sm:$0xff] %v6184_v47 }
 0x5cb   : > { %v5381_v34 = vadd.f32 %v5380_v26, %v5052_v42  ;;  %4764 = vmatmul.bf16.gmra.mxu3 %v7630_v44  ;;  %5093 = vmatmul.bf16.gmra.mxu0 %v7634_v12  ;;  %v7655_v26 = vld [vmem:[%s9183_s30 + $0x98c] sm:$0xf0]  ;;  %v7662_v44 = vor.u32 %v8819_v60, %v7661_v45  ;;  %v8823_v45 = vld [vmem:[%s9183_s30 + $0x9b4] sm:$0xf] }
 0x5cc   : > { %8489 = vmatmul.msk.bf16.gmra.mxu2 %vm3366_vm0, %v7642_v3  ;;  %v7691_v60 = vld [vmem:[%s9183_s30 + $0x9cc] sm:$0xf0] }
 0x5cd   : > { %5422 = vmatmul.bf16.gmra.mxu1 %v7638_v43  ;;  %v5710_v48 = vadd.f32 %v5709_v54, %v5381_v34  ;;  %v7666_v54 = vor.u32 %v8816_v21, %v7663_v8 }
 0x5ce   : > { %v4725_v4 = vpop.f32.mrf.mxu3 }
 0x5cf   : > { %vm5929_vm8 = vcmp.gt.f32.partialorder %v5710_v48, 0.0  ;;  %v6057_v61 = vmul.f32 0.15, %v5710_v48  ;;  %v4726_v62 = vadd.f32 %v4725_v4, %v10078_v14  ;;  %v5712_v1 = vpop.f32.mrf.mxu2  ;;  %v7658_v14 = vor.u32 %v8815_v23, %v7655_v26  ;;  %v8827_v26 = vld [vmem:[%s9183_s30 + $0x9d0] sm:$0xf0] }
 0x5d0   : > { %v5056_v49 = vpop.f32.mrf.mxu0 }
 0x5d1   : > { %v6185_v56 = vsel %vm5929_vm8, %v5710_v48, %v6057_v61  ;;  %v5055_v30 = vadd.f32 %v5054_v17, %v4726_v62 }
 0x5d2   : > { %v5385_v38 = vpop.f32.mrf.mxu1  ;;  %6313 = vst [vmem:[%s10380_s15 + $0x218] sm:$0xff] %v6185_v56  ;;  %v7683_v56 = vld [vmem:[%s9183_s30 + $0x9c4] sm:$0xf0] }
 0x5d3   : > { %v5384_v9 = vadd.f32 %v5383_v55, %v5055_v30  ;;  %v7689_v30 = vld [vmem:[%s9183_s30 + $0x9b0] sm:$0xf] }
 0x5d5   : > { %v5713_v16 = vadd.f32 %v5712_v1, %v5384_v9  ;;  %v7697_v9 = vld [vmem:[%s9183_s30 + $0x9b8] sm:$0xf] }
 0x5d6   : > { %v4727_v33 = vpop.f32.mrf.mxu3 }
 0x5d7   : > { %vm5930_vm9 = vcmp.gt.f32.partialorder %v5713_v16, 0.0  ;;  %v6058_v19 = vmul.f32 0.15, %v5713_v16  ;;  %v4728_v0 = vadd.f32 %v4727_v33, %v10092_v13  ;;  %v5714_v58 = vpop.f32.mrf.mxu2 }
 0x5d8   : > { %v5059_v27 = vpop.f32.mrf.mxu0 }
 0x5d9   : > { %v6186_v12 = vsel %vm5930_vm9, %v5713_v16, %v6058_v19  ;;  %v5057_v17 = vadd.f32 %v5056_v49, %v4728_v0  ;;  %v8822_v49 = vld [vmem:[%s9183_s30 + $0x9ac] sm:$0xf]  ;;  %v7694_v19 = vor.u32 %v8823_v45, %v7691_v60 }
 0x5da   : > { %v5388_v3 = vpop.f32.mrf.mxu1  ;;  %6314 = vst [vmem:[%s10380_s15 + $0x220] sm:$0xff] %v6186_v12 }
 0x5db   : > { %v5386_v43 = vadd.f32 %v5385_v38, %v5057_v17  ;;  %4769 = vmatmul.bf16.gmra.mxu3 %v7658_v14  ;;  %5098 = vmatmul.bf16.gmra.mxu0 %v7662_v44  ;;  %v8826_v38 = vld [vmem:[%s9183_s30 + $0x9c8] sm:$0xf0]  ;;  %v7698_v14 = vor.u32 %v8827_v26, %v7697_v9 }
 0x5dc   : > { %8490 = vmatmul.msk.bf16.gmra.mxu2 %vm3366_vm0, %v7670_v57  ;;  %v7690_v8 = vor.u32 %v8826_v38, %v7689_v30 }
 0x5dd   : > { %5427 = vmatmul.bf16.gmra.mxu1 %v7666_v54  ;;  %v5715_v13 = vadd.f32 %v5714_v58, %v5386_v43 }
 0x5de   : > { %v4730_v47 = vpop.f32.mrf.mxu3 }
 0x5df   : > { %vm5931_vm10 = vcmp.gt.f32.partialorder %v5715_v13, 0.0  ;;  %v6059_v42 = vmul.f32 0.15, %v5715_v13  ;;  %v4731_v55 = vadd.f32 %v4730_v47, %v10098_v28  ;;  %v5717_v34 = vpop.f32.mrf.mxu2  ;;  %v7686_v28 = vor.u32 %v8822_v49, %v7683_v56  ;;  %v8830_v49 = vld [vmem:[%s9183_s30 + $0x9ec] sm:$0xf] }
 0x5e0   : > { %v5061_v48 = vpop.f32.mrf.mxu0  ;;  %v7719_v56 = vld [vmem:[%s9183_s30 + $0xa04] sm:$0xf0] }
 0x5e1   : > { %v6187_v4 = vsel %vm5931_vm10, %v5715_v13, %v6059_v42  ;;  %v5060_v61 = vadd.f32 %v5059_v27, %v4731_v55  ;;  %v8829_v55 = vld [vmem:[%s9183_s30 + $0x9e4] sm:$0xf] }
 0x5e2   : > { %v5390_v62 = vpop.f32.mrf.mxu1  ;;  %6315 = vst [vmem:[%s10380_s15 + $0x228] sm:$0xff] %v6187_v4  ;;  %v8833_v4 = vld [vmem:[%s9183_s30 + $0xa00] sm:$0xf0] }
 0x5e3   : > { %v5389_v1 = vadd.f32 %v5388_v3, %v5060_v61  ;;  %v7725_v61 = vld [vmem:[%s9183_s30 + $0x9f0] sm:$0xf] }
 0x5e5   : > { %v5718_v23 = vadd.f32 %v5717_v34, %v5389_v1  ;;  %v7711_v34 = vld [vmem:[%s9183_s30 + $0x9fc] sm:$0xf0]  ;;  %v8834_v1 = vld [vmem:[%s9183_s30 + $0xa08] sm:$0xf0] }
 0x5e6   : > { %v4732_v25 = vpop.f32.mrf.mxu3  ;;  %v7726_v60 = vor.u32 %v8834_v1, %v7725_v61 }
 0x5e7   : > { %vm5932_vm11 = vcmp.gt.f32.partialorder %v5718_v23, 0.0  ;;  %v6060_v16 = vmul.f32 0.15, %v5718_v23  ;;  %v4733_v20 = vadd.f32 %v4732_v25, %v10112_v63  ;;  %v5719_v21 = vpop.f32.mrf.mxu2  ;;  %v7722_v25 = vor.u32 %v8830_v49, %v7719_v56 }
 0x5e8   : > { %v5064_v33 = vpop.f32.mrf.mxu0 }
 0x5e9   : > { %v6188_v0 = vsel %vm5932_vm11, %v5718_v23, %v6060_v16  ;;  %v5062_v58 = vadd.f32 %v5061_v48, %v4733_v20  ;;  %v7717_v48 = vld [vmem:[%s9183_s30 + $0x9e8] sm:$0xf] }
 0x5ea   : > { %v5393_v44 = vpop.f32.mrf.mxu1  ;;  %6316 = vst [vmem:[%s10380_s15 + $0x230] sm:$0xff] %v6188_v0  ;;  %v7718_v26 = vor.u32 %v8833_v4, %v7717_v48 }
 0x5eb   : > { %v5391_v27 = vadd.f32 %v5390_v62, %v5062_v58  ;;  %4774 = vmatmul.bf16.gmra.mxu3 %v7686_v28  ;;  %5103 = vmatmul.bf16.gmra.mxu0 %v7690_v8 }
 0x5ec   : > { %8491 = vmatmul.msk.bf16.gmra.mxu2 %vm3366_vm0, %v7698_v14 }
 0x5ed   : > { %5432 = vmatmul.bf16.gmra.mxu1 %v7694_v19  ;;  %v5720_v63 = vadd.f32 %v5719_v21, %v5391_v27 }
 0x5ee   : > { %v4735_v57 = vpop.f32.mrf.mxu3 }
 0x5ef   : > { %vm5933_vm12 = vcmp.gt.f32.partialorder %v5720_v63, 0.0  ;;  %v6061_v54 = vmul.f32 0.15, %v5720_v63  ;;  %v4736_v12 = vadd.f32 %v4735_v57, %v10121_v31  ;;  %v5722_v17 = vpop.f32.mrf.mxu2  ;;  %v7714_v31 = vor.u32 %v8829_v55, %v7711_v34  ;;  %v8836_v57 = vld [vmem:[%s9183_s30 + $0xa1c] sm:$0xf] }
 0x5f0   : > { %v5066_v3 = vpop.f32.mrf.mxu0 }
 0x5f1   : > { %v6189_v43 = vsel %vm5933_vm12, %v5720_v63, %v6061_v54  ;;  %v5065_v13 = vadd.f32 %v5064_v33, %v4736_v12  ;;  %v7739_v54 = vld [vmem:[%s9183_s30 + $0xa34] sm:$0xf0]  ;;  %v7745_v12 = vld [vmem:[%s9183_s30 + $0xa20] sm:$0xf] }
 0x5f2   : > { %v5395_v47 = vpop.f32.mrf.mxu1  ;;  %6317 = vst [vmem:[%s10380_s15 + $0x238] sm:$0xff] %v6189_v43 }
 0x5f3   : > { %v5394_v42 = vadd.f32 %v5393_v44, %v5065_v13  ;;  %v8841_v13 = vld [vmem:[%s9183_s30 + $0xa40] sm:$0xf0] }
 0x5f5   : > { %v5723_v62 = vadd.f32 %v5722_v17, %v5394_v42  ;;  %v8840_v17 = vld [vmem:[%s9183_s30 + $0xa38] sm:$0xf0]  ;;  %v7747_v42 = vld [vmem:[%s9183_s30 + $0xa3c] sm:$0xf0] }
 0x5f6   : > { %v4737_v30 = vpop.f32.mrf.mxu3  ;;  %v7746_v61 = vor.u32 %v8840_v17, %v7745_v12 }
 0x5f7   : > { %vm5934_vm13 = vcmp.gt.f32.partialorder %v5723_v62, 0.0  ;;  %v6062_v38 = vmul.f32 0.15, %v5723_v62  ;;  %v4738_v9 = vadd.f32 %v4737_v30, %v10135_v29  ;;  %v5724_v23 = vpop.f32.mrf.mxu2 }
 0x5f8   : > { %v5069_v45 = vpop.f32.mrf.mxu0 }
 0x5f9   : > { %v6190_v28 = vsel %vm5934_vm13, %v5723_v62, %v6062_v38  ;;  %v5067_v16 = vadd.f32 %v5066_v3, %v4738_v9  ;;  %v7753_v3 = vld [vmem:[%s9183_s30 + $0xa28] sm:$0xf] }
 0x5fa   : > { %v5398_v20 = vpop.f32.mrf.mxu1  ;;  %6318 = vst [vmem:[%s10380_s15 + $0x240] sm:$0xff] %v6190_v28  ;;  %v7754_v1 = vor.u32 %v8841_v13, %v7753_v3 }
 0x5fb   : > { %v5396_v21 = vadd.f32 %v5395_v47, %v5067_v16  ;;  %4779 = vmatmul.bf16.gmra.mxu3 %v7714_v31  ;;  %5108 = vmatmul.bf16.gmra.mxu0 %v7718_v26  ;;  %v8837_v47 = vld [vmem:[%s9183_s30 + $0xa24] sm:$0xf] }
 0x5fc   : > { %8492 = vmatmul.msk.bf16.gmra.mxu2 %vm3366_vm0, %v7726_v60  ;;  %v7750_v49 = vor.u32 %v8837_v47, %v7747_v42 }
 0x5fd   : > { %5437 = vmatmul.bf16.gmra.mxu1 %v7722_v25  ;;  %v5725_v29 = vadd.f32 %v5724_v23, %v5396_v21  ;;  %v8843_v21 = vld [vmem:[%s9183_s30 + $0xa54] sm:$0xf] }
 0x5fe   : > { %v4740_v8 = vpop.f32.mrf.mxu3 }
 0x5ff   : > { %vm5935_vm14 = vcmp.gt.f32.partialorder %v5725_v29, 0.0  ;;  %v6063_v33 = vmul.f32 0.15, %v5725_v29  ;;  %v4741_v14 = vadd.f32 %v4740_v8, %v10141_v46  ;;  %v5727_v19 = vpop.f32.mrf.mxu2  ;;  %v7742_v46 = vor.u32 %v8836_v57, %v7739_v54  ;;  %v7773_v8 = vld [vmem:[%s9183_s30 + $0xa58] sm:$0xf] }
 0x600   : > { %v5071_v0 = vpop.f32.mrf.mxu0 }
 0x601   : > { %v6191_v58 = vsel %vm5935_vm14, %v5725_v29, %v6063_v33  ;;  %v5070_v44 = vadd.f32 %v5069_v45, %v4741_v14  ;;  %v7767_v29 = vld [vmem:[%s9183_s30 + $0xa6c] sm:$0xf0]  ;;  %v8847_v33 = vld [vmem:[%s9183_s30 + $0xa70] sm:$0xf0]  ;;  %v7781_v14 = vld [vmem:[%s9183_s30 + $0xa60] sm:$0xf] }
 0x602   : > { %v5400_v27 = vpop.f32.mrf.mxu1  ;;  %6319 = vst [vmem:[%s10380_s15 + $0x248] sm:$0xff] %v6191_v58  ;;  %v8844_v58 = vld [vmem:[%s9183_s30 + $0xa5c] sm:$0xf]  ;;  %v7774_v12 = vor.u32 %v8847_v33, %v7773_v8 }
 0x603   : > { %v5399_v63 = vadd.f32 %v5398_v20, %v5070_v44  ;;  %v7775_v44 = vld [vmem:[%s9183_s30 + $0xa74] sm:$0xf0] }
 0x605   : > { %v5728_v43 = vadd.f32 %v5727_v19, %v5399_v63 }
 0x606   : > { %v4742_v55 = vpop.f32.mrf.mxu3 }
 0x607   : > { %vm5936_vm15 = vcmp.gt.f32.partialorder %v5728_v43, 0.0  ;;  %v6064_v34 = vmul.f32 0.15, %v5728_v43  ;;  %v4743_v48 = vadd.f32 %v4742_v55, %v10155_v5  ;;  %v5729_v4 = vpop.f32.mrf.mxu2 }
 0x608   : > { %v5074_v62 = vpop.f32.mrf.mxu0 }
 0x609   : > { %v6192_v56 = vsel %vm5936_vm15, %v5728_v43, %v6064_v34  ;;  %v5072_v30 = vadd.f32 %v5071_v0, %v4743_v48  ;;  %v8848_v0 = vld [vmem:[%s9183_s30 + $0xa78] sm:$0xf0]  ;;  %v7778_v43 = vor.u32 %v8844_v58, %v7775_v44 }
 0x60a   : > { %v5403_v31 = vpop.f32.mrf.mxu1  ;;  %6320 = vst [vmem:[%s10380_s15 + $0x250] sm:$0xff] %v6192_v56  ;;  %v7782_v3 = vor.u32 %v8848_v0, %v7781_v14 }
 0x60b   : > { %v5401_v38 = vadd.f32 %v5400_v27, %v5072_v30  ;;  %4784 = vmatmul.bf16.gmra.mxu3 %v7742_v46  ;;  %5113 = vmatmul.bf16.gmra.mxu0 %v7746_v61  ;;  %v8850_v30 = vld [vmem:[%s9183_s30 + $0xa8c] sm:$0xf] }
 0x60c   : > { %8493 = vmatmul.msk.bf16.gmra.mxu2 %vm3366_vm0, %v7754_v1 }
 0x60d   : > { %5442 = vmatmul.bf16.gmra.mxu1 %v7750_v49  ;;  %v5730_v5 = vadd.f32 %v5729_v4, %v5401_v38  ;;  %v7801_v38 = vld [vmem:[%s9183_s30 + $0xa90] sm:$0xf] }
 0x60e   : > { %v4745_v9 = vpop.f32.mrf.mxu3 }
 0x60f   : > { %vm5937_vm1 = vcmp.gt.f32.partialorder %v5730_v5, 0.0  ;;  %v6065_v23 = vmul.f32 0.15, %v5730_v5  ;;  %v4746_v26 = vadd.f32 %v4745_v9, %v10161_v32  ;;  %v5732_v45 = vpop.f32.mrf.mxu2  ;;  %v7770_v32 = vor.u32 %v8843_v21, %v7767_v29  ;;  %v7809_v9 = vld [vmem:[%s9183_s30 + $0xa98] sm:$0xf] }
 0x610   : > { %v5076_v60 = vpop.f32.mrf.mxu0 }
 0x611   : > { %v6193_v25 = vsel %vm5937_vm1, %v5730_v5, %v6065_v23  ;;  %v5075_v28 = vadd.f32 %v5074_v62, %v4746_v26  ;;  %v8854_v5 = vld [vmem:[%s9183_s30 + $0xaa8] sm:$0xf0]  ;;  %v8855_v26 = vld [vmem:[%s9183_s30 + $0xab0] sm:$0xf0] }
 0x612   : > { %v5405_v16 = vpop.f32.mrf.mxu1  ;;  %6321 = vst [vmem:[%s10380_s15 + $0x258] sm:$0xff] %v6193_v25  ;;  %v7802_v21 = vor.u32 %v8854_v5, %v7801_v38  ;;  %v7810_v8 = vor.u32 %v8855_v26, %v7809_v9 }
 0x613   : > { %v5404_v20 = vadd.f32 %v5403_v31, %v5075_v28  ;;  %v7795_v31 = vld [vmem:[%s9183_s30 + $0xaa4] sm:$0xf0] }
 0x615   : > { %v5733_v19 = vadd.f32 %v5732_v45, %v5404_v20  ;;  %v8851_v45 = vld [vmem:[%s9183_s30 + $0xa94] sm:$0xf] }
 0x616   : > { %v4747_v27 = vpop.f32.mrf.mxu3 }
 0x617   : > { %vm5938_vm2 = vcmp.gt.f32.partialorder %v5733_v19, 0.0  ;;  %v6066_v63 = vmul.f32 0.15, %v5733_v19  ;;  %v4748_v57 = vadd.f32 %v4747_v27, %v10175_v15  ;;  %v5734_v54 = vpop.f32.mrf.mxu2 }
 0x618   : > { %v5079_v17 = vpop.f32.mrf.mxu0 }
 0x619   : > { %v6194_v13 = vsel %vm5938_vm2, %v5733_v19, %v6066_v63  ;;  %v5077_v47 = vadd.f32 %v5076_v60, %v4748_v57  ;;  %v7803_v60 = vld [vmem:[%s9183_s30 + $0xaac] sm:$0xf0] }
 0x61a   : > { %v5408_v42 = vpop.f32.mrf.mxu1  ;;  %6322 = vst [vmem:[%s10380_s15 + $0x260] sm:$0xff] %v6194_v13  ;;  %v7806_v33 = vor.u32 %v8851_v45, %v7803_v60  ;;  %v7823_v13 = vld [vmem:[%s9183_s30 + $0xadc] sm:$0xf0] }
 0x61b   : > { %v5406_v55 = vadd.f32 %v5405_v16, %v5077_v47  ;;  %4789 = vmatmul.bf16.gmra.mxu3 %v7770_v32  ;;  %5118 = vmatmul.bf16.gmra.mxu0 %v7774_v12  ;;  %v7829_v47 = vld [vmem:[%s9183_s30 + $0xac8] sm:$0xf] }
 0x61c   : > { %8494 = vmatmul.msk.bf16.gmra.mxu2 %vm3366_vm0, %v7782_v3 }
 0x61d   : > { %5447 = vmatmul.bf16.gmra.mxu1 %v7778_v43  ;;  %v5735_v15 = vadd.f32 %v5734_v54, %v5406_v55  ;;  %v8857_v43 = vld [vmem:[%s9183_s30 + $0xac4] sm:$0xf]  ;;  %v7837_v55 = vld [vmem:[%s9183_s30 + $0xad0] sm:$0xf] }
 0x61e   : > { %v4750_v46 = vpop.f32.mrf.mxu3 }
 0x61f   : > { %vm5939_vm3 = vcmp.gt.f32.partialorder %v5735_v15, 0.0  ;;  %v6067_v34 = vmul.f32 0.15, %v5735_v15  ;;  %v4751_v48 = vadd.f32 %v4750_v46, %v10181_v51  ;;  %v5737_v4 = vpop.f32.mrf.mxu2  ;;  %v7798_v51 = vor.u32 %v8850_v30, %v7795_v31  ;;  %v8862_v46 = vld [vmem:[%s9183_s30 + $0xae8] sm:$0xf0] }
 0x620   : > { %v5081_v61 = vpop.f32.mrf.mxu0  ;;  %v7838_v30 = vor.u32 %v8862_v46, %v7837_v55 }
 0x621   : > { %v6195_v62 = vsel %vm5939_vm3, %v5735_v15, %v6067_v34  ;;  %v5080_v1 = vadd.f32 %v5079_v17, %v4751_v48  ;;  %v8858_v34 = vld [vmem:[%s9183_s30 + $0xacc] sm:$0xf]  ;;  %v7831_v48 = vld [vmem:[%s9183_s30 + $0xae4] sm:$0xf0] }
 0x622   : > { %v5410_v49 = vpop.f32.mrf.mxu1  ;;  %6323 = vst [vmem:[%s10380_s15 + $0x268] sm:$0xff] %v6195_v62  ;;  %v7834_v31 = vor.u32 %v8858_v34, %v7831_v48 }
 0x623   : > { %v5409_v56 = vadd.f32 %v5408_v42, %v5080_v1  ;;  %v8861_v42 = vld [vmem:[%s9183_s30 + $0xae0] sm:$0xf0] }
 0x625   : > { %v5738_v23 = vadd.f32 %v5737_v4, %v5409_v56 }
 0x626   : > { %v4752_v25 = vpop.f32.mrf.mxu3 }
 0x627   : > { %vm5940_vm4 = vcmp.gt.f32.partialorder %v5738_v23, 0.0  ;;  %v6068_v28 = vmul.f32 0.15, %v5738_v23  ;;  %v4753_v16 = vadd.f32 %v4752_v25, %v10195_v24  ;;  %v5739_v20 = vpop.f32.mrf.mxu2 }
 0x628   : > { %v5084_v29 = vpop.f32.mrf.mxu0 }
 0x629   : > { %v6196_v14 = vsel %vm5940_vm4, %v5738_v23, %v6068_v28  ;;  %v5082_v19 = vadd.f32 %v5081_v61, %v4753_v16 }
 0x62a   : > { %v5413_v0 = vpop.f32.mrf.mxu1  ;;  %6324 = vst [vmem:[%s10380_s15 + $0x270] sm:$0xff] %v6196_v14  ;;  %v8868_v14 = vld [vmem:[%s9183_s30 + $0xb18] sm:$0xf0] }
 0x62b   : > { %v5411_v58 = vadd.f32 %v5410_v49, %v5082_v19  ;;  %4794 = vmatmul.bf16.gmra.mxu3 %v7798_v51  ;;  %5123 = vmatmul.bf16.gmra.mxu0 %v7802_v21  ;;  %v7830_v49 = vor.u32 %v8861_v42, %v7829_v47  ;;  %v7865_v19 = vld [vmem:[%s9183_s30 + $0xb08] sm:$0xf] }
 0x62c   : > { %8495 = vmatmul.msk.bf16.gmra.mxu2 %vm3366_vm0, %v7810_v8  ;;  %v7851_v8 = vld [vmem:[%s9183_s30 + $0xb14] sm:$0xf0] }
 0x62d   : > { %5452 = vmatmul.bf16.gmra.mxu1 %v7806_v33  ;;  %v5740_v24 = vadd.f32 %v5739_v20, %v5411_v58  ;;  %v7857_v33 = vld [vmem:[%s9183_s30 + $0xb00] sm:$0xf]  ;;  %v8869_v58 = vld [vmem:[%s9183_s30 + $0xb20] sm:$0xf0] }
 0x62e   : > { %v4755_v44 = vpop.f32.mrf.mxu3 }
 0x62f   : > { %vm5941_vm5 = vcmp.gt.f32.partialorder %v5740_v24, 0.0  ;;  %v6069_v27 = vmul.f32 0.15, %v5740_v24  ;;  %v4756_v32 = vadd.f32 %v4755_v44, %v10202_v39  ;;  %v5742_v63 = vpop.f32.mrf.mxu2  ;;  %v7826_v39 = vor.u32 %v8857_v43, %v7823_v13  ;;  %v7859_v44 = vld [vmem:[%s9183_s30 + $0xb1c] sm:$0xf0] }
 0x630   : > { %v5086_v57 = vpop.f32.mrf.mxu0 }
 0x631   : > { %v6197_v54 = vsel %vm5941_vm5, %v5740_v24, %v6069_v27  ;;  %v5085_v12 = vadd.f32 %v5084_v29, %v4756_v32  ;;  %v8864_v29 = vld [vmem:[%s9183_s30 + $0xafc] sm:$0xf]  ;;  %v8865_v24 = vld [vmem:[%s9183_s30 + $0xb04] sm:$0xf] }
 0x632   : > { %v5415_v17 = vpop.f32.mrf.mxu1  ;;  %6325 = vst [vmem:[%s10380_s15 + $0x278] sm:$0xff] %v6197_v54  ;;  %v7858_v54 = vor.u32 %v8868_v14, %v7857_v33 }
 0x633   : > { %v5414_v3 = vadd.f32 %v5413_v0, %v5085_v12 }
 0x635   : > { %v5743_v15 = vadd.f32 %v5742_v63, %v5414_v3  ;;  %v7862_v3 = vor.u32 %v8865_v24, %v7859_v44 }
 0x636   : > { %v4757_v4 = vpop.f32.mrf.mxu3 }
 0x637   : > { %vm5942_vm6 = vcmp.gt.f32.partialorder %v5743_v15, 0.0  ;;  %v6070_v61 = vmul.f32 0.15, %v5743_v15  ;;  %v4758_v62 = vadd.f32 %v4757_v4, %v10216_v53  ;;  %v5744_v1 = vpop.f32.mrf.mxu2 }
 0x638   : > { %v5089_v56 = vpop.f32.mrf.mxu0 }
 0x639   : > { %v6198_v38 = vsel %vm5942_vm6, %v5743_v15, %v6070_v61  ;;  %v5087_v5 = vadd.f32 %v5086_v57, %v4758_v62 }
 0x63a   : > { %v5418_v9 = vpop.f32.mrf.mxu1  ;;  %6326 = vst [vmem:[%s10380_s15 + $0x280] sm:$0xff] %v6198_v38 }
 0x63b   : > { %v5416_v23 = vadd.f32 %v5415_v17, %v5087_v5  ;;  %4799 = vmatmul.bf16.gmra.mxu3 %v7826_v39  ;;  %5128 = vmatmul.bf16.gmra.mxu0 %v7830_v49  ;;  %v7866_v17 = vor.u32 %v8869_v58, %v7865_v19  ;;  %v7879_v49 = vld [vmem:[%s9183_s30 + $0xb4c] sm:$0xf0]  ;;  %v8876_v5 = vld [vmem:[%s9183_s30 + $0xb58] sm:$0xf0] }
 0x63c   : > { %8496 = vmatmul.msk.bf16.gmra.mxu2 %vm3366_vm0, %v7838_v30  ;;  %v8875_v30 = vld [vmem:[%s9183_s30 + $0xb50] sm:$0xf0] }
 0x63d   : > { %5457 = vmatmul.bf16.gmra.mxu1 %v7834_v31  ;;  %v5745_v53 = vadd.f32 %v5744_v1, %v5416_v23  ;;  %v8871_v1 = vld [vmem:[%s9183_s30 + $0xb34] sm:$0xf]  ;;  %v7893_v31 = vld [vmem:[%s9183_s30 + $0xb40] sm:$0xf]  ;;  %v7887_v23 = vld [vmem:[%s9183_s30 + $0xb54] sm:$0xf0] }
 0x63e   : > { %v4760_v26 = vpop.f32.mrf.mxu3 }
 0x63f   : > { %vm5943_vm7 = vcmp.gt.f32.partialorder %v5745_v53, 0.0  ;;  %v6071_v45 = vmul.f32 0.15, %v5745_v53  ;;  %v4761_v60 = vadd.f32 %v4760_v26, %v10223_v52  ;;  %v5747_v25 = vpop.f32.mrf.mxu2  ;;  %v7854_v52 = vor.u32 %v8864_v29, %v7851_v8 }
 0x640   : > { %v5091_v51 = vpop.f32.mrf.mxu0 }
 0x641   : > { %v6199_v28 = vsel %vm5943_vm7, %v5745_v53, %v6071_v45  ;;  %v5090_v16 = vadd.f32 %v5089_v56, %v4761_v60  ;;  %v7885_v56 = vld [vmem:[%s9183_s30 + $0xb38] sm:$0xf] }
 0x642   : > { %v5420_v20 = vpop.f32.mrf.mxu1  ;;  %6327 = vst [vmem:[%s10380_s15 + $0x288] sm:$0xff] %v6199_v28  ;;  %v7894_v28 = vor.u32 %v8876_v5, %v7893_v31 }
 0x643   : > { %v5419_v21 = vadd.f32 %v5418_v9, %v5090_v16  ;;  %v8872_v9 = vld [vmem:[%s9183_s30 + $0xb3c] sm:$0xf] }
 0x644   : > { %v7890_v16 = vor.u32 %v8872_v9, %v7887_v23 }
 0x645   : > { %v5748_v0 = vadd.f32 %v5747_v25, %v5419_v21  ;;  %v7886_v25 = vor.u32 %v8875_v30, %v7885_v56 }
 0x646   : > { %v4762_v27 = vpop.f32.mrf.mxu3 }
 0x647   : > { %vm5944_vm8 = vcmp.gt.f32.partialorder %v5748_v0, 0.0  ;;  %v6072_v32 = vmul.f32 0.15, %v5748_v0  ;;  %v4763_v63 = vadd.f32 %v4762_v27, %v10237_v22  ;;  %v5749_v57 = vpop.f32.mrf.mxu2 }
 0x648   : > { %v5094_v12 = vpop.f32.mrf.mxu0 }
 0x649   : > { %v6200_v43 = vsel %vm5944_vm8, %v5748_v0, %v6072_v32  ;;  %v5092_v13 = vadd.f32 %v5091_v51, %v4763_v63  ;;  %v8878_v32 = vld [vmem:[%s9183_s30 + $0xb6c] sm:$0xf]  ;;  %v7907_v63 = vld [vmem:[%s9183_s30 + $0xb84] sm:$0xf0] }
 0x64a   : > { %v5423_v47 = vpop.f32.mrf.mxu1  ;;  %6328 = vst [vmem:[%s10380_s15 + $0x290] sm:$0xff] %v6200_v43  ;;  %v8879_v43 = vld [vmem:[%s9183_s30 + $0xb74] sm:$0xf] }
 0x64b   : > { %v5421_v42 = vadd.f32 %v5420_v20, %v5092_v13  ;;  %4804 = vmatmul.bf16.gmra.mxu3 %v7854_v52  ;;  %5133 = vmatmul.bf16.gmra.mxu0 %v7858_v54  ;;  %v8882_v54 = vld [vmem:[%s9183_s30 + $0xb88] sm:$0xf0]  ;;  %v7915_v13 = vld [vmem:[%s9183_s30 + $0xb8c] sm:$0xf0] }
 0x64c   : > { %8497 = vmatmul.msk.bf16.gmra.mxu2 %vm3366_vm0, %v7866_v17 }
 0x64d   : > { %5462 = vmatmul.bf16.gmra.mxu1 %v7862_v3  ;;  %v5750_v22 = vadd.f32 %v5749_v57, %v5421_v42  ;;  %v7913_v57 = vld [vmem:[%s9183_s30 + $0xb70] sm:$0xf]  ;;  %v8883_v3 = vld [vmem:[%s9183_s30 + $0xb90] sm:$0xf0] }
 0x64e   : > { %v4765_v55 = vpop.f32.mrf.mxu3 }
 0x64f   : > { %vm5945_vm9 = vcmp.gt.f32.partialorder %v5750_v22, 0.0  ;;  %v6073_v15 = vmul.f32 0.15, %v5750_v22  ;;  %v4766_v46 = vadd.f32 %v4765_v55, %v10244_v50  ;;  %v5752_v34 = vpop.f32.mrf.mxu2  ;;  %v7882_v50 = vor.u32 %v8871_v1, %v7879_v49 }
 0x650   : > { %v5096_v48 = vpop.f32.mrf.mxu0 }
 0x651   : > { %v6201_v4 = vsel %vm5945_vm9, %v5750_v22, %v6073_v15  ;;  %v5095_v39 = vadd.f32 %v5094_v12, %v4766_v46  ;;  %v7921_v12 = vld [vmem:[%s9183_s30 + $0xb78] sm:$0xf]  ;;  %v7914_v15 = vor.u32 %v8882_v54, %v7913_v57 }
 0x652   : > { %v5425_v61 = vpop.f32.mrf.mxu1  ;;  %6329 = vst [vmem:[%s10380_s15 + $0x298] sm:$0xff] %v6201_v4 }
 0x653   : > { %v5424_v62 = vadd.f32 %v5423_v47, %v5095_v39 }
 0x655   : > { %v5753_v38 = vadd.f32 %v5752_v34, %v5424_v62  ;;  %v7922_v34 = vor.u32 %v8883_v3, %v7921_v12 }
 0x656   : > { %v4767_v53 = vpop.f32.mrf.mxu3 }
 0x657   : > { %vm5946_vm10 = vcmp.gt.f32.partialorder %v5753_v38, 0.0  ;;  %v6074_v26 = vmul.f32 0.15, %v5753_v38  ;;  %v4768_v45 = vadd.f32 %v4767_v53, %v10258_v41  ;;  %v5754_v60 = vpop.f32.mrf.mxu2  ;;  %v8885_v53 = vld [vmem:[%s9183_s30 + $0xba4] sm:$0xf] }
 0x658   : > { %v5099_v51 = vpop.f32.mrf.mxu0 }
 0x659   : > { %v6202_v20 = vsel %vm5946_vm10, %v5753_v38, %v6074_v26  ;;  %v5097_v21 = vadd.f32 %v5096_v48, %v4768_v45  ;;  %v7918_v48 = vor.u32 %v8879_v43, %v7915_v13  ;;  %v7941_v26 = vld [vmem:[%s9183_s30 + $0xba8] sm:$0xf]  ;;  %v8889_v45 = vld [vmem:[%s9183_s30 + $0xbc0] sm:$0xf0]  ;;  %v8892_v43 = vld [vmem:[%s9183_s30 + $0xbdc] sm:$0xf] }
 0x65a   : > { %v5428_v29 = vpop.f32.mrf.mxu1  ;;  %6330 = vst [vmem:[%s10380_s15 + $0x2a0] sm:$0xff] %v6202_v20  ;;  %v7963_v13 = vld [vmem:[%s9183_s30 + $0xbf4] sm:$0xf0] }
 0x65b   : > { %v5426_v8 = vadd.f32 %v5425_v61, %v5097_v21  ;;  %4809 = vmatmul.bf16.gmra.mxu3 %v7882_v50  ;;  %5138 = vmatmul.bf16.gmra.mxu0 %v7886_v25  ;;  %v7935_v50 = vld [vmem:[%s9183_s30 + $0xbbc] sm:$0xf0] }
 0x65c   : > { %8498 = vmatmul.msk.bf16.gmra.mxu2 %vm3366_vm0, %v7894_v28  ;;  %v8886_v28 = vld [vmem:[%s9183_s30 + $0xbac] sm:$0xf] }
 0x65d   : > { %5467 = vmatmul.bf16.gmra.mxu1 %v7890_v16  ;;  %v5755_v41 = vadd.f32 %v5754_v60, %v5426_v8  ;;  %v7949_v60 = vld [vmem:[%s9183_s30 + $0xbb0] sm:$0xf]  ;;  %v7943_v16 = vld [vmem:[%s9183_s30 + $0xbc4] sm:$0xf0] }
 0x65e   : > { %v4770_v33 = vpop.f32.mrf.mxu3 }
 0x65f   : > { %vm5947_vm11 = vcmp.gt.f32.partialorder %v5755_v41, 0.0  ;;  %v6075_v14 = vmul.f32 0.15, %v5755_v41  ;;  %v4771_v19 = vadd.f32 %v4770_v33, %v10265_v40  ;;  %v5757_v0 = vpop.f32.mrf.mxu2  ;;  %v7910_v40 = vor.u32 %v8878_v32, %v7907_v63 }
 0x660   : > { %v5101_v58 = vpop.f32.mrf.mxu0 }
 0x661   : > { %v6203_v24 = vsel %vm5947_vm11, %v5755_v41, %v6075_v14  ;;  %v5100_v44 = vadd.f32 %v5099_v51, %v4771_v19  ;;  %v8890_v51 = vld [vmem:[%s9183_s30 + $0xbc8] sm:$0xf0]  ;;  %v7942_v41 = vor.u32 %v8889_v45, %v7941_v26  ;;  %v7946_v19 = vor.u32 %v8886_v28, %v7943_v16  ;;  %v7997_v28 = vld [vmem:[%s9183_s30 + $0xc18] sm:$0xf]  ;;  %v8903_v16 = vld [vmem:[%s9183_s30 + $0xc30] sm:$0xf0] }
 0x662   : > { %v5430_v27 = vpop.f32.mrf.mxu1  ;;  %6331 = vst [vmem:[%s10380_s15 + $0x2a8] sm:$0xff] %v6203_v24  ;;  %v7950_v14 = vor.u32 %v8890_v51, %v7949_v60  ;;  %v7991_v51 = vld [vmem:[%s9183_s30 + $0xc2c] sm:$0xf0] }
 0x663   : > { %v5429_v52 = vadd.f32 %v5428_v29, %v5100_v44 }
 0x665   : > { %v5758_v17 = vadd.f32 %v5757_v0, %v5429_v52 }
 0x666   : > { %v4772_v47 = vpop.f32.mrf.mxu3 }
 0x667   : > { %vm5948_vm12 = vcmp.gt.f32.partialorder %v5758_v17, 0.0  ;;  %v6076_v42 = vmul.f32 0.15, %v5758_v17  ;;  %v4773_v22 = vadd.f32 %v4772_v47, %v10279_v6  ;;  %v5759_v55 = vpop.f32.mrf.mxu2  ;;  %v7969_v47 = vld [vmem:[%s9183_s30 + $0xbe0] sm:$0xf] }
 0x668   : > { %v5104_v46 = vpop.f32.mrf.mxu0 }
 0x669   : > { %v6204_v4 = vsel %vm5948_vm12, %v5758_v17, %v6076_v42  ;;  %v5102_v39 = vadd.f32 %v5101_v58, %v4773_v22  ;;  %v7977_v42 = vld [vmem:[%s9183_s30 + $0xbe8] sm:$0xf] }
 0x66a   : > { %v5433_v61 = vpop.f32.mrf.mxu1  ;;  %6332 = vst [vmem:[%s10380_s15 + $0x2b0] sm:$0xff] %v6204_v4 }
 0x66b   : > { %v5431_v62 = vadd.f32 %v5430_v27, %v5102_v39  ;;  %4814 = vmatmul.bf16.gmra.mxu3 %v7910_v40  ;;  %5143 = vmatmul.bf16.gmra.mxu0 %v7914_v15  ;;  %v8896_v40 = vld [vmem:[%s9183_s30 + $0xbf8] sm:$0xf0]  ;;  %v8893_v15 = vld [vmem:[%s9183_s30 + $0xbe4] sm:$0xf] }
 0x66c   : > { %8499 = vmatmul.msk.bf16.gmra.mxu2 %vm3366_vm0, %v7922_v34 }
 0x66d   : > { %5472 = vmatmul.bf16.gmra.mxu1 %v7918_v48  ;;  %v5760_v6 = vadd.f32 %v5759_v55, %v5431_v62  ;;  %v8897_v55 = vld [vmem:[%s9183_s30 + $0xc00] sm:$0xf0] }
 0x66e   : > { %v4775_v1 = vpop.f32.mrf.mxu3 }
 0x66f   : > { %vm5949_vm13 = vcmp.gt.f32.partialorder %v5760_v6, 0.0  ;;  %v6077_v49 = vmul.f32 0.15, %v5760_v6  ;;  %v4776_v56 = vadd.f32 %v4775_v1, %v10286_v10  ;;  %v5762_v30 = vpop.f32.mrf.mxu2  ;;  %v7938_v10 = vor.u32 %v8885_v53, %v7935_v50 }
 0x670   : > { %v5106_v31 = vpop.f32.mrf.mxu0 }
 0x671   : > { %v6205_v38 = vsel %vm5949_vm13, %v5760_v6, %v6077_v49  ;;  %v5105_v5 = vadd.f32 %v5104_v46, %v4776_v56  ;;  %v7971_v46 = vld [vmem:[%s9183_s30 + $0xbfc] sm:$0xf0]  ;;  %v7978_v6 = vor.u32 %v8897_v55, %v7977_v42  ;;  %v8019_v42 = vld [vmem:[%s9183_s30 + $0xc64] sm:$0xf0]  ;;  %v8910_v55 = vld [vmem:[%s9183_s30 + $0xc68] sm:$0xf0] }
 0x672   : > { %v5435_v9 = vpop.f32.mrf.mxu1  ;;  %6333 = vst [vmem:[%s10380_s15 + $0x2b8] sm:$0xff] %v6205_v38  ;;  %v7974_v1 = vor.u32 %v8893_v15, %v7971_v46  ;;  %v8033_v15 = vld [vmem:[%s9183_s30 + $0xc58] sm:$0xf] }
 0x673   : > { %v5434_v23 = vadd.f32 %v5433_v61, %v5105_v5  ;;  %v7970_v61 = vor.u32 %v8896_v40, %v7969_v47  ;;  %v8906_v40 = vld [vmem:[%s9183_s30 + $0xc4c] sm:$0xf] }
 0x675   : > { %v5763_v25 = vadd.f32 %v5762_v30, %v5434_v23 }
 0x676   : > { %v4777_v20 = vpop.f32.mrf.mxu3 }
 0x677   : > { %vm5950_vm14 = vcmp.gt.f32.partialorder %v5763_v25, 0.0  ;;  %v6078_v21 = vmul.f32 0.15, %v5763_v25  ;;  %v4778_v29 = vadd.f32 %v4777_v20, %v10300_v36  ;;  %v5764_v8 = vpop.f32.mrf.mxu2  ;;  %v8005_v20 = vld [vmem:[%s9183_s30 + $0xc20] sm:$0xf] }
 0x678   : > { %v5109_v33 = vpop.f32.mrf.mxu0 }
 0x679   : > { %v6206_v0 = vsel %vm5950_vm14, %v5763_v25, %v6078_v21  ;;  %v5107_v58 = vadd.f32 %v5106_v31, %v4778_v29  ;;  %v8899_v25 = vld [vmem:[%s9183_s30 + $0xc14] sm:$0xf]  ;;  %v8904_v21 = vld [vmem:[%s9183_s30 + $0xc38] sm:$0xf0] }
 0x67a   : > { %v5438_v24 = vpop.f32.mrf.mxu1  ;;  %6334 = vst [vmem:[%s10380_s15 + $0x2c0] sm:$0xff] %v6206_v0  ;;  %v8900_v29 = vld [vmem:[%s9183_s30 + $0xc1c] sm:$0xf]  ;;  %v7998_v0 = vor.u32 %v8903_v16, %v7997_v28  ;;  %v8913_v28 = vld [vmem:[%s9183_s30 + $0xc84] sm:$0xf] }
 0x67b   : > { %v5436_v44 = vadd.f32 %v5435_v9, %v5107_v58  ;;  %4819 = vmatmul.bf16.gmra.mxu3 %v7938_v10  ;;  %5148 = vmatmul.bf16.gmra.mxu0 %v7942_v41  ;;  %v8047_v16 = vld [vmem:[%s9183_s30 + $0xc9c] sm:$0xf0] }
 0x67c   : > { %8500 = vmatmul.msk.bf16.gmra.mxu2 %vm3366_vm0, %v7950_v14 }
 0x67d   : > { %5477 = vmatmul.bf16.gmra.mxu1 %v7946_v19  ;;  %v5765_v36 = vadd.f32 %v5764_v8, %v5436_v44  ;;  %v7999_v8 = vld [vmem:[%s9183_s30 + $0xc34] sm:$0xf0] }
 0x67e   : > { %v4780_v27 = vpop.f32.mrf.mxu3  ;;  %v8002_v44 = vor.u32 %v8900_v29, %v7999_v8  ;;  %v8918_v8 = vld [vmem:[%s9183_s30 + $0xca8] sm:$0xf0] }
 0x67f   : > { %vm5951_vm15 = vcmp.gt.f32.partialorder %v5765_v36, 0.0  ;;  %v6079_v52 = vmul.f32 0.15, %v5765_v36  ;;  %v4781_v32 = vadd.f32 %v4780_v27, %v10307_v18  ;;  %v5767_v63 = vpop.f32.mrf.mxu2  ;;  %v7966_v18 = vor.u32 %v8892_v43, %v7963_v13 }
 0x680   : > { %v5111_v57 = vpop.f32.mrf.mxu0 }
 0x681   : > { %v6207_v54 = vsel %vm5951_vm15, %v5765_v36, %v6079_v52  ;;  %v5110_v12 = vadd.f32 %v5109_v33, %v4781_v32 }
 0x682   : > { %v5440_v17 = vpop.f32.mrf.mxu1  ;;  %6335 = vst [vmem:[%s10380_s15 + $0x2c8] sm:$0xff] %v6207_v54 }
 0x683   : > { %v5439_v3 = vadd.f32 %v5438_v24, %v5110_v12  ;;  %v8006_v24 = vor.u32 %v8904_v21, %v8005_v20  ;;  %v8053_v20 = vld [vmem:[%s9183_s30 + $0xc88] sm:$0xf]  ;;  %v8061_v21 = vld [vmem:[%s9183_s30 + $0xc90] sm:$0xf] }
 0x685   : > { %v5768_v22 = vadd.f32 %v5767_v63, %v5439_v3 }
 0x686   : > { %v4782_v34 = vpop.f32.mrf.mxu3 }
 0x687   : > { %vm5952_vm1 = vcmp.gt.f32.partialorder %v5768_v22, 0.0  ;;  %v6080_v48 = vmul.f32 0.15, %v5768_v22  ;;  %v4783_v4 = vadd.f32 %v4782_v34, %v10321_v11  ;;  %v5769_v39 = vpop.f32.mrf.mxu2  ;;  %v8911_v34 = vld [vmem:[%s9183_s30 + $0xc70] sm:$0xf0] }
 0x688   : > { %v5114_v62 = vpop.f32.mrf.mxu0 }
 0x689   : > { %v6208_v49 = vsel %vm5952_vm1, %v5768_v22, %v6080_v48  ;;  %v5112_v56 = vadd.f32 %v5111_v57, %v4783_v4  ;;  %v8025_v22 = vld [vmem:[%s9183_s30 + $0xc50] sm:$0xf] }
 0x68a   : > { %v5443_v30 = vpop.f32.mrf.mxu1  ;;  %6336 = vst [vmem:[%s10380_s15 + $0x2d0] sm:$0xff] %v6208_v49  ;;  %v8027_v48 = vld [vmem:[%s9183_s30 + $0xc6c] sm:$0xf0]  ;;  %v8034_v49 = vor.u32 %v8911_v34, %v8033_v15  ;;  %v8081_v15 = vld [vmem:[%s9183_s30 + $0xcc0] sm:$0xf] }
 0x68b   : > { %v5441_v31 = vadd.f32 %v5440_v17, %v5112_v56  ;;  %4824 = vmatmul.bf16.gmra.mxu3 %v7966_v18  ;;  %5153 = vmatmul.bf16.gmra.mxu0 %v7970_v61  ;;  %v8907_v18 = vld [vmem:[%s9183_s30 + $0xc54] sm:$0xf]  ;;  %v8089_v34 = vld [vmem:[%s9183_s30 + $0xcc8] sm:$0xf] }
 0x68c   : > { %8501 = vmatmul.msk.bf16.gmra.mxu2 %vm3366_vm0, %v7978_v6  ;;  %v8026_v6 = vor.u32 %v8910_v55, %v8025_v22  ;;  %v8030_v56 = vor.u32 %v8907_v18, %v8027_v48  ;;  %v8920_v22 = vld [vmem:[%s9183_s30 + $0xcbc] sm:$0xf]  ;;  %v8075_v55 = vld [vmem:[%s9183_s30 + $0xcd4] sm:$0xf0]  ;;  %v8925_v48 = vld [vmem:[%s9183_s30 + $0xce0] sm:$0xf0] }
 0x68d   : > { %5482 = vmatmul.bf16.gmra.mxu1 %v7974_v1  ;;  %v5770_v11 = vadd.f32 %v5769_v39, %v5441_v31 }
 0x68e   : > { %v4785_v38 = vpop.f32.mrf.mxu3 }
 0x68f   : > { %vm5953_vm2 = vcmp.gt.f32.partialorder %v5770_v11, 0.0  ;;  %v6081_v5 = vmul.f32 0.15, %v5770_v11  ;;  %v4786_v9 = vadd.f32 %v4785_v38, %v10328_v2  ;;  %v5772_v23 = vpop.f32.mrf.mxu2  ;;  %v7994_v2 = vor.u32 %v8899_v25, %v7991_v51 }
 0x690   : > { %v5116_v53 = vpop.f32.mrf.mxu0 }
 0x691   : > { %v6209_v50 = vsel %vm5953_vm2, %v5770_v11, %v6081_v5  ;;  %v5115_v26 = vadd.f32 %v5114_v62, %v4786_v9 }
 0x692   : > { %v5445_v45 = vpop.f32.mrf.mxu1  ;;  %6337 = vst [vmem:[%s10380_s15 + $0x2d8] sm:$0xff] %v6209_v50 }
 0x693   : > { %v5444_v60 = vadd.f32 %v5443_v30, %v5115_v26 }
 0x695   : > { %v5773_v10 = vadd.f32 %v5772_v23, %v5444_v60  ;;  %v11272_v23 = vld [vmem:[#allocation56_spill] sm:$0xff] }
 0x696   : > { %v4787_v41 = vpop.f32.mrf.mxu3 }
 0x697   : > { %vm5954_vm3 = vcmp.gt.f32.partialorder %v5773_v10, 0.0  ;;  %v6082_v33 = vmul.f32 0.15, %v5773_v10  ;;  %v4788_v14 = vadd.f32 %v4787_v41, %v10342_v37  ;;  %v5774_v19 = vpop.f32.mrf.mxu2  ;;  %v8914_v41 = vld [vmem:[%s9183_s30 + $0xc8c] sm:$0xf] }
 0x698   : > { %v5119_v58 = vpop.f32.mrf.mxu0 }
 0x699   : > { %v6210_v36 = vsel %vm5954_vm3, %v5773_v10, %v6082_v33  ;;  %v5117_v27 = vadd.f32 %v5116_v53, %v4788_v14  ;;  %v8917_v10 = vld [vmem:[%s9183_s30 + $0xca0] sm:$0xf0]  ;;  %v8050_v14 = vor.u32 %v8913_v28, %v8047_v16 }
 0x69a   : > { %v5448_v52 = vpop.f32.mrf.mxu1  ;;  %6338 = vst [vmem:[%s10380_s15 + $0x2e0] sm:$0xff] %v6210_v36  ;;  %v8062_v36 = vor.u32 %v8918_v8, %v8061_v21  ;;  %v8103_v21 = vld [vmem:[%s9183_s30 + $0xd0c] sm:$0xf0]  ;;  %v8931_v8 = vld [vmem:[%s9183_s30 + $0xd10] sm:$0xf0] }
 0x69b   : > { %v5446_v32 = vadd.f32 %v5445_v45, %v5117_v27  ;;  %4829 = vmatmul.bf16.gmra.mxu3 %v7994_v2  ;;  %5158 = vmatmul.bf16.gmra.mxu0 %v7998_v0  ;;  %v8055_v2 = vld [vmem:[%s9183_s30 + $0xca4] sm:$0xf0] }
 0x69c   : > { %8502 = vmatmul.msk.bf16.gmra.mxu2 %vm3366_vm0, %v8006_v24  ;;  %v8054_v24 = vor.u32 %v8917_v10, %v8053_v20  ;;  %v8058_v27 = vor.u32 %v8914_v41, %v8055_v2  ;;  %v8927_v10 = vld [vmem:[%s9183_s30 + $0xcf4] sm:$0xf]  ;;  %v8117_v41 = vld [vmem:[%s9183_s30 + $0xd00] sm:$0xf] }
 0x69d   : > { %5487 = vmatmul.bf16.gmra.mxu1 %v8002_v44  ;;  %v5775_v37 = vadd.f32 %v5774_v19, %v5446_v32 }
 0x69e   : > { %v4790_v63 = vpop.f32.mrf.mxu3 }
 0x69f   : > { %vm5955_vm4 = vcmp.gt.f32.partialorder %v5775_v37, 0.0  ;;  %v6083_v57 = vmul.f32 0.15, %v5775_v37  ;;  %v4791_v54 = vadd.f32 %v4790_v63, %v10351_v59  ;;  %v5777_v12 = vpop.f32.mrf.mxu2  ;;  %v8022_v59 = vor.u32 %v8906_v40, %v8019_v42 }
 0x6a0   : > { %v5121_v17 = vpop.f32.mrf.mxu0 }
 0x6a1   : > { %v6211_v3 = vsel %vm5955_vm4, %v5775_v37, %v6083_v57  ;;  %v5120_v43 = vadd.f32 %v5119_v58, %v4791_v54 }
 0x6a2   : > { %v5450_v13 = vpop.f32.mrf.mxu1  ;;  %6339 = vst [vmem:[%s10380_s15 + $0x2e8] sm:$0xff] %v6211_v3 }
 0x6a3   : > { %v5449_v47 = vadd.f32 %v5448_v52, %v5120_v43 }
 0x6a5   : > { %v5778_v46 = vadd.f32 %v5777_v12, %v5449_v47  ;;  %v11273_v12 = vld [vmem:[#allocation58_spill] sm:$0xff] }
 0x6a6   : > { %v4792_v4 = vpop.f32.mrf.mxu3 }
 0x6a7   : > { %vm5956_vm5 = vcmp.gt.f32.partialorder %v5778_v46, 0.0  ;;  %v6084_v39 = vmul.f32 0.15, %v5778_v46  ;;  %v4793_v61 = vadd.f32 %v4792_v4, %v10364_v7  ;;  %v5779_v62 = vpop.f32.mrf.mxu2  ;;  %v8921_v4 = vld [vmem:[%s9183_s30 + $0xcc4] sm:$0xf] }
 0x6a8   : > { %v5124_v1 = vpop.f32.mrf.mxu0 }
 0x6a9   : > { %v6212_v30 = vsel %vm5956_vm5, %v5778_v46, %v6084_v39  ;;  %v5122_v31 = vadd.f32 %v5121_v17, %v4793_v61  ;;  %v8924_v46 = vld [vmem:[%s9183_s30 + $0xcd8] sm:$0xf0]  ;;  %v8078_v61 = vor.u32 %v8920_v22, %v8075_v55 }
 0x6aa   : > { %v5453_v11 = vpop.f32.mrf.mxu1  ;;  %6340 = vst [vmem:[%s10380_s15 + $0x2f0] sm:$0xff] %v6212_v30 }
 0x6ab   : > { %v5451_v38 = vadd.f32 %v5450_v13, %v5122_v31  ;;  %4834 = vmatmul.bf16.gmra.mxu3 %v8022_v59  ;;  %5163 = vmatmul.bf16.gmra.mxu0 %v8026_v6  ;;  %v8083_v59 = vld [vmem:[%s9183_s30 + $0xcdc] sm:$0xf0]  ;;  %v11274_v6 = vld [vmem:[#allocation59_spill] sm:$0xff]  ;;  %v8090_v31 = vor.u32 %v8925_v48, %v8089_v34  ;;  %v8137_v48 = vld [vmem:[%s9183_s30 + $0xd30] sm:$0xf] }
 0x6ac   : > { %8503 = vmatmul.msk.bf16.gmra.mxu2 %vm3366_vm0, %v8034_v49  ;;  %v8934_v34 = vld [vmem:[%s9183_s30 + $0xd2c] sm:$0xf] }
 0x6ad   : > { %5492 = vmatmul.bf16.gmra.mxu1 %v8030_v56  ;;  %v5780_v7 = vadd.f32 %v5779_v62, %v5451_v38  ;;  %v8082_v56 = vor.u32 %v8924_v46, %v8081_v15 }
 0x6ae   : > { %v4795_v5 = vpop.f32.mrf.mxu3 }
 0x6af   : > { %vm5957_vm6 = vcmp.gt.f32.partialorder %v5780_v7, 0.0  ;;  %v6085_v9 = vmul.f32 0.15, %v5780_v7  ;;  %v4796_v53 = vadd.f32 %v4795_v5, %v11272_v23  ;;  %v5782_v50 = vpop.f32.mrf.mxu2 }
 0x6b0   : > { %v5126_v26 = vpop.f32.mrf.mxu0 }
 0x6b1   : > { %v6213_v45 = vsel %vm5957_vm6, %v5780_v7, %v6085_v9  ;;  %v5125_v60 = vadd.f32 %v5124_v1, %v4796_v53 }
 0x6b2   : > { %v5455_v25 = vpop.f32.mrf.mxu1  ;;  %6341 = vst [vmem:[%s10380_s15 + $0x2f8] sm:$0xff] %v6213_v45 }
 0x6b3   : > { %v5454_v51 = vadd.f32 %v5453_v11, %v5125_v60  ;;  %v8086_v11 = vor.u32 %v8921_v4, %v8083_v59  ;;  %v8938_v4 = vld [vmem:[%s9183_s30 + $0xd48] sm:$0xf0]  ;;  %v8145_v59 = vld [vmem:[%s9183_s30 + $0xd38] sm:$0xf] }
 0x6b5   : > { %v5783_v29 = vadd.f32 %v5782_v50, %v5454_v51 }
 0x6b6   : > { %v4797_v33 = vpop.f32.mrf.mxu3 }
 0x6b7   : > { %vm5958_vm7 = vcmp.gt.f32.partialorder %v5783_v29, 0.0  ;;  %v6086_v19 = vmul.f32 0.15, %v5783_v29  ;;  %v4798_v0 = vadd.f32 %v4797_v33, %v10047_v35  ;;  %v5784_v58 = vpop.f32.mrf.mxu2  ;;  %v8932_v33 = vld [vmem:[%s9183_s30 + $0xd18] sm:$0xf0] }
 0x6b8   : > { %v5129_v44 = vpop.f32.mrf.mxu0 }
 0x6b9   : > { %v6214_v52 = vsel %vm5958_vm7, %v5783_v29, %v6086_v19  ;;  %v5127_v32 = vadd.f32 %v5126_v26, %v4798_v0  ;;  %v11275_v26 = vld [vmem:[#allocation60_spill] sm:$0xff]  ;;  %v8109_v29 = vld [vmem:[%s9183_s30 + $0xcf8] sm:$0xf] }
 0x6ba   : > { %v5458_v37 = vpop.f32.mrf.mxu1  ;;  %6342 = vst [vmem:[%s10380_s15 + $0x300] sm:$0xff] %v6214_v52  ;;  %v8111_v19 = vld [vmem:[%s9183_s30 + $0xd14] sm:$0xf0]  ;;  %v8110_v52 = vor.u32 %v8931_v8, %v8109_v29 }
 0x6bb   : > { %v5456_v63 = vadd.f32 %v5455_v25, %v5127_v32  ;;  %4839 = vmatmul.bf16.gmra.mxu3 %v8050_v14  ;;  %5168 = vmatmul.bf16.gmra.mxu0 %v8054_v24  ;;  %v8928_v14 = vld [vmem:[%s9183_s30 + $0xcfc] sm:$0xf] }
 0x6bc   : > { %8504 = vmatmul.msk.bf16.gmra.mxu2 %vm3366_vm0, %v8062_v36 }
 0x6bd   : > { %5497 = vmatmul.bf16.gmra.mxu1 %v8058_v27  ;;  %v5785_v35 = vadd.f32 %v5784_v58, %v5456_v63  ;;  %v8106_v58 = vor.u32 %v8927_v10, %v8103_v21  ;;  %v8114_v63 = vor.u32 %v8928_v14, %v8111_v19  ;;  %v8945_v14 = vld [vmem:[%s9183_s30 + $0xd80] sm:$0xf0]  ;;  %v8173_v19 = vld [vmem:[%s9183_s30 + $0xd70] sm:$0xf] }
 0x6be   : > { %v4800_v57 = vpop.f32.mrf.mxu3 }
 0x6bf   : > { %vm5959_vm8 = vcmp.gt.f32.partialorder %v5785_v35, 0.0  ;;  %v6087_v54 = vmul.f32 0.15, %v5785_v35  ;;  %v4801_v17 = vadd.f32 %v4800_v57, %v11273_v12  ;;  %v5787_v3 = vpop.f32.mrf.mxu2 }
 0x6c0   : > { %v5131_v43 = vpop.f32.mrf.mxu0 }
 0x6c1   : > { %v6215_v13 = vsel %vm5959_vm8, %v5785_v35, %v6087_v54  ;;  %v5130_v47 = vadd.f32 %v5129_v44, %v4801_v17  ;;  %v11276_v44 = vld [vmem:[#allocation61_spill] sm:$0xff] }
 0x6c2   : > { %v5460_v40 = vpop.f32.mrf.mxu1  ;;  %6343 = vst [vmem:[%s10380_s15 + $0x308] sm:$0xff] %v6215_v13  ;;  %v11277_v13 = vld [vmem:[#allocation62_spill] sm:$0xff] }
 0x6c3   : > { %v5459_v42 = vadd.f32 %v5458_v37, %v5130_v47  ;;  %v8118_v37 = vor.u32 %v8932_v33, %v8117_v41  ;;  %v8941_v41 = vld [vmem:[%s9183_s30 + $0xd64] sm:$0xf]  ;;  %v8165_v33 = vld [vmem:[%s9183_s30 + $0xd68] sm:$0xf] }
 0x6c5   : > { %v5788_v18 = vadd.f32 %v5787_v3, %v5459_v42 }
 0x6c6   : > { %v4802_v39 = vpop.f32.mrf.mxu3 }
 0x6c7   : > { %vm5960_vm9 = vcmp.gt.f32.partialorder %v5788_v18, 0.0  ;;  %v6088_v62 = vmul.f32 0.15, %v5788_v18  ;;  %v4803_v1 = vadd.f32 %v4802_v39, %v11274_v6  ;;  %v5789_v49 = vpop.f32.mrf.mxu2  ;;  %v8139_v6 = vld [vmem:[%s9183_s30 + $0xd4c] sm:$0xf0] }
 0x6c8   : > { %v5134_v30 = vpop.f32.mrf.mxu0 }
 0x6c9   : > { %v6216_v38 = vsel %vm5960_vm9, %v5788_v18, %v6088_v62  ;;  %v5132_v7 = vadd.f32 %v5131_v43, %v4803_v1  ;;  %v8131_v18 = vld [vmem:[%s9183_s30 + $0xd44] sm:$0xf0]  ;;  %v8935_v62 = vld [vmem:[%s9183_s30 + $0xd34] sm:$0xf] }
 0x6ca   : > { %v5463_v5 = vpop.f32.mrf.mxu1  ;;  %6344 = vst [vmem:[%s10380_s15 + $0x310] sm:$0xff] %v6216_v38  ;;  %v8138_v38 = vor.u32 %v8938_v4, %v8137_v48 }
 0x6cb   : > { %v5461_v9 = vadd.f32 %v5460_v40, %v5132_v7  ;;  %4844 = vmatmul.bf16.gmra.mxu3 %v8078_v61  ;;  %5173 = vmatmul.bf16.gmra.mxu0 %v8082_v56  ;;  %v8939_v61 = vld [vmem:[%s9183_s30 + $0xd50] sm:$0xf0] }
 0x6cc   : > { %8505 = vmatmul.msk.bf16.gmra.mxu2 %vm3366_vm0, %v8090_v31 }
 0x6cd   : > { %5502 = vmatmul.bf16.gmra.mxu1 %v8086_v11  ;;  %v5790_v23 = vadd.f32 %v5789_v49, %v5461_v9  ;;  %v8134_v49 = vor.u32 %v8934_v34, %v8131_v18  ;;  %v8142_v9 = vor.u32 %v8935_v62, %v8139_v6  ;;  %v8952_v62 = vld [vmem:[%s9183_s30 + $0xdb8] sm:$0xf0]  ;;  %v8201_v6 = vld [vmem:[%s9183_s30 + $0xda8] sm:$0xf] }
 0x6ce   : > { %v4805_v53 = vpop.f32.mrf.mxu3 }
 0x6cf   : > { %vm5961_vm10 = vcmp.gt.f32.partialorder %v5790_v23, 0.0  ;;  %v6089_v50 = vmul.f32 0.15, %v5790_v23  ;;  %v4806_v45 = vadd.f32 %v4805_v53, %v11275_v26  ;;  %v5792_v60 = vpop.f32.mrf.mxu2 }
 0x6d0   : > { %v5136_v25 = vpop.f32.mrf.mxu0 }
 0x6d1   : > { %v6217_v51 = vsel %vm5961_vm10, %v5790_v23, %v6089_v50  ;;  %v5135_v28 = vadd.f32 %v5134_v30, %v4806_v45  ;;  %v11278_v30 = vld [vmem:[#allocation63_spill] sm:$0xff] }
 0x6d2   : > { %v5465_v16 = vpop.f32.mrf.mxu1  ;;  %6345 = vst [vmem:[%s10380_s15 + $0x318] sm:$0xff] %v6217_v51  ;;  %v11279_v51 = vld [vmem:[#allocation64_spill] sm:$0xff] }
 0x6d3   : > { %v5464_v20 = vadd.f32 %v5463_v5, %v5135_v28  ;;  %v8146_v5 = vor.u32 %v8939_v61, %v8145_v59  ;;  %v8948_v59 = vld [vmem:[%s9183_s30 + $0xd9c] sm:$0xf]  ;;  %v8193_v61 = vld [vmem:[%s9183_s30 + $0xda0] sm:$0xf] }
 0x6d5   : > { %v5793_v2 = vadd.f32 %v5792_v60, %v5464_v20 }
 0x6d6   : > { %v4807_v0 = vpop.f32.mrf.mxu3 }
 0x6d7   : > { %vm5962_vm11 = vcmp.gt.f32.partialorder %v5793_v2, 0.0  ;;  %v6090_v24 = vmul.f32 0.15, %v5793_v2  ;;  %v4808_v36 = vadd.f32 %v4807_v0, %v11276_v44  ;;  %v5794_v27 = vpop.f32.mrf.mxu2  ;;  %v8167_v44 = vld [vmem:[%s9183_s30 + $0xd84] sm:$0xf0] }
 0x6d8   : > { %v5139_v32 = vpop.f32.mrf.mxu0 }
 0x6d9   : > { %v6218_v35 = vsel %vm5962_vm11, %v5793_v2, %v6090_v24  ;;  %v5137_v57 = vadd.f32 %v5136_v25, %v4808_v36  ;;  %v8159_v2 = vld [vmem:[%s9183_s30 + $0xd7c] sm:$0xf0]  ;;  %v8942_v24 = vld [vmem:[%s9183_s30 + $0xd6c] sm:$0xf] }
 0x6da   : > { %v5468_v54 = vpop.f32.mrf.mxu1  ;;  %6346 = vst [vmem:[%s10380_s15 + $0x320] sm:$0xff] %v6218_v35  ;;  %v8166_v35 = vor.u32 %v8945_v14, %v8165_v33 }
 0x6db   : > { %v5466_v12 = vadd.f32 %v5465_v16, %v5137_v57  ;;  %4849 = vmatmul.bf16.gmra.mxu3 %v8106_v58  ;;  %5178 = vmatmul.bf16.gmra.mxu0 %v8110_v52  ;;  %v8946_v58 = vld [vmem:[%s9183_s30 + $0xd88] sm:$0xf0] }
 0x6dc   : > { %8506 = vmatmul.msk.bf16.gmra.mxu2 %vm3366_vm0, %v8118_v37 }
 0x6dd   : > { %5507 = vmatmul.bf16.gmra.mxu1 %v8114_v63  ;;  %v5795_v17 = vadd.f32 %v5794_v27, %v5466_v12  ;;  %v8162_v27 = vor.u32 %v8941_v41, %v8159_v2  ;;  %v8170_v12 = vor.u32 %v8942_v24, %v8167_v44  ;;  %v8959_v24 = vld [vmem:[%s9183_s30 + $0xdf0] sm:$0xf0]  ;;  %v8229_v44 = vld [vmem:[%s9183_s30 + $0xde0] sm:$0xf] }
 0x6de   : > { %v4810_v3 = vpop.f32.mrf.mxu3 }
 0x6df   : > { %vm5963_vm12 = vcmp.gt.f32.partialorder %v5795_v17, 0.0  ;;  %v6091_v43 = vmul.f32 0.15, %v5795_v17  ;;  %v4811_v47 = vadd.f32 %v4810_v3, %v11277_v13  ;;  %v5797_v40 = vpop.f32.mrf.mxu2 }
 0x6e0   : > { %v5141_v42 = vpop.f32.mrf.mxu0 }
 0x6e1   : > { %v6219_v22 = vsel %vm5963_vm12, %v5795_v17, %v6091_v43  ;;  %v5140_v55 = vadd.f32 %v5139_v32, %v4811_v47  ;;  %v11280_v32 = vld [vmem:[#allocation65_spill] sm:$0xff] }
 0x6e2   : > { %v5470_v15 = vpop.f32.mrf.mxu1  ;;  %6347 = vst [vmem:[%s10380_s15 + $0x328] sm:$0xff] %v6219_v22  ;;  %v11281_v22 = vld [vmem:[#allocation66_spill] sm:$0xff] }
 0x6e3   : > { %v5469_v46 = vadd.f32 %v5468_v54, %v5140_v55  ;;  %v8174_v54 = vor.u32 %v8946_v58, %v8173_v19  ;;  %v8955_v19 = vld [vmem:[%s9183_s30 + $0xdd4] sm:$0xf]  ;;  %v8221_v58 = vld [vmem:[%s9183_s30 + $0xdd8] sm:$0xf] }
 0x6e5   : > { %v5798_v39 = vadd.f32 %v5797_v40, %v5469_v46 }
 0x6e6   : > { %v4812_v1 = vpop.f32.mrf.mxu3 }
 0x6e7   : > { %vm5964_vm13 = vcmp.gt.f32.partialorder %v5798_v39, 0.0  ;;  %v6092_v56 = vmul.f32 0.15, %v5798_v39  ;;  %v4813_v31 = vadd.f32 %v4812_v1, %v11278_v30  ;;  %v5799_v11 = vpop.f32.mrf.mxu2  ;;  %v8195_v30 = vld [vmem:[%s9183_s30 + $0xdbc] sm:$0xf0] }
 0x6e8   : > { %v5144_v7 = vpop.f32.mrf.mxu0 }
 0x6e9   : > { %v6220_v23 = vsel %vm5964_vm13, %v5798_v39, %v6092_v56  ;;  %v5142_v53 = vadd.f32 %v5141_v42, %v4813_v31  ;;  %v8187_v39 = vld [vmem:[%s9183_s30 + $0xdb4] sm:$0xf0]  ;;  %v8949_v56 = vld [vmem:[%s9183_s30 + $0xda4] sm:$0xf] }
 0x6ea   : > { %v5473_v50 = vpop.f32.mrf.mxu1  ;;  %6348 = vst [vmem:[%s10380_s15 + $0x330] sm:$0xff] %v6220_v23  ;;  %v8194_v23 = vor.u32 %v8952_v62, %v8193_v61 }
 0x6eb   : > { %v5471_v26 = vadd.f32 %v5470_v15, %v5142_v53  ;;  %4854 = vmatmul.bf16.gmra.mxu3 %v8134_v49  ;;  %5183 = vmatmul.bf16.gmra.mxu0 %v8138_v38  ;;  %v8953_v49 = vld [vmem:[%s9183_s30 + $0xdc0] sm:$0xf0] }
 0x6ec   : > { %8507 = vmatmul.msk.bf16.gmra.mxu2 %vm3366_vm0, %v8146_v5 }
 0x6ed   : > { %5512 = vmatmul.bf16.gmra.mxu1 %v8142_v9  ;;  %v5800_v45 = vadd.f32 %v5799_v11, %v5471_v26  ;;  %v8190_v11 = vor.u32 %v8948_v59, %v8187_v39  ;;  %v8198_v26 = vor.u32 %v8949_v56, %v8195_v30  ;;  %v11286_v56 = vld [vmem:[#allocation71_spill] sm:$0xff] }
 0x6ee   : > { %v4815_v60 = vpop.f32.mrf.mxu3 }
 0x6ef   : > { %vm5965_vm14 = vcmp.gt.f32.partialorder %v5800_v45, 0.0  ;;  %v6093_v25 = vmul.f32 0.15, %v5800_v45  ;;  %v4816_v28 = vadd.f32 %v4815_v60, %v11279_v51  ;;  %v5802_v16 = vpop.f32.mrf.mxu2 }
 0x6f0   : > { %v5146_v20 = vpop.f32.mrf.mxu0 }
 0x6f1   : > { %v6221_v10 = vsel %vm5965_vm14, %v5800_v45, %v6093_v25  ;;  %v5145_v21 = vadd.f32 %v5144_v7, %v4816_v28  ;;  %v11282_v7 = vld [vmem:[#allocation67_spill] sm:$0xff] }
 0x6f2   : > { %v5475_v29 = vpop.f32.mrf.mxu1  ;;  %6349 = vst [vmem:[%s10380_s15 + $0x338] sm:$0xff] %v6221_v10  ;;  %v11283_v10 = vld [vmem:[#allocation68_spill] sm:$0xff] }
 0x6f3   : > { %v5474_v8 = vadd.f32 %v5473_v50, %v5145_v21  ;;  %v8202_v50 = vor.u32 %v8953_v49, %v8201_v6 }
 0x6f5   : > { %v5803_v0 = vadd.f32 %v5802_v16, %v5474_v8 }
 0x6f6   : > { %v4817_v36 = vpop.f32.mrf.mxu3 }
 0x6f7   : > { %vm5966_vm15 = vcmp.gt.f32.partialorder %v5803_v0, 0.0  ;;  %v6094_v52 = vmul.f32 0.15, %v5803_v0  ;;  %v4818_v37 = vadd.f32 %v4817_v36, %v11280_v32  ;;  %v5804_v63 = vpop.f32.mrf.mxu2  ;;  %v8223_v32 = vld [vmem:[%s9183_s30 + $0xdf4] sm:$0xf0] }
 0x6f8   : > { %v5149_v57 = vpop.f32.mrf.mxu0 }
 0x6f9   : > { %v6222_v17 = vsel %vm5966_vm15, %v5803_v0, %v6094_v52  ;;  %v5147_v3 = vadd.f32 %v5146_v20, %v4818_v37  ;;  %v8215_v0 = vld [vmem:[%s9183_s30 + $0xdec] sm:$0xf0]  ;;  %v8956_v52 = vld [vmem:[%s9183_s30 + $0xddc] sm:$0xf] }
 0x6fa   : > { %v5478_v43 = vpop.f32.mrf.mxu1  ;;  %6350 = vst [vmem:[%s10380_s15 + $0x340] sm:$0xff] %v6222_v17  ;;  %v8222_v17 = vor.u32 %v8959_v24, %v8221_v58 }
 0x6fb   : > { %v5476_v13 = vadd.f32 %v5475_v29, %v5147_v3  ;;  %4859 = vmatmul.bf16.gmra.mxu3 %v8162_v27  ;;  %5188 = vmatmul.bf16.gmra.mxu0 %v8166_v35  ;;  %v8960_v27 = vld [vmem:[%s9183_s30 + $0xdf8] sm:$0xf0] }
 0x6fc   : > { %8508 = vmatmul.msk.bf16.gmra.mxu2 %vm3366_vm0, %v8174_v54 }
 0x6fd   : > { %5517 = vmatmul.bf16.gmra.mxu1 %v8170_v12  ;;  %v5805_v47 = vadd.f32 %v5804_v63, %v5476_v13  ;;  %v8218_v63 = vor.u32 %v8955_v19, %v8215_v0  ;;  %v8226_v13 = vor.u32 %v8956_v52, %v8223_v32 }
 0x6fe   : > { %v4820_v40 = vpop.f32.mrf.mxu3 }
 0x6ff   : > { %vm5967_vm1 = vcmp.gt.f32.partialorder %v5805_v47, 0.0  ;;  %v6095_v42 = vmul.f32 0.15, %v5805_v47  ;;  %v4821_v55 = vadd.f32 %v4820_v40, %v11281_v22  ;;  %v5807_v15 = vpop.f32.mrf.mxu2 }
 0x700   : > { %v5151_v46 = vpop.f32.mrf.mxu0 }
 0x701   : > { %v6223_v34 = vsel %vm5967_vm1, %v5805_v47, %v6095_v42  ;;  %v5150_v18 = vadd.f32 %v5149_v57, %v4821_v55  ;;  %v11284_v57 = vld [vmem:[#allocation69_spill] sm:$0xff] }
 0x702   : > { %v5480_v48 = vpop.f32.mrf.mxu1  ;;  %6351 = vst [vmem:[%s10380_s15 + $0x348] sm:$0xff] %v6223_v34  ;;  %v11285_v34 = vld [vmem:[#allocation70_spill] sm:$0xff] }
 0x703   : > { %v5479_v4 = vadd.f32 %v5478_v43, %v5150_v18  ;;  %v8230_v43 = vor.u32 %v8960_v27, %v8229_v44  ;;  %v11289_v27 = vld [vmem:[#allocation74_spill] sm:$0xff] }
 0x705   : > { %v5808_v1 = vadd.f32 %v5807_v15, %v5479_v4 }
 0x706   : > { %v4822_v31 = vpop.f32.mrf.mxu3 }
 0x707   : > { %vm5968_vm2 = vcmp.gt.f32.partialorder %v5808_v1, 0.0  ;;  %v6096_v38 = vmul.f32 0.15, %v5808_v1  ;;  %v4823_v5 = vadd.f32 %v4822_v31, %v11282_v7  ;;  %v5809_v9 = vpop.f32.mrf.mxu2 }
 0x708   : > { %v5154_v53 = vpop.f32.mrf.mxu0 }
 0x709   : > { %v6224_v45 = vsel %vm5968_vm2, %v5808_v1, %v6096_v38  ;;  %v5152_v60 = vadd.f32 %v5151_v46, %v4823_v5 }
 0x70a   : > { %v5483_v25 = vpop.f32.mrf.mxu1  ;;  %6352 = vst [vmem:[%s10380_s15 + $0x350] sm:$0xff] %v6224_v45 }
 0x70b   : > { %v5481_v51 = vadd.f32 %v5480_v48, %v5152_v60  ;;  %4864 = vmatmul.bf16.gmra.mxu3 %v8190_v11  ;;  %5193 = vmatmul.bf16.gmra.mxu0 %v8194_v23 }
 0x70c   : > { %8509 = vmatmul.msk.bf16.gmra.mxu2 %vm3366_vm0, %v8202_v50 }
 0x70d   : > { %5522 = vmatmul.bf16.gmra.mxu1 %v8198_v26  ;;  %v5810_v28 = vadd.f32 %v5809_v9, %v5481_v51  ;;  %v11287_v26 = vld [vmem:[#allocation72_spill] sm:$0xff] }
 0x70e   : > { %v4825_v16 = vpop.f32.mrf.mxu3 }
 0x70f   : > { %vm5969_vm3 = vcmp.gt.f32.partialorder %v5810_v28, 0.0  ;;  %v6097_v20 = vmul.f32 0.15, %v5810_v28  ;;  %v4826_v21 = vadd.f32 %v4825_v16, %v11283_v10  ;;  %v5812_v29 = vpop.f32.mrf.mxu2 }
 0x710   : > { %v5156_v8 = vpop.f32.mrf.mxu0 }
 0x711   : > { %v6225_v41 = vsel %vm5969_vm3, %v5810_v28, %v6097_v20  ;;  %v5155_v2 = vadd.f32 %v5154_v53, %v4826_v21 }
 0x712   : > { %v5485_v33 = vpop.f32.mrf.mxu1  ;;  %6353 = vst [vmem:[%s10380_s15 + $0x358] sm:$0xff] %v6225_v41 }
 0x713   : > { %v5484_v14 = vadd.f32 %v5483_v25, %v5155_v2 }
 0x715   : > { %v5813_v36 = vadd.f32 %v5812_v29, %v5484_v14 }
 0x716   : > { %v4827_v37 = vpop.f32.mrf.mxu3 }
 0x717   : > { %vm5970_vm4 = vcmp.gt.f32.partialorder %v5813_v36, 0.0  ;;  %v6098_v35 = vmul.f32 0.15, %v5813_v36  ;;  %v4828_v54 = vadd.f32 %v4827_v37, %v11284_v57  ;;  %v5814_v12 = vpop.f32.mrf.mxu2 }
 0x718   : > { %v5159_v3 = vpop.f32.mrf.mxu0 }
 0x719   : > { %v6226_v47 = vsel %vm5970_vm4, %v5813_v36, %v6098_v35  ;;  %v5157_v40 = vadd.f32 %v5156_v8, %v4828_v54  ;;  %v11288_v8 = vld [vmem:[#allocation73_spill] sm:$0xff] }
 0x71a   : > { %v5488_v42 = vpop.f32.mrf.mxu1  ;;  %6354 = vst [vmem:[%s10380_s15 + $0x360] sm:$0xff] %v6226_v47 }
 0x71b   : > { %v5486_v22 = vadd.f32 %v5485_v33, %v5157_v40  ;;  %4869 = vmatmul.bf16.gmra.mxu3 %v8218_v63  ;;  %5198 = vmatmul.bf16.gmra.mxu0 %v8222_v17 }
 0x71c   : > { %8510 = vmatmul.msk.bf16.gmra.mxu2 %vm3366_vm0, %v8230_v43  ;;  %v11290_v43 = vld [vmem:[#allocation75_spill] sm:$0xff] }
 0x71d   : > { %5527 = vmatmul.bf16.gmra.mxu1 %v8226_v13  ;;  %v5815_v55 = vadd.f32 %v5814_v12, %v5486_v22 }
 0x71e   : > { %v4830_v15 = vpop.f32.mrf.mxu3 }
 0x71f   : > { %vm5971_vm5 = vcmp.gt.f32.partialorder %v5815_v55, 0.0  ;;  %v6099_v46 = vmul.f32 0.15, %v5815_v55  ;;  %v4831_v18 = vadd.f32 %v4830_v15, %v11285_v34  ;;  %v5817_v48 = vpop.f32.mrf.mxu2 }
 0x720   : > { %v5161_v4 = vpop.f32.mrf.mxu0 }
 0x721   : > { %v6227_v59 = vsel %vm5971_vm5, %v5815_v55, %v6099_v46  ;;  %v5160_v39 = vadd.f32 %v5159_v3, %v4831_v18 }
 0x722   : > { %v5490_v61 = vpop.f32.mrf.mxu1  ;;  %6355 = vst [vmem:[%s10380_s15 + $0x368] sm:$0xff] %v6227_v59 }
 0x723   : > { %v5489_v62 = vadd.f32 %v5488_v42, %v5160_v39 }
 0x725   : > { %v5818_v6 = vadd.f32 %v5817_v48, %v5489_v62  ;;  %v11291_v48 = vld [vmem:[#allocation76_spill] sm:$0xff] }
 0x726   : > { %v4832_v1 = vpop.f32.mrf.mxu3 }
 0x727   : > { %vm5972_vm6 = vcmp.gt.f32.partialorder %v5818_v6, 0.0  ;;  %v6100_v49 = vmul.f32 0.15, %v5818_v6  ;;  %v4833_v30 = vadd.f32 %v4832_v1, %v11286_v56  ;;  %v5819_v31 = vpop.f32.mrf.mxu2 }
 0x728   : > { %v5164_v11 = vpop.f32.mrf.mxu0 }
 0x729   : > { %v6228_v38 = vsel %vm5972_vm6, %v5818_v6, %v6100_v49  ;;  %v5162_v7 = vadd.f32 %v5161_v4, %v4833_v30 }
 0x72a   : > { %v5493_v5 = vpop.f32.mrf.mxu1  ;;  %6356 = vst [vmem:[%s10380_s15 + $0x370] sm:$0xff] %v6228_v38 }
 0x72b   : > { %v5491_v9 = vadd.f32 %v5490_v61, %v5162_v7 }
 0x72d   : > { %v5820_v23 = vadd.f32 %v5819_v31, %v5491_v9  ;;  %v11292_v31 = vld [vmem:[#allocation77_spill] sm:$0xff] }
 0x72e   : > { %v4835_v53 = vpop.f32.mrf.mxu3 }
 0x72f   : > { %vm5973_vm0 = vcmp.gt.f32.partialorder %v5820_v23, 0.0  ;;  %v6101_v50 = vmul.f32 0.15, %v5820_v23  ;;  %v4836_v45 = vadd.f32 %v4835_v53, %v11287_v26  ;;  %v5822_v60 = vpop.f32.mrf.mxu2 }
 0x730   : > { %v5166_v25 = vpop.f32.mrf.mxu0 }
 0x731   : > { %v6229_v51 = vsel %vm5973_vm0, %v5820_v23, %v6101_v50  ;;  %v5165_v28 = vadd.f32 %v5164_v11, %v4836_v45 }
 0x732   : > { %v5495_v16 = vpop.f32.mrf.mxu1  ;;  %6357 = vst [vmem:[%s10380_s15 + $0x378] sm:$0xff] %v6229_v51 }
 0x733   : > { %v5494_v20 = vadd.f32 %v5493_v5, %v5165_v28 }
 0x735   : > { %v5823_v10 = vadd.f32 %v5822_v60, %v5494_v20  ;;  %v11293_v60 = vld [vmem:[#allocation78_spill] sm:$0xff] }
 0x736   : > { %v4837_v21 = vpop.f32.mrf.mxu3 }
 0x737   : > { %vm5974_vm7 = vcmp.gt.f32.partialorder %v5823_v10, 0.0  ;;  %v6102_v29 = vmul.f32 0.15, %v5823_v10  ;;  %v4838_v41 = vadd.f32 %v4837_v21, %v11288_v8  ;;  %v5824_v2 = vpop.f32.mrf.mxu2 }
 0x738   : > { %v5169_v33 = vpop.f32.mrf.mxu0 }
 0x739   : > { %v6230_v14 = vsel %vm5974_vm7, %v5823_v10, %v6102_v29  ;;  %v5167_v19 = vadd.f32 %v5166_v25, %v4838_v41 }
 0x73a   : > { %v5498_v0 = vpop.f32.mrf.mxu1  ;;  %6358 = vst [vmem:[%s10380_s15 + $0x380] sm:$0xff] %v6230_v14 }
 0x73b   : > { %v5496_v58 = vadd.f32 %v5495_v16, %v5167_v19 }
 0x73d   : > { %v5825_v24 = vadd.f32 %v5824_v2, %v5496_v58  ;;  %v11294_v2 = vld [vmem:[#allocation79_spill] sm:$0xff] }
 0x73e   : > { %v4840_v44 = vpop.f32.mrf.mxu3 }
 0x73f   : > { %vm5975_vm8 = vcmp.gt.f32.partialorder %v5825_v24, 0.0  ;;  %v6103_v36 = vmul.f32 0.15, %v5825_v24  ;;  %v4841_v52 = vadd.f32 %v4840_v44, %v11289_v27  ;;  %v5827_v32 = vpop.f32.mrf.mxu2 }
 0x740   : > { %v5171_v37 = vpop.f32.mrf.mxu0 }
 0x741   : > { %v6231_v63 = vsel %vm5975_vm8, %v5825_v24, %v6103_v36  ;;  %v5170_v35 = vadd.f32 %v5169_v33, %v4841_v52 }
 0x742   : > { %v5500_v57 = vpop.f32.mrf.mxu1  ;;  %6359 = vst [vmem:[%s10380_s15 + $0x388] sm:$0xff] %v6231_v63 }
 0x743   : > { %v5499_v54 = vadd.f32 %v5498_v0, %v5170_v35 }
 0x745   : > { %v5828_v12 = vadd.f32 %v5827_v32, %v5499_v54  ;;  %v11295_v32 = vld [vmem:[#allocation80_spill] sm:$0xff] }
 0x746   : > { %v4842_v17 = vpop.f32.mrf.mxu3 }
 0x747   : > { %vm5976_vm9 = vcmp.gt.f32.partialorder %v5828_v12, 0.0  ;;  %v6104_v3 = vmul.f32 0.15, %v5828_v12  ;;  %v4843_v13 = vadd.f32 %v4842_v17, %v11290_v43  ;;  %v5829_v47 = vpop.f32.mrf.mxu2 }
 0x748   : > { %v5174_v40 = vpop.f32.mrf.mxu0 }
 0x749   : > { %v6232_v42 = vsel %vm5976_vm9, %v5828_v12, %v6104_v3  ;;  %v5172_v22 = vadd.f32 %v5171_v37, %v4843_v13 }
 0x74a   : > { %v5503_v55 = vpop.f32.mrf.mxu1  ;;  %6360 = vst [vmem:[%s10380_s15 + $0x390] sm:$0xff] %v6232_v42 }
 0x74b   : > { %v5501_v15 = vadd.f32 %v5500_v57, %v5172_v22 }
 0x74d   : > { %v5830_v46 = vadd.f32 %v5829_v47, %v5501_v15  ;;  %v11296_v47 = vld [vmem:[#allocation81_spill] sm:$0xff] }
 0x74e   : > { %v4845_v34 = vpop.f32.mrf.mxu3 }
 0x74f   : > { %vm5977_vm10 = vcmp.gt.f32.partialorder %v5830_v46, 0.0  ;;  %v6105_v18 = vmul.f32 0.15, %v5830_v46  ;;  %v4846_v4 = vadd.f32 %v4845_v34, %v11291_v48  ;;  %v5832_v59 = vpop.f32.mrf.mxu2 }
 0x750   : > { %v5176_v39 = vpop.f32.mrf.mxu0 }
 0x751   : > { %v6233_v61 = vsel %vm5977_vm10, %v5830_v46, %v6105_v18  ;;  %v5175_v62 = vadd.f32 %v5174_v40, %v4846_v4 }
 0x752   : > { %v5505_v6 = vpop.f32.mrf.mxu1  ;;  %6361 = vst [vmem:[%s10380_s15 + $0x398] sm:$0xff] %v6233_v61 }
 0x753   : > { %v5504_v1 = vadd.f32 %v5503_v55, %v5175_v62 }
 0x755   : > { %v5833_v49 = vadd.f32 %v5832_v59, %v5504_v1  ;;  %v11297_v59 = vld [vmem:[#allocation82_spill] sm:$0xff] }
 0x756   : > { %v4847_v56 = vpop.f32.mrf.mxu3 }
 0x757   : > { %vm5978_vm11 = vcmp.gt.f32.partialorder %v5833_v49, 0.0  ;;  %v6106_v30 = vmul.f32 0.15, %v5833_v49  ;;  %v4848_v11 = vadd.f32 %v4847_v56, %v11292_v31  ;;  %v5834_v38 = vpop.f32.mrf.mxu2 }
 0x758   : > { %v5179_v7 = vpop.f32.mrf.mxu0 }
 0x759   : > { %v6234_v5 = vsel %vm5978_vm11, %v5833_v49, %v6106_v30  ;;  %v5177_v9 = vadd.f32 %v5176_v39, %v4848_v11 }
 0x75a   : > { %v5508_v23 = vpop.f32.mrf.mxu1  ;;  %6362 = vst [vmem:[%s10380_s15 + $0x3a0] sm:$0xff] %v6234_v5 }
 0x75b   : > { %v5506_v53 = vadd.f32 %v5505_v6, %v5177_v9 }
 0x75d   : > { %v5835_v50 = vadd.f32 %v5834_v38, %v5506_v53  ;;  %v11298_v38 = vld [vmem:[#allocation83_spill] sm:$0xff] }
 0x75e   : > { %v4850_v26 = vpop.f32.mrf.mxu3 }
 0x75f   : > { %vm5979_vm12 = vcmp.gt.f32.partialorder %v5835_v50, 0.0  ;;  %v6107_v45 = vmul.f32 0.15, %v5835_v50  ;;  %v4851_v25 = vadd.f32 %v4850_v26, %v11293_v60  ;;  %v5837_v51 = vpop.f32.mrf.mxu2 }
 0x760   : > { %v5181_v28 = vpop.f32.mrf.mxu0 }
 0x761   : > { %v6235_v16 = vsel %vm5979_vm12, %v5835_v50, %v6107_v45  ;;  %v5180_v20 = vadd.f32 %v5179_v7, %v4851_v25 }
 0x762   : > { %v5510_v10 = vpop.f32.mrf.mxu1  ;;  %6363 = vst [vmem:[%s10380_s15 + $0x3a8] sm:$0xff] %v6235_v16 }
 0x763   : > { %v5509_v21 = vadd.f32 %v5508_v23, %v5180_v20 }
 0x765   : > { %v5838_v29 = vadd.f32 %v5837_v51, %v5509_v21  ;;  %v11299_v51 = vld [vmem:[#allocation84_spill] sm:$0xff] }
 0x766   : > { %v4852_v8 = vpop.f32.mrf.mxu3 }
 0x767   : > { %vm5980_vm13 = vcmp.gt.f32.partialorder %v5838_v29, 0.0  ;;  %v6108_v41 = vmul.f32 0.15, %v5838_v29  ;;  %v4853_v33 = vadd.f32 %v4852_v8, %v11294_v2  ;;  %v5839_v14 = vpop.f32.mrf.mxu2 }
 0x768   : > { %v5184_v19 = vpop.f32.mrf.mxu0 }
 0x769   : > { %v6236_v0 = vsel %vm5980_vm13, %v5838_v29, %v6108_v41  ;;  %v5182_v58 = vadd.f32 %v5181_v28, %v4853_v33 }
 0x76a   : > { %v5513_v24 = vpop.f32.mrf.mxu1  ;;  %6364 = vst [vmem:[%s10380_s15 + $0x3b0] sm:$0xff] %v6236_v0 }
 0x76b   : > { %v5511_v44 = vadd.f32 %v5510_v10, %v5182_v58 }
 0x76d   : > { %v5840_v36 = vadd.f32 %v5839_v14, %v5511_v44  ;;  %v11300_v14 = vld [vmem:[#allocation85_spill] sm:$0xff] }
 0x76e   : > { %v4855_v27 = vpop.f32.mrf.mxu3 }
 0x76f   : > { %vm5981_vm14 = vcmp.gt.f32.partialorder %v5840_v36, 0.0  ;;  %v6109_v52 = vmul.f32 0.15, %v5840_v36  ;;  %v4856_v37 = vadd.f32 %v4855_v27, %v11295_v32  ;;  %v5842_v63 = vpop.f32.mrf.mxu2 }
 0x770   : > { %v5186_v35 = vpop.f32.mrf.mxu0 }
 0x771   : > { %v6237_v57 = vsel %vm5981_vm14, %v5840_v36, %v6109_v52  ;;  %v5185_v54 = vadd.f32 %v5184_v19, %v4856_v37  ;;  %v11301_v37 = vld [vmem:[#allocation86_spill] sm:$0xff] }
 0x772   : > { %v5515_v12 = vpop.f32.mrf.mxu1  ;;  %6365 = vst [vmem:[%s10380_s15 + $0x3b8] sm:$0xff] %v6237_v57 }
 0x773   : > { %v5514_v17 = vadd.f32 %v5513_v24, %v5185_v54 }
 0x775   : > { %v5843_v3 = vadd.f32 %v5842_v63, %v5514_v17 }
 0x776   : > { %v4857_v43 = vpop.f32.mrf.mxu3 }
 0x777   : > { %vm5982_vm15 = vcmp.gt.f32.partialorder %v5843_v3, 0.0  ;;  %v6110_v13 = vmul.f32 0.15, %v5843_v3  ;;  %v4858_v40 = vadd.f32 %v4857_v43, %v11296_v47  ;;  %v5844_v42 = vpop.f32.mrf.mxu2  ;;  %v11302_v47 = vld [vmem:[#allocation87_spill] sm:$0xff] }
 0x778   : > { %v5189_v22 = vpop.f32.mrf.mxu0 }
 0x779   : > { %v6238_v55 = vsel %vm5982_vm15, %v5843_v3, %v6110_v13  ;;  %v5187_v15 = vadd.f32 %v5186_v35, %v4858_v40 }
 0x77a   : > { %v5518_v46 = vpop.f32.mrf.mxu1  ;;  %6366 = vst [vmem:[%s10380_s15 + $0x3c0] sm:$0xff] %v6238_v55 }
 0x77b   : > { %v5516_v34 = vadd.f32 %v5515_v12, %v5187_v15 }
 0x77d   : > { %v5845_v18 = vadd.f32 %v5844_v42, %v5516_v34 }
 0x77e   : > { %v4860_v48 = vpop.f32.mrf.mxu3 }
 0x77f   : > { %vm5983_vm1 = vcmp.gt.f32.partialorder %v5845_v18, 0.0  ;;  %v6111_v4 = vmul.f32 0.15, %v5845_v18  ;;  %v4861_v39 = vadd.f32 %v4860_v48, %v11297_v59  ;;  %v5847_v61 = vpop.f32.mrf.mxu2 }
 0x780   : > { %v5191_v62 = vpop.f32.mrf.mxu0 }
 0x781   : > { %v6239_v6 = vsel %vm5983_vm1, %v5845_v18, %v6111_v4  ;;  %v5190_v1 = vadd.f32 %v5189_v22, %v4861_v39 }
 0x782   : > { %6367 = vst [vmem:[%s10380_s15 + $0x3c8] sm:$0xff] %v6239_v6  ;;  %v5520_v49 = vpop.f32.mrf.mxu1 }
 0x783   : > { %v5519_v56 = vadd.f32 %v5518_v46, %v5190_v1 }
 0x785   : > { %v5848_v30 = vadd.f32 %v5847_v61, %v5519_v56 }
 0x786   : > { %v4862_v31 = vpop.f32.mrf.mxu3 }
 0x787   : > { %vm5984_vm2 = vcmp.gt.f32.partialorder %v5848_v30, 0.0  ;;  %v6112_v11 = vmul.f32 0.15, %v5848_v30  ;;  %v4863_v7 = vadd.f32 %v4862_v31, %v11298_v38  ;;  %v5849_v5 = vpop.f32.mrf.mxu2 }
 0x788   : > { %v5194_v53 = vpop.f32.mrf.mxu0 }
 0x789   : > { %v6240_v9 = vsel %vm5984_vm2, %v5848_v30, %v6112_v11  ;;  %v5192_v23 = vadd.f32 %v5191_v62, %v4863_v7 }
 0x78a   : > { %6368 = vst [vmem:[%s10380_s15 + $0x3d0] sm:$0xff] %v6240_v9  ;;  %v5523_v26 = vpop.f32.mrf.mxu1 }
 0x78b   : > { %v5521_v50 = vadd.f32 %v5520_v49, %v5192_v23 }
 0x78d   : > { %v5850_v45 = vadd.f32 %v5849_v5, %v5521_v50 }
 0x78e   : > { %v4865_v60 = vpop.f32.mrf.mxu3 }
 0x78f   : > { %vm5985_vm3 = vcmp.gt.f32.partialorder %v5850_v45, 0.0  ;;  %v6113_v25 = vmul.f32 0.15, %v5850_v45  ;;  %v4866_v28 = vadd.f32 %v4865_v60, %v11299_v51  ;;  %v5852_v16 = vpop.f32.mrf.mxu2 }
 0x790   : > { %v5196_v29 = vpop.f32.mrf.mxu0 }
 0x791   : > { %v6241_v20 = vsel %vm5985_vm3, %v5850_v45, %v6113_v25  ;;  %v5195_v10 = vadd.f32 %v5194_v53, %v4866_v28 }
 0x792   : > { %6369 = vst [vmem:[%s10380_s15 + $0x3d8] sm:$0xff] %v6241_v20  ;;  %v5525_v41 = vpop.f32.mrf.mxu1 }
 0x793   : > { %v5524_v21 = vadd.f32 %v5523_v26, %v5195_v10 }
 0x795   : > { %v5853_v8 = vadd.f32 %v5852_v16, %v5524_v21 }
 0x796   : > { %v4867_v2 = vpop.f32.mrf.mxu3 }
 0x797   : > { %vm5986_vm4 = vcmp.gt.f32.partialorder %v5853_v8, 0.0  ;;  %v6114_v33 = vmul.f32 0.15, %v5853_v8  ;;  %v4868_v19 = vadd.f32 %v4867_v2, %v11300_v14  ;;  %v5854_v0 = vpop.f32.mrf.mxu2 }
 0x798   : > { %v5199_v27 = vpop.f32.mrf.mxu0 }
 0x799   : > { %v6242_v58 = vsel %vm5986_vm4, %v5853_v8, %v6114_v33  ;;  %v5197_v24 = vadd.f32 %v5196_v29, %v4868_v19 }
 0x79a   : > { %6370 = vst [vmem:[%s10380_s15 + $0x3e0] sm:$0xff] %v6242_v58  ;;  %v5528_v35 = vpop.f32.mrf.mxu1 }
 0x79b   : > { %v5526_v44 = vadd.f32 %v5525_v41, %v5197_v24 }
 0x79d   : > { %v5855_v36 = vadd.f32 %v5854_v0, %v5526_v44 }
 0x79e   : > { %v4870_v52 = vpop.f32.mrf.mxu3 }
 0x79f   : > { %vm5987_vm5 = vcmp.gt.f32.partialorder %v5855_v36, 0.0  ;;  %v6115_v32 = vmul.f32 0.15, %v5855_v36  ;;  %v4871_v63 = vadd.f32 %v4870_v52, %v11301_v37  ;;  %v5857_v12 = vpop.f32.mrf.mxu2 }
 0x7a0   : > { %v5201_v42 = vpop.f32.mrf.mxu0 }
 0x7a1   : > { %v6243_v57 = vsel %vm5987_vm5, %v5855_v36, %v6115_v32  ;;  %v5200_v54 = vadd.f32 %v5199_v27, %v4871_v63 }
 0x7a2   : > { %6371 = vst [vmem:[%s10380_s15 + $0x3e8] sm:$0xff] %v6243_v57  ;;  %v5530_v15 = vpop.f32.mrf.mxu1 }
 0x7a3   : > { %v5529_v17 = vadd.f32 %v5528_v35, %v5200_v54 }
 0x7a5   : > { %v5858_v3 = vadd.f32 %v5857_v12, %v5529_v17 }
 0x7a6   : > { %v4872_v43 = vpop.f32.mrf.mxu3 }
 0x7a7   : > { %vm5988_vm6 = vcmp.gt.f32.partialorder %v5858_v3, 0.0  ;;  %v6116_v13 = vmul.f32 0.15, %v5858_v3  ;;  %v4873_v40 = vadd.f32 %v4872_v43, %v11302_v47  ;;  %v5859_v34 = vpop.f32.mrf.mxu2 }
 0x7a9   : > { %v6244_v22 = vsel %vm5988_vm6, %v5858_v3, %v6116_v13  ;;  %v5202_v55 = vadd.f32 %v5201_v42, %v4873_v40 }
 0x7aa   : > { %6372 = vst [vmem:[%s10380_s15 + $0x3f0] sm:$0xff] %v6244_v22 }
 0x7ab   : > { %v5531_v46 = vadd.f32 %v5530_v15, %v5202_v55 }
 0x7ad   : > { %v5860_v18 = vadd.f32 %v5859_v34, %v5531_v46 }
 0x7af   : > { %vm5989_vm0 = vcmp.gt.f32.partialorder %v5860_v18, 0.0  ;;  %v6117_v48 = vmul.f32 0.15, %v5860_v18 }
 0x7b1   : > { %v6245_v4 = vsel %vm5989_vm0, %v5860_v18, %v6117_v48 }
 0x7b2   : > { %6373 = vst [vmem:[%s10380_s15 + $0x3f8] sm:$0xff] %v6245_v4 }
 0x7b3 PF: > { %s13_s12 = sadd.s32 1, %s9058_s12  }
 0x7b4   : > { %p10_p4 = scmp.ge.s32.totalorder %s13_s12, 10  }
 0x7b6   :  { %12 = sbr.rel (!%p10_p4) target bundleno = 1 (0x1), region = 62 }

</bundles_post_ra>
